<compile_context>
chip_gen: v6e
topology: v6e:2x2x1
jax: 0.10.0
libtpu: 0.0.40
codegen_flags: <defaults>
</compile_context>

<pallas_src>
import jax
import jax.numpy as jnp
from jax import lax
from jax.experimental import pallas as pl
from jax.experimental.pallas import tpu as pltpu


# ----------------------------------------------------------------------------
# Pallas kernel: SharedMLP (two folded conv1x1 + ReLU) + max-pool over nsample
# ----------------------------------------------------------------------------
def _mlp_maxpool_kernel(x_ref, w1_ref, w2_ref, b2_ref, o_ref):
    tg, S, Cin1 = x_ref.shape
    Cout = o_ref.shape[-1]
    # NOTE: this (tg, S, Cin1) -> (tg*S, Cin1) reshape is layout-free only while
    # S is a multiple of the bf16 sublane packing (16). For other nsample values
    # it becomes a per-step VMEM relayout (perf, not correctness).
    x = x_ref[...].reshape(tg * S, Cin1)                                # bf16
    # b1 is folded into w1 via the trailing all-ones input channel of x.
    h = jnp.maximum(
        jnp.dot(x, w1_ref[...], preferred_element_type=jnp.float32), 0.0)
    h2 = jnp.dot(h.astype(w2_ref.dtype), w2_ref[...],                   # bf16 in, f32 acc
                 preferred_element_type=jnp.float32)
    h2 = jnp.maximum(h2 + b2_ref[...], 0.0)                             # (tg*S, Cout) f32
    o_ref[...] = jnp.max(h2.reshape(tg, S, Cout), axis=1)               # max-pool over S


# ----------------------------------------------------------------------------
# Chip-aware tiling policy
# ----------------------------------------------------------------------------
def _num_tensorcores():
    """Best-effort TensorCore count for the 'parallel' grid axis (1 is always safe)."""
    try:
        dev = jax.devices()[0]
    except Exception:
        return 1
    n = getattr(dev, "num_cores", None)
    if isinstance(n, int) and n > 0:
        return n
    kind = str(getattr(dev, "device_kind", "")).lower()
    if "v7" in kind or "v5p" in kind or "v4" in kind:   # multi-TC / megacore chips
        return 2
    return 1


def _vmem_limit_bytes():
    """Scoped-VMEM request: half of physical, capped (v7x has only 64 MiB physical)."""
    cap = None
    try:
        cap = getattr(pltpu.get_tpu_info(), "vmem_capacity_bytes", None)
    except Exception:
        cap = None
    if not cap:
        cap = 64 << 20
    return int(min(cap // 2, 48 << 20))


def _pick_tg(G, S, cin, *, n_cores=1, vmem_budget=24 << 20):
    """Pick the row-tile tg: fit VMEM, keep tg*S an MXU M-tile multiple, then
    minimize per-core rows (even split across TCs) and per-step overhead."""
    cin_p = -(-max(cin, 1) // 128) * 128                 # lane padding of contraction dim
    def per_step_bytes(t):
        rows = t * S
        return (2 * rows * cin_p * 2                     # x tile (bf16), double-buffered
                + rows * 256 * (4 + 2 + 4)               # h f32 + h bf16 + h2 f32
                + 2 * t * 256 * 4                        # out tile (f32), double-buffered
                + 2 * (cin_p * 256 + 256 * 256) * 2)     # resident weights (bf16), 2 bufs
    cands = [t for t in (1024, 512, 256, 128, 64, 32, 16)
             if (t * S) % 256 == 0 and per_step_bytes(t) <= vmem_budget]
    if not cands:
        cands = [16]
    best, best_key = None, None
    for t in cands:
        steps = -(-G // t)
        per_core_rows = -(-steps // max(n_cores, 1)) * t
        key = (per_core_rows, steps)                     # fewest rows/core, then fewest steps
        if best_key is None or key < best_key:
            best, best_key = t, key
    return best


def mlp_maxpool_pallas(x_gsc, w1a, w2, b2, *, tg=None):
    """x_gsc: (G, S, Cin+1) bf16 (last channel is all-ones carrying b1).
    w1a: (Cin+1, 256) bf16, w2: (256, 256) bf16, b2: (1, 256) f32.
    Returns (G, 256) float32."""
    G, S, Cin1 = x_gsc.shape
    Cmid, Cout = w1a.shape[1], w2.shape[1]
    n_cores = _num_tensorcores()
    vmem_limit = _vmem_limit_bytes()
    if tg is None:
        tg = _pick_tg(G, S, Cin1, n_cores=n_cores,
                      vmem_budget=int(vmem_limit * 0.75))
    steps = pl.cdiv(G, tg)        # ragged last block handled by Pallas masked stores

    x_bf = x_gsc if x_gsc.dtype == jnp.bfloat16 else x_gsc.astype(jnp.bfloat16)
    w1_bf = w1a if w1a.dtype == jnp.bfloat16 else w1a.astype(jnp.bfloat16)
    w2_bf = w2 if w2.dtype == jnp.bfloat16 else w2.astype(jnp.bfloat16)
    b2_f32 = b2.astype(jnp.float32)

    cost = pl.CostEstimate(
        flops=2 * G * S * (Cin1 * Cmid + Cmid * Cout),
        transcendentals=0,
        bytes_accessed=(x_bf.size * 2 + G * Cout * 4
                        + (w1_bf.size + w2_bf.size) * 2 + b2_f32.size * 4))

    grid_spec = pltpu.PrefetchScalarGridSpec(
        num_scalar_prefetch=0,
        grid=(steps,),
        in_specs=[
            pl.BlockSpec((tg, S, Cin1), lambda g: (g, 0, 0)),   # x tile (natural layout)
            pl.BlockSpec((Cin1, Cmid), lambda g: (0, 0)),       # W1 (BN + b1 folded), resident
            pl.BlockSpec((Cmid, Cout), lambda g: (0, 0)),       # W2 (BN folded), resident
            pl.BlockSpec((1, Cout), lambda g: (0, 0)),          # b2 (f32)
        ],
        out_specs=pl.BlockSpec((tg, Cout), lambda g: (g, 0)),
    )
    out = pl.pallas_call(
        _mlp_maxpool_kernel,
        out_shape=jax.ShapeDtypeStruct((G, Cout), jnp.float32),
        grid_spec=grid_spec,
        compiler_params=pltpu.CompilerParams(
            dimension_semantics=("parallel",),
            vmem_limit_bytes=vmem_limit),
        cost_estimate=cost,
    )(x_bf, w1_bf, w2_bf, b2_f32)
    return out


# ----------------------------------------------------------------------------
# CylinderQueryAndGroup (JAX glue; reproduces the CUDA cylinder_query semantics:
# strict inequalities, first-nsample hits in point-index order, fill with first hit)
# ----------------------------------------------------------------------------
def cylinder_query_and_group(xyz, new_xyz, rot, features,
                             radius, hmin, hmax, nsample,
                             normalize_xyz=True, out_dtype=jnp.float32,
                             append_ones=False):
    # xyz: (B, N, 3); new_xyz: (B, M, 3); rot: (B, M, 3, 3); features: (B, C, N)
    B, N, _ = xyz.shape
    delta = xyz[:, None, :, :] - new_xyz[:, :, None, :]            # (B, M, N, 3)
    rotated = jnp.einsum('bmnc,bmcd->bmnd', delta, rot)            # row-vec @ rot
    d2 = rotated[..., 1] ** 2 + rotated[..., 2] ** 2
    xr = rotated[..., 0]
    inside = (d2 < radius * radius) & (xr > hmin) & (xr < hmax)    # (B, M, N)

    # First-nsample hits in ascending point-index order via top_k on negated keys:
    # memory stays O(B*M*N) (no (B, M, S, N) match tensor).
    # TODO(synk): for production N (10k-20k) this gather should be fused into the
    # Pallas kernel via scalar-prefetched indices + manual DMA.
    keys = jnp.where(inside, jnp.arange(N, dtype=jnp.int32), jnp.int32(N))
    neg_topk, _ = lax.top_k(-keys, nsample)                        # descending -> keys ascending
    idx = -neg_topk                                                # (B, M, S), ascending keys
    first_idx = idx[..., :1]                                       # first hit (or N if none)
    # TODO(synk): empty-neighborhood case pads with point 0, mirroring the zeroed
    # CUDA cylinder_query output for the no-hit case (verify against upstream).
    first_idx = jnp.where(first_idx == N, 0, first_idx)
    idx = jnp.where(idx == N, first_idx, idx)

    gather = jax.vmap(lambda pts, ids: pts[ids])                   # (N,D),(M,S)->(M,S,D)
    g_xyz = gather(xyz, idx) - new_xyz[:, :, None, :]              # (B, M, S, 3)
    if normalize_xyz:
        g_xyz = g_xyz / radius
    g_xyz = jnp.einsum('bmsc,bmcd->bmsd', g_xyz, rot)              # rotate_xyz=True
    g_feat = gather(jnp.transpose(features, (0, 2, 1)), idx)       # (B, M, S, C)
    parts = [g_xyz, g_feat]
    if append_ones:                                                # carries folded b1
        parts.append(jnp.ones(g_xyz.shape[:-1] + (1,), g_xyz.dtype))
    # Cast is fused into the concat by XLA -> the grouped tensor is written in
    # out_dtype directly (no standalone HBM cast pass).
    return jnp.concatenate(parts, axis=-1).astype(out_dtype)       # (B, M, S, 3+C[+1])


# ----------------------------------------------------------------------------
# Parameter init (deterministic, BN eval-mode folded; b1 folded into W1)
# ----------------------------------------------------------------------------
def init_cloudcrop_params(key, seed_feature_dim, eps=1e-5):
    cin = 3 + seed_feature_dim
    k1, k2 = jax.random.split(key)
    # pt_utils.SharedMLP([cin, 256, 256], bn=True): conv bias disabled when bn=True.
    w1 = jax.random.normal(k1, (cin, 256), jnp.float32) * 0.05     # (I, O) channels-last
    w2 = jax.random.normal(k2, (256, 256), jnp.float32) * 0.05
    # BatchNorm2d deterministic init: gamma=1, beta=0, running_mean=0, running_var=1.
    # TODO(synk): BN folded in eval mode (running stats); train-mode batch stats not implemented.
    def fold(w, gamma, beta, mean, var):
        scale = gamma / jnp.sqrt(var + eps)
        return w * scale[None, :], (beta - mean * scale)[None, :]
    ones, zeros = jnp.ones((256,), jnp.float32), jnp.zeros((256,), jnp.float32)
    w1f, b1f = fold(w1, ones, zeros, zeros, ones)
    w2f, b2f = fold(w2, ones, zeros, zeros, ones)
    # Fold b1 into W1 as an extra input channel (matched by the all-ones channel of x).
    w1a = jnp.concatenate([w1f, b1f], axis=0).astype(jnp.bfloat16)   # (cin+1, 256)
    return dict(w1a=w1a, w2=w2f.astype(jnp.bfloat16), b2=b2f)        # b2 stays f32


# ----------------------------------------------------------------------------
# CloudCrop forward
# ----------------------------------------------------------------------------
def cloudcrop_forward(params, seed_xyz, seed_features, vp_rot, *,
                      nsample, radius=0.05, hmin=-0.02, hmax=0.04, tg=None):
    B, M, _ = seed_xyz.shape
    grouped = cylinder_query_and_group(
        seed_xyz, seed_xyz, vp_rot, seed_features,
        radius, hmin, hmax, nsample,
        out_dtype=jnp.bfloat16, append_ones=True)                   # (B, M, S, Cin+1) bf16
    Cin1 = grouped.shape[-1]
    x_gsc = grouped.reshape(B * M, nsample, Cin1)                    # natural layout
    out = mlp_maxpool_pallas(x_gsc, params['w1a'], params['w2'],
                             params['b2'], tg=tg)                    # (G, 256) f32
    return jnp.transpose(out.reshape(B, M, -1), (0, 2, 1))           # (B, 256, M)


if __name__ == "__main__":
    B, Ns, C = 2, 64, 32          # batch, graspable seeds, seed_feature_dim
    nsample = 16
    radius, hmin, hmax = 0.05, -0.02, 0.04

    key = jax.random.PRNGKey(0)
    kx, kf, kr, kp = jax.random.split(key, 4)
    seed_xyz = jax.random.uniform(kx, (B, Ns, 3), jnp.float32) * 0.2      # (B, Ns, 3)
    seed_feat = jax.random.normal(kf, (B, C, Ns), jnp.float32)            # (B, C, Ns)
    vp_rot, _ = jnp.linalg.qr(jax.random.normal(kr, (B, Ns, 3, 3), jnp.float32))

    params = init_cloudcrop_params(kp, C)

    out = cloudcrop_forward(params, seed_xyz, seed_feat, vp_rot,
                            nsample=nsample, radius=radius, hmin=hmin, hmax=hmax)
    out = jax.block_until_ready(out)
    assert out.shape == (B, 256, Ns), out.shape

    # Pure-JAX reference for the Pallas portion (SharedMLP + max-pool), using the
    # same bf16 quantization of the matmul inputs as the kernel.
    grouped = cylinder_query_and_group(seed_xyz, seed_xyz, vp_rot, seed_feat,
                                       radius, hmin, hmax, nsample,
                                       out_dtype=jnp.bfloat16, append_ones=True)
    x_ref = grouped.astype(jnp.float32)                                    # bf16-rounded
    w1a_f = params['w1a'].astype(jnp.float32)
    w2_f = params['w2'].astype(jnp.float32)
    h = jnp.einsum('bmsc,co->bmso', x_ref, w1a_f,
                   precision=lax.Precision.HIGHEST)
    h = jnp.maximum(h, 0.0)
    h = jnp.einsum('bmso,op->bmsp', h.astype(jnp.bfloat16).astype(jnp.float32),
                   w2_f, precision=lax.Precision.HIGHEST) + params['b2'][0]
    h = jnp.maximum(h, 0.0)
    ref = jnp.transpose(jnp.max(h, axis=2), (0, 2, 1))                     # (B, 256, Ns)
    err = float(jnp.max(jnp.abs(out - ref)))
    assert jnp.allclose(out, ref, rtol=1e-4, atol=1e-4), err

    print("KERNEL_OK")
</pallas_src>

<mosaic_0001>
module attributes {stable_mosaic.version = 11 : i64} {
  func.func @_mlp_maxpool_kernel(%arg0: i32, %arg1: memref<128x16x36xbf16, #tpu.memory_space<vmem>>, %arg2: memref<36x256xbf16, #tpu.memory_space<vmem>>, %arg3: memref<256x256xbf16, #tpu.memory_space<vmem>>, %arg4: memref<1x256xf32, #tpu.memory_space<vmem>>, %arg5: memref<128x256xf32, #tpu.memory_space<vmem>>) attributes {dimension_semantics = [#tpu.dimension_semantics<parallel>], iteration_bounds = array<i64: 1>, scalar_prefetch = 0 : i64, scratch_operands = 0 : i64, tpu.core_type = #tpu.core_type<tc>, window_params = [{transform_indices = @transform_0, window_bounds = array<i64: 128, 16, 36>}, {pipeline_mode = #tpu.pipeline_mode<synchronous>, transform_indices = @transform_1, window_bounds = array<i64: 36, 256>}, {pipeline_mode = #tpu.pipeline_mode<synchronous>, transform_indices = @transform_2, window_bounds = array<i64: 256, 256>}, {pipeline_mode = #tpu.pipeline_mode<synchronous>, transform_indices = @transform_3, window_bounds = array<i64: 1, 256>}, {transform_indices = @transform_4, window_bounds = array<i64: 128, 256>}]} {
    %c0 = arith.constant 0 : index
    %c0_0 = arith.constant 0 : index
    %c0_1 = arith.constant 0 : index
    %0 = vector.load %arg1[%c0, %c0_0, %c0_1] : memref<128x16x36xbf16, #tpu.memory_space<vmem>>, vector<128x16x36xbf16>
    %1 = vector.shape_cast %0 : vector<128x16x36xbf16> to vector<2048x36xbf16>
    %c0_2 = arith.constant 0 : index
    %c0_3 = arith.constant 0 : index
    %2 = vector.load %arg2[%c0_2, %c0_3] : memref<36x256xbf16, #tpu.memory_space<vmem>>, vector<36x256xbf16>
    %cst = arith.constant dense<0.000000e+00> : vector<2048x256xf32>
    %3 = tpu.matmul %1, %2, %cst {dimension_numbers = #tpu.dot_dimension_numbers<[1], [0], [0], [1], [0, 0, 1, 1], [], []>} : vector<2048x36xbf16>, vector<36x256xbf16>, vector<2048x256xf32> -> vector<2048x256xf32>
    %cst_4 = arith.constant 0.000000e+00 : f32
    %4 = vector.broadcast %cst_4 : f32 to vector<2048x256xf32>
    %5 = arith.maximumf %3, %4 : vector<2048x256xf32>
    %6 = arith.truncf %5 : vector<2048x256xf32> to vector<2048x256xbf16>
    %c0_5 = arith.constant 0 : index
    %c0_6 = arith.constant 0 : index
    %7 = vector.load %arg3[%c0_5, %c0_6] : memref<256x256xbf16, #tpu.memory_space<vmem>>, vector<256x256xbf16>
    %cst_7 = arith.constant dense<0.000000e+00> : vector<2048x256xf32>
    %8 = tpu.matmul %6, %7, %cst_7 {dimension_numbers = #tpu.dot_dimension_numbers<[1], [0], [0], [1], [0, 0, 1, 1], [], []>} : vector<2048x256xbf16>, vector<256x256xbf16>, vector<2048x256xf32> -> vector<2048x256xf32>
    %c0_8 = arith.constant 0 : index
    %c0_9 = arith.constant 0 : index
    %9 = vector.load %arg4[%c0_8, %c0_9] : memref<1x256xf32, #tpu.memory_space<vmem>>, vector<1x256xf32>
    %10 = vector.broadcast %9 : vector<1x256xf32> to vector<2048x256xf32>
    %11 = arith.addf %8, %10 : vector<2048x256xf32>
    %cst_10 = arith.constant 0.000000e+00 : f32
    %12 = vector.broadcast %cst_10 : f32 to vector<2048x256xf32>
    %13 = arith.maximumf %11, %12 : vector<2048x256xf32>
    %14 = vector.shape_cast %13 : vector<2048x256xf32> to vector<128x16x256xf32>
    %cst_11 = arith.constant dense<0xFF800000> : vector<128x256xf32>
    %15 = vector.multi_reduction <maximumf>, %14, %cst_11 [1] : vector<128x16x256xf32> to vector<128x256xf32>
    %c0_12 = arith.constant 0 : index
    %c0_13 = arith.constant 0 : index
    %16 = vector.load %arg5[%c0_12, %c0_13] : memref<128x256xf32, #tpu.memory_space<vmem>>, vector<128x256xf32>
    tpu.vector_store %arg5[%c0_12, %c0_13], %15 {strides = array<i32>} : memref<128x256xf32, #tpu.memory_space<vmem>>, vector<128x256xf32>,
    return
  }
  func.func @transform_0(%arg0: i32) -> (i32, i32, i32) {
    %c0_i32 = arith.constant 0 : i32
    %c0_i32_0 = arith.constant 0 : i32
    %c0_i32_1 = arith.constant 0 : i32
    return %arg0, %c0_i32, %c0_i32_0 : i32, i32, i32
  }
  func.func @transform_1(%arg0: i32) -> (i32, i32) {
    %c0_i32 = arith.constant 0 : i32
    %c0_i32_0 = arith.constant 0 : i32
    %c0_i32_1 = arith.constant 0 : i32
    return %c0_i32, %c0_i32_0 : i32, i32
  }
  func.func @transform_2(%arg0: i32) -> (i32, i32) {
    %c0_i32 = arith.constant 0 : i32
    %c0_i32_0 = arith.constant 0 : i32
    %c0_i32_1 = arith.constant 0 : i32
    return %c0_i32, %c0_i32_0 : i32, i32
  }
  func.func @transform_3(%arg0: i32) -> (i32, i32) {
    %c0_i32 = arith.constant 0 : i32
    %c0_i32_0 = arith.constant 0 : i32
    %c0_i32_1 = arith.constant 0 : i32
    return %c0_i32, %c0_i32_0 : i32, i32
  }
  func.func @transform_4(%arg0: i32) -> (i32, i32) {
    %c0_i32 = arith.constant 0 : i32
    %c0_i32_0 = arith.constant 0 : i32
    return %arg0, %c0_i32 : i32, i32
  }
}

</mosaic_0001>

<bundles_post_ra>
// kernel: tpu_custom_call.1
= control target key start
LH: loop header
LB: loop body
LE: loop exit
PB: predicated region body
PF: predicated region fallthrough
CT: control target
= control target key end

     0   :  { %vm1330_vm0 = vcmask 1041408   ;;  %v8343_v4 = vmov 0   ;;  %vm945_vm1 = vcmask 293888   ;;  %s10216_s0 = inlined_call_operand.vmem [shape: bf16[128,16,36], index: 0, kind: input, shape index: {}]   ;;  %s10217_s1 = inlined_call_operand.vmem [shape: bf16[36,256], index: 1, kind: input, shape index: {}]   ;;  %s10218_s2 = inlined_call_operand.vmem [shape: bf16[256,256], index: 2, kind: input, shape index: {}]   ;;  %s10219_s3 = inlined_call_operand.vmem [shape: f32[1,256], index: 3, kind: input, shape index: {}]   ;;  %s10220_s4 = inlined_call_operand.hbm [shape: f32[128,256], index: 4, kind: output, shape index: {}]  }
   0x1   :  { %v279_v0 = vld [vmem:[%s10217_s1 + $0x20] sm:$0x33]  ;;  %v8139_v3 = vld [vmem:[%s10217_s1 + $0x14] ss:$8 sps:$4 sm:$0xff]   ;;  %1369 = vmatprep.mubr.bf16.mxu0 %v8343_v4  ;;  %v8141_v6 = vld [vmem:[%s10217_s1 + $0x10] ss:$8 sps:$4 sm:$0xff]  }
   0x2   :  { %v7939_v1 = vcombine.high %v279_v0, %v279_v0  ;;  %v7938_v2 = vcombine.low %v279_v0, %v279_v0  ;;  %v8142_v7 = vld [vmem:[%s10217_s1 + $0x4] ss:$8 sps:$4 sm:$0xff]   ;;  %v8144_v8 = vld [vmem:[%s10217_s1] ss:$8 sps:$4 sm:$0xff]   ;;  %v8147_v11 = vld [vmem:[%s10216_s0 + $0x10] sm:$0xff]  }
   0x3   :  { %v8145_v9 = vld [vmem:[%s10216_s0] sm:$0xff]   ;;  %v8146_v10 = vld [vmem:[%s10216_s0 + $0x8] sm:$0xff]   ;;  %v8148_v12 = vld [vmem:[%s10216_s0 + $0x18] sm:$0xff]  }
   0x4   :  { %7940 = vmatprep.subr.msk.bf16.mxu0 %vm1330_vm0, %v7939_v1  ;;  %v1332_v5 = vsel %vm1330_vm0, %v7938_v2, 0  ;;  %v8149_v13 = vld [vmem:[%s10216_s0 + $0x20] sm:$0xff]   ;;  %v8166_v14 = vld [vmem:[%s10218_s2 + $0x74] ss:$8 sps:$4 sm:$0xff]   ;;  %v8168_v15 = vld [vmem:[%s10218_s2 + $0x70] ss:$8 sps:$4 sm:$0xff]  }
   0x5   :  { %1348 = vmatpush1.bf16.msra.mxu0 %v1332_v5  ;;  %v8150_v16 = vld [vmem:[%s10216_s0 + $0x28] sm:$0xff]   ;;  %8101 = vmatprep.subr.bf16.mxu1 %v8166_v14  ;;  %v8173_v19 = vld [vmem:[%s10218_s2 + $0x54] ss:$8 sps:$4 sm:$0xff]   ;;  %v8175_v20 = vld [vmem:[%s10218_s2 + $0x50] ss:$8 sps:$4 sm:$0xff]  }
   0x6   :  { %1349 = vmatprep.subr.bf16.mxu0 %v8139_v3  ;;  %8117 = vmatpush1.bf16.msra.mxu1 %v8168_v15  ;;  %v8170_v17 = vld [vmem:[%s10218_s2 + $0x64] ss:$8 sps:$4 sm:$0xff]   ;;  %v8172_v18 = vld [vmem:[%s10218_s2 + $0x60] ss:$8 sps:$4 sm:$0xff]   ;;  %v8151_v21 = vld [vmem:[%s10216_s0 + $0x30] sm:$0xff]  }
   0x7   :  { %8102 = vmatprep.subr.bf16.mxu1 %v8170_v17  ;;  %v8177_v22 = vld [vmem:[%s10218_s2 + $0x44] ss:$8 sps:$4 sm:$0xff]   ;;  %v8179_v23 = vld [vmem:[%s10218_s2 + $0x40] ss:$8 sps:$4 sm:$0xff]   ;;  %v8180_v24 = vld [vmem:[%s10218_s2 + $0x34] ss:$8 sps:$4 sm:$0xff]  }
   0x8   :  { %v8182_v25 = vld [vmem:[%s10218_s2 + $0x30] ss:$8 sps:$4 sm:$0xff]   ;;  %v8184_v27 = vld [vmem:[%s10218_s2 + $0x24] ss:$8 sps:$4 sm:$0xff]   ;;  %v8186_v28 = vld [vmem:[%s10218_s2 + $0x20] ss:$8 sps:$4 sm:$0xff]  }
   0x9   :  { %1350 = vmatpush1.bf16.msra.mxu0 %v8141_v6  ;;  %v8152_v26 = vld [vmem:[%s10216_s0 + $0x38] sm:$0xff]   ;;  %v8153_v31 = vld [vmem:[%s10216_s0 + $0x40] sm:$0xff]   ;;  %v8154_v34 = vld [vmem:[%s10216_s0 + $0x48] sm:$0xff]  }
   0xa   :  { %1351 = vmatprep.subr.bf16.mxu0 %v8142_v7  ;;  %8118 = vmatpush1.bf16.msra.mxu1 %v8172_v18  ;;  %v8187_v29 = vld [vmem:[%s10218_s2 + $0x14] ss:$8 sps:$4 sm:$0xff]   ;;  %v8189_v30 = vld [vmem:[%s10218_s2 + $0x10] ss:$8 sps:$4 sm:$0xff]   ;;  %v8191_v32 = vld [vmem:[%s10218_s2 + $0x4] ss:$8 sps:$4 sm:$0xff]  }
   0xb   :  { %8103 = vmatprep.subr.bf16.mxu1 %v8173_v19  ;;  %v8193_v33 = vld [vmem:[%s10218_s2] ss:$8 sps:$4 sm:$0xff]   ;;  %v8194_v35 = vld [vmem:[%s10218_s2 + $0xf4] ss:$8 sps:$4 sm:$0xff]   ;;  %v8196_v36 = vld [vmem:[%s10218_s2 + $0xf0] ss:$8 sps:$4 sm:$0xff]  }
   0xc   :  { %v8198_v37 = vld [vmem:[%s10218_s2 + $0xe4] ss:$8 sps:$4 sm:$0xff]   ;;  %v8200_v38 = vld [vmem:[%s10218_s2 + $0xe0] ss:$8 sps:$4 sm:$0xff]   ;;  %v8155_v39 = vld [vmem:[%s10216_s0 + $0x50] sm:$0xff]  }
   0xd   :  { %1352 = vmatpush1.bf16.msra.mxu0 %v8144_v8  ;;  %v8201_v40 = vld [vmem:[%s10218_s2 + $0xd4] ss:$8 sps:$4 sm:$0xff]   ;;  %v8203_v41 = vld [vmem:[%s10218_s2 + $0xd0] ss:$8 sps:$4 sm:$0xff]   ;;  %v8205_v42 = vld [vmem:[%s10218_s2 + $0xc4] ss:$8 sps:$4 sm:$0xff]  }
   0xe   :  { %3622 = vmatprep.subr.bf16.mxu0 %v8166_v14  ;;  %8119 = vmatpush1.bf16.msra.mxu1 %v8175_v20  ;;  %v8207_v43 = vld [vmem:[%s10218_s2 + $0xc0] ss:$8 sps:$4 sm:$0xff]   ;;  %v8156_v44 = vld [vmem:[%s10216_s0 + $0x58] sm:$0xff]   ;;  %v8212_v47 = vld [vmem:[%s10218_s2 + $0xa4] ss:$8 sps:$4 sm:$0xff]  }
   0xf   :  { %8104 = vmatprep.subr.bf16.mxu1 %v8177_v22  ;;  %v8208_v45 = vld [vmem:[%s10218_s2 + $0xb4] ss:$8 sps:$4 sm:$0xff]   ;;  %v8210_v46 = vld [vmem:[%s10218_s2 + $0xb0] ss:$8 sps:$4 sm:$0xff]   ;;  %v8214_v48 = vld [vmem:[%s10218_s2 + $0xa0] ss:$8 sps:$4 sm:$0xff]  }
  0x10   :  { %7941 = vmatmul.mubr.msk.bf16.vlgmr.msra.gmra.mxu0 %vm945_vm1, %v8145_v9  ;;  %v8157_v49 = vld [vmem:[%s10216_s0 + $0x60] sm:$0xff]   ;;  %v8215_v50 = vld [vmem:[%s10218_s2 + $0x94] ss:$8 sps:$4 sm:$0xff]   ;;  %v8217_v51 = vld [vmem:[%s10218_s2 + $0x90] ss:$8 sps:$4 sm:$0xff]  }
  0x11   :  { %1379 = vmatprep.mubr.bf16.mxu0 %v8343_v4  ;;  %3623 = vmatpush1.bf16.msra.mxu0 %v8168_v15  ;;  %v8219_v52 = vld [vmem:[%s10218_s2 + $0x84] ss:$8 sps:$4 sm:$0xff]   ;;  %v8221_v53 = vld [vmem:[%s10218_s2 + $0x80] ss:$8 sps:$4 sm:$0xff]  }
  0x12   :  { %3624 = vmatprep.subr.bf16.mxu0 %v8170_v17  ;;  %8120 = vmatpush1.bf16.msra.mxu1 %v8179_v23  ;;  %v8158_v54 = vld [vmem:[%s10216_s0 + $0x68] sm:$0xff]  }
  0x13   :  { %8105 = vmatprep.subr.bf16.mxu1 %v8180_v24 }
  0x15   :  { %3625 = vmatpush1.bf16.msra.mxu0 %v8172_v18 }
  0x16   :  { %3626 = vmatprep.subr.bf16.mxu0 %v8173_v19  ;;  %8121 = vmatpush1.bf16.msra.mxu1 %v8182_v25 }
  0x17   :  { %8106 = vmatprep.subr.bf16.mxu1 %v8184_v27 }
  0x18   :  { %7942 = vmatmul.mubr.msk.bf16.gmra.mxu0 %vm945_vm1, %v8146_v10 }
  0x19   :  { %1389 = vmatprep.mubr.bf16.mxu0 %v8343_v4  ;;  %3627 = vmatpush1.bf16.msra.mxu0 %v8175_v20 }
  0x1a   :  { %3628 = vmatprep.subr.bf16.mxu0 %v8177_v22  ;;  %8122 = vmatpush1.bf16.msra.mxu1 %v8186_v28 }
  0x1b   :  { %8107 = vmatprep.subr.bf16.mxu1 %v8187_v29 }
  0x1d   :  { %3629 = vmatpush1.bf16.msra.mxu0 %v8179_v23 }
  0x1e   :  { %3630 = vmatprep.subr.bf16.mxu0 %v8180_v24  ;;  %8123 = vmatpush1.bf16.msra.mxu1 %v8189_v30 }
  0x1f   :  { %8108 = vmatprep.subr.bf16.mxu1 %v8191_v32 }
  0x20   :  { %7943 = vmatmul.mubr.msk.bf16.gmra.mxu0 %vm945_vm1, %v8147_v11 }
  0x21   :  { %1399 = vmatprep.mubr.bf16.mxu0 %v8343_v4  ;;  %3631 = vmatpush1.bf16.msra.mxu0 %v8182_v25 }
  0x22   :  { %3632 = vmatprep.subr.bf16.mxu0 %v8184_v27  ;;  %8124 = vmatpush1.bf16.msra.mxu1 %v8193_v33 }
  0x23   :  { %8109 = vmatprep.subr.bf16.mxu1 %v8194_v35 }
  0x25   :  { %3633 = vmatpush1.bf16.msra.mxu0 %v8186_v28 }
  0x26   :  { %3634 = vmatprep.subr.bf16.mxu0 %v8187_v29  ;;  %8125 = vmatpush2.bf16.msra.mxu1 %v8196_v36 }
  0x27   :  { %8110 = vmatprep.subr.bf16.mxu1 %v8198_v37 }
  0x28   :  { %7944 = vmatmul.mubr.msk.bf16.gmra.mxu0 %vm945_vm1, %v8148_v12 }
  0x29   :  { %1409 = vmatprep.mubr.bf16.mxu0 %v8343_v4  ;;  %3635 = vmatpush1.bf16.msra.mxu0 %v8189_v30 }
  0x2a   :  { %3636 = vmatprep.subr.bf16.mxu0 %v8191_v32  ;;  %8126 = vmatpush2.bf16.msra.mxu1 %v8200_v38 }
  0x2b   :  { %8111 = vmatprep.subr.bf16.mxu1 %v8201_v40 }
  0x2d   :  { %3637 = vmatpush1.bf16.msra.mxu0 %v8193_v33 }
  0x2e   :  { %3638 = vmatprep.subr.bf16.mxu0 %v8194_v35  ;;  %8127 = vmatpush2.bf16.msra.mxu1 %v8203_v41 }
  0x2f   :  { %8112 = vmatprep.subr.bf16.mxu1 %v8205_v42 }
  0x30   :  { %7945 = vmatmul.mubr.msk.bf16.gmra.mxu0 %vm945_vm1, %v8149_v13 }
  0x31   :  { %1419 = vmatprep.mubr.bf16.mxu0 %v8343_v4  ;;  %3639 = vmatpush2.bf16.msra.mxu0 %v8196_v36 }
  0x32   :  { %3640 = vmatprep.subr.bf16.mxu0 %v8198_v37  ;;  %8128 = vmatpush2.bf16.msra.mxu1 %v8207_v43 }
  0x33   :  { %8113 = vmatprep.subr.bf16.mxu1 %v8208_v45 }
  0x35   :  { %3641 = vmatpush2.bf16.msra.mxu0 %v8200_v38 }
  0x36   :  { %3642 = vmatprep.subr.bf16.mxu0 %v8201_v40  ;;  %8129 = vmatpush2.bf16.msra.mxu1 %v8210_v46 }
  0x37   :  { %8114 = vmatprep.subr.bf16.mxu1 %v8212_v47 }
  0x38   :  { %7946 = vmatmul.mubr.msk.bf16.gmra.mxu0 %vm945_vm1, %v8150_v16 }
  0x39   :  { %1429 = vmatprep.mubr.bf16.mxu0 %v8343_v4  ;;  %3643 = vmatpush2.bf16.msra.mxu0 %v8203_v41 }
  0x3a   :  { %3644 = vmatprep.subr.bf16.mxu0 %v8205_v42  ;;  %8130 = vmatpush2.bf16.msra.mxu1 %v8214_v48 }
  0x3b   :  { %8115 = vmatprep.subr.bf16.mxu1 %v8215_v50 }
  0x3d   :  { %3645 = vmatpush2.bf16.msra.mxu0 %v8207_v43 }
  0x3e   :  { %3646 = vmatprep.subr.bf16.mxu0 %v8208_v45  ;;  %8131 = vmatpush2.bf16.msra.mxu1 %v8217_v51 }
  0x3f   :  { %8116 = vmatprep.subr.bf16.mxu1 %v8219_v52 }
  0x40   :  { %7947 = vmatmul.mubr.msk.bf16.gmra.mxu0 %vm945_vm1, %v8151_v21 }
  0x41   :  { %1439 = vmatprep.mubr.bf16.mxu0 %v8343_v4  ;;  %3647 = vmatpush2.bf16.msra.mxu0 %v8210_v46 }
  0x42   :  { %3648 = vmatprep.subr.bf16.mxu0 %v8212_v47  ;;  %8132 = vmatpush2.bf16.msra.mxu1 %v8221_v53 }
  0x45   :  { %3649 = vmatpush2.bf16.msra.mxu0 %v8214_v48 }
  0x46   :  { %3650 = vmatprep.subr.bf16.mxu0 %v8215_v50 }
  0x48   :  { %7948 = vmatmul.mubr.msk.bf16.gmra.mxu0 %vm945_vm1, %v8152_v26 }
  0x49   :  { %1449 = vmatprep.mubr.bf16.mxu0 %v8343_v4  ;;  %3651 = vmatpush2.bf16.msra.mxu0 %v8217_v51 }
  0x4a   :  { %3652 = vmatprep.subr.bf16.mxu0 %v8219_v52 }
  0x4d   :  { %3653 = vmatpush2.bf16.msra.mxu0 %v8221_v53 }
  0x50   :  { %7949 = vmatmul.mubr.msk.bf16.gmra.mxu0 %vm945_vm1, %v8153_v31 }
  0x51   :  { %1459 = vmatprep.mubr.bf16.mxu0 %v8343_v4 }
  0x58   :  { %7950 = vmatmul.mubr.msk.bf16.gmra.mxu0 %vm945_vm1, %v8154_v34 }
  0x59   :  { %1469 = vmatprep.mubr.bf16.mxu0 %v8343_v4 }
  0x60   :  { %7951 = vmatmul.mubr.msk.bf16.gmra.mxu0 %vm945_vm1, %v8155_v39 }
  0x61   :  { %1479 = vmatprep.mubr.bf16.mxu0 %v8343_v4 }
  0x68   :  { %7952 = vmatmul.mubr.msk.bf16.gmra.mxu0 %vm945_vm1, %v8156_v44 }
  0x69   :  { %1489 = vmatprep.mubr.bf16.mxu0 %v8343_v4 }
  0x70   :  { %7953 = vmatmul.mubr.msk.bf16.gmra.mxu0 %vm945_vm1, %v8157_v49 }
  0x71   :  { %1499 = vmatprep.mubr.bf16.mxu0 %v8343_v4 }
  0x78   :  { %7954 = vmatmul.mubr.msk.bf16.gmra.mxu0 %vm945_vm1, %v8158_v54 }
  0x79   :  { %9 = vsyncpa [#allocation3], 0  ;;  %1509 = vmatprep.mubr.bf16.mxu0 %v8343_v4  ;;  %v8159_v55 = vld [vmem:[%s10216_s0 + $0x70] sm:$0xff]   ;;  %v8160_v56 = vld [vmem:[%s10216_s0 + $0x78] sm:$0xff]   ;;  %vm7495_vm2 = vcmask 1041409   ;;  %vm7497_vm3 = vcmask 1042434  }
  0x7a   :  { %v8161_v57 = vld [vmem:[%s10216_s0 + $0x80] sm:$0xff]   ;;  %v8162_v58 = vld [vmem:[%s10216_s0 + $0x88] sm:$0xff]   ;;  %v8163_v59 = vld [vmem:[%s10216_s0 + $0x90] sm:$0xff]   ;;  %vm7499_vm4 = vcmask 1043459   ;;  %vm7501_vm5 = vcmask 1044484   ;;  %vm7503_vm6 = vcmask 1045509  }
  0x7b   :  { %v8164_v60 = vld [vmem:[%s10216_s0 + $0x98] sm:$0xff]   ;;  %v8165_v61 = vld [vmem:[%s10216_s0 + $0xa0] sm:$0xff]   ;;  %v8169_v62 = vld [vmem:[%s10216_s0 + $0xa8] sm:$0xff]   ;;  %vm7505_vm7 = vcmask 1046534   ;;  %vm7507_vm8 = vcmask 1047559  }
  0x7c   :  { %v8176_v63 = vld [vmem:[%s10216_s0 + $0xb0] sm:$0xff]   ;;  %v8183_v0 = vld [vmem:[%s10216_s0 + $0xb8] sm:$0xff]   ;;  %v8190_v1 = vld [vmem:[%s10216_s0 + $0xc0] sm:$0xff]  }
  0x7d   :  { %v8197_v6 = vld [vmem:[%s10216_s0 + $0xc8] sm:$0xff]   ;;  %v8204_v17 = vld [vmem:[%s10216_s0 + $0xd0] sm:$0xff]   ;;  %v8211_v28 = vld [vmem:[%s10216_s0 + $0xd8] sm:$0xff]  }
  0x7e   :  { %v8218_v39 = vld [vmem:[%s10216_s0 + $0xe0] sm:$0xff]   ;;  %v8222_v50 = vld [vmem:[%s10216_s0 + $0xe8] sm:$0xff]  }
  0x80   :  { %7955 = vmatmul.mubr.msk.bf16.gmra.mxu0 %vm945_vm1, %v8159_v55 }
  0x81   :  { %1519 = vmatprep.mubr.bf16.mxu0 %v8343_v4 }
  0x88   :  { %7956 = vmatmul.mubr.msk.bf16.gmra.mxu0 %vm945_vm1, %v8160_v56 }
  0x89   :  { %1529 = vmatprep.mubr.bf16.mxu0 %v8343_v4 }
  0x90   :  { %7957 = vmatmul.mubr.msk.bf16.gmra.mxu0 %vm945_vm1, %v8161_v57 }
  0x91   :  { %1539 = vmatprep.mubr.bf16.mxu0 %v8343_v4 }
  0x98   :  { %7958 = vmatmul.mubr.msk.bf16.gmra.mxu0 %vm945_vm1, %v8162_v58 }
  0x99   :  { %1549 = vmatprep.mubr.bf16.mxu0 %v8343_v4 }
  0xa0   :  { %7959 = vmatmul.mubr.msk.bf16.gmra.mxu0 %vm945_vm1, %v8163_v59 }
  0xa1   :  { %1559 = vmatprep.mubr.bf16.mxu0 %v8343_v4 }
  0xa8   :  { %7960 = vmatmul.mubr.msk.bf16.gmra.mxu0 %vm945_vm1, %v8164_v60 }
  0xa9   :  { %1569 = vmatprep.mubr.bf16.mxu0 %v8343_v4 }
  0xb0   :  { %7961 = vmatmul.mubr.msk.bf16.gmra.mxu0 %vm945_vm1, %v8165_v61  ;;  %v8223_v61 = vld [vmem:[%s10216_s0 + $0xf0] sm:$0xff]  }
  0xb1   :  { %1579 = vmatprep.mubr.bf16.mxu0 %v8343_v4 }
  0xb8   :  { %7962 = vmatmul.mubr.msk.bf16.gmra.mxu0 %vm945_vm1, %v8169_v62 }
  0xb9   :  { %1589 = vmatprep.mubr.bf16.mxu0 %v8343_v4 }
  0xc0   :  { %7963 = vmatmul.mubr.msk.bf16.gmra.mxu0 %vm945_vm1, %v8176_v63 }
  0xc1   :  { %1599 = vmatprep.mubr.bf16.mxu0 %v8343_v4 }
  0xc8   :  { %7964 = vmatmul.mubr.msk.bf16.gmra.mxu0 %vm945_vm1, %v8183_v0 }
  0xc9   :  { %1609 = vmatprep.mubr.bf16.mxu0 %v8343_v4 }
  0xd0   :  { %v1371_v2 = vpop.f32.mrf.mxu0  ;;  %7965 = vmatmul.mubr.msk.bf16.gmra.mxu0 %vm945_vm1, %v8190_v1 }
  0xd1   :  { %1619 = vmatprep.mubr.bf16.mxu0 %v8343_v4  ;;  %v2650_v7 = vmax.f32 %v1371_v2, 0.0 }
  0xd2   :  { %v1373_v3 = vpop.f32.mrf.mxu0 }
  0xd3   :  { %v2651_v10 = vmax.f32 %v1373_v3, 0.0 }
  0xd4   :  { %v1375_v5 = vpop.f32.mrf.mxu0 }
  0xd5   :  { %v2652_v8 = vmax.f32 %v1375_v5, 0.0 }
  0xd6   :  { %v1377_v9 = vpop.f32.mrf.mxu0 }
  0xd7   :  { %v8612_v11 = vpack.c.bf16 %v2652_v8, %v2650_v7  ;;  %v2653_v12 = vmax.f32 %v1377_v9, 0.0  ;;  %v8224_v9 = vld [vmem:[%s10216_s0 + $0xf8] sm:$0xff]  }
  0xd8   :  { %v1381_v13 = vpop.f32.mrf.mxu0  ;;  %7966 = vmatmul.mubr.msk.bf16.gmra.mxu0 %vm945_vm1, %v8197_v6 }
  0xd9   :  { %v8615_v14 = vpack.c.bf16 %v2653_v12, %v2651_v10  ;;  %1629 = vmatprep.mubr.bf16.mxu0 %v8343_v4  ;;  %v2654_v18 = vmax.f32 %v1381_v13, 0.0 }
  0xda   :  { %v1383_v15 = vpop.f32.mrf.mxu0 }
  0xdb   :  { %v2655_v21 = vmax.f32 %v1383_v15, 0.0 }
  0xdc   :  { %v1385_v16 = vpop.f32.mrf.mxu0 }
  0xdd   :  { %v2656_v19 = vmax.f32 %v1385_v16, 0.0 }
  0xde   :  { %v1387_v20 = vpop.f32.mrf.mxu0 }
  0xdf   :  { %v8621_v22 = vpack.c.bf16 %v2656_v19, %v2654_v18  ;;  %v2657_v23 = vmax.f32 %v1387_v20, 0.0 }
  0xe0   :  { %v1391_v24 = vpop.f32.mrf.mxu0  ;;  %7967 = vmatmul.mubr.msk.bf16.gmra.mxu0 %vm945_vm1, %v8204_v17 }
  0xe1   :  { %v8624_v25 = vpack.c.bf16 %v2657_v23, %v2655_v21  ;;  %1639 = vmatprep.mubr.bf16.mxu0 %v8343_v4  ;;  %v2658_v29 = vmax.f32 %v1391_v24, 0.0  ;;  %v8225_v23 = vld [vmem:[%s10216_s0 + $0x100] sm:$0xff]  }
  0xe2   :  { %v1393_v26 = vpop.f32.mrf.mxu0 }
  0xe3   :  { %v2659_v32 = vmax.f32 %v1393_v26, 0.0 }
  0xe4   :  { %v1395_v27 = vpop.f32.mrf.mxu0 }
  0xe5   :  { %v2660_v30 = vmax.f32 %v1395_v27, 0.0 }
  0xe6   :  { %v1397_v31 = vpop.f32.mrf.mxu0 }
  0xe7   :  { %v8630_v33 = vpack.c.bf16 %v2660_v30, %v2658_v29  ;;  %v2661_v34 = vmax.f32 %v1397_v31, 0.0 }
  0xe8   :  { %v1401_v35 = vpop.f32.mrf.mxu0  ;;  %7968 = vmatmul.mubr.msk.bf16.gmra.mxu0 %vm945_vm1, %v8211_v28 }
  0xe9   :  { %v8633_v36 = vpack.c.bf16 %v2661_v34, %v2659_v32  ;;  %1649 = vmatprep.mubr.bf16.mxu0 %v8343_v4  ;;  %v2662_v44 = vmax.f32 %v1401_v35, 0.0 }
  0xea   :  { %v1403_v37 = vpop.f32.mrf.mxu0 }
  0xeb   :  { %v2663_v42 = vmax.f32 %v1403_v37, 0.0  ;;  %v8226_v37 = vld [vmem:[%s10216_s0 + $0x108] sm:$0xff]  }
  0xec   :  { %v1405_v38 = vpop.f32.mrf.mxu0 }
  0xed   :  { %v2664_v40 = vmax.f32 %v1405_v38, 0.0 }
  0xee   :  { %v1407_v41 = vpop.f32.mrf.mxu0 }
  0xef   :  { %v2665_v43 = vmax.f32 %v1407_v41, 0.0  ;;  %v3168_v47 = vpack.c.bf16 %v2664_v40, %v2662_v44 }
  0xf0   :  { %v1411_v45 = vpop.f32.mrf.mxu0  ;;  %7969 = vmatmul.mubr.msk.bf16.gmra.mxu0 %vm945_vm1, %v8218_v39 }
  0xf1   :  { %v3169_v46 = vpack.c.bf16 %v2665_v43, %v2663_v42  ;;  %1659 = vmatprep.mubr.bf16.mxu0 %v8343_v4  ;;  %v2666_v55 = vmax.f32 %v1411_v45, 0.0 }
  0xf2   :  { %v1413_v48 = vpop.f32.mrf.mxu0 }
  0xf3   :  { %3684 = vmatprep.mubr.bf16.mxu1 %v3169_v46  ;;  %v2667_v53 = vmax.f32 %v1413_v48, 0.0  ;;  %v8227_v48 = vld [vmem:[%s10216_s0 + $0x110] sm:$0xff]  }
  0xf4   :  { %v1415_v49 = vpop.f32.mrf.mxu0  ;;  %3685 = vmatmul.mubr.bf16.vlgmr.msra.gmra.mxu1 %v3168_v47 }
  0xf5   :  { %v2668_v51 = vmax.f32 %v1415_v49, 0.0 }
  0xf6   :  { %v1417_v52 = vpop.f32.mrf.mxu0 }
  0xf7   :  { %v2669_v54 = vmax.f32 %v1417_v52, 0.0  ;;  %v3170_v58 = vpack.c.bf16 %v2668_v51, %v2666_v55 }
  0xf8   :  { %v1421_v56 = vpop.f32.mrf.mxu0  ;;  %7970 = vmatmul.mubr.msk.bf16.gmra.mxu0 %vm945_vm1, %v8222_v50 }
  0xf9   :  { %v3171_v57 = vpack.c.bf16 %v2669_v54, %v2667_v53  ;;  %1669 = vmatprep.mubr.bf16.mxu0 %v8343_v4  ;;  %v2670_v2 = vmax.f32 %v1421_v56, 0.0 }
  0xfa   :  { %v1423_v59 = vpop.f32.mrf.mxu0 }
  0xfb   :  { %3694 = vmatprep.mubr.bf16.mxu1 %v3171_v57  ;;  %v2671_v0 = vmax.f32 %v1423_v59, 0.0  ;;  %v8228_v59 = vld [vmem:[%s10216_s0 + $0x118] sm:$0xff]  }
  0xfc   :  { %v1425_v60 = vpop.f32.mrf.mxu0  ;;  %3695 = vmatmul.mubr.bf16.gmra.mxu1 %v3170_v58 }
  0xfd   :  { %v2672_v62 = vmax.f32 %v1425_v60, 0.0 }
  0xfe   :  { %v1427_v63 = vpop.f32.mrf.mxu0 }
  0xff   :  { %v2673_v1 = vmax.f32 %v1427_v63, 0.0  ;;  %v3172_v6 = vpack.c.bf16 %v2672_v62, %v2670_v2 }
 0x100   :  { %v1431_v3 = vpop.f32.mrf.mxu0  ;;  %7971 = vmatmul.mubr.msk.bf16.gmra.mxu0 %vm945_vm1, %v8223_v61 }
 0x101   :  { %v3173_v5 = vpack.c.bf16 %v2673_v1, %v2671_v0  ;;  %1679 = vmatprep.mubr.bf16.mxu0 %v8343_v4  ;;  %v2674_v16 = vmax.f32 %v1431_v3, 0.0 }
 0x102   :  { %v1433_v7 = vpop.f32.mrf.mxu0 }
 0x103   :  { %3704 = vmatprep.mubr.bf16.mxu1 %v3173_v5  ;;  %v2675_v13 = vmax.f32 %v1433_v7, 0.0  ;;  %v8229_v7 = vld [vmem:[%s10216_s0 + $0x120] sm:$0xff]  }
 0x104   :  { %v1435_v8 = vpop.f32.mrf.mxu0  ;;  %3705 = vmatmul.mubr.bf16.gmra.mxu1 %v3172_v6 }
 0x105   :  { %v2676_v10 = vmax.f32 %v1435_v8, 0.0 }
 0x106   :  { %v1437_v12 = vpop.f32.mrf.mxu0 }
 0x107   :  { %v2677_v15 = vmax.f32 %v1437_v12, 0.0  ;;  %v3174_v19 = vpack.c.bf16 %v2676_v10, %v2674_v16 }
 0x108   :  { %v1441_v17 = vpop.f32.mrf.mxu0  ;;  %7972 = vmatmul.mubr.msk.bf16.gmra.mxu0 %vm945_vm1, %v8224_v9 }
 0x109   :  { %v3175_v18 = vpack.c.bf16 %v2677_v15, %v2675_v13  ;;  %1689 = vmatprep.mubr.bf16.mxu0 %v8343_v4  ;;  %v2678_v29 = vmax.f32 %v1441_v17, 0.0 }
 0x10a   :  { %v1443_v20 = vpop.f32.mrf.mxu0 }
 0x10b   :  { %3714 = vmatprep.mubr.bf16.mxu1 %v3175_v18  ;;  %v2679_v27 = vmax.f32 %v1443_v20, 0.0  ;;  %v8230_v20 = vld [vmem:[%s10216_s0 + $0x128] sm:$0xff]  }
 0x10c   :  { %v1445_v21 = vpop.f32.mrf.mxu0  ;;  %3715 = vmatmul.mubr.bf16.gmra.mxu1 %v3174_v19 }
 0x10d   :  { %v2680_v24 = vmax.f32 %v1445_v21, 0.0 }
 0x10e   :  { %v1447_v26 = vpop.f32.mrf.mxu0 }
 0x10f   :  { %v2681_v28 = vmax.f32 %v1447_v26, 0.0  ;;  %v3176_v32 = vpack.c.bf16 %v2680_v24, %v2678_v29 }
 0x110   :  { %v1451_v30 = vpop.f32.mrf.mxu0  ;;  %7973 = vmatmul.mubr.msk.bf16.gmra.mxu0 %vm945_vm1, %v8225_v23 }
 0x111   :  { %v3177_v31 = vpack.c.bf16 %v2681_v28, %v2679_v27  ;;  %1699 = vmatprep.mubr.bf16.mxu0 %v8343_v4  ;;  %v2682_v42 = vmax.f32 %v1451_v30, 0.0 }
 0x112   :  { %v1453_v34 = vpop.f32.mrf.mxu0 }
 0x113   :  { %3724 = vmatprep.mubr.bf16.mxu1 %v3177_v31  ;;  %v2683_v40 = vmax.f32 %v1453_v34, 0.0  ;;  %v8231_v34 = vld [vmem:[%s10216_s0 + $0x130] sm:$0xff]  }
 0x114   :  { %v1455_v35 = vpop.f32.mrf.mxu0  ;;  %3725 = vmatmul.mubr.bf16.gmra.mxu1 %v3176_v32 }
 0x115   :  { %v2684_v38 = vmax.f32 %v1455_v35, 0.0 }
 0x116   :  { %v1457_v39 = vpop.f32.mrf.mxu0 }
 0x117   :  { %v2685_v41 = vmax.f32 %v1457_v39, 0.0  ;;  %v3178_v45 = vpack.c.bf16 %v2684_v38, %v2682_v42 }
 0x118   :  { %v1461_v43 = vpop.f32.mrf.mxu0  ;;  %7974 = vmatmul.mubr.msk.bf16.gmra.mxu0 %vm945_vm1, %v8226_v37 }
 0x119   :  { %v3179_v44 = vpack.c.bf16 %v2685_v41, %v2683_v40  ;;  %1709 = vmatprep.mubr.bf16.mxu0 %v8343_v4  ;;  %v2686_v53 = vmax.f32 %v1461_v43, 0.0 }
 0x11a   :  { %v1463_v46 = vpop.f32.mrf.mxu0 }
 0x11b   :  { %3734 = vmatprep.mubr.bf16.mxu1 %v3179_v44  ;;  %v2687_v51 = vmax.f32 %v1463_v46, 0.0  ;;  %v8232_v46 = vld [vmem:[%s10216_s0 + $0x138] sm:$0xff]  }
 0x11c   :  { %v1465_v47 = vpop.f32.mrf.mxu0  ;;  %3735 = vmatmul.mubr.bf16.gmra.mxu1 %v3178_v45 }
 0x11d   :  { %v2688_v49 = vmax.f32 %v1465_v47, 0.0 }
 0x11e   :  { %v1467_v50 = vpop.f32.mrf.mxu0 }
 0x11f   :  { %v2689_v52 = vmax.f32 %v1467_v50, 0.0  ;;  %v3180_v56 = vpack.c.bf16 %v2688_v49, %v2686_v53 }
 0x120   :  { %v1471_v54 = vpop.f32.mrf.mxu0  ;;  %7975 = vmatmul.mubr.msk.bf16.gmra.mxu0 %vm945_vm1, %v8227_v48 }
 0x121   :  { %v3181_v55 = vpack.c.bf16 %v2689_v52, %v2687_v51  ;;  %1719 = vmatprep.mubr.bf16.mxu0 %v8343_v4  ;;  %v2690_v0 = vmax.f32 %v1471_v54, 0.0 }
 0x122   :  { %v1473_v57 = vpop.f32.mrf.mxu0 }
 0x123   :  { %3744 = vmatprep.mubr.bf16.mxu1 %v3181_v55  ;;  %v2691_v62 = vmax.f32 %v1473_v57, 0.0  ;;  %v8233_v57 = vld [vmem:[%s10216_s0 + $0x140] sm:$0xff]  }
 0x124   :  { %v1475_v58 = vpop.f32.mrf.mxu0  ;;  %3745 = vmatmul.mubr.bf16.gmra.mxu1 %v3180_v56 }
 0x125   :  { %v2692_v60 = vmax.f32 %v1475_v58, 0.0 }
 0x126   :  { %v1477_v61 = vpop.f32.mrf.mxu0 }
 0x127   :  { %v2693_v63 = vmax.f32 %v1477_v61, 0.0  ;;  %v3182_v3 = vpack.c.bf16 %v2692_v60, %v2690_v0 }
 0x128   :  { %v1481_v1 = vpop.f32.mrf.mxu0  ;;  %7976 = vmatmul.mubr.msk.bf16.gmra.mxu0 %vm945_vm1, %v8228_v59 }
 0x129   :  { %v3183_v2 = vpack.c.bf16 %v2693_v63, %v2691_v62  ;;  %1729 = vmatprep.mubr.bf16.mxu0 %v8343_v4  ;;  %v2694_v13 = vmax.f32 %v1481_v1, 0.0 }
 0x12a   :  { %v1483_v5 = vpop.f32.mrf.mxu0 }
 0x12b   :  { %3754 = vmatprep.mubr.bf16.mxu1 %v3183_v2  ;;  %v2695_v10 = vmax.f32 %v1483_v5, 0.0  ;;  %v8234_v5 = vld [vmem:[%s10216_s0 + $0x148] sm:$0xff]  }
 0x12c   :  { %v1485_v6 = vpop.f32.mrf.mxu0  ;;  %3755 = vmatmul.mubr.bf16.gmra.mxu1 %v3182_v3 }
 0x12d   :  { %v2696_v8 = vmax.f32 %v1485_v6, 0.0 }
 0x12e   :  { %v1487_v9 = vpop.f32.mrf.mxu0 }
 0x12f   :  { %v2697_v12 = vmax.f32 %v1487_v9, 0.0  ;;  %v3184_v17 = vpack.c.bf16 %v2696_v8, %v2694_v13 }
 0x130   :  { %v1491_v15 = vpop.f32.mrf.mxu0  ;;  %7977 = vmatmul.mubr.msk.bf16.gmra.mxu0 %vm945_vm1, %v8229_v7 }
 0x131   :  { %v3185_v16 = vpack.c.bf16 %v2697_v12, %v2695_v10  ;;  %1739 = vmatprep.mubr.bf16.mxu0 %v8343_v4  ;;  %v2698_v27 = vmax.f32 %v1491_v15, 0.0 }
 0x132   :  { %v1493_v18 = vpop.f32.mrf.mxu0 }
 0x133   :  { %3764 = vmatprep.mubr.bf16.mxu1 %v3185_v16  ;;  %v2699_v24 = vmax.f32 %v1493_v18, 0.0  ;;  %v8235_v18 = vld [vmem:[%s10216_s0 + $0x150] sm:$0xff]  }
 0x134   :  { %v1495_v19 = vpop.f32.mrf.mxu0  ;;  %3765 = vmatmul.mubr.bf16.gmra.mxu1 %v3184_v17 }
 0x135   :  { %v2700_v21 = vmax.f32 %v1495_v19, 0.0 }
 0x136   :  { %v1497_v23 = vpop.f32.mrf.mxu0 }
 0x137   :  { %v2701_v26 = vmax.f32 %v1497_v23, 0.0  ;;  %v3186_v30 = vpack.c.bf16 %v2700_v21, %v2698_v27 }
 0x138   :  { %v1501_v28 = vpop.f32.mrf.mxu0  ;;  %7978 = vmatmul.mubr.msk.bf16.gmra.mxu0 %vm945_vm1, %v8230_v20 }
 0x139   :  { %v3187_v29 = vpack.c.bf16 %v2701_v26, %v2699_v24  ;;  %1749 = vmatprep.mubr.bf16.mxu0 %v8343_v4  ;;  %v2702_v40 = vmax.f32 %v1501_v28, 0.0 }
 0x13a   :  { %v1503_v31 = vpop.f32.mrf.mxu0 }
 0x13b   :  { %3774 = vmatprep.mubr.bf16.mxu1 %v3187_v29  ;;  %v2703_v38 = vmax.f32 %v1503_v31, 0.0  ;;  %v8236_v31 = vld [vmem:[%s10216_s0 + $0x158] sm:$0xff]  }
 0x13c   :  { %v1505_v32 = vpop.f32.mrf.mxu0  ;;  %3775 = vmatmul.mubr.bf16.gmra.mxu1 %v3186_v30 }
 0x13d   :  { %v2704_v35 = vmax.f32 %v1505_v32, 0.0 }
 0x13e   :  { %v1507_v37 = vpop.f32.mrf.mxu0 }
 0x13f   :  { %v2705_v39 = vmax.f32 %v1507_v37, 0.0  ;;  %v3188_v43 = vpack.c.bf16 %v2704_v35, %v2702_v40 }
 0x140   :  { %v1511_v41 = vpop.f32.mrf.mxu0  ;;  %7979 = vmatmul.mubr.msk.bf16.gmra.mxu0 %vm945_vm1, %v8231_v34 }
 0x141   :  { %v3189_v42 = vpack.c.bf16 %v2705_v39, %v2703_v38  ;;  %1759 = vmatprep.mubr.bf16.mxu0 %v8343_v4  ;;  %v2706_v51 = vmax.f32 %v1511_v41, 0.0 }
 0x142   :  { %v1513_v44 = vpop.f32.mrf.mxu0 }
 0x143   :  { %3784 = vmatprep.mubr.bf16.mxu1 %v3189_v42  ;;  %v2707_v49 = vmax.f32 %v1513_v44, 0.0  ;;  %v8237_v44 = vld [vmem:[%s10216_s0 + $0x160] sm:$0xff]  }
 0x144   :  { %v1515_v45 = vpop.f32.mrf.mxu0  ;;  %3785 = vmatmul.mubr.bf16.gmra.mxu1 %v3188_v43 }
 0x145   :  { %v2708_v47 = vmax.f32 %v1515_v45, 0.0 }
 0x146   :  { %v1517_v48 = vpop.f32.mrf.mxu0 }
 0x147   :  { %v2709_v50 = vmax.f32 %v1517_v48, 0.0  ;;  %v3190_v54 = vpack.c.bf16 %v2708_v47, %v2706_v51 }
 0x148   :  { %v1521_v52 = vpop.f32.mrf.mxu0  ;;  %7980 = vmatmul.mubr.msk.bf16.gmra.mxu0 %vm945_vm1, %v8232_v46 }
 0x149   :  { %v3191_v53 = vpack.c.bf16 %v2709_v50, %v2707_v49  ;;  %1769 = vmatprep.mubr.bf16.mxu0 %v8343_v4  ;;  %v2710_v62 = vmax.f32 %v1521_v52, 0.0 }
 0x14a   :  { %v1523_v55 = vpop.f32.mrf.mxu0 }
 0x14b   :  { %3794 = vmatprep.mubr.bf16.mxu1 %v3191_v53  ;;  %v2711_v60 = vmax.f32 %v1523_v55, 0.0  ;;  %v8238_v55 = vld [vmem:[%s10216_s0 + $0x168] sm:$0xff]  }
 0x14c   :  { %v1525_v56 = vpop.f32.mrf.mxu0  ;;  %3795 = vmatmul.mubr.bf16.gmra.mxu1 %v3190_v54 }
 0x14d   :  { %v2712_v58 = vmax.f32 %v1525_v56, 0.0 }
 0x14e   :  { %v1527_v59 = vpop.f32.mrf.mxu0 }
 0x14f   :  { %v2713_v61 = vmax.f32 %v1527_v59, 0.0  ;;  %v3192_v1 = vpack.c.bf16 %v2712_v58, %v2710_v62 }
 0x150   :  { %v1531_v63 = vpop.f32.mrf.mxu0  ;;  %7981 = vmatmul.mubr.msk.bf16.gmra.mxu0 %vm945_vm1, %v8233_v57 }
 0x151   :  { %v3193_v0 = vpack.c.bf16 %v2713_v61, %v2711_v60  ;;  %1779 = vmatprep.mubr.bf16.mxu0 %v8343_v4  ;;  %v2714_v10 = vmax.f32 %v1531_v63, 0.0 }
 0x152   :  { %v1533_v2 = vpop.f32.mrf.mxu0 }
 0x153   :  { %3804 = vmatprep.mubr.bf16.mxu1 %v3193_v0  ;;  %v2715_v8 = vmax.f32 %v1533_v2, 0.0  ;;  %v8239_v2 = vld [vmem:[%s10216_s0 + $0x170] sm:$0xff]  }
 0x154   :  { %v1535_v3 = vpop.f32.mrf.mxu0  ;;  %3805 = vmatmul.mubr.bf16.gmra.mxu1 %v3192_v1 }
 0x155   :  { %v2716_v6 = vmax.f32 %v1535_v3, 0.0 }
 0x156   :  { %v1537_v7 = vpop.f32.mrf.mxu0 }
 0x157   :  { %v2717_v9 = vmax.f32 %v1537_v7, 0.0  ;;  %v3194_v15 = vpack.c.bf16 %v2716_v6, %v2714_v10 }
 0x158   :  { %v1541_v12 = vpop.f32.mrf.mxu0  ;;  %7982 = vmatmul.mubr.msk.bf16.gmra.mxu0 %vm945_vm1, %v8234_v5 }
 0x159   :  { %v3195_v13 = vpack.c.bf16 %v2717_v9, %v2715_v8  ;;  %1789 = vmatprep.mubr.bf16.mxu0 %v8343_v4  ;;  %v2718_v24 = vmax.f32 %v1541_v12, 0.0 }
 0x15a   :  { %v1543_v16 = vpop.f32.mrf.mxu0 }
 0x15b   :  { %3814 = vmatprep.mubr.bf16.mxu1 %v3195_v13  ;;  %v2719_v21 = vmax.f32 %v1543_v16, 0.0  ;;  %v8240_v16 = vld [vmem:[%s10216_s0 + $0x178] sm:$0xff]  }
 0x15c   :  { %v1545_v17 = vpop.f32.mrf.mxu0  ;;  %3815 = vmatmul.mubr.bf16.gmra.mxu1 %v3194_v15 }
 0x15d   :  { %v2720_v19 = vmax.f32 %v1545_v17, 0.0 }
 0x15e   :  { %v1547_v20 = vpop.f32.mrf.mxu0 }
 0x15f   :  { %v2721_v23 = vmax.f32 %v1547_v20, 0.0  ;;  %v3196_v28 = vpack.c.bf16 %v2720_v19, %v2718_v24 }
 0x160   :  { %v1551_v26 = vpop.f32.mrf.mxu0  ;;  %7983 = vmatmul.mubr.msk.bf16.gmra.mxu0 %vm945_vm1, %v8235_v18 }
 0x161   :  { %v3197_v27 = vpack.c.bf16 %v2721_v23, %v2719_v21  ;;  %1799 = vmatprep.mubr.bf16.mxu0 %v8343_v4  ;;  %v2722_v38 = vmax.f32 %v1551_v26, 0.0 }
 0x162   :  { %v1553_v29 = vpop.f32.mrf.mxu0 }
 0x163   :  { %3824 = vmatprep.mubr.bf16.mxu1 %v3197_v27  ;;  %v2723_v35 = vmax.f32 %v1553_v29, 0.0  ;;  %v8241_v29 = vld [vmem:[%s10216_s0 + $0x180] sm:$0xff]  }
 0x164   :  { %v1555_v30 = vpop.f32.mrf.mxu0  ;;  %3825 = vmatmul.mubr.bf16.gmra.mxu1 %v3196_v28 }
 0x165   :  { %v2724_v32 = vmax.f32 %v1555_v30, 0.0 }
 0x166   :  { %v1557_v34 = vpop.f32.mrf.mxu0 }
 0x167   :  { %v2725_v37 = vmax.f32 %v1557_v34, 0.0  ;;  %v3198_v41 = vpack.c.bf16 %v2724_v32, %v2722_v38 }
 0x168   :  { %v1561_v39 = vpop.f32.mrf.mxu0  ;;  %7984 = vmatmul.mubr.msk.bf16.gmra.mxu0 %vm945_vm1, %v8236_v31 }
 0x169   :  { %v3199_v40 = vpack.c.bf16 %v2725_v37, %v2723_v35  ;;  %1809 = vmatprep.mubr.bf16.mxu0 %v8343_v4  ;;  %v2726_v49 = vmax.f32 %v1561_v39, 0.0 }
 0x16a   :  { %v1563_v42 = vpop.f32.mrf.mxu0 }
 0x16b   :  { %3834 = vmatprep.mubr.bf16.mxu1 %v3199_v40  ;;  %v2727_v47 = vmax.f32 %v1563_v42, 0.0  ;;  %v8242_v42 = vld [vmem:[%s10216_s0 + $0x188] sm:$0xff]  }
 0x16c   :  { %v1565_v43 = vpop.f32.mrf.mxu0  ;;  %3835 = vmatmul.mubr.bf16.gmra.mxu1 %v3198_v41 }
 0x16d   :  { %v2728_v45 = vmax.f32 %v1565_v43, 0.0 }
 0x16e   :  { %v1567_v46 = vpop.f32.mrf.mxu0 }
 0x16f   :  { %v2729_v48 = vmax.f32 %v1567_v46, 0.0  ;;  %v3200_v52 = vpack.c.bf16 %v2728_v45, %v2726_v49 }
 0x170   :  { %v1571_v50 = vpop.f32.mrf.mxu0  ;;  %7985 = vmatmul.mubr.msk.bf16.gmra.mxu0 %vm945_vm1, %v8237_v44 }
 0x171   :  { %v3201_v51 = vpack.c.bf16 %v2729_v48, %v2727_v47  ;;  %1819 = vmatprep.mubr.bf16.mxu0 %v8343_v4  ;;  %v2730_v60 = vmax.f32 %v1571_v50, 0.0 }
 0x172   :  { %v1573_v53 = vpop.f32.mrf.mxu0 }
 0x173   :  { %3844 = vmatprep.mubr.bf16.mxu1 %v3201_v51  ;;  %v2731_v58 = vmax.f32 %v1573_v53, 0.0  ;;  %v8243_v53 = vld [vmem:[%s10216_s0 + $0x190] sm:$0xff]  }
 0x174   :  { %v1575_v54 = vpop.f32.mrf.mxu0  ;;  %3845 = vmatmul.mubr.bf16.gmra.mxu1 %v3200_v52 }
 0x175   :  { %v2732_v56 = vmax.f32 %v1575_v54, 0.0 }
 0x176   :  { %v1577_v57 = vpop.f32.mrf.mxu0 }
 0x177   :  { %v2733_v59 = vmax.f32 %v1577_v57, 0.0  ;;  %v3202_v63 = vpack.c.bf16 %v2732_v56, %v2730_v60 }
 0x178   :  { %v1581_v61 = vpop.f32.mrf.mxu0  ;;  %7986 = vmatmul.mubr.msk.bf16.gmra.mxu0 %vm945_vm1, %v8238_v55 }
 0x179   :  { %v3203_v62 = vpack.c.bf16 %v2733_v59, %v2731_v58  ;;  %1829 = vmatprep.mubr.bf16.mxu0 %v8343_v4  ;;  %v2734_v8 = vmax.f32 %v1581_v61, 0.0 }
 0x17a   :  { %v1583_v0 = vpop.f32.mrf.mxu0 }
 0x17b   :  { %3854 = vmatprep.mubr.bf16.mxu1 %v3203_v62  ;;  %v2735_v6 = vmax.f32 %v1583_v0, 0.0  ;;  %v8244_v0 = vld [vmem:[%s10216_s0 + $0x198] sm:$0xff]  }
 0x17c   :  { %v1585_v1 = vpop.f32.mrf.mxu0  ;;  %3855 = vmatmul.mubr.bf16.gmra.mxu1 %v3202_v63 }
 0x17d   :  { %v2736_v3 = vmax.f32 %v1585_v1, 0.0 }
 0x17e   :  { %v1587_v5 = vpop.f32.mrf.mxu0 }
 0x17f   :  { %v2737_v7 = vmax.f32 %v1587_v5, 0.0  ;;  %v3204_v12 = vpack.c.bf16 %v2736_v3, %v2734_v8 }
 0x180   :  { %v1591_v9 = vpop.f32.mrf.mxu0  ;;  %7987 = vmatmul.mubr.msk.bf16.gmra.mxu0 %vm945_vm1, %v8239_v2 }
 0x181   :  { %v3205_v10 = vpack.c.bf16 %v2737_v7, %v2735_v6  ;;  %1839 = vmatprep.mubr.bf16.mxu0 %v8343_v4  ;;  %v2738_v21 = vmax.f32 %v1591_v9, 0.0  ;;  %v3452_v6 = vlaneseq }
 0x182   :  { %v1593_v13 = vpop.f32.mrf.mxu0 }
 0x183   :  { %3864 = vmatprep.mubr.bf16.mxu1 %v3205_v10  ;;  %v2739_v19 = vmax.f32 %v1593_v13, 0.0  ;;  %v3453_v13 = vshrl.u32 %v3452_v6, 7 }
 0x184   :  { %v1595_v15 = vpop.f32.mrf.mxu0  ;;  %3865 = vmatmul.mubr.bf16.gmra.mxu1 %v3204_v12 }
 0x185   :  { %v2740_v17 = vmax.f32 %v1595_v15, 0.0 }
 0x186   :  { %v1597_v18 = vpop.f32.mrf.mxu0 }
 0x187   :  { %v2741_v20 = vmax.f32 %v1597_v18, 0.0  ;;  %v3206_v26 = vpack.c.bf16 %v2740_v17, %v2738_v21  ;;  %v3454_v21 = vsub.s32 0, %v3453_v13 }
 0x188   :  { %v1601_v23 = vpop.f32.mrf.mxu0  ;;  %7988 = vmatmul.mubr.msk.bf16.gmra.mxu0 %vm945_vm1, %v8240_v16  ;;  %v8245_v16 = vld [vmem:[%s10216_s0 + $0x1a0] sm:$0xff]  }
 0x189   :  { %v3207_v24 = vpack.c.bf16 %v2741_v20, %v2739_v19  ;;  %1849 = vmatprep.mubr.bf16.mxu0 %v8343_v4  ;;  %v2742_v35 = vmax.f32 %v1601_v23, 0.0 }
 0x18a   :  { %v1603_v27 = vpop.f32.mrf.mxu0 }
 0x18b   :  { %3874 = vmatprep.mubr.bf16.mxu1 %v3207_v24  ;;  %v2743_v32 = vmax.f32 %v1603_v27, 0.0 }
 0x18c   :  { %v1605_v28 = vpop.f32.mrf.mxu0  ;;  %3875 = vmatmul.mubr.bf16.gmra.mxu1 %v3206_v26  ;;  %v3450_v26 = vld [vmem:[%s10219_s3] sm:$0x3] }
 0x18d   :  { %v2744_v30 = vmax.f32 %v1605_v28, 0.0  ;;  %v3458_v28 = vsub.s32 1, %v3453_v13 }
 0x18e   :  { %v1607_v31 = vpop.f32.mrf.mxu0 }
 0x18f   :  { %v2745_v34 = vmax.f32 %v1607_v31, 0.0  ;;  %v3208_v39 = vpack.c.bf16 %v2744_v30, %v2742_v35  ;;  %v8764_v31 = vrot.slane %v3450_v26, %v3454_v21  ;;  %v8246_v35 = vld [vmem:[%s10216_s0 + $0x1a8] sm:$0xff]  }
 0x190   :  { %v1611_v37 = vpop.f32.mrf.mxu0  ;;  %7989 = vmatmul.mubr.msk.bf16.gmra.mxu0 %vm945_vm1, %v8241_v29 }
 0x191   :  { %v3209_v38 = vpack.c.bf16 %v2745_v34, %v2743_v32  ;;  %1859 = vmatprep.mubr.bf16.mxu0 %v8343_v4  ;;  %v2746_v47 = vmax.f32 %v1611_v37, 0.0  ;;  %v8769_v37 = vrot.slane %v3450_v26, %v3458_v28 }
 0x192   :  { %v1613_v40 = vpop.f32.mrf.mxu0 }
 0x193   :  { %3884 = vmatprep.mubr.bf16.mxu1 %v3209_v38  ;;  %v2747_v45 = vmax.f32 %v1613_v40, 0.0 }
 0x194   :  { %v1615_v41 = vpop.f32.mrf.mxu0  ;;  %3885 = vmatmul.mubr.bf16.gmra.mxu1 %v3208_v39 }
 0x195   :  { %v2748_v43 = vmax.f32 %v1615_v41, 0.0 }
 0x196   :  { %v1617_v44 = vpop.f32.mrf.mxu0 }
 0x197   :  { %v2749_v46 = vmax.f32 %v1617_v44, 0.0  ;;  %v3210_v50 = vpack.c.bf16 %v2748_v43, %v2746_v47 }
 0x198   :  { %v1621_v48 = vpop.f32.mrf.mxu0  ;;  %7990 = vmatmul.mubr.msk.bf16.gmra.mxu0 %vm945_vm1, %v8242_v42 }
 0x199   :  { %v3211_v49 = vpack.c.bf16 %v2749_v46, %v2747_v45  ;;  %1869 = vmatprep.mubr.bf16.mxu0 %v8343_v4  ;;  %v2750_v58 = vmax.f32 %v1621_v48, 0.0 }
 0x19a   :  { %v1623_v51 = vpop.f32.mrf.mxu0 }
 0x19b   :  { %3894 = vmatprep.mubr.bf16.mxu1 %v3211_v49  ;;  %v2751_v56 = vmax.f32 %v1623_v51, 0.0 }
 0x19c   :  { %v1625_v52 = vpop.f32.mrf.mxu0  ;;  %3895 = vmatmul.mubr.bf16.gmra.mxu1 %v3210_v50 }
 0x19d   :  { %v2752_v54 = vmax.f32 %v1625_v52, 0.0 }
 0x19e   :  { %v1627_v55 = vpop.f32.mrf.mxu0 }
 0x19f   :  { %v2753_v57 = vmax.f32 %v1627_v55, 0.0  ;;  %v3212_v61 = vpack.c.bf16 %v2752_v54, %v2750_v58  ;;  %v8247_v58 = vld [vmem:[%s10216_s0 + $0x1b0] sm:$0xff]  }
 0x1a0   :  { %v1631_v59 = vpop.f32.mrf.mxu0  ;;  %7991 = vmatmul.mubr.msk.bf16.gmra.mxu0 %vm945_vm1, %v8243_v53 }
 0x1a1   :  { %v3213_v60 = vpack.c.bf16 %v2753_v57, %v2751_v56  ;;  %1879 = vmatprep.mubr.bf16.mxu0 %v8343_v4  ;;  %v2754_v7 = vmax.f32 %v1631_v59, 0.0 }
 0x1a2   :  { %v1633_v62 = vpop.f32.mrf.mxu0 }
 0x1a3   :  { %3904 = vmatprep.mubr.bf16.mxu1 %v3213_v60  ;;  %v2755_v3 = vmax.f32 %v1633_v62, 0.0 }
 0x1a4   :  { %v1635_v63 = vpop.f32.mrf.mxu0  ;;  %3905 = vmatmul.mubr.bf16.gmra.mxu1 %v3212_v61 }
 0x1a5   :  { %v2756_v1 = vmax.f32 %v1635_v63, 0.0 }
 0x1a6   :  { %v1637_v2 = vpop.f32.mrf.mxu0 }
 0x1a7   :  { %v2757_v5 = vmax.f32 %v1637_v2, 0.0  ;;  %v3214_v10 = vpack.c.bf16 %v2756_v1, %v2754_v7 }
 0x1a8   :  { %v1641_v8 = vpop.f32.mrf.mxu0  ;;  %7992 = vmatmul.mubr.msk.bf16.gmra.mxu0 %vm945_vm1, %v8244_v0 }
 0x1a9   :  { %v3215_v9 = vpack.c.bf16 %v2757_v5, %v2755_v3  ;;  %1889 = vmatprep.mubr.bf16.mxu0 %v8343_v4  ;;  %v2758_v23 = vmax.f32 %v1641_v8, 0.0 }
 0x1aa   :  { %v1643_v12 = vpop.f32.mrf.mxu0 }
 0x1ab   :  { %3914 = vmatprep.mubr.bf16.mxu1 %v3215_v9  ;;  %v2759_v19 = vmax.f32 %v1643_v12, 0.0 }
 0x1ac   :  { %v1645_v15 = vpop.f32.mrf.mxu0  ;;  %3915 = vmatmul.mubr.bf16.gmra.mxu1 %v3214_v10 }
 0x1ad   :  { %v2760_v17 = vmax.f32 %v1645_v15, 0.0 }
 0x1ae   :  { %v1647_v18 = vpop.f32.mrf.mxu0 }
 0x1af   :  { %v2761_v20 = vmax.f32 %v1647_v18, 0.0  ;;  %v3216_v29 = vpack.c.bf16 %v2760_v17, %v2758_v23  ;;  %v8248_v23 = vld [vmem:[%s10216_s0 + $0x1b8] sm:$0xff]  }
 0x1b0   :  { %v1651_v24 = vpop.f32.mrf.mxu0  ;;  %7993 = vmatmul.mubr.msk.bf16.gmra.mxu0 %vm945_vm1, %v8245_v16 }
 0x1b1   :  { %v3217_v27 = vpack.c.bf16 %v2761_v20, %v2759_v19  ;;  %1899 = vmatprep.mubr.bf16.mxu0 %v8343_v4  ;;  %v2762_v44 = vmax.f32 %v1651_v24, 0.0 }
 0x1b2   :  { %v1653_v30 = vpop.f32.mrf.mxu0 }
 0x1b3   :  { %3924 = vmatprep.mubr.bf16.mxu1 %v3217_v27  ;;  %v2763_v41 = vmax.f32 %v1653_v30, 0.0 }
 0x1b4   :  { %v1655_v32 = vpop.f32.mrf.mxu0  ;;  %v3686_v34 = vpop.f32.mrf.mxu1  ;;  %3925 = vmatmul.mubr.bf16.gmra.mxu1 %v3216_v29 }
 0x1b5   :  { %v2764_v38 = vmax.f32 %v1655_v32, 0.0  ;;  %v3687_v42 = vadd.f32 %v3686_v34, %v8764_v31 }
 0x1b6   :  { %v1657_v39 = vpop.f32.mrf.mxu0  ;;  %v3688_v40 = vpop.f32.mrf.mxu1 }
 0x1b7   :  { %v2765_v43 = vmax.f32 %v1657_v39, 0.0  ;;  %v3689_v48 = vadd.f32 %v3688_v40, %v8769_v37  ;;  %v3218_v50 = vpack.c.bf16 %v2764_v38, %v2762_v44  ;;  %v4947_v53 = vmax.f32 %v3687_v42, 0.0 }
 0x1b8   :  { %v1661_v45 = vpop.f32.mrf.mxu0  ;;  %7994 = vmatmul.mubr.msk.bf16.gmra.mxu0 %vm945_vm1, %v8246_v35  ;;  %v3690_v46 = vpop.f32.mrf.mxu1 }
 0x1b9   :  { %v3219_v47 = vpack.c.bf16 %v2765_v43, %v2763_v41  ;;  %v3691_v49 = vadd.f32 %v3690_v46, %v8764_v31  ;;  %1909 = vmatprep.mubr.bf16.mxu0 %v8343_v4  ;;  %v4948_v59 = vmax.f32 %v3689_v48, 0.0  ;;  %v2766_v8 = vmax.f32 %v1661_v45, 0.0 }
 0x1ba   :  { %v1663_v51 = vpop.f32.mrf.mxu0  ;;  %v3692_v52 = vpop.f32.mrf.mxu1 }
 0x1bb   :  { %v4949_v54 = vmax.f32 %v3691_v49, 0.0  ;;  %v3693_v55 = vadd.f32 %v3692_v52, %v8769_v37  ;;  %3934 = vmatprep.mubr.bf16.mxu1 %v3219_v47  ;;  %v2767_v3 = vmax.f32 %v1663_v51, 0.0 }
 0x1bc   :  { %v1665_v56 = vpop.f32.mrf.mxu0  ;;  %v3696_v57 = vpop.f32.mrf.mxu1  ;;  %3935 = vmatmul.mubr.bf16.gmra.mxu1 %v3218_v50 }
 0x1bd   :  { %v8780_v60 = vmax.f32 %v4947_v53, %v4949_v54  ;;  %v4950_v61 = vmax.f32 %v3693_v55, 0.0  ;;  %v2768_v1 = vmax.f32 %v1665_v56, 0.0  ;;  %v3697_v2 = vadd.f32 %v3696_v57, %v8764_v31  ;;  %v8249_v53 = vld [vmem:[%s10216_s0 + $0x1c0] sm:$0xff]  }
 0x1be   :  { %v1667_v62 = vpop.f32.mrf.mxu0  ;;  %v3698_v63 = vpop.f32.mrf.mxu1 }
 0x1bf   :  { %v8782_v0 = vmax.f32 %v4948_v59, %v4950_v61  ;;  %v2769_v5 = vmax.f32 %v1667_v62, 0.0  ;;  %v3699_v12 = vadd.f32 %v3698_v63, %v8769_v37  ;;  %v3220_v16 = vpack.c.bf16 %v2768_v1, %v2766_v8 }
 0x1c0   :  { %v1671_v6 = vpop.f32.mrf.mxu0  ;;  %7995 = vmatmul.mubr.msk.bf16.gmra.mxu0 %vm945_vm1, %v8247_v58  ;;  %v3700_v7 = vpop.f32.mrf.mxu1  ;;  %v4951_v17 = vmax.f32 %v3697_v2, 0.0 }
 0x1c1   :  { %v3701_v9 = vadd.f32 %v3700_v7, %v8764_v31  ;;  %1919 = vmatprep.mubr.bf16.mxu0 %v8343_v4  ;;  %v3221_v10 = vpack.c.bf16 %v2769_v5, %v2767_v3  ;;  %v4952_v26 = vmax.f32 %v3699_v12, 0.0  ;;  %v2770_v41 = vmax.f32 %v1671_v6, 0.0 }
 0x1c2   :  { %v1673_v13 = vpop.f32.mrf.mxu0  ;;  %v3702_v15 = vpop.f32.mrf.mxu1 }
 0x1c3   :  { %v4953_v18 = vmax.f32 %v3701_v9, 0.0  ;;  %v3703_v19 = vadd.f32 %v3702_v15, %v8769_v37  ;;  %3944 = vmatprep.mubr.bf16.mxu1 %v3221_v10  ;;  %v2771_v32 = vmax.f32 %v1673_v13, 0.0 }
 0x1c4   :  { %v1675_v20 = vpop.f32.mrf.mxu0  ;;  %v3706_v21 = vpop.f32.mrf.mxu1  ;;  %3945 = vmatmul.mubr.bf16.gmra.mxu1 %v3220_v16 }
 0x1c5   :  { %v8793_v24 = vmax.f32 %v4951_v17, %v4953_v18  ;;  %v4954_v27 = vmax.f32 %v3703_v19, 0.0  ;;  %v2772_v30 = vmax.f32 %v1675_v20, 0.0  ;;  %v3707_v35 = vadd.f32 %v3706_v21, %v8764_v31  ;;  %v8250_v19 = vld [vmem:[%s10216_s0 + $0x1c8] sm:$0xff]  }
 0x1c6   :  { %v1677_v28 = vpop.f32.mrf.mxu0  ;;  %v3708_v29 = vpop.f32.mrf.mxu1 }
 0x1c7   :  { %v8795_v34 = vmax.f32 %v4952_v26, %v4954_v27  ;;  %v2773_v38 = vmax.f32 %v1677_v28, 0.0  ;;  %v3709_v42 = vadd.f32 %v3708_v29, %v8769_v37  ;;  %v3222_v47 = vpack.c.bf16 %v2772_v30, %v2770_v41 }
 0x1c8   :  { %v1681_v39 = vpop.f32.mrf.mxu0  ;;  %7996 = vmatmul.mubr.msk.bf16.gmra.mxu0 %vm945_vm1, %v8248_v23  ;;  %v3710_v40 = vpop.f32.mrf.mxu1  ;;  %v4955_v49 = vmax.f32 %v3707_v35, 0.0 }
 0x1c9   :  { %1929 = vmatprep.mubr.bf16.mxu0 %v8343_v4  ;;  %v3223_v43 = vpack.c.bf16 %v2773_v38, %v2771_v32  ;;  %v3711_v44 = vadd.f32 %v3710_v40, %v8764_v31  ;;  %v4956_v54 = vmax.f32 %v3709_v42, 0.0  ;;  %v2774_v5 = vmax.f32 %v1681_v39, 0.0 }
 0x1ca   :  { %v1683_v45 = vpop.f32.mrf.mxu0  ;;  %v3712_v46 = vpop.f32.mrf.mxu1 }
 0x1cb   :  { %v3713_v48 = vadd.f32 %v3712_v46, %v8769_v37  ;;  %v4957_v50 = vmax.f32 %v3711_v44, 0.0  ;;  %3954 = vmatprep.mubr.bf16.mxu1 %v3223_v43  ;;  %v2775_v63 = vmax.f32 %v1683_v45, 0.0 }
 0x1cc   :  { %v1685_v51 = vpop.f32.mrf.mxu0  ;;  %v3716_v52 = vpop.f32.mrf.mxu1  ;;  %3955 = vmatmul.mubr.bf16.gmra.mxu1 %v3222_v47 }
 0x1cd   :  { %v4958_v55 = vmax.f32 %v3713_v48, 0.0  ;;  %v8806_v56 = vmax.f32 %v4955_v49, %v4957_v50  ;;  %v2776_v61 = vmax.f32 %v1685_v51, 0.0  ;;  %v3717_v62 = vadd.f32 %v3716_v52, %v8764_v31  ;;  %v8251_v52 = vld [vmem:[%s10216_s0 + $0x1d0] sm:$0xff]  }
 0x1ce   :  { %v1687_v57 = vpop.f32.mrf.mxu0  ;;  %v3718_v58 = vpop.f32.mrf.mxu1 }
 0x1cf   :  { %v8808_v59 = vmax.f32 %v4956_v54, %v4958_v55  ;;  %v2777_v1 = vmax.f32 %v1687_v57, 0.0  ;;  %v3719_v6 = vadd.f32 %v3718_v58, %v8769_v37  ;;  %v3224_v12 = vpack.c.bf16 %v2776_v61, %v2774_v5 }
 0x1d0   :  { %v1691_v2 = vpop.f32.mrf.mxu0  ;;  %7997 = vmatmul.mubr.msk.bf16.gmra.mxu0 %vm945_vm1, %v8249_v53  ;;  %v3720_v3 = vpop.f32.mrf.mxu1  ;;  %v4959_v13 = vmax.f32 %v3717_v62, 0.0 }
 0x1d1   :  { %v3721_v7 = vadd.f32 %v3720_v3, %v8764_v31  ;;  %1939 = vmatprep.mubr.bf16.mxu0 %v8343_v4  ;;  %v3225_v8 = vpack.c.bf16 %v2777_v1, %v2775_v63  ;;  %v4960_v20 = vmax.f32 %v3719_v6, 0.0  ;;  %v2778_v40 = vmax.f32 %v1691_v2, 0.0 }
 0x1d2   :  { %v1693_v9 = vpop.f32.mrf.mxu0  ;;  %v3722_v10 = vpop.f32.mrf.mxu1 }
 0x1d3   :  { %v4961_v15 = vmax.f32 %v3721_v7, 0.0  ;;  %v3723_v16 = vadd.f32 %v3722_v10, %v8769_v37  ;;  %3964 = vmatprep.mubr.bf16.mxu1 %v3225_v8  ;;  %v2779_v30 = vmax.f32 %v1693_v9, 0.0 }
 0x1d4   :  { %v1695_v17 = vpop.f32.mrf.mxu0  ;;  %v3726_v18 = vpop.f32.mrf.mxu1  ;;  %3965 = vmatmul.mubr.bf16.gmra.mxu1 %v3224_v12 }
 0x1d5   :  { %v8819_v21 = vmax.f32 %v4959_v13, %v4961_v15  ;;  %v4962_v23 = vmax.f32 %v3723_v16, 0.0  ;;  %v2780_v29 = vmax.f32 %v1695_v17, 0.0  ;;  %v3727_v32 = vadd.f32 %v3726_v18, %v8764_v31  ;;  %v8252_v16 = vld [vmem:[%s10216_s0 + $0x1d8] sm:$0xff]  }
 0x1d6   :  { %v1697_v26 = vpop.f32.mrf.mxu0  ;;  %v3728_v27 = vpop.f32.mrf.mxu1 }
 0x1d7   :  { %v8821_v28 = vmax.f32 %v4960_v20, %v4962_v23  ;;  %v2781_v35 = vmax.f32 %v1697_v26, 0.0  ;;  %v3729_v42 = vadd.f32 %v3728_v27, %v8769_v37  ;;  %v3226_v46 = vpack.c.bf16 %v2780_v29, %v2778_v40 }
 0x1d8   :  { %v1701_v38 = vpop.f32.mrf.mxu0  ;;  %7998 = vmatmul.mubr.msk.bf16.gmra.mxu0 %vm945_vm1, %v8250_v19  ;;  %v3730_v39 = vpop.f32.mrf.mxu1  ;;  %v4963_v47 = vmax.f32 %v3727_v32, 0.0 }
 0x1d9   :  { %1949 = vmatprep.mubr.bf16.mxu0 %v8343_v4  ;;  %v3227_v41 = vpack.c.bf16 %v2781_v35, %v2779_v30  ;;  %v3731_v43 = vadd.f32 %v3730_v39, %v8764_v31  ;;  %v4964_v53 = vmax.f32 %v3729_v42, 0.0  ;;  %v2782_v5 = vmax.f32 %v1701_v38, 0.0 }
 0x1da   :  { %v1703_v44 = vpop.f32.mrf.mxu0  ;;  %v3732_v45 = vpop.f32.mrf.mxu1 }
 0x1db   :  { %v4965_v48 = vmax.f32 %v3731_v43, 0.0  ;;  %v3733_v49 = vadd.f32 %v3732_v45, %v8769_v37  ;;  %3974 = vmatprep.mubr.bf16.mxu1 %v3227_v41  ;;  %v2783_v62 = vmax.f32 %v1703_v44, 0.0 }
 0x1dc   :  { %v1705_v50 = vpop.f32.mrf.mxu0  ;;  %v3736_v51 = vpop.f32.mrf.mxu1  ;;  %3975 = vmatmul.mubr.bf16.gmra.mxu1 %v3226_v46 }
 0x1dd   :  { %v8832_v54 = vmax.f32 %v4963_v47, %v4965_v48  ;;  %v4966_v55 = vmax.f32 %v3733_v49, 0.0  ;;  %v2784_v61 = vmax.f32 %v1705_v50, 0.0  ;;  %v3737_v12 = vadd.f32 %v3736_v51, %v8764_v31 }
 0x1de   :  { %v1707_v57 = vpop.f32.mrf.mxu0  ;;  %v3738_v58 = vpop.f32.mrf.mxu1 }
 0x1df   :  { %v8834_v63 = vmax.f32 %v4964_v53, %v4966_v55  ;;  %v2785_v1 = vmax.f32 %v1707_v57, 0.0  ;;  %v3228_v10 = vpack.c.bf16 %v2784_v61, %v2782_v5  ;;  %v4967_v27 = vmax.f32 %v3737_v12, 0.0 }
 0x1e0   :  { %v1711_v2 = vpop.f32.mrf.mxu0  ;;  %7999 = vmatmul.mubr.msk.bf16.gmra.mxu0 %vm945_vm1, %v8251_v52  ;;  %v3740_v3 = vpop.f32.mrf.mxu1  ;;  %v3739_v38 = vadd.f32 %v3738_v58, %v8769_v37  ;;  %v8253_v52 = vld [vmem:[%s10216_s0 + $0x1e0] sm:$0xff]  }
 0x1e1   :  { %1959 = vmatprep.mubr.bf16.mxu0 %v8343_v4  ;;  %v3229_v6 = vpack.c.bf16 %v2785_v1, %v2783_v62  ;;  %v3741_v7 = vadd.f32 %v3740_v3, %v8764_v31  ;;  %v2786_v39 = vmax.f32 %v1711_v2, 0.0 }
 0x1e2   :  { %v1713_v8 = vpop.f32.mrf.mxu0  ;;  %v3742_v9 = vpop.f32.mrf.mxu1  ;;  %v4968_v53 = vmax.f32 %v3739_v38, 0.0 }
 0x1e3   :  { %3984 = vmatprep.mubr.bf16.mxu1 %v3229_v6  ;;  %v4969_v17 = vmax.f32 %v3741_v7, 0.0  ;;  %v3743_v20 = vadd.f32 %v3742_v9, %v8769_v37  ;;  %v2787_v29 = vmax.f32 %v1713_v8, 0.0 }
 0x1e4   :  { %v1715_v13 = vpop.f32.mrf.mxu0  ;;  %v3746_v15 = vpop.f32.mrf.mxu1  ;;  %3985 = vmatmul.mubr.bf16.gmra.mxu1 %v3228_v10 }
 0x1e5   :  { %v2788_v23 = vmax.f32 %v1715_v13, 0.0  ;;  %v3747_v26 = vadd.f32 %v3746_v15, %v8764_v31  ;;  %v5559_v41 = vmax.f32 %v4967_v27, %v4969_v17  ;;  %v4970_v45 = vmax.f32 %v3743_v20, 0.0 }
 0x1e6   :  { %v1717_v18 = vpop.f32.mrf.mxu0  ;;  %v3748_v19 = vpop.f32.mrf.mxu1 }
 0x1e7   :  { %v2789_v30 = vmax.f32 %v1717_v18, 0.0  ;;  %v3230_v46 = vpack.c.bf16 %v2788_v23, %v2786_v39  ;;  %v4971_v47 = vmax.f32 %v3747_v26, 0.0  ;;  %v5560_v57 = vrot.slane %v5559_v41, 4  ;;  %v8254_v39 = vld [vmem:[%s10216_s0 + $0x1e8] sm:$0xff]  }
 0x1e8   :  { %v1721_v32 = vpop.f32.mrf.mxu0  ;;  %8000 = vmatmul.mubr.msk.bf16.gmra.mxu0 %vm945_vm1, %v8252_v16  ;;  %v3750_v35 = vpop.f32.mrf.mxu1  ;;  %v3749_v58 = vadd.f32 %v3748_v19, %v8769_v37  ;;  %v5566_v1 = vmax.f32 %v4968_v53, %v4970_v45 }
 0x1e9   :  { %v3751_v40 = vadd.f32 %v3750_v35, %v8764_v31  ;;  %1969 = vmatprep.mubr.bf16.mxu0 %v8343_v4  ;;  %v3231_v42 = vpack.c.bf16 %v2789_v30, %v2787_v29  ;;  %v2790_v10 = vmax.f32 %v1721_v32, 0.0  ;;  %v5561_v15 = vmax.f32 %v5559_v41, %v5560_v57 }
 0x1ea   :  { %v1723_v43 = vpop.f32.mrf.mxu0  ;;  %v3752_v44 = vpop.f32.mrf.mxu1  ;;  %v4972_v16 = vmax.f32 %v3749_v58, 0.0  ;;  %v5567_v23 = vrot.slane %v5566_v1, 4 }
 0x1eb   :  { %v4973_v48 = vmax.f32 %v3751_v40, 0.0  ;;  %v3753_v49 = vadd.f32 %v3752_v44, %v8769_v37  ;;  %3994 = vmatprep.mubr.bf16.mxu1 %v3231_v42  ;;  %v2791_v3 = vmax.f32 %v1723_v43, 0.0  ;;  %v5562_v43 = vrot.slane %v5561_v15, 2 }
 0x1ec   :  { %v1725_v50 = vpop.f32.mrf.mxu0  ;;  %v3756_v51 = vpop.f32.mrf.mxu1  ;;  %3995 = vmatmul.mubr.bf16.gmra.mxu1 %v3230_v46 }
 0x1ed   :  { %v5573_v55 = vmax.f32 %v4971_v47, %v4973_v48  ;;  %v2792_v2 = vmax.f32 %v1725_v50, 0.0  ;;  %v4974_v5 = vmax.f32 %v3753_v49, 0.0  ;;  %v3757_v6 = vadd.f32 %v3756_v51, %v8764_v31 }
 0x1ee   :  { %v1727_v61 = vpop.f32.mrf.mxu0  ;;  %v3758_v62 = vpop.f32.mrf.mxu1  ;;  %v5568_v47 = vmax.f32 %v5566_v1, %v5567_v23 }
 0x1ef   :  { %v2793_v7 = vmax.f32 %v1727_v61, 0.0  ;;  %v5574_v12 = vrot.slane %v5573_v55, 4  ;;  %v3759_v13 = vadd.f32 %v3758_v62, %v8769_v37  ;;  %v3232_v26 = vpack.c.bf16 %v2792_v2, %v2790_v10 }
 0x1f0   :  { %v1731_v8 = vpop.f32.mrf.mxu0  ;;  %8001 = vmatmul.mubr.msk.bf16.gmra.mxu0 %vm945_vm1, %v8253_v52  ;;  %v3760_v9 = vpop.f32.mrf.mxu1  ;;  %v5580_v29 = vmax.f32 %v4972_v16, %v4974_v5  ;;  %v4975_v30 = vmax.f32 %v3757_v6, 0.0  ;;  %v5569_v10 = vrot.slane %v5568_v47, 2 }
 0x1f1   :  { %1979 = vmatprep.mubr.bf16.mxu0 %v8343_v4  ;;  %v3233_v17 = vpack.c.bf16 %v2793_v7, %v2791_v3  ;;  %v3761_v18 = vadd.f32 %v3760_v9, %v8764_v31  ;;  %v5575_v40 = vmax.f32 %v5573_v55, %v5574_v12  ;;  %v4976_v41 = vmax.f32 %v3759_v13, 0.0 }
 0x1f2   :  { %v1733_v19 = vpop.f32.mrf.mxu0  ;;  %v3762_v20 = vpop.f32.mrf.mxu1  ;;  %v5581_v51 = vrot.slane %v5580_v29, 4  ;;  %v2794_v61 = vmax.f32 %v1731_v8, 0.0  ;;  %v5563_v3 = vmax.f32 %v5561_v15, %v5562_v43  ;;  %v8255_v15 = vld [vmem:[%s10216_s0 + $0x1f0] sm:$0xff]  }
 0x1f3   :  { %v3763_v27 = vadd.f32 %v3762_v20, %v8769_v37  ;;  %v4977_v35 = vmax.f32 %v3761_v18, 0.0  ;;  %4004 = vmatprep.mubr.bf16.mxu1 %v3233_v17  ;;  %v2795_v52 = vmax.f32 %v1733_v19, 0.0  ;;  %v5576_v55 = vrot.slane %v5575_v40, 2 }
 0x1f4   :  { %v1735_v32 = vpop.f32.mrf.mxu0  ;;  %v3766_v38 = vpop.f32.mrf.mxu1  ;;  %4005 = vmatmul.mubr.bf16.gmra.mxu1 %v3232_v26  ;;  %v5582_v17 = vmax.f32 %v5580_v29, %v5581_v51  ;;  %v8872_v29 = vmax.f32 %v5568_v47, %v5569_v10 }
 0x1f5   :  { %v4978_v42 = vmax.f32 %v3763_v27, 0.0  ;;  %v5587_v44 = vmax.f32 %v4975_v30, %v4977_v35  ;;  %v2796_v49 = vmax.f32 %v1735_v32, 0.0  ;;  %v3767_v50 = vadd.f32 %v3766_v38, %v8764_v31 }
 0x1f6   :  { %v1737_v45 = vpop.f32.mrf.mxu0  ;;  %v3768_v46 = vpop.f32.mrf.mxu1  ;;  %v5577_v20 = vmax.f32 %v5575_v40, %v5576_v55  ;;  %v5564_v27 = vrot.slane %v5563_v3, 1 }
 0x1f7   :  { %v5594_v48 = vmax.f32 %v4976_v41, %v4978_v42  ;;  %v2797_v53 = vmax.f32 %v1737_v45, 0.0  ;;  %v5588_v62 = vrot.slane %v5587_v44, 4  ;;  %v3769_v6 = vadd.f32 %v3768_v46, %v8769_v37 }
 0x1f8   :  { %v1741_v57 = vpop.f32.mrf.mxu0  ;;  %8002 = vmatmul.mubr.msk.bf16.gmra.mxu0 %vm945_vm1, %v8254_v39  ;;  %v3770_v58 = vpop.f32.mrf.mxu1  ;;  %v3234_v12 = vpack.c.bf16 %v2796_v49, %v2794_v61  ;;  %v4979_v13 = vmax.f32 %v3767_v50, 0.0  ;;  %v5583_v45 = vrot.slane %v5582_v17, 2 }
 0x1f9   :  { %v3771_v2 = vadd.f32 %v3770_v58, %v8764_v31  ;;  %1989 = vmatprep.mubr.bf16.mxu0 %v8343_v4  ;;  %v5595_v1 = vrot.slane %v5594_v48, 4  ;;  %v3235_v5 = vpack.c.bf16 %v2797_v53, %v2795_v52  ;;  %v5589_v23 = vmax.f32 %v5587_v44, %v5588_v62 }
 0x1fa   :  { %v1743_v7 = vpop.f32.mrf.mxu0  ;;  %v3772_v9 = vpop.f32.mrf.mxu1  ;;  %v4980_v35 = vmax.f32 %v3769_v6, 0.0  ;;  %v2798_v52 = vmax.f32 %v1741_v57, 0.0 }
 0x1fb   :  { %v4981_v16 = vmax.f32 %v3771_v2, 0.0  ;;  %v3773_v18 = vadd.f32 %v3772_v9, %v8769_v37  ;;  %4014 = vmatprep.mubr.bf16.mxu1 %v3235_v5  ;;  %v5596_v30 = vmax.f32 %v5594_v48, %v5595_v1  ;;  %v2799_v46 = vmax.f32 %v1743_v7, 0.0 }
 0x1fc   :  { %v1745_v8 = vpop.f32.mrf.mxu0  ;;  %v3776_v19 = vpop.f32.mrf.mxu1  ;;  %4015 = vmatmul.mubr.bf16.gmra.mxu1 %v3234_v12  ;;  %v5578_v48 = vrot.slane %v5577_v20, 1  ;;  %v5590_v51 = vrot.slane %v5589_v23, 2  ;;  %v5565_v7 = vmax.f32 %v5563_v3, %v5564_v27  ;;  %v5584_v9 = vmax.f32 %v5582_v17, %v5583_v45 }
 0x1fd   :  { %v5601_v26 = vmax.f32 %v4979_v13, %v4981_v16  ;;  %v4982_v32 = vmax.f32 %v3773_v18, 0.0  ;;  %v2800_v42 = vmax.f32 %v1745_v8, 0.0  ;;  %v3777_v43 = vadd.f32 %v3776_v19, %v8764_v31  ;;  %v8256_v16 = vld [vmem:[%s10216_s0 + $0x1f8] sm:$0xff]  }
 0x1fe   :  { %v1747_v38 = vpop.f32.mrf.mxu0  ;;  %v3778_v39 = vpop.f32.mrf.mxu1  ;;  %v5597_v47 = vrot.slane %v5596_v30, 2  ;;  %v5571_v18 = vrot.slane %v8872_v29, 1  ;;  %v5579_v8 = vmax.f32 %v5577_v20, %v5578_v48  ;;  %v5591_v19 = vmax.f32 %v5589_v23, %v5590_v51 }
 0x1ff   :  { %v5602_v41 = vrot.slane %v5601_v26, 4  ;;  %v5608_v49 = vmax.f32 %v4980_v35, %v4982_v32  ;;  %v2801_v50 = vmax.f32 %v1747_v38, 0.0  ;;  %v3779_v61 = vadd.f32 %v3778_v39, %v8769_v37 }
 0x200   :  { %v8875_v40 = vpop.f32.mrf.mxu0  ;;  %8003 = vmatmul.mubr.msk.bf16.gmra.mxu0 %vm945_vm1, %v8255_v15  ;;  %v3780_v44 = vpop.f32.mrf.mxu1  ;;  %v3236_v1 = vpack.c.bf16 %v2800_v42, %v2798_v52  ;;  %v4983_v5 = vmax.f32 %v3777_v43, 0.0  ;;  %v5585_v43 = vrot.slane %v5584_v9, 1  ;;  %v5592_v52 = vrot.slane %v5591_v19, 1 }
 0x201   :  { %v3781_v53 = vadd.f32 %v3780_v44, %v8764_v31  ;;  %1999 = vmatprep.mubr.bf16.mxu0 %v8343_v4  ;;  %v5603_v58 = vmax.f32 %v5601_v26, %v5602_v41  ;;  %v3237_v55 = vpack.c.bf16 %v2801_v50, %v2799_v46  ;;  %v5609_v10 = vrot.slane %v5608_v49, 4 }
 0x202   :  { %v1753_v62 = vpop.f32.mrf.mxu0  ;;  %v3782_v2 = vpop.f32.mrf.mxu1  ;;  %v5598_v26 = vmax.f32 %v5596_v30, %v5597_v47  ;;  %v4984_v3 = vmax.f32 %v3779_v61, 0.0  ;;  %v2802_v23 = vmax.f32 %v8875_v40, 0.0  ;;  %v7516_v40 = vsel %vm7495_vm2, %v5579_v8, %v5565_v7 }
 0x203   :  { %v4985_v6 = vmax.f32 %v3781_v53, 0.0  ;;  %v3783_v57 = vadd.f32 %v3782_v2, %v8769_v37  ;;  %4024 = vmatprep.mubr.bf16.mxu1 %v3237_v55  ;;  %v5604_v35 = vrot.slane %v5603_v58, 2  ;;  %v2803_v39 = vmax.f32 %v1753_v62, 0.0 }
 0x204   :  { %v1755_v12 = vpop.f32.mrf.mxu0  ;;  %v3786_v13 = vpop.f32.mrf.mxu1  ;;  %4025 = vmatmul.mubr.bf16.gmra.mxu1 %v3236_v1  ;;  %v5610_v45 = vmax.f32 %v5608_v49, %v5609_v10  ;;  %v5599_v53 = vrot.slane %v5598_v26, 1  ;;  %v5572_v62 = vmax.f32 %v8872_v29, %v5571_v18 }
 0x205   :  { %v5615_v15 = vmax.f32 %v4983_v5, %v4985_v6  ;;  %v4986_v17 = vmax.f32 %v3783_v57, 0.0  ;;  %v2804_v41 = vmax.f32 %v1755_v12, 0.0  ;;  %v3787_v50 = vadd.f32 %v3786_v13, %v8764_v31 }
 0x206   :  { %v1757_v27 = vpop.f32.mrf.mxu0  ;;  %v3788_v32 = vpop.f32.mrf.mxu1  ;;  %v5605_v2 = vmax.f32 %v5603_v58, %v5604_v35  ;;  %v5611_v6 = vrot.slane %v5610_v45, 2  ;;  %v5593_v58 = vmax.f32 %v5591_v19, %v5592_v52  ;;  %v5600_v18 = vmax.f32 %v5598_v26, %v5599_v53 }
 0x207   :  { %v5616_v38 = vrot.slane %v5615_v15, 4  ;;  %v2805_v42 = vmax.f32 %v1757_v27, 0.0  ;;  %v5622_v46 = vmax.f32 %v4984_v3, %v4986_v17  ;;  %v3789_v51 = vadd.f32 %v3788_v32, %v8769_v37 }
 0x208   :  { %v8887_v44 = vpop.f32.mrf.mxu0  ;;  %8004 = vmatmul.mubr.msk.bf16.gmra.mxu0 %vm945_vm1, %v8256_v16  ;;  %v3790_v20 = vpop.f32.mrf.mxu1  ;;  %v3238_v1 = vpack.c.bf16 %v2804_v41, %v2802_v23  ;;  %v4987_v10 = vmax.f32 %v3787_v50, 0.0  ;;  %v8257_v16 = vld [vmem:[%s10216_s0 + $0x200] sm:$0xff]   ;;  %v5606_v8 = vrot.slane %v5605_v2, 1 }
 0x209   :  { %v5617_v30 = vmax.f32 %v5615_v15, %v5616_v38  ;;  %v3239_v48 = vpack.c.bf16 %v2805_v42, %v2803_v39  ;;  %2009 = vmatprep.mubr.bf16.mxu0 %v8343_v4  ;;  %v5623_v49 = vrot.slane %v5622_v46, 4  ;;  %v3791_v47 = vadd.f32 %v3790_v20, %v8764_v31 }
 0x20a   :  { %v1763_v55 = vpop.f32.mrf.mxu0  ;;  %v3792_v61 = vpop.f32.mrf.mxu1  ;;  %v5586_v15 = vmax.f32 %v5584_v9, %v5585_v43  ;;  %v4988_v17 = vmax.f32 %v3789_v51, 0.0  ;;  %v8901_v42 = vmax.f32 %v5610_v45, %v5611_v6 }
 0x20b   :  { %v3793_v5 = vadd.f32 %v3792_v61, %v8769_v37  ;;  %4034 = vmatprep.mubr.bf16.mxu1 %v3239_v48  ;;  %v4989_v57 = vmax.f32 %v3791_v47, 0.0  ;;  %v5618_v3 = vrot.slane %v5617_v30, 2  ;;  %v5624_v35 = vmax.f32 %v5622_v46, %v5623_v49 }
 0x20c   :  { %v1765_v12 = vpop.f32.mrf.mxu0  ;;  %v3796_v13 = vpop.f32.mrf.mxu1  ;;  %4035 = vmatmul.mubr.bf16.gmra.mxu1 %v3238_v1  ;;  %v2807_v9 = vmax.f32 %v1763_v55, 0.0  ;;  %v2806_v46 = vmax.f32 %v8887_v44, 0.0  ;;  %v7517_v44 = vsel %vm7497_vm3, %v5593_v58, %v7516_v40 }
 0x20d   :  { %v4990_v29 = vmax.f32 %v3793_v5, 0.0  ;;  %v5629_v27 = vmax.f32 %v4987_v10, %v4989_v57  ;;  %v2808_v39 = vmax.f32 %v1765_v12, 0.0  ;;  %v3797_v41 = vadd.f32 %v3796_v13, %v8764_v31  ;;  %v8258_v13 = vld [vmem:[%s10216_s0 + $0x208] sm:$0xff]  }
 0x20e   :  { %v1767_v32 = vpop.f32.mrf.mxu0  ;;  %v3798_v7 = vpop.f32.mrf.mxu1  ;;  %v8906_v26 = vmax.f32 %v5617_v30, %v5618_v3  ;;  %v5625_v51 = vrot.slane %v5624_v35, 2  ;;  %v7523_v30 = vsel %vm7495_vm2, %v5586_v15, %v5572_v62  ;;  %v5607_v3 = vmax.f32 %v5605_v2, %v5606_v8 }
 0x20f   :  { %v5636_v38 = vmax.f32 %v4988_v17, %v4990_v29  ;;  %v5630_v50 = vrot.slane %v5629_v27, 4  ;;  %v2809_v43 = vmax.f32 %v1767_v32, 0.0  ;;  %v3799_v53 = vadd.f32 %v3798_v7, %v8769_v37 }
 0x210   :  { %v8903_v20 = vpop.f32.mrf.mxu0  ;;  %8005 = vmatmul.mubr.msk.bf16.gmra.mxu0 %vm945_vm1, %v8257_v16  ;;  %v3800_v19 = vpop.f32.mrf.mxu1  ;;  %v3240_v61 = vpack.c.bf16 %v2808_v39, %v2806_v46  ;;  %v4991_v1 = vmax.f32 %v3797_v41, 0.0  ;;  %v8919_v16 = vsel %vm7497_vm3, %v5600_v18, %v7523_v30  ;;  %v5613_v62 = vrot.slane %v8901_v42, 1 }
 0x211   :  { %v5637_v23 = vrot.slane %v5636_v38, 4  ;;  %v3801_v48 = vadd.f32 %v3800_v19, %v8764_v31  ;;  %2019 = vmatprep.mubr.bf16.mxu0 %v8343_v4  ;;  %v5631_v45 = vmax.f32 %v5629_v27, %v5630_v50  ;;  %v3241_v52 = vpack.c.bf16 %v2809_v43, %v2807_v9 }
 0x212   :  { %v1773_v49 = vpop.f32.mrf.mxu0  ;;  %v3802_v47 = vpop.f32.mrf.mxu1  ;;  %v5620_v40 = vrot.slane %v8906_v26, 1  ;;  %v4992_v15 = vmax.f32 %v3799_v53, 0.0  ;;  %v5626_v7 = vmax.f32 %v5624_v35, %v5625_v51  ;;  %v2810_v46 = vmax.f32 %v8903_v20, 0.0 }
 0x213   :  { %v5638_v55 = vmax.f32 %v5636_v38, %v5637_v23  ;;  %v4993_v5 = vmax.f32 %v3801_v48, 0.0  ;;  %v5632_v6 = vrot.slane %v5631_v45, 2  ;;  %v3803_v10 = vadd.f32 %v3802_v47, %v8769_v37  ;;  %4044 = vmatprep.mubr.bf16.mxu1 %v3241_v52 }
 0x214   :  { %v1775_v57 = vpop.f32.mrf.mxu0  ;;  %v3806_v12 = vpop.f32.mrf.mxu1  ;;  %4045 = vmatmul.mubr.bf16.gmra.mxu1 %v3240_v61  ;;  %v2811_v50 = vmax.f32 %v1773_v49, 0.0  ;;  %v7518_v48 = vsel %vm7499_vm4, %v5607_v3, %v7517_v44  ;;  %v8259_v44 = vld [vmem:[%s10216_s0 + $0x210] sm:$0xff]  }
 0x215   :  { %v5639_v17 = vrot.slane %v5638_v55, 2  ;;  %v5643_v29 = vmax.f32 %v4991_v1, %v4993_v5  ;;  %v4994_v58 = vmax.f32 %v3803_v10, 0.0  ;;  %v2812_v39 = vmax.f32 %v1775_v57, 0.0 }
 0x216   :  { %v1777_v27 = vpop.f32.mrf.mxu0  ;;  %v3808_v32 = vpop.f32.mrf.mxu1  ;;  %v3807_v41 = vadd.f32 %v3806_v12, %v8764_v31  ;;  %v5633_v18 = vmax.f32 %v5631_v45, %v5632_v6  ;;  %v5614_v12 = vmax.f32 %v8901_v42, %v5613_v62 }
 0x217   :  { %v5644_v38 = vrot.slane %v5643_v29, 4  ;;  %v5650_v2 = vmax.f32 %v4992_v15, %v4994_v58  ;;  %v2813_v8 = vmax.f32 %v1777_v27, 0.0  ;;  %v5640_v19 = vmax.f32 %v5638_v55, %v5639_v17 }
 0x218   :  { %v8924_v9 = vpop.f32.mrf.mxu0  ;;  %8006 = vmatmul.mubr.msk.bf16.gmra.mxu0 %vm945_vm1, %v8258_v13  ;;  %v3810_v43 = vpop.f32.mrf.mxu1  ;;  %v3809_v52 = vadd.f32 %v3808_v32, %v8769_v37  ;;  %v3242_v61 = vpack.c.bf16 %v2812_v39, %v2810_v46  ;;  %v4995_v1 = vmax.f32 %v3807_v41, 0.0  ;;  %v5627_v55 = vrot.slane %v5626_v7, 1 }
 0x219   :  { %v5645_v23 = vmax.f32 %v5643_v29, %v5644_v38  ;;  %v3811_v35 = vadd.f32 %v3810_v43, %v8764_v31  ;;  %2029 = vmatprep.mubr.bf16.mxu0 %v8343_v4  ;;  %v5651_v51 = vrot.slane %v5650_v2, 4  ;;  %v3243_v45 = vpack.c.bf16 %v2813_v8, %v2811_v50 }
 0x21a   :  { %v1783_v53 = vpop.f32.mrf.mxu0  ;;  %v3812_v49 = vpop.f32.mrf.mxu1  ;;  %v5634_v30 = vrot.slane %v5633_v18, 1  ;;  %v5621_v13 = vmax.f32 %v8906_v26, %v5620_v40  ;;  %v5641_v3 = vrot.slane %v5640_v19, 1  ;;  %v4996_v58 = vmax.f32 %v3809_v52, 0.0 }
 0x21b   :  { %v5646_v47 = vrot.slane %v5645_v23, 2  ;;  %v4997_v5 = vmax.f32 %v3811_v35, 0.0  ;;  %v5652_v20 = vmax.f32 %v5650_v2, %v5651_v51  ;;  %v3813_v6 = vadd.f32 %v3812_v49, %v8769_v37  ;;  %4054 = vmatprep.mubr.bf16.mxu1 %v3243_v45 }
 0x21c   :  { %v1785_v10 = vpop.f32.mrf.mxu0  ;;  %v3816_v57 = vpop.f32.mrf.mxu1  ;;  %4055 = vmatmul.mubr.bf16.gmra.mxu1 %v3242_v61  ;;  %v2815_v41 = vmax.f32 %v1783_v53, 0.0  ;;  %v5628_v8 = vmax.f32 %v5626_v7, %v5627_v55  ;;  %v5635_v43 = vmax.f32 %v5633_v18, %v5634_v30  ;;  %v2814_v42 = vmax.f32 %v8924_v9, 0.0 }
 0x21d   :  { %v5657_v17 = vmax.f32 %v4995_v1, %v4997_v5  ;;  %v5647_v29 = vmax.f32 %v5645_v23, %v5646_v47  ;;  %v5653_v15 = vrot.slane %v5652_v20, 2  ;;  %v4998_v27 = vmax.f32 %v3813_v6, 0.0 }
 0x21e   :  { %v1787_v32 = vpop.f32.mrf.mxu0  ;;  %v3818_v38 = vpop.f32.mrf.mxu1  ;;  %v2816_v50 = vmax.f32 %v1785_v10, 0.0  ;;  %v5642_v46 = vmax.f32 %v5640_v19, %v5641_v3  ;;  %v7525_v45 = vsel %vm7499_vm4, %v5614_v12, %v8919_v16  ;;  %v3817_v7 = vadd.f32 %v3816_v57, %v8764_v31 }
 0x21f   :  { %v5658_v39 = vrot.slane %v5657_v17, 4  ;;  %v2817_v2 = vmax.f32 %v1787_v32, 0.0  ;;  %v5664_v62 = vmax.f32 %v4996_v58, %v4998_v27  ;;  %v5654_v23 = vmax.f32 %v5652_v20, %v5653_v15  ;;  %v8260_v20 = vld [vmem:[%s10216_s0 + $0x218] sm:$0xff]  }
 0x220   :  { %v1791_v26 = vpop.f32.mrf.mxu0  ;;  %8007 = vmatmul.mubr.msk.bf16.gmra.mxu0 %vm945_vm1, %v8259_v44  ;;  %v3820_v40 = vpop.f32.mrf.mxu1  ;;  %v5648_v52 = vrot.slane %v5647_v29, 1  ;;  %v7519_v49 = vsel %vm7501_vm5, %v5621_v13, %v7518_v48  ;;  %v3244_v61 = vpack.c.bf16 %v2816_v50, %v2814_v42  ;;  %v7526_v1 = vsel %vm7501_vm5, %v5628_v8, %v7525_v45 }
 0x221   :  { %v5659_v35 = vmax.f32 %v5657_v17, %v5658_v39  ;;  %v3245_v51 = vpack.c.bf16 %v2817_v2, %v2815_v41  ;;  %2039 = vmatprep.mubr.bf16.mxu0 %v8343_v4  ;;  %v5665_v53 = vrot.slane %v5664_v62, 4  ;;  %v3821_v19 = vadd.f32 %v3820_v40, %v8764_v31 }
 0x222   :  { %v1793_v18 = vpop.f32.mrf.mxu0  ;;  %v3822_v9 = vpop.f32.mrf.mxu1  ;;  %v7520_v5 = vsel %vm7503_vm6, %v5635_v43, %v7519_v49  ;;  %v7527_v6 = vsel %vm7503_vm6, %v5642_v46, %v7526_v1  ;;  %v5655_v48 = vrot.slane %v5654_v23, 1  ;;  %v3819_v57 = vadd.f32 %v3818_v38, %v8769_v37 }
 0x223   :  { %v5660_v47 = vrot.slane %v5659_v35, 2  ;;  %4064 = vmatprep.mubr.bf16.mxu1 %v3245_v51  ;;  %v5666_v55 = vmax.f32 %v5664_v62, %v5665_v53  ;;  %v5649_v44 = vmax.f32 %v5647_v29, %v5648_v52  ;;  %v4999_v13 = vmax.f32 %v3817_v7, 0.0 }
 0x224   :  { %v1795_v16 = vpop.f32.mrf.mxu0  ;;  %v3826_v30 = vpop.f32.mrf.mxu1  ;;  %4065 = vmatmul.mubr.bf16.gmra.mxu1 %v3244_v61  ;;  %v3823_v3 = vadd.f32 %v3822_v9, %v8769_v37  ;;  %v2818_v27 = vmax.f32 %v1791_v26, 0.0  ;;  %v5001_v32 = vmax.f32 %v3821_v19, 0.0  ;;  %v2819_v50 = vmax.f32 %v1793_v18, 0.0 }
 0x225   :  { %v5661_v10 = vmax.f32 %v5659_v35, %v5660_v47  ;;  %v5667_v12 = vrot.slane %v5666_v55, 2  ;;  %v2820_v39 = vmax.f32 %v1795_v16, 0.0  ;;  %v3827_v2 = vadd.f32 %v3826_v30, %v8764_v31 }
 0x226   :  { %v1797_v17 = vpop.f32.mrf.mxu0  ;;  %v3828_v15 = vpop.f32.mrf.mxu1  ;;  %v5656_v29 = vmax.f32 %v5654_v23, %v5655_v48  ;;  %v5000_v62 = vmax.f32 %v3819_v57, 0.0  ;;  %v7521_v26 = vsel %vm7505_vm7, %v5649_v44, %v7520_v5  ;;  %v5002_v35 = vmax.f32 %v3823_v3, 0.0  ;;  %v8261_v5 = vld [vmem:[%s10216_s0 + $0x220] sm:$0xff]  }
 0x227   :  { %v5662_v58 = vrot.slane %v5661_v10, 1  ;;  %v5668_v41 = vmax.f32 %v5666_v55, %v5667_v12  ;;  %v2821_v8 = vmax.f32 %v1797_v17, 0.0  ;;  %v5671_v7 = vmax.f32 %v4999_v13, %v5001_v32 }
 0x228   :  { %v1801_v43 = vpop.f32.mrf.mxu0  ;;  %8008 = vmatmul.mubr.msk.bf16.gmra.mxu0 %vm945_vm1, %v8260_v20  ;;  %v3830_v38 = vpop.f32.mrf.mxu1  ;;  %v3246_v18 = vpack.c.bf16 %v2820_v39, %v2818_v27  ;;  %v5003_v49 = vmax.f32 %v3827_v2, 0.0  ;;  %v3829_v47 = vadd.f32 %v3828_v15, %v8769_v37  ;;  %v7528_v55 = vsel %vm7505_vm7, %v5656_v29, %v7527_v6 }
 0x229   :  { %v5663_v42 = vmax.f32 %v5661_v10, %v5662_v58  ;;  %v3831_v40 = vadd.f32 %v3830_v38, %v8764_v31  ;;  %2049 = vmatprep.mubr.bf16.mxu0 %v8343_v4  ;;  %v5669_v46 = vrot.slane %v5668_v41, 1  ;;  %v3247_v51 = vpack.c.bf16 %v2821_v8, %v2819_v50 }
 0x22a   :  { %v1803_v45 = vpop.f32.mrf.mxu0  ;;  %v3832_v52 = vpop.f32.mrf.mxu1  ;;  %v5678_v30 = vmax.f32 %v5000_v62, %v5002_v35  ;;  %v5672_v13 = vrot.slane %v5671_v7, 4  ;;  %v5004_v3 = vmax.f32 %v3829_v47, 0.0  ;;  %v2822_v27 = vmax.f32 %v1801_v43, 0.0 }
 0x22b   :  { %v7522_v53 = vsel %vm7507_vm8, %v5663_v42, %v7521_v26  ;;  %v5005_v9 = vmax.f32 %v3831_v40, 0.0  ;;  %v5670_v23 = vmax.f32 %v5668_v41, %v5669_v46  ;;  %v3833_v61 = vadd.f32 %v3832_v52, %v8769_v37  ;;  %4074 = vmatprep.mubr.bf16.mxu1 %v3247_v51  ;;  %v8262_v51 = vld [vmem:[%s10216_s0 + $0x228] sm:$0xff]  }
 0x22c   :  { %7760 = vst [vmem:[#allocation2 + $0x10] sm:$0xff] %v7522_v53  ;;  %v1805_v19 = vpop.f32.mrf.mxu0  ;;  %v3836_v1 = vpop.f32.mrf.mxu1  ;;  %4075 = vmatmul.mubr.bf16.gmra.mxu1 %v3246_v18  ;;  %v2823_v17 = vmax.f32 %v1803_v45, 0.0  ;;  %v5679_v39 = vrot.slane %v5678_v30, 4  ;;  %v5673_v26 = vmax.f32 %v5671_v7, %v5672_v13 }
 0x22d   :  { %v7529_v16 = vsel %vm7507_vm8, %v5670_v23, %v7528_v55  ;;  %v5685_v20 = vmax.f32 %v5003_v49, %v5005_v9  ;;  %v5006_v48 = vmax.f32 %v3833_v61, 0.0  ;;  %v2824_v44 = vmax.f32 %v1805_v19, 0.0 }
 0x22e   :  { %v1807_v10 = vpop.f32.mrf.mxu0  ;;  %v3838_v57 = vpop.f32.mrf.mxu1  ;;  %7761 = vst [vmem:[#allocation2 + $0x18] sm:$0xff] %v7529_v16  ;;  %v3837_v12 = vadd.f32 %v3836_v1, %v8764_v31  ;;  %v5680_v49 = vmax.f32 %v5678_v30, %v5679_v39  ;;  %v5674_v19 = vrot.slane %v5673_v26, 2 }
 0x22f   :  { %v2825_v15 = vmax.f32 %v1807_v10, 0.0  ;;  %v5686_v41 = vrot.slane %v5685_v20, 4  ;;  %v5692_v50 = vmax.f32 %v5004_v3, %v5006_v48  ;;  %v3248_v29 = vpack.c.bf16 %v2824_v44, %v2822_v27 }
 0x230   :  { %v1811_v58 = vpop.f32.mrf.mxu0  ;;  %8009 = vmatmul.mubr.msk.bf16.gmra.mxu0 %vm945_vm1, %v8261_v5  ;;  %v3840_v6 = vpop.f32.mrf.mxu1  ;;  %v5007_v42 = vmax.f32 %v3837_v12, 0.0  ;;  %v3839_v62 = vadd.f32 %v3838_v57, %v8769_v37  ;;  %v5675_v39 = vmax.f32 %v5673_v26, %v5674_v19 }
 0x231   :  { %v3841_v32 = vadd.f32 %v3840_v6, %v8764_v31  ;;  %2059 = vmatprep.mubr.bf16.mxu0 %v8343_v4  ;;  %v3249_v2 = vpack.c.bf16 %v2825_v15, %v2823_v17  ;;  %v5687_v52 = vmax.f32 %v5685_v20, %v5686_v41  ;;  %v5693_v53 = vrot.slane %v5692_v50, 4 }
 0x232   :  { %v1813_v8 = vpop.f32.mrf.mxu0  ;;  %v3842_v38 = vpop.f32.mrf.mxu1  ;;  %v5008_v47 = vmax.f32 %v3839_v62, 0.0  ;;  %v2826_v48 = vmax.f32 %v1811_v58, 0.0  ;;  %v5681_v15 = vrot.slane %v5680_v49, 2 }
 0x233   :  { %v5009_v40 = vmax.f32 %v3841_v32, 0.0  ;;  %v3843_v46 = vadd.f32 %v3842_v38, %v8769_v37  ;;  %4084 = vmatprep.mubr.bf16.mxu1 %v3249_v2  ;;  %v2827_v1 = vmax.f32 %v1813_v8, 0.0  ;;  %v5688_v44 = vrot.slane %v5687_v52, 2  ;;  %v8263_v8 = vld [vmem:[%s10216_s0 + $0x230] sm:$0xff]  }
 0x234   :  { %v1815_v43 = vpop.f32.mrf.mxu0  ;;  %v3846_v35 = vpop.f32.mrf.mxu1  ;;  %4085 = vmatmul.mubr.bf16.gmra.mxu1 %v3248_v29  ;;  %v5694_v30 = vmax.f32 %v5692_v50, %v5693_v53  ;;  %v8985_v26 = vmax.f32 %v5680_v49, %v5681_v15 }
 0x235   :  { %v5699_v45 = vmax.f32 %v5007_v42, %v5009_v40  ;;  %v5010_v18 = vmax.f32 %v3843_v46, 0.0  ;;  %v2828_v61 = vmax.f32 %v1815_v43, 0.0  ;;  %v3847_v7 = vadd.f32 %v3846_v35, %v8764_v31 }
 0x236   :  { %v1817_v9 = vpop.f32.mrf.mxu0  ;;  %v3848_v23 = vpop.f32.mrf.mxu1  ;;  %v5689_v42 = vmax.f32 %v5687_v52, %v5688_v44  ;;  %v5695_v62 = vrot.slane %v5694_v30, 2  ;;  %v5683_v15 = vrot.slane %v8985_v26, 1 }
 0x237   :  { %v2829_v5 = vmax.f32 %v1817_v9, 0.0  ;;  %v5700_v10 = vrot.slane %v5699_v45, 4  ;;  %v5706_v57 = vmax.f32 %v5008_v47, %v5010_v18  ;;  %v3849_v13 = vadd.f32 %v3848_v23, %v8769_v37 }
 0x238   :  { %v1821_v55 = vpop.f32.mrf.mxu0  ;;  %8010 = vmatmul.mubr.msk.bf16.gmra.mxu0 %vm945_vm1, %v8262_v51  ;;  %v3850_v16 = vpop.f32.mrf.mxu1  ;;  %v3250_v6 = vpack.c.bf16 %v2828_v61, %v2826_v48  ;;  %v5011_v27 = vmax.f32 %v3847_v7, 0.0  ;;  %v5676_v9 = vrot.slane %v5675_v39, 1  ;;  %v5690_v49 = vrot.slane %v5689_v42, 1 }
 0x239   :  { %v3851_v20 = vadd.f32 %v3850_v16, %v8764_v31  ;;  %2069 = vmatprep.mubr.bf16.mxu0 %v8343_v4  ;;  %v3251_v12 = vpack.c.bf16 %v2829_v5, %v2827_v1  ;;  %v5701_v50 = vmax.f32 %v5699_v45, %v5700_v10  ;;  %v5707_v38 = vrot.slane %v5706_v57, 4 }
 0x23a   :  { %v1823_v3 = vpop.f32.mrf.mxu0  ;;  %v3852_v17 = vpop.f32.mrf.mxu1  ;;  %v5012_v40 = vmax.f32 %v3849_v13, 0.0  ;;  %v2830_v1 = vmax.f32 %v1821_v55, 0.0  ;;  %v5696_v16 = vmax.f32 %v5694_v30, %v5695_v62  ;;  %v8264_v30 = vld [vmem:[%s10216_s0 + $0x238] sm:$0xff]  }
 0x23b   :  { %v5013_v32 = vmax.f32 %v3851_v20, 0.0  ;;  %v3853_v58 = vadd.f32 %v3852_v17, %v8769_v37  ;;  %4094 = vmatprep.mubr.bf16.mxu1 %v3251_v12  ;;  %v2831_v23 = vmax.f32 %v1823_v3, 0.0  ;;  %v5702_v52 = vrot.slane %v5701_v50, 2 }
 0x23c   :  { %v1825_v41 = vpop.f32.mrf.mxu0  ;;  %v3856_v2 = vpop.f32.mrf.mxu1  ;;  %4095 = vmatmul.mubr.bf16.gmra.mxu1 %v3250_v6  ;;  %v5708_v19 = vmax.f32 %v5706_v57, %v5707_v38  ;;  %v5697_v38 = vrot.slane %v5696_v16, 1 }
 0x23d   :  { %v5713_v29 = vmax.f32 %v5011_v27, %v5013_v32  ;;  %v5014_v46 = vmax.f32 %v3853_v58, 0.0  ;;  %v2832_v53 = vmax.f32 %v1825_v41, 0.0  ;;  %v3857_v18 = vadd.f32 %v3856_v2, %v8764_v31 }
 0x23e   :  { %v1827_v43 = vpop.f32.mrf.mxu0  ;;  %v3858_v35 = vpop.f32.mrf.mxu1  ;;  %v5677_v32 = vmax.f32 %v5675_v39, %v5676_v9  ;;  %v5703_v58 = vmax.f32 %v5701_v50, %v5702_v52  ;;  %v5709_v41 = vrot.slane %v5708_v19, 2 }
 0x23f   :  { %v5714_v51 = vrot.slane %v5713_v29, 4  ;;  %v5720_v47 = vmax.f32 %v5012_v40, %v5014_v46  ;;  %v2833_v61 = vmax.f32 %v1827_v43, 0.0  ;;  %v3859_v10 = vadd.f32 %v3858_v35, %v8769_v37 }
 0x240   :  { %v1831_v45 = vpop.f32.mrf.mxu0  ;;  %8011 = vmatmul.mubr.msk.bf16.gmra.mxu0 %vm945_vm1, %v8263_v8  ;;  %v3860_v7 = vpop.f32.mrf.mxu1  ;;  %v3252_v13 = vpack.c.bf16 %v2832_v53, %v2830_v1  ;;  %v5015_v3 = vmax.f32 %v3857_v18, 0.0  ;;  %v5691_v8 = vmax.f32 %v5689_v42, %v5690_v49  ;;  %v5704_v9 = vrot.slane %v5703_v58, 1 }
 0x241   :  { %v3861_v5 = vadd.f32 %v3860_v7, %v8764_v31  ;;  %2079 = vmatprep.mubr.bf16.mxu0 %v8343_v4  ;;  %v3253_v48 = vpack.c.bf16 %v2833_v61, %v2831_v23  ;;  %v5715_v12 = vmax.f32 %v5713_v29, %v5714_v51  ;;  %v5721_v6 = vrot.slane %v5720_v47, 4 }
 0x242   :  { %v1833_v20 = vpop.f32.mrf.mxu0  ;;  %v3862_v44 = vpop.f32.mrf.mxu1  ;;  %v5016_v29 = vmax.f32 %v3859_v10, 0.0  ;;  %v5710_v42 = vmax.f32 %v5708_v19, %v5709_v41  ;;  %v2834_v52 = vmax.f32 %v1831_v45, 0.0  ;;  %v7530_v19 = vsel %vm7495_vm2, %v5691_v8, %v5677_v32 }
 0x243   :  { %v5017_v17 = vmax.f32 %v3861_v5, 0.0  ;;  %v3863_v55 = vadd.f32 %v3862_v44, %v8769_v37  ;;  %4104 = vmatprep.mubr.bf16.mxu1 %v3253_v48  ;;  %v5716_v43 = vrot.slane %v5715_v12, 2  ;;  %v5722_v18 = vmax.f32 %v5720_v47, %v5721_v6 }
 0x244   :  { %v1835_v57 = vpop.f32.mrf.mxu0  ;;  %v3866_v27 = vpop.f32.mrf.mxu1  ;;  %4105 = vmatmul.mubr.bf16.gmra.mxu1 %v3252_v13  ;;  %v2835_v23 = vmax.f32 %v1833_v20, 0.0  ;;  %v5684_v6 = vmax.f32 %v8985_v26, %v5683_v15  ;;  %v5698_v41 = vmax.f32 %v5696_v16, %v5697_v38 }
 0x245   :  { %v5727_v2 = vmax.f32 %v5015_v3, %v5017_v17  ;;  %v5018_v62 = vmax.f32 %v3863_v55, 0.0  ;;  %v2836_v51 = vmax.f32 %v1835_v57, 0.0  ;;  %v3867_v53 = vadd.f32 %v3866_v27, %v8764_v31 }
 0x246   :  { %v1837_v40 = vpop.f32.mrf.mxu0  ;;  %v3868_v46 = vpop.f32.mrf.mxu1  ;;  %v5717_v44 = vmax.f32 %v5715_v12, %v5716_v43  ;;  %v5723_v45 = vrot.slane %v5722_v18, 2 }
 0x247   :  { %v5728_v35 = vrot.slane %v5727_v2, 4  ;;  %v5734_v61 = vmax.f32 %v5016_v29, %v5018_v62  ;;  %v2837_v7 = vmax.f32 %v1837_v40, 0.0  ;;  %v3869_v10 = vadd.f32 %v3868_v46, %v8769_v37 }
 0x248   :  { %v1841_v39 = vpop.f32.mrf.mxu0  ;;  %8012 = vmatmul.mubr.msk.bf16.gmra.mxu0 %vm945_vm1, %v8264_v30  ;;  %v3870_v50 = vpop.f32.mrf.mxu1  ;;  %v3254_v13 = vpack.c.bf16 %v2836_v51, %v2834_v52  ;;  %v5019_v3 = vmax.f32 %v3867_v53, 0.0  ;;  %v8265_v30 = vld [vmem:[%s10216_s0 + $0x240] sm:$0xff]   ;;  %v5711_v62 = vrot.slane %v5710_v42, 1  ;;  %v5718_v46 = vrot.slane %v5717_v44, 1 }
 0x249   :  { %v3871_v1 = vadd.f32 %v3870_v50, %v8764_v31  ;;  %2089 = vmatprep.mubr.bf16.mxu0 %v8343_v4  ;;  %v5729_v5 = vmax.f32 %v5727_v2, %v5728_v35  ;;  %v5735_v49 = vrot.slane %v5734_v61, 4  ;;  %v3255_v48 = vpack.c.bf16 %v2837_v7, %v2835_v23 }
 0x24a   :  { %v1843_v47 = vpop.f32.mrf.mxu0  ;;  %v3872_v20 = vpop.f32.mrf.mxu1  ;;  %v5705_v2 = vmax.f32 %v5703_v58, %v5704_v9  ;;  %v5020_v26 = vmax.f32 %v3869_v10, 0.0  ;;  %v9009_v53 = vmax.f32 %v5722_v18, %v5723_v45  ;;  %v2838_v50 = vmax.f32 %v1841_v39, 0.0 }
 0x24b   :  { %v5021_v17 = vmax.f32 %v3871_v1, 0.0  ;;  %v3873_v55 = vadd.f32 %v3872_v20, %v8769_v37  ;;  %4114 = vmatprep.mubr.bf16.mxu1 %v3255_v48  ;;  %v5736_v12 = vmax.f32 %v5734_v61, %v5735_v49  ;;  %v5730_v40 = vrot.slane %v5729_v5, 2 }
 0x24c   :  { %v1845_v57 = vpop.f32.mrf.mxu0  ;;  %v3876_v27 = vpop.f32.mrf.mxu1  ;;  %4115 = vmatmul.mubr.bf16.gmra.mxu1 %v3254_v13  ;;  %v2839_v23 = vmax.f32 %v1843_v47, 0.0  ;;  %v7537_v45 = vsel %vm7495_vm2, %v5698_v41, %v5684_v6  ;;  %v7531_v39 = vsel %vm7497_vm3, %v5705_v2, %v7530_v19 }
 0x24d   :  { %v5741_v29 = vmax.f32 %v5019_v3, %v5021_v17  ;;  %v5022_v15 = vmax.f32 %v3873_v55, 0.0  ;;  %v2840_v35 = vmax.f32 %v1845_v57, 0.0  ;;  %v3877_v51 = vadd.f32 %v3876_v27, %v8764_v31 }
 0x24e   :  { %v1847_v32 = vpop.f32.mrf.mxu0  ;;  %v3878_v8 = vpop.f32.mrf.mxu1  ;;  %v5737_v61 = vrot.slane %v5736_v12, 2  ;;  %v9014_v1 = vmax.f32 %v5729_v5, %v5730_v40  ;;  %v5712_v55 = vmax.f32 %v5710_v42, %v5711_v62 }
 0x24f   :  { %v5742_v43 = vrot.slane %v5741_v29, 4  ;;  %v5748_v7 = vmax.f32 %v5020_v26, %v5022_v15  ;;  %v2841_v16 = vmax.f32 %v1847_v32, 0.0  ;;  %v3879_v18 = vadd.f32 %v3878_v8, %v8769_v37 }
 0x250   :  { %v1851_v58 = vpop.f32.mrf.mxu0  ;;  %8013 = vmatmul.mubr.msk.bf16.gmra.mxu0 %vm945_vm1, %v8265_v30  ;;  %v3880_v38 = vpop.f32.mrf.mxu1  ;;  %v3256_v13 = vpack.c.bf16 %v2840_v35, %v2838_v50  ;;  %v5023_v3 = vmax.f32 %v3877_v51, 0.0  ;;  %v8266_v30 = vld [vmem:[%s10216_s0 + $0x248] sm:$0xff]   ;;  %v5738_v40 = vmax.f32 %v5736_v12, %v5737_v61  ;;  %v5725_v32 = vrot.slane %v9009_v53, 1 }
 0x251   :  { %v5743_v9 = vmax.f32 %v5741_v29, %v5742_v43  ;;  %v3881_v52 = vadd.f32 %v3880_v38, %v8764_v31  ;;  %2099 = vmatprep.mubr.bf16.mxu0 %v8343_v4  ;;  %v5749_v49 = vrot.slane %v5748_v7, 4  ;;  %v3257_v48 = vpack.c.bf16 %v2841_v16, %v2839_v23 }
 0x252   :  { %v1853_v10 = vpop.f32.mrf.mxu0  ;;  %v3882_v47 = vpop.f32.mrf.mxu1  ;;  %v5719_v29 = vmax.f32 %v5717_v44, %v5718_v46  ;;  %v5024_v41 = vmax.f32 %v3879_v18, 0.0  ;;  %v5732_v62 = vrot.slane %v9014_v1, 1  ;;  %v2842_v51 = vmax.f32 %v1851_v58, 0.0 }
 0x253   :  { %v5744_v20 = vrot.slane %v5743_v9, 2  ;;  %v5025_v17 = vmax.f32 %v3881_v52, 0.0  ;;  %v3883_v57 = vadd.f32 %v3882_v47, %v8769_v37  ;;  %4124 = vmatprep.mubr.bf16.mxu1 %v3257_v48  ;;  %v5750_v26 = vmax.f32 %v5748_v7, %v5749_v49 }
 0x254   :  { %v1855_v5 = vpop.f32.mrf.mxu0  ;;  %v3886_v27 = vpop.f32.mrf.mxu1  ;;  %4125 = vmatmul.mubr.bf16.gmra.mxu1 %v3256_v13  ;;  %v2843_v23 = vmax.f32 %v1853_v10, 0.0  ;;  %v5739_v16 = vrot.slane %v5738_v40, 1 }
 0x255   :  { %v5755_v15 = vmax.f32 %v5023_v3, %v5025_v17  ;;  %v5745_v6 = vmax.f32 %v5743_v9, %v5744_v20  ;;  %v5026_v19 = vmax.f32 %v3883_v57, 0.0  ;;  %v2844_v43 = vmax.f32 %v1855_v5, 0.0 }
 0x256   :  { %v1857_v42 = vpop.f32.mrf.mxu0  ;;  %v3888_v2 = vpop.f32.mrf.mxu1  ;;  %v3887_v35 = vadd.f32 %v3886_v27, %v8764_v31  ;;  %v5751_v38 = vrot.slane %v5750_v26, 2  ;;  %v7538_v3 = vsel %vm7497_vm3, %v5712_v55, %v7537_v45  ;;  %v7532_v17 = vsel %vm7499_vm4, %v5719_v29, %v7531_v39 }
 0x257   :  { %v5756_v8 = vrot.slane %v5755_v15, 4  ;;  %v5762_v44 = vmax.f32 %v5024_v41, %v5026_v19  ;;  %v2845_v12 = vmax.f32 %v1857_v42, 0.0  ;;  %v5746_v9 = vrot.slane %v5745_v6, 1 }
 0x258   :  { %v9026_v46 = vpop.f32.mrf.mxu0  ;;  %8014 = vmatmul.mubr.msk.bf16.gmra.mxu0 %vm945_vm1, %v8266_v30  ;;  %v3890_v7 = vpop.f32.mrf.mxu1  ;;  %v3889_v58 = vadd.f32 %v3888_v2, %v8769_v37  ;;  %v3258_v47 = vpack.c.bf16 %v2844_v43, %v2842_v51  ;;  %v5027_v20 = vmax.f32 %v3887_v35, 0.0  ;;  %v5726_v41 = vmax.f32 %v9009_v53, %v5725_v32 }
 0x259   :  { %v5757_v61 = vmax.f32 %v5755_v15, %v5756_v8  ;;  %v3891_v50 = vadd.f32 %v3890_v7, %v8764_v31  ;;  %2109 = vmatprep.mubr.bf16.mxu0 %v8343_v4  ;;  %v5763_v52 = vrot.slane %v5762_v44, 4  ;;  %v3259_v49 = vpack.c.bf16 %v2845_v12, %v2843_v23  ;;  %v8267_v15 = vld [vmem:[%s10216_s0 + $0x250] sm:$0xff]  }
 0x25a   :  { %v1863_v48 = vpop.f32.mrf.mxu0  ;;  %v3892_v18 = vpop.f32.mrf.mxu1  ;;  %v5733_v19 = vmax.f32 %v9014_v1, %v5732_v62  ;;  %v5752_v42 = vmax.f32 %v5750_v26, %v5751_v38  ;;  %v5028_v39 = vmax.f32 %v3889_v58, 0.0  ;;  %v5740_v35 = vmax.f32 %v5738_v40, %v5739_v16 }
 0x25b   :  { %v5758_v10 = vrot.slane %v5757_v61, 2  ;;  %v5029_v13 = vmax.f32 %v3891_v50, 0.0  ;;  %v5764_v57 = vmax.f32 %v5762_v44, %v5763_v52  ;;  %v3893_v5 = vadd.f32 %v3892_v18, %v8769_v37  ;;  %4134 = vmatprep.mubr.bf16.mxu1 %v3259_v49 }
 0x25c   :  { %v1865_v27 = vpop.f32.mrf.mxu0  ;;  %v3896_v30 = vpop.f32.mrf.mxu1  ;;  %4135 = vmatmul.mubr.bf16.gmra.mxu1 %v3258_v47  ;;  %v5747_v51 = vmax.f32 %v5745_v6, %v5746_v9  ;;  %v2847_v7 = vmax.f32 %v1863_v48, 0.0  ;;  %v5753_v26 = vrot.slane %v5752_v42, 1  ;;  %v2846_v32 = vmax.f32 %v9026_v46, 0.0 }
 0x25d   :  { %v5769_v2 = vmax.f32 %v5027_v20, %v5029_v13  ;;  %v5759_v45 = vmax.f32 %v5757_v61, %v5758_v10  ;;  %v5765_v55 = vrot.slane %v5764_v57, 2  ;;  %v5030_v29 = vmax.f32 %v3893_v5, 0.0 }
 0x25e   :  { %v1867_v8 = vpop.f32.mrf.mxu0  ;;  %v3898_v43 = vpop.f32.mrf.mxu1  ;;  %v2848_v44 = vmax.f32 %v1865_v27, 0.0  ;;  %v3897_v16 = vadd.f32 %v3896_v30, %v8764_v31  ;;  %v7539_v58 = vsel %vm7499_vm4, %v5726_v41, %v7538_v3  ;;  %v7533_v48 = vsel %vm7501_vm5, %v5733_v19, %v7532_v17  ;;  %v8268_v27 = vld [vmem:[%s10216_s0 + $0x258] sm:$0xff]  }
 0x25f   :  { %v5770_v23 = vrot.slane %v5769_v2, 4  ;;  %v5766_v12 = vmax.f32 %v5764_v57, %v5765_v55  ;;  %v5776_v50 = vmax.f32 %v5028_v39, %v5030_v29  ;;  %v2849_v52 = vmax.f32 %v1867_v8, 0.0 }
 0x260   :  { %v1871_v53 = vpop.f32.mrf.mxu0  ;;  %8015 = vmatmul.mubr.msk.bf16.gmra.mxu0 %vm945_vm1, %v8267_v15  ;;  %v3900_v1 = vpop.f32.mrf.mxu1  ;;  %v5760_v40 = vrot.slane %v5759_v45, 1  ;;  %v3260_v10 = vpack.c.bf16 %v2848_v44, %v2846_v32  ;;  %v7540_v46 = vsel %vm7501_vm5, %v5740_v35, %v7539_v58  ;;  %v7534_v47 = vsel %vm7503_vm6, %v5747_v51, %v7533_v48 }
 0x261   :  { %v5771_v62 = vmax.f32 %v5769_v2, %v5770_v23  ;;  %v3901_v38 = vadd.f32 %v3900_v1, %v8764_v31  ;;  %2119 = vmatprep.mubr.bf16.mxu0 %v8343_v4  ;;  %v5777_v6 = vrot.slane %v5776_v50, 4  ;;  %v3261_v61 = vpack.c.bf16 %v2849_v52, %v2847_v7 }
 0x262   :  { %v1873_v9 = vpop.f32.mrf.mxu0  ;;  %v3902_v49 = vpop.f32.mrf.mxu1  ;;  %v5767_v20 = vrot.slane %v5766_v12, 1  ;;  %v5754_v30 = vmax.f32 %v5752_v42, %v5753_v26  ;;  %v5761_v41 = vmax.f32 %v5759_v45, %v5760_v40  ;;  %v5031_v2 = vmax.f32 %v3897_v16, 0.0 }
 0x263   :  { %v5772_v18 = vrot.slane %v5771_v62, 2  ;;  %v5778_v13 = vmax.f32 %v5776_v50, %v5777_v6  ;;  %4144 = vmatprep.mubr.bf16.mxu1 %v3261_v61  ;;  %v5033_v3 = vmax.f32 %v3901_v38, 0.0  ;;  %v3903_v17 = vadd.f32 %v3902_v49, %v8769_v37 }
 0x264   :  { %v1875_v57 = vpop.f32.mrf.mxu0  ;;  %v3906_v5 = vpop.f32.mrf.mxu1  ;;  %4145 = vmatmul.mubr.bf16.gmra.mxu1 %v3260_v10  ;;  %v3899_v55 = vadd.f32 %v3898_v43, %v8769_v37  ;;  %v2850_v35 = vmax.f32 %v1871_v53, 0.0  ;;  %v2851_v51 = vmax.f32 %v1873_v9, 0.0  ;;  %v5768_v44 = vmax.f32 %v5766_v12, %v5767_v20 }
 0x265   :  { %v5773_v15 = vmax.f32 %v5771_v62, %v5772_v18  ;;  %v5779_v19 = vrot.slane %v5778_v13, 2  ;;  %v2852_v23 = vmax.f32 %v1875_v57, 0.0  ;;  %v3907_v42 = vadd.f32 %v3906_v5, %v8764_v31 }
 0x266   :  { %v1877_v39 = vpop.f32.mrf.mxu0  ;;  %v3908_v29 = vpop.f32.mrf.mxu1  ;;  %v5783_v26 = vmax.f32 %v5031_v2, %v5033_v3  ;;  %v5034_v32 = vmax.f32 %v3903_v17, 0.0  ;;  %v7535_v53 = vsel %vm7505_vm7, %v5761_v41, %v7534_v47  ;;  %v5032_v61 = vmax.f32 %v3899_v55, 0.0 }
 0x267   :  { %v5774_v8 = vrot.slane %v5773_v15, 1  ;;  %v5780_v7 = vmax.f32 %v5778_v13, %v5779_v19  ;;  %v2853_v50 = vmax.f32 %v1877_v39, 0.0  ;;  %v3909_v12 = vadd.f32 %v3908_v29, %v8769_v37  ;;  %v8269_v13 = vld [vmem:[%s10216_s0 + $0x260] sm:$0xff]  }
 0x268   :  { %v1881_v52 = vpop.f32.mrf.mxu0  ;;  %8016 = vmatmul.mubr.msk.bf16.gmra.mxu0 %vm945_vm1, %v8268_v27  ;;  %v3910_v1 = vpop.f32.mrf.mxu1  ;;  %v3262_v9 = vpack.c.bf16 %v2852_v23, %v2850_v35  ;;  %v7541_v58 = vsel %vm7503_vm6, %v5754_v30, %v7540_v46  ;;  %v5035_v18 = vmax.f32 %v3907_v42, 0.0  ;;  %v5784_v5 = vrot.slane %v5783_v26, 4 }
 0x269   :  { %v5775_v45 = vmax.f32 %v5773_v15, %v5774_v8  ;;  %v3911_v43 = vadd.f32 %v3910_v1, %v8764_v31  ;;  %2129 = vmatprep.mubr.bf16.mxu0 %v8343_v4  ;;  %v5781_v62 = vrot.slane %v5780_v7, 1  ;;  %v3263_v38 = vpack.c.bf16 %v2853_v50, %v2851_v51 }
 0x26a   :  { %v1883_v40 = vpop.f32.mrf.mxu0  ;;  %v3912_v6 = vpop.f32.mrf.mxu1  ;;  %v7542_v57 = vsel %vm7505_vm7, %v5768_v44, %v7541_v58  ;;  %v5790_v27 = vmax.f32 %v5032_v61, %v5034_v32  ;;  %v5036_v46 = vmax.f32 %v3909_v12, 0.0  ;;  %v5785_v51 = vmax.f32 %v5783_v26, %v5784_v5 }
 0x26b   :  { %v7536_v16 = vsel %vm7507_vm8, %v5775_v45, %v7535_v53  ;;  %v5037_v49 = vmax.f32 %v3911_v43, 0.0  ;;  %v5782_v48 = vmax.f32 %v5780_v7, %v5781_v62  ;;  %v3913_v10 = vadd.f32 %v3912_v6, %v8769_v37  ;;  %4154 = vmatprep.mubr.bf16.mxu1 %v3263_v38 }
 0x26c   :  { %7762 = vst [vmem:[#allocation2 + $0x20] sm:$0xff] %v7536_v16  ;;  %v1885_v47 = vpop.f32.mrf.mxu0  ;;  %v3916_v20 = vpop.f32.mrf.mxu1  ;;  %4155 = vmatmul.mubr.bf16.gmra.mxu1 %v3262_v9  ;;  %v2855_v55 = vmax.f32 %v1883_v40, 0.0  ;;  %v5791_v23 = vrot.slane %v5790_v27, 4  ;;  %v2854_v44 = vmax.f32 %v1881_v52, 0.0  ;;  %v8270_v52 = vld [vmem:[%s10216_s0 + $0x268] sm:$0xff]   ;;  %v5786_v6 = vrot.slane %v5785_v51, 2 }
 0x26d   :  { %v7543_v15 = vsel %vm7507_vm8, %v5782_v48, %v7542_v57  ;;  %v5797_v30 = vmax.f32 %v5035_v18, %v5037_v49  ;;  %v5038_v3 = vmax.f32 %v3913_v10, 0.0  ;;  %v2856_v19 = vmax.f32 %v1885_v47, 0.0 }
 0x26e   :  { %v1887_v17 = vpop.f32.mrf.mxu0  ;;  %v3918_v41 = vpop.f32.mrf.mxu1  ;;  %7763 = vst [vmem:[#allocation2 + $0x28] sm:$0xff] %v7543_v15  ;;  %v3917_v2 = vadd.f32 %v3916_v20, %v8764_v31  ;;  %v5792_v10 = vmax.f32 %v5790_v27, %v5791_v23 }
 0x26f   :  { %v5804_v39 = vmax.f32 %v5036_v46, %v5038_v3  ;;  %v2857_v29 = vmax.f32 %v1887_v17, 0.0  ;;  %v5798_v42 = vrot.slane %v5797_v30, 4  ;;  %v3919_v45 = vadd.f32 %v3918_v41, %v8769_v37 }
 0x270   :  { %v1891_v8 = vpop.f32.mrf.mxu0  ;;  %8017 = vmatmul.mubr.msk.bf16.gmra.mxu0 %vm945_vm1, %v8269_v13  ;;  %v3920_v35 = vpop.f32.mrf.mxu1  ;;  %v3264_v53 = vpack.c.bf16 %v2856_v19, %v2854_v44  ;;  %v5039_v62 = vmax.f32 %v3917_v2, 0.0  ;;  %v5787_v3 = vmax.f32 %v5785_v51, %v5786_v6 }
 0x271   :  { %v3921_v7 = vadd.f32 %v3920_v35, %v8764_v31  ;;  %2139 = vmatprep.mubr.bf16.mxu0 %v8343_v4  ;;  %v5805_v50 = vrot.slane %v5804_v39, 4  ;;  %v3265_v1 = vpack.c.bf16 %v2857_v29, %v2855_v55  ;;  %v5799_v9 = vmax.f32 %v5797_v30, %v5798_v42 }
 0x272   :  { %v1893_v32 = vpop.f32.mrf.mxu0  ;;  %v3922_v43 = vpop.f32.mrf.mxu1  ;;  %v5040_v58 = vmax.f32 %v3919_v45, 0.0  ;;  %v2858_v17 = vmax.f32 %v1891_v8, 0.0  ;;  %v5793_v29 = vrot.slane %v5792_v10, 2  ;;  %v5788_v45 = vrot.slane %v5787_v3, 1 }
 0x273   :  { %v5041_v38 = vmax.f32 %v3921_v7, 0.0  ;;  %v3923_v12 = vadd.f32 %v3922_v43, %v8769_v37  ;;  %4164 = vmatprep.mubr.bf16.mxu1 %v3265_v1  ;;  %v5806_v49 = vmax.f32 %v5804_v39, %v5805_v50  ;;  %v2859_v20 = vmax.f32 %v1893_v32, 0.0  ;;  %v8271_v1 = vld [vmem:[%s10216_s0 + $0x270] sm:$0xff]  }
 0x274   :  { %v1895_v26 = vpop.f32.mrf.mxu0  ;;  %v3926_v40 = vpop.f32.mrf.mxu1  ;;  %4165 = vmatmul.mubr.bf16.gmra.mxu1 %v3264_v53  ;;  %v5800_v30 = vrot.slane %v5799_v9, 2 }
 0x275   :  { %v5811_v16 = vmax.f32 %v5039_v62, %v5041_v38  ;;  %v5042_v61 = vmax.f32 %v3923_v12, 0.0  ;;  %v2860_v47 = vmax.f32 %v1895_v26, 0.0  ;;  %v3927_v57 = vadd.f32 %v3926_v40, %v8764_v31 }
 0x276   :  { %v1897_v48 = vpop.f32.mrf.mxu0  ;;  %v3928_v18 = vpop.f32.mrf.mxu1  ;;  %v5807_v19 = vrot.slane %v5806_v49, 2  ;;  %v5801_v43 = vmax.f32 %v5799_v9, %v5800_v30  ;;  %v9086_v40 = vmax.f32 %v5792_v10, %v5793_v29 }
 0x277   :  { %v5818_v13 = vmax.f32 %v5040_v58, %v5042_v61  ;;  %v2861_v5 = vmax.f32 %v1897_v48, 0.0  ;;  %v5812_v41 = vrot.slane %v5811_v16, 4  ;;  %v3266_v35 = vpack.c.bf16 %v2860_v47, %v2858_v17 }
 0x278   :  { %v1901_v15 = vpop.f32.mrf.mxu0  ;;  %8018 = vmatmul.mubr.msk.bf16.gmra.mxu0 %vm945_vm1, %v8270_v52  ;;  %v3930_v46 = vpop.f32.mrf.mxu1  ;;  %v3929_v23 = vadd.f32 %v3928_v18, %v8769_v37  ;;  %v5043_v7 = vmax.f32 %v3927_v57, 0.0  ;;  %v5808_v53 = vmax.f32 %v5806_v49, %v5807_v19  ;;  %v5802_v10 = vrot.slane %v5801_v43, 1 }
 0x279   :  { %2149 = vmatprep.mubr.bf16.mxu0 %v8343_v4  ;;  %v3267_v2 = vpack.c.bf16 %v2861_v5, %v2859_v20  ;;  %v3931_v27 = vadd.f32 %v3930_v46, %v8764_v31  ;;  %v5819_v44 = vrot.slane %v5818_v13, 4  ;;  %v5813_v32 = vmax.f32 %v5811_v16, %v5812_v41 }
 0x27a   :  { %v1903_v55 = vpop.f32.mrf.mxu0  ;;  %v3932_v39 = vpop.f32.mrf.mxu1  ;;  %v5044_v52 = vmax.f32 %v3929_v23, 0.0  ;;  %v2862_v49 = vmax.f32 %v1901_v15, 0.0  ;;  %v5809_v46 = vrot.slane %v5808_v53, 1  ;;  %v8272_v23 = vld [vmem:[%s10216_s0 + $0x278] sm:$0xff]  }
 0x27b   :  { %v5045_v42 = vmax.f32 %v3931_v27, 0.0  ;;  %v3933_v51 = vadd.f32 %v3932_v39, %v8769_v37  ;;  %4174 = vmatprep.mubr.bf16.mxu1 %v3267_v2  ;;  %v5820_v58 = vmax.f32 %v5818_v13, %v5819_v44  ;;  %v2863_v18 = vmax.f32 %v1903_v55, 0.0 }
 0x27c   :  { %v1905_v8 = vpop.f32.mrf.mxu0  ;;  %v3936_v50 = vpop.f32.mrf.mxu1  ;;  %4175 = vmatmul.mubr.bf16.gmra.mxu1 %v3266_v35  ;;  %v5814_v9 = vrot.slane %v5813_v32, 2  ;;  %v5789_v55 = vmax.f32 %v5787_v3, %v5788_v45  ;;  %v5795_v44 = vrot.slane %v9086_v40, 1 }
 0x27d   :  { %v5825_v62 = vmax.f32 %v5043_v7, %v5045_v42  ;;  %v5046_v38 = vmax.f32 %v3933_v51, 0.0  ;;  %v2864_v6 = vmax.f32 %v1905_v8, 0.0  ;;  %v3937_v61 = vadd.f32 %v3936_v50, %v8764_v31 }
 0x27e   :  { %v1907_v12 = vpop.f32.mrf.mxu0  ;;  %v3938_v26 = vpop.f32.mrf.mxu1  ;;  %v5821_v39 = vrot.slane %v5820_v58, 2  ;;  %v5815_v7 = vmax.f32 %v5813_v32, %v5814_v9  ;;  %v5803_v50 = vmax.f32 %v5801_v43, %v5802_v10 }
 0x27f   :  { %v5826_v48 = vrot.slane %v5825_v62, 4  ;;  %v2865_v47 = vmax.f32 %v1907_v12, 0.0  ;;  %v5832_v57 = vmax.f32 %v5044_v52, %v5046_v38  ;;  %v3939_v41 = vadd.f32 %v3938_v26, %v8769_v37 }
 0x280   :  { %v1911_v20 = vpop.f32.mrf.mxu0  ;;  %8019 = vmatmul.mubr.msk.bf16.gmra.mxu0 %vm945_vm1, %v8271_v1  ;;  %v3940_v16 = vpop.f32.mrf.mxu1  ;;  %v3268_v19 = vpack.c.bf16 %v2864_v6, %v2862_v49  ;;  %v5047_v2 = vmax.f32 %v3937_v61, 0.0  ;;  %v5810_v1 = vmax.f32 %v5808_v53, %v5809_v46  ;;  %v5822_v61 = vmax.f32 %v5820_v58, %v5821_v39 }
 0x281   :  { %v3941_v5 = vadd.f32 %v3940_v16, %v8764_v31  ;;  %2159 = vmatprep.mubr.bf16.mxu0 %v8343_v4  ;;  %v3269_v17 = vpack.c.bf16 %v2865_v47, %v2863_v18  ;;  %v5827_v29 = vmax.f32 %v5825_v62, %v5826_v48  ;;  %v5833_v42 = vrot.slane %v5832_v57, 4 }
 0x282   :  { %v1913_v13 = vpop.f32.mrf.mxu0  ;;  %v3942_v30 = vpop.f32.mrf.mxu1  ;;  %v5048_v3 = vmax.f32 %v3939_v41, 0.0  ;;  %v5816_v16 = vrot.slane %v5815_v7, 1  ;;  %v2866_v43 = vmax.f32 %v1911_v20, 0.0  ;;  %v5796_v41 = vmax.f32 %v9086_v40, %v5795_v44 }
 0x283   :  { %v5049_v27 = vmax.f32 %v3941_v5, 0.0  ;;  %v3943_v15 = vadd.f32 %v3942_v30, %v8769_v37  ;;  %4184 = vmatprep.mubr.bf16.mxu1 %v3269_v17  ;;  %v2867_v12 = vmax.f32 %v1913_v13, 0.0  ;;  %v5828_v48 = vrot.slane %v5827_v29, 2 }
 0x284   :  { %v1915_v35 = vpop.f32.mrf.mxu0  ;;  %v3946_v8 = vpop.f32.mrf.mxu1  ;;  %4185 = vmatmul.mubr.bf16.gmra.mxu1 %v3268_v19  ;;  %v5834_v9 = vmax.f32 %v5832_v57, %v5833_v42  ;;  %v7544_v13 = vsel %vm7495_vm2, %v5803_v50, %v5789_v55  ;;  %v5823_v57 = vrot.slane %v5822_v61, 1 }
 0x285   :  { %v5839_v51 = vmax.f32 %v5047_v2, %v5049_v27  ;;  %v5050_v45 = vmax.f32 %v3943_v15, 0.0  ;;  %v2868_v26 = vmax.f32 %v1915_v35, 0.0  ;;  %v3947_v47 = vadd.f32 %v3946_v8, %v8764_v31  ;;  %v8273_v15 = vld [vmem:[%s10216_s0 + $0x280] sm:$0xff]  }
 0x286   :  { %v1917_v62 = vpop.f32.mrf.mxu0  ;;  %v3948_v6 = vpop.f32.mrf.mxu1  ;;  %v5829_v20 = vmax.f32 %v5827_v29, %v5828_v48  ;;  %v7551_v35 = vsel %vm7495_vm2, %v5810_v1, %v5796_v41  ;;  %v5835_v55 = vrot.slane %v5834_v9, 2 }
 0x287   :  { %v5840_v38 = vrot.slane %v5839_v51, 4  ;;  %v2869_v52 = vmax.f32 %v1917_v62, 0.0  ;;  %v5846_v18 = vmax.f32 %v5048_v3, %v5050_v45  ;;  %v3949_v46 = vadd.f32 %v3948_v6, %v8769_v37 }
 0x288   :  { %v1921_v32 = vpop.f32.mrf.mxu0  ;;  %8020 = vmatmul.mubr.msk.bf16.gmra.mxu0 %vm945_vm1, %v8272_v23  ;;  %v3950_v49 = vpop.f32.mrf.mxu1  ;;  %v3270_v30 = vpack.c.bf16 %v2868_v26, %v2866_v43  ;;  %v5051_v2 = vmax.f32 %v3947_v47, 0.0  ;;  %v5817_v23 = vmax.f32 %v5815_v7, %v5816_v16  ;;  %v5824_v26 = vmax.f32 %v5822_v61, %v5823_v57 }
 0x289   :  { %v3271_v53 = vpack.c.bf16 %v2869_v52, %v2867_v12  ;;  %2169 = vmatprep.mubr.bf16.mxu0 %v8343_v4  ;;  %v5841_v5 = vmax.f32 %v5839_v51, %v5840_v38  ;;  %v5847_v10 = vrot.slane %v5846_v18, 4  ;;  %v3951_v58 = vadd.f32 %v3950_v49, %v8764_v31 }
 0x28a   :  { %v1923_v17 = vpop.f32.mrf.mxu0  ;;  %v3952_v19 = vpop.f32.mrf.mxu1  ;;  %v5052_v8 = vmax.f32 %v3949_v46, 0.0  ;;  %v5830_v52 = vrot.slane %v5829_v20, 1 }
 0x28b   :  { %4194 = vmatprep.mubr.bf16.mxu1 %v3271_v53  ;;  %v5053_v27 = vmax.f32 %v3951_v58, 0.0  ;;  %v5848_v42 = vmax.f32 %v5846_v18, %v5847_v10  ;;  %v3953_v40 = vadd.f32 %v3952_v19, %v8769_v37  ;;  %v5842_v51 = vrot.slane %v5841_v5, 2 }
 0x28c   :  { %v1925_v39 = vpop.f32.mrf.mxu0  ;;  %v3956_v44 = vpop.f32.mrf.mxu1  ;;  %4195 = vmatmul.mubr.bf16.gmra.mxu1 %v3270_v30  ;;  %v2871_v3 = vmax.f32 %v1923_v17, 0.0  ;;  %v2870_v18 = vmax.f32 %v1921_v32, 0.0  ;;  %v5836_v53 = vmax.f32 %v5834_v9, %v5835_v55  ;;  %v7545_v58 = vsel %vm7497_vm3, %v5817_v23, %v7544_v13  ;;  %v8274_v9 = vld [vmem:[%s10216_s0 + $0x288] sm:$0xff]  }
 0x28d   :  { %v5853_v50 = vmax.f32 %v5051_v2, %v5053_v27  ;;  %v5054_v45 = vmax.f32 %v3953_v40, 0.0  ;;  %v2872_v62 = vmax.f32 %v1925_v39, 0.0  ;;  %v3957_v7 = vadd.f32 %v3956_v44, %v8764_v31 }
 0x28e   :  { %v1927_v29 = vpop.f32.mrf.mxu0  ;;  %v3958_v12 = vpop.f32.mrf.mxu1  ;;  %v5849_v48 = vrot.slane %v5848_v42, 2  ;;  %v5843_v17 = vmax.f32 %v5841_v5, %v5842_v51  ;;  %v5831_v40 = vmax.f32 %v5829_v20, %v5830_v52  ;;  %v5837_v44 = vrot.slane %v5836_v53, 1 }
 0x28f   :  { %v2873_v38 = vmax.f32 %v1927_v29, 0.0  ;;  %v5854_v6 = vrot.slane %v5853_v50, 4  ;;  %v5860_v47 = vmax.f32 %v5052_v8, %v5054_v45  ;;  %v3959_v10 = vadd.f32 %v3958_v12, %v8769_v37 }
 0x290   :  { %v1931_v1 = vpop.f32.mrf.mxu0  ;;  %8021 = vmatmul.mubr.msk.bf16.gmra.mxu0 %vm945_vm1, %v8273_v15  ;;  %v3960_v43 = vpop.f32.mrf.mxu1  ;;  %v3272_v30 = vpack.c.bf16 %v2872_v62, %v2870_v18  ;;  %v5055_v57 = vmax.f32 %v3957_v7, 0.0  ;;  %v9121_v15 = vsel %vm7497_vm3, %v5824_v26, %v7551_v35  ;;  %v5850_v13 = vmax.f32 %v5848_v42, %v5849_v48 }
 0x291   :  { %v3273_v16 = vpack.c.bf16 %v2873_v38, %v2871_v3  ;;  %2179 = vmatprep.mubr.bf16.mxu0 %v8343_v4  ;;  %v5855_v49 = vmax.f32 %v5853_v50, %v5854_v6  ;;  %v3961_v61 = vadd.f32 %v3960_v43, %v8764_v31  ;;  %v5861_v41 = vrot.slane %v5860_v47, 4 }
 0x292   :  { %v1933_v46 = vpop.f32.mrf.mxu0  ;;  %v3962_v19 = vpop.f32.mrf.mxu1  ;;  %v5056_v55 = vmax.f32 %v3959_v10, 0.0  ;;  %v5844_v12 = vrot.slane %v5843_v17, 1  ;;  %v5851_v20 = vrot.slane %v5850_v13, 1  ;;  %v2874_v42 = vmax.f32 %v1931_v1, 0.0 }
 0x293   :  { %4204 = vmatprep.mubr.bf16.mxu1 %v3273_v16  ;;  %v5856_v32 = vrot.slane %v5855_v49, 2  ;;  %v5057_v2 = vmax.f32 %v3961_v61, 0.0  ;;  %v3963_v27 = vadd.f32 %v3962_v19, %v8769_v37  ;;  %v5862_v5 = vmax.f32 %v5860_v47, %v5861_v41 }
 0x294   :  { %v1935_v39 = vpop.f32.mrf.mxu0  ;;  %v3966_v23 = vpop.f32.mrf.mxu1  ;;  %4205 = vmatmul.mubr.bf16.gmra.mxu1 %v3272_v30  ;;  %v2875_v3 = vmax.f32 %v1933_v46, 0.0  ;;  %v7546_v47 = vsel %vm7499_vm4, %v5831_v40, %v7545_v58  ;;  %v5838_v61 = vmax.f32 %v5836_v53, %v5837_v44  ;;  %v8275_v58 = vld [vmem:[%s10216_s0 + $0x290] sm:$0xff]  }
 0x295   :  { %v5867_v51 = vmax.f32 %v5055_v57, %v5057_v2  ;;  %v5058_v8 = vmax.f32 %v3963_v27, 0.0  ;;  %v5857_v29 = vmax.f32 %v5855_v49, %v5856_v32  ;;  %v2876_v45 = vmax.f32 %v1935_v39, 0.0 }
 0x296   :  { %v1937_v50 = vpop.f32.mrf.mxu0  ;;  %v3968_v38 = vpop.f32.mrf.mxu1  ;;  %v5863_v6 = vrot.slane %v5862_v5, 2  ;;  %v3967_v52 = vadd.f32 %v3966_v23, %v8764_v31  ;;  %v5845_v39 = vmax.f32 %v5843_v17, %v5844_v12 }
 0x297   :  { %v2877_v62 = vmax.f32 %v1937_v50, 0.0  ;;  %v5868_v7 = vrot.slane %v5867_v51, 4  ;;  %v5874_v35 = vmax.f32 %v5056_v55, %v5058_v8  ;;  %v3969_v49 = vadd.f32 %v3968_v38, %v8769_v37 }
 0x298   :  { %v1941_v26 = vpop.f32.mrf.mxu0  ;;  %8022 = vmatmul.mubr.msk.bf16.gmra.mxu0 %vm945_vm1, %v8274_v9  ;;  %v3970_v18 = vpop.f32.mrf.mxu1  ;;  %v5858_v46 = vrot.slane %v5857_v29, 1  ;;  %v3274_v41 = vpack.c.bf16 %v2876_v45, %v2874_v42  ;;  %v5864_v1 = vmax.f32 %v5862_v5, %v5863_v6  ;;  %v5852_v9 = vmax.f32 %v5850_v13, %v5851_v20 }
 0x299   :  { %v3275_v48 = vpack.c.bf16 %v2877_v62, %v2875_v3  ;;  %2189 = vmatprep.mubr.bf16.mxu0 %v8343_v4  ;;  %v5869_v16 = vmax.f32 %v5867_v51, %v5868_v7  ;;  %v5875_v43 = vrot.slane %v5874_v35, 4  ;;  %v3971_v30 = vadd.f32 %v3970_v18, %v8764_v31 }
 0x29a   :  { %v1943_v10 = vpop.f32.mrf.mxu0  ;;  %v3972_v19 = vpop.f32.mrf.mxu1  ;;  %v5059_v40 = vmax.f32 %v3967_v52, 0.0  ;;  %v5060_v51 = vmax.f32 %v3969_v49, 0.0  ;;  %v5859_v6 = vmax.f32 %v5857_v29, %v5858_v46  ;;  %v5865_v7 = vrot.slane %v5864_v1, 1 }
 0x29b   :  { %4214 = vmatprep.mubr.bf16.mxu1 %v3275_v48  ;;  %v5870_v32 = vrot.slane %v5869_v16, 2  ;;  %v5876_v57 = vmax.f32 %v5874_v35, %v5875_v43  ;;  %v3973_v2 = vadd.f32 %v3972_v19, %v8769_v37  ;;  %v5061_v53 = vmax.f32 %v3971_v30, 0.0 }
 0x29c   :  { %v1945_v27 = vpop.f32.mrf.mxu0  ;;  %v3976_v23 = vpop.f32.mrf.mxu1  ;;  %4215 = vmatmul.mubr.bf16.gmra.mxu1 %v3274_v41  ;;  %v2879_v3 = vmax.f32 %v1943_v10, 0.0  ;;  %v2878_v20 = vmax.f32 %v1941_v26, 0.0  ;;  %v7553_v18 = vsel %vm7499_vm4, %v5838_v61, %v9121_v15  ;;  %v7547_v10 = vsel %vm7501_vm5, %v5845_v39, %v7546_v47  ;;  %v8276_v15 = vld [vmem:[%s10216_s0 + $0x298] sm:$0xff]  }
 0x29d   :  { %v5871_v44 = vmax.f32 %v5869_v16, %v5870_v32  ;;  %v5877_v55 = vrot.slane %v5876_v57, 2  ;;  %v5062_v8 = vmax.f32 %v3973_v2, 0.0  ;;  %v5881_v50 = vmax.f32 %v5059_v40, %v5061_v53 }
 0x29e   :  { %v1947_v5 = vpop.f32.mrf.mxu0  ;;  %v2880_v45 = vmax.f32 %v1945_v27, 0.0  ;;  %v3978_v38 = vpop.f32.mrf.mxu1  ;;  %v3977_v17 = vadd.f32 %v3976_v23, %v8764_v31  ;;  %v7554_v46 = vsel %vm7501_vm5, %v5852_v9, %v7553_v18  ;;  %v7548_v19 = vsel %vm7503_vm6, %v5859_v6, %v7547_v10 }
 0x29f   :  { %v2881_v62 = vmax.f32 %v1947_v5, 0.0  ;;  %v5888_v35 = vmax.f32 %v5060_v51, %v5062_v8  ;;  %v5878_v12 = vmax.f32 %v5876_v57, %v5877_v55  ;;  %v5882_v42 = vrot.slane %v5881_v50, 4 }
 0x2a0   :  { %v1951_v13 = vpop.f32.mrf.mxu0  ;;  %8023 = vmatmul.mubr.msk.bf16.gmra.mxu0 %vm945_vm1, %v8275_v58  ;;  %v3980_v48 = vpop.f32.mrf.mxu1  ;;  %v5872_v16 = vrot.slane %v5871_v44, 1  ;;  %v3276_v30 = vpack.c.bf16 %v2880_v45, %v2878_v20  ;;  %v5866_v32 = vmax.f32 %v5864_v1, %v5865_v7  ;;  %v5063_v2 = vmax.f32 %v3977_v17, 0.0 }
 0x2a1   :  { %v3277_v52 = vpack.c.bf16 %v2881_v62, %v2879_v3  ;;  %2199 = vmatprep.mubr.bf16.mxu0 %v8343_v4  ;;  %v5889_v43 = vrot.slane %v5888_v35, 4  ;;  %v3981_v29 = vadd.f32 %v3980_v48, %v8764_v31  ;;  %v5883_v41 = vmax.f32 %v5881_v50, %v5882_v42 }
 0x2a2   :  { %v1953_v49 = vpop.f32.mrf.mxu0  ;;  %v3982_v26 = vpop.f32.mrf.mxu1  ;;  %v5879_v61 = vrot.slane %v5878_v12, 1  ;;  %v5873_v9 = vmax.f32 %v5871_v44, %v5872_v16  ;;  %v3979_v23 = vadd.f32 %v3978_v38, %v8769_v37  ;;  %v7555_v45 = vsel %vm7503_vm6, %v5866_v32, %v7554_v46 }
 0x2a3   :  { %4224 = vmatprep.mubr.bf16.mxu1 %v3277_v52  ;;  %v5890_v57 = vmax.f32 %v5888_v35, %v5889_v43  ;;  %v5884_v58 = vrot.slane %v5883_v41, 2  ;;  %v5065_v40 = vmax.f32 %v3981_v29, 0.0  ;;  %v3983_v47 = vadd.f32 %v3982_v26, %v8769_v37 }
 0x2a4   :  { %v1955_v27 = vpop.f32.mrf.mxu0  ;;  %v3986_v39 = vpop.f32.mrf.mxu1  ;;  %4225 = vmatmul.mubr.bf16.gmra.mxu1 %v3276_v30  ;;  %v2883_v55 = vmax.f32 %v1953_v49, 0.0  ;;  %v2882_v6 = vmax.f32 %v1951_v13, 0.0  ;;  %v5880_v44 = vmax.f32 %v5878_v12, %v5879_v61  ;;  %v5064_v48 = vmax.f32 %v3979_v23, 0.0 }
 0x2a5   :  { %v5891_v53 = vrot.slane %v5890_v57, 2  ;;  %v5885_v51 = vmax.f32 %v5883_v41, %v5884_v58  ;;  %v2884_v8 = vmax.f32 %v1955_v27, 0.0  ;;  %v3987_v5 = vadd.f32 %v3986_v39, %v8764_v31 }
 0x2a6   :  { %v1957_v1 = vpop.f32.mrf.mxu0  ;;  %v3988_v3 = vpop.f32.mrf.mxu1  ;;  %v5066_v7 = vmax.f32 %v3983_v47, 0.0  ;;  %v5895_v20 = vmax.f32 %v5063_v2, %v5065_v40  ;;  %v7549_v13 = vsel %vm7505_vm7, %v5873_v9, %v7548_v19  ;;  %v7556_v2 = vsel %vm7505_vm7, %v5880_v44, %v7555_v45 }
 0x2a7   :  { %v2885_v50 = vmax.f32 %v1957_v1, 0.0  ;;  %v5892_v62 = vmax.f32 %v5890_v57, %v5891_v53  ;;  %v5886_v17 = vrot.slane %v5885_v51, 1  ;;  %v3989_v18 = vadd.f32 %v3988_v3, %v8769_v37  ;;  %v8277_v57 = vld [vmem:[%s10216_s0 + $0x2a0] sm:$0xff]  }
 0x2a8   :  { %v1961_v35 = vpop.f32.mrf.mxu0  ;;  %8024 = vmatmul.mubr.msk.bf16.gmra.mxu0 %vm945_vm1, %v8276_v15  ;;  %v3990_v42 = vpop.f32.mrf.mxu1  ;;  %v3278_v49 = vpack.c.bf16 %v2884_v8, %v2882_v6  ;;  %v5067_v10 = vmax.f32 %v3987_v5, 0.0  ;;  %v5902_v41 = vmax.f32 %v5064_v48, %v5066_v7  ;;  %v5896_v19 = vrot.slane %v5895_v20, 4 }
 0x2a9   :  { %v3279_v38 = vpack.c.bf16 %v2885_v50, %v2883_v55  ;;  %2209 = vmatprep.mubr.bf16.mxu0 %v8343_v4  ;;  %v5893_v52 = vrot.slane %v5892_v62, 1  ;;  %v3991_v16 = vadd.f32 %v3990_v42, %v8764_v31  ;;  %v5887_v29 = vmax.f32 %v5885_v51, %v5886_v17 }
 0x2aa   :  { %v1963_v43 = vpop.f32.mrf.mxu0  ;;  %v3992_v46 = vpop.f32.mrf.mxu1  ;;  %v5068_v58 = vmax.f32 %v3989_v18, 0.0  ;;  %v5903_v1 = vrot.slane %v5902_v41, 4  ;;  %v5897_v5 = vmax.f32 %v5895_v20, %v5896_v19  ;;  %v2886_v50 = vmax.f32 %v1961_v35, 0.0  ;;  %v8278_v18 = vld [vmem:[%s10216_s0 + $0x2a8] sm:$0xff]  }
 0x2ab   :  { %4234 = vmatprep.mubr.bf16.mxu1 %v3279_v38  ;;  %v5894_v12 = vmax.f32 %v5892_v62, %v5893_v52  ;;  %v5069_v30 = vmax.f32 %v3991_v16, 0.0  ;;  %v3993_v26 = vadd.f32 %v3992_v46, %v8769_v37  ;;  %v7550_v27 = vsel %vm7507_vm8, %v5887_v29, %v7549_v13 }
 0x2ac   :  { %v1965_v32 = vpop.f32.mrf.mxu0  ;;  %v3996_v15 = vpop.f32.mrf.mxu1  ;;  %4235 = vmatmul.mubr.bf16.gmra.mxu1 %v3278_v49  ;;  %7764 = vst [vmem:[#allocation2 + $0x30] sm:$0xff] %v7550_v27  ;;  %v2887_v9 = vmax.f32 %v1963_v43, 0.0  ;;  %v5904_v48 = vmax.f32 %v5902_v41, %v5903_v1  ;;  %v5898_v16 = vrot.slane %v5897_v5, 2 }
 0x2ad   :  { %v7557_v61 = vsel %vm7507_vm8, %v5894_v12, %v7556_v2  ;;  %v5909_v40 = vmax.f32 %v5067_v10, %v5069_v30  ;;  %v5070_v47 = vmax.f32 %v3993_v26, 0.0  ;;  %v2888_v53 = vmax.f32 %v1965_v32, 0.0 }
 0x2ae   :  { %v1967_v39 = vpop.f32.mrf.mxu0  ;;  %7765 = vst [vmem:[#allocation2 + $0x38] sm:$0xff] %v7557_v61  ;;  %v3998_v55 = vpop.f32.mrf.mxu1  ;;  %v3997_v3 = vadd.f32 %v3996_v15, %v8764_v31  ;;  %v5905_v27 = vrot.slane %v5904_v48, 2 }
 0x2af   :  { %v2889_v23 = vmax.f32 %v1967_v39, 0.0  ;;  %v5916_v51 = vmax.f32 %v5068_v58, %v5070_v47  ;;  %v5910_v6 = vrot.slane %v5909_v40, 4  ;;  %v3999_v44 = vadd.f32 %v3998_v55, %v8769_v37 }
 0x2b0   :  { %v1971_v8 = vpop.f32.mrf.mxu0  ;;  %8025 = vmatmul.mubr.msk.bf16.gmra.mxu0 %vm945_vm1, %v8277_v57  ;;  %v4000_v62 = vpop.f32.mrf.mxu1  ;;  %v3280_v38 = vpack.c.bf16 %v2888_v53, %v2886_v50  ;;  %v5071_v43 = vmax.f32 %v3997_v3, 0.0  ;;  %v5899_v58 = vmax.f32 %v5897_v5, %v5898_v16 }
 0x2b1   :  { %v3281_v45 = vpack.c.bf16 %v2889_v23, %v2887_v9  ;;  %2219 = vmatprep.mubr.bf16.mxu0 %v8343_v4  ;;  %v5917_v7 = vrot.slane %v5916_v51, 4  ;;  %v4001_v42 = vadd.f32 %v4000_v62, %v8764_v31  ;;  %v5911_v49 = vmax.f32 %v5909_v40, %v5910_v6 }
 0x2b2   :  { %v1973_v17 = vpop.f32.mrf.mxu0  ;;  %v4002_v52 = vpop.f32.mrf.mxu1  ;;  %v5072_v46 = vmax.f32 %v3999_v44, 0.0  ;;  %v2890_v47 = vmax.f32 %v1971_v8, 0.0 }
 0x2b3   :  { %4244 = vmatprep.mubr.bf16.mxu1 %v3281_v45  ;;  %v4003_v20 = vadd.f32 %v4002_v52, %v8769_v37  ;;  %v5073_v13 = vmax.f32 %v4001_v42, 0.0  ;;  %v5918_v10 = vmax.f32 %v5916_v51, %v5917_v7  ;;  %v2891_v32 = vmax.f32 %v1973_v17, 0.0  ;;  %v8279_v7 = vld [vmem:[%s10216_s0 + $0x2b0] sm:$0xff]  }
 0x2b4   :  { %v1975_v35 = vpop.f32.mrf.mxu0  ;;  %v4006_v29 = vpop.f32.mrf.mxu1  ;;  %4245 = vmatmul.mubr.bf16.gmra.mxu1 %v3280_v38  ;;  %v5912_v53 = vrot.slane %v5911_v49, 2  ;;  %v5906_v45 = vmax.f32 %v5904_v48, %v5905_v27  ;;  %v5900_v52 = vrot.slane %v5899_v58, 1 }
 0x2b5   :  { %v5074_v12 = vmax.f32 %v4003_v20, 0.0  ;;  %v5923_v26 = vmax.f32 %v5071_v43, %v5073_v13  ;;  %v2892_v41 = vmax.f32 %v1975_v35, 0.0  ;;  %v4007_v15 = vadd.f32 %v4006_v29, %v8764_v31 }
 0x2b6   :  { %v1977_v30 = vpop.f32.mrf.mxu0  ;;  %v4008_v2 = vpop.f32.mrf.mxu1  ;;  %v5919_v23 = vrot.slane %v5918_v10, 2  ;;  %v5913_v20 = vmax.f32 %v5911_v49, %v5912_v53 }
 0x2b7   :  { %v2893_v57 = vmax.f32 %v1977_v30, 0.0  ;;  %v5930_v19 = vmax.f32 %v5072_v46, %v5074_v12  ;;  %v5924_v39 = vrot.slane %v5923_v26, 4  ;;  %v3282_v50 = vpack.c.bf16 %v2892_v41, %v2890_v47 }
 0x2b8   :  { %v1981_v61 = vpop.f32.mrf.mxu0  ;;  %8026 = vmatmul.mubr.msk.bf16.gmra.mxu0 %vm945_vm1, %v8278_v18  ;;  %v4010_v9 = vpop.f32.mrf.mxu1  ;;  %v5075_v62 = vmax.f32 %v4007_v15, 0.0  ;;  %v4009_v6 = vadd.f32 %v4008_v2, %v8769_v37  ;;  %v5920_v35 = vmax.f32 %v5918_v10, %v5919_v23  ;;  %v5907_v12 = vrot.slane %v5906_v45, 1 }
 0x2b9   :  { %v3283_v40 = vpack.c.bf16 %v2893_v57, %v2891_v32  ;;  %2229 = vmatprep.mubr.bf16.mxu0 %v8343_v4  ;;  %v5931_v55 = vrot.slane %v5930_v19, 4  ;;  %v4011_v1 = vadd.f32 %v4010_v9, %v8764_v31  ;;  %v5925_v44 = vmax.f32 %v5923_v26, %v5924_v39 }
 0x2ba   :  { %v1983_v51 = vpop.f32.mrf.mxu0  ;;  %v4012_v3 = vpop.f32.mrf.mxu1  ;;  %v5076_v30 = vmax.f32 %v4009_v6, 0.0  ;;  %v2894_v27 = vmax.f32 %v1981_v61, 0.0  ;;  %v5921_v9 = vrot.slane %v5920_v35, 1  ;;  %v5908_v6 = vmax.f32 %v5906_v45, %v5907_v12 }
 0x2bb   :  { %4254 = vmatprep.mubr.bf16.mxu1 %v3283_v40  ;;  %v5077_v5 = vmax.f32 %v4011_v1, 0.0  ;;  %v5932_v17 = vmax.f32 %v5930_v19, %v5931_v55  ;;  %v4013_v38 = vadd.f32 %v4012_v3, %v8769_v37  ;;  %v2895_v16 = vmax.f32 %v1983_v51, 0.0  ;;  %v8280_v3 = vld [vmem:[%s10216_s0 + $0x2b8] sm:$0xff]  }
 0x2bc   :  { %v1985_v8 = vpop.f32.mrf.mxu0  ;;  %v4016_v42 = vpop.f32.mrf.mxu1  ;;  %4255 = vmatmul.mubr.bf16.gmra.mxu1 %v3282_v50  ;;  %v5926_v57 = vrot.slane %v5925_v44, 2  ;;  %v5914_v40 = vrot.slane %v5913_v20, 1 }
 0x2bd   :  { %v5937_v18 = vmax.f32 %v5075_v62, %v5077_v5  ;;  %v5078_v43 = vmax.f32 %v4013_v38, 0.0  ;;  %v2896_v13 = vmax.f32 %v1985_v8, 0.0  ;;  %v4017_v26 = vadd.f32 %v4016_v42, %v8764_v31 }
 0x2be   :  { %v1987_v48 = vpop.f32.mrf.mxu0  ;;  %v4018_v46 = vpop.f32.mrf.mxu1  ;;  %v5933_v2 = vrot.slane %v5932_v17, 2  ;;  %v5901_v62 = vmax.f32 %v5899_v58, %v5900_v52  ;;  %v5927_v5 = vmax.f32 %v5925_v44, %v5926_v57 }
 0x2bf   :  { %v2897_v29 = vmax.f32 %v1987_v48, 0.0  ;;  %v5938_v32 = vrot.slane %v5937_v18, 4  ;;  %v5944_v19 = vmax.f32 %v5076_v30, %v5078_v43  ;;  %v4019_v15 = vadd.f32 %v4018_v46, %v8769_v37 }
 0x2c0   :  { %v1991_v41 = vpop.f32.mrf.mxu0  ;;  %8027 = vmatmul.mubr.msk.bf16.gmra.mxu0 %vm945_vm1, %v8279_v7  ;;  %v4020_v10 = vpop.f32.mrf.mxu1  ;;  %v3284_v53 = vpack.c.bf16 %v2896_v13, %v2894_v27  ;;  %v5079_v1 = vmax.f32 %v4017_v26, 0.0  ;;  %v5934_v8 = vmax.f32 %v5932_v17, %v5933_v2  ;;  %v5915_v43 = vmax.f32 %v5913_v20, %v5914_v40 }
 0x2c1   :  { %v3285_v49 = vpack.c.bf16 %v2897_v29, %v2895_v16  ;;  %2239 = vmatprep.mubr.bf16.mxu0 %v8343_v4  ;;  %v4021_v47 = vadd.f32 %v4020_v10, %v8764_v31  ;;  %v5939_v55 = vmax.f32 %v5937_v18, %v5938_v32  ;;  %v5945_v38 = vrot.slane %v5944_v19, 4 }
 0x2c2   :  { %v1993_v39 = vpop.f32.mrf.mxu0  ;;  %v4022_v23 = vpop.f32.mrf.mxu1  ;;  %v5080_v42 = vmax.f32 %v4019_v15, 0.0  ;;  %v5922_v32 = vmax.f32 %v5920_v35, %v5921_v9  ;;  %v5928_v45 = vrot.slane %v5927_v5, 1  ;;  %v2898_v44 = vmax.f32 %v1991_v41, 0.0 }
 0x2c3   :  { %4264 = vmatprep.mubr.bf16.mxu1 %v3285_v49  ;;  %v5081_v51 = vmax.f32 %v4021_v47, 0.0  ;;  %v4023_v61 = vadd.f32 %v4022_v23, %v8769_v37  ;;  %v2899_v13 = vmax.f32 %v1993_v39, 0.0  ;;  %v5940_v26 = vrot.slane %v5939_v55, 2 }
 0x2c4   :  { %v1995_v50 = vpop.f32.mrf.mxu0  ;;  %v4026_v7 = vpop.f32.mrf.mxu1  ;;  %4265 = vmatmul.mubr.bf16.gmra.mxu1 %v3284_v53  ;;  %v5935_v20 = vrot.slane %v5934_v8, 1  ;;  %v5946_v57 = vmax.f32 %v5944_v19, %v5945_v38  ;;  %v7558_v15 = vsel %vm7495_vm2, %v5915_v43, %v5901_v62  ;;  %v7565_v41 = vsel %vm7495_vm2, %v5922_v32, %v5908_v6  ;;  %v8281_v19 = vld [vmem:[%s10216_s0 + $0x2c0] sm:$0xff]  }
 0x2c5   :  { %v5951_v48 = vmax.f32 %v5079_v1, %v5081_v51  ;;  %v5082_v16 = vmax.f32 %v4023_v61, 0.0  ;;  %v2900_v29 = vmax.f32 %v1995_v50, 0.0  ;;  %v4027_v17 = vadd.f32 %v4026_v7, %v8764_v31 }
 0x2c6   :  { %v1997_v18 = vpop.f32.mrf.mxu0  ;;  %v4028_v30 = vpop.f32.mrf.mxu1  ;;  %v5941_v9 = vmax.f32 %v5939_v55, %v5940_v26  ;;  %v5929_v51 = vmax.f32 %v5927_v5, %v5928_v45  ;;  %v5936_v7 = vmax.f32 %v5934_v8, %v5935_v20  ;;  %v5947_v38 = vrot.slane %v5946_v57, 2 }
 0x2c7   :  { %v2901_v46 = vmax.f32 %v1997_v18, 0.0  ;;  %v5952_v27 = vrot.slane %v5951_v48, 4  ;;  %v5958_v49 = vmax.f32 %v5080_v42, %v5082_v16  ;;  %v4029_v10 = vadd.f32 %v4028_v30, %v8769_v37 }
 0x2c8   :  { %v2001_v58 = vpop.f32.mrf.mxu0  ;;  %8028 = vmatmul.mubr.msk.bf16.gmra.mxu0 %vm945_vm1, %v8280_v3  ;;  %v4030_v12 = vpop.f32.mrf.mxu1  ;;  %v3286_v47 = vpack.c.bf16 %v2900_v29, %v2898_v44  ;;  %v5083_v50 = vmax.f32 %v4027_v17, 0.0  ;;  %v5942_v29 = vrot.slane %v5941_v9, 1  ;;  %v5948_v44 = vmax.f32 %v5946_v57, %v5947_v38 }
 0x2c9   :  { %v3287_v52 = vpack.c.bf16 %v2901_v46, %v2899_v13  ;;  %2249 = vmatprep.mubr.bf16.mxu0 %v8343_v4  ;;  %v5959_v2 = vrot.slane %v5958_v49, 4  ;;  %v4031_v39 = vadd.f32 %v4030_v12, %v8764_v31  ;;  %v5953_v53 = vmax.f32 %v5951_v48, %v5952_v27 }
 0x2ca   :  { %v2003_v35 = vpop.f32.mrf.mxu0  ;;  %v4032_v40 = vpop.f32.mrf.mxu1  ;;  %v5084_v42 = vmax.f32 %v4029_v10, 0.0  ;;  %v2902_v27 = vmax.f32 %v2001_v58, 0.0  ;;  %v9206_v10 = vsel %vm7497_vm3, %v5936_v7, %v7565_v41 }
 0x2cb   :  { %4274 = vmatprep.mubr.bf16.mxu1 %v3287_v52  ;;  %v4033_v23 = vadd.f32 %v4032_v40, %v8769_v37  ;;  %v5960_v61 = vmax.f32 %v5958_v49, %v5959_v2  ;;  %v5085_v3 = vmax.f32 %v4031_v39, 0.0  ;;  %v2903_v48 = vmax.f32 %v2003_v35, 0.0 }
 0x2cc   :  { %v2005_v1 = vpop.f32.mrf.mxu0  ;;  %v4036_v62 = vpop.f32.mrf.mxu1  ;;  %4275 = vmatmul.mubr.bf16.gmra.mxu1 %v3286_v47  ;;  %v5954_v46 = vrot.slane %v5953_v53, 2  ;;  %v7559_v2 = vsel %vm7497_vm3, %v5929_v51, %v7558_v15  ;;  %v5949_v51 = vrot.slane %v5948_v44, 1 }
 0x2cd   :  { %v5086_v16 = vmax.f32 %v4033_v23, 0.0  ;;  %v5965_v55 = vmax.f32 %v5083_v50, %v5085_v3  ;;  %v2904_v18 = vmax.f32 %v2005_v1, 0.0  ;;  %v4037_v5 = vadd.f32 %v4036_v62, %v8764_v31 }
 0x2ce   :  { %v2007_v6 = vpop.f32.mrf.mxu0  ;;  %v4038_v13 = vpop.f32.mrf.mxu1  ;;  %v5961_v26 = vrot.slane %v5960_v61, 2  ;;  %v5955_v39 = vmax.f32 %v5953_v53, %v5954_v46  ;;  %v5943_v50 = vmax.f32 %v5941_v9, %v5942_v29 }
 0x2cf   :  { %v2905_v43 = vmax.f32 %v2007_v6, 0.0  ;;  %v5972_v30 = vmax.f32 %v5084_v42, %v5086_v16  ;;  %v5966_v8 = vrot.slane %v5965_v55, 4  ;;  %v4039_v52 = vadd.f32 %v4038_v13, %v8769_v37 }
 0x2d0   :  { %v2011_v32 = vpop.f32.mrf.mxu0  ;;  %8029 = vmatmul.mubr.msk.bf16.gmra.mxu0 %vm945_vm1, %v8281_v19  ;;  %v4040_v45 = vpop.f32.mrf.mxu1  ;;  %v3288_v47 = vpack.c.bf16 %v2904_v18, %v2902_v27  ;;  %v5087_v23 = vmax.f32 %v4037_v5, 0.0  ;;  %v8282_v19 = vld [vmem:[%s10216_s0 + $0x2c8] sm:$0xff]   ;;  %v5962_v3 = vmax.f32 %v5960_v61, %v5961_v26 }
 0x2d1   :  { %v3289_v49 = vpack.c.bf16 %v2905_v43, %v2903_v48  ;;  %2259 = vmatprep.mubr.bf16.mxu0 %v8343_v4  ;;  %v5973_v17 = vrot.slane %v5972_v30, 4  ;;  %v4041_v12 = vadd.f32 %v4040_v45, %v8764_v31  ;;  %v5967_v35 = vmax.f32 %v5965_v55, %v5966_v8 }
 0x2d2   :  { %v2013_v20 = vpop.f32.mrf.mxu0  ;;  %v4042_v58 = vpop.f32.mrf.mxu1  ;;  %v5088_v7 = vmax.f32 %v4039_v52, 0.0  ;;  %v5956_v43 = vrot.slane %v5955_v39, 1  ;;  %v2906_v13 = vmax.f32 %v2011_v32, 0.0  ;;  %v5963_v29 = vrot.slane %v5962_v3, 1 }
 0x2d3   :  { %4284 = vmatprep.mubr.bf16.mxu1 %v3289_v49  ;;  %v5974_v40 = vmax.f32 %v5972_v30, %v5973_v17  ;;  %v5089_v1 = vmax.f32 %v4041_v12, 0.0  ;;  %v5968_v62 = vrot.slane %v5967_v35, 2  ;;  %v4043_v15 = vadd.f32 %v4042_v58, %v8769_v37 }
 0x2d4   :  { %v2015_v57 = vpop.f32.mrf.mxu0  ;;  %v4046_v41 = vpop.f32.mrf.mxu1  ;;  %4285 = vmatmul.mubr.bf16.gmra.mxu1 %v3288_v47  ;;  %v2907_v42 = vmax.f32 %v2013_v20, 0.0  ;;  %v7560_v8 = vsel %vm7499_vm4, %v5943_v50, %v7559_v2  ;;  %v5950_v52 = vmax.f32 %v5948_v44, %v5949_v51  ;;  %v8283_v2 = vld [vmem:[%s10216_s0 + $0x2d0] sm:$0xff]   ;;  %v5957_v50 = vmax.f32 %v5955_v39, %v5956_v43 }
 0x2d5   :  { %v5979_v38 = vmax.f32 %v5087_v23, %v5089_v1  ;;  %v5975_v16 = vrot.slane %v5974_v40, 2  ;;  %v5090_v6 = vmax.f32 %v4043_v15, 0.0  ;;  %v2908_v55 = vmax.f32 %v2015_v57, 0.0 }
 0x2d6   :  { %v2017_v53 = vpop.f32.mrf.mxu0  ;;  %v4048_v18 = vpop.f32.mrf.mxu1  ;;  %v4047_v9 = vadd.f32 %v4046_v41, %v8764_v31  ;;  %v5969_v30 = vmax.f32 %v5967_v35, %v5968_v62  ;;  %v5964_v62 = vmax.f32 %v5962_v3, %v5963_v29 }
 0x2d7   :  { %v2909_v48 = vmax.f32 %v2017_v53, 0.0  ;;  %v5980_v46 = vrot.slane %v5979_v38, 4  ;;  %v5986_v5 = vmax.f32 %v5088_v7, %v5090_v6  ;;  %v4049_v45 = vadd.f32 %v4048_v18, %v8769_v37 }
 0x2d8   :  { %v2021_v61 = vpop.f32.mrf.mxu0  ;;  %8030 = vmatmul.mubr.msk.bf16.gmra.mxu0 %vm945_vm1, %v8282_v19  ;;  %v4050_v27 = vpop.f32.mrf.mxu1  ;;  %v5976_v12 = vmax.f32 %v5974_v40, %v5975_v16  ;;  %v3290_v47 = vpack.c.bf16 %v2908_v55, %v2906_v13  ;;  %v5091_v23 = vmax.f32 %v4047_v9, 0.0  ;;  %v5970_v15 = vrot.slane %v5969_v30, 1 }
 0x2d9   :  { %v3291_v26 = vpack.c.bf16 %v2909_v48, %v2907_v42  ;;  %2269 = vmatprep.mubr.bf16.mxu0 %v8343_v4  ;;  %v5981_v49 = vmax.f32 %v5979_v38, %v5980_v46  ;;  %v4051_v32 = vadd.f32 %v4050_v27, %v8764_v31  ;;  %v5987_v20 = vrot.slane %v5986_v5, 4 }
 0x2da   :  { %v2023_v17 = vpop.f32.mrf.mxu0  ;;  %v4052_v58 = vpop.f32.mrf.mxu1  ;;  %v5092_v51 = vmax.f32 %v4049_v45, 0.0  ;;  %v7567_v18 = vsel %vm7499_vm4, %v5950_v52, %v9206_v10  ;;  %v5977_v13 = vrot.slane %v5976_v12, 1  ;;  %v5971_v46 = vmax.f32 %v5969_v30, %v5970_v15 }
 0x2db   :  { %4294 = vmatprep.mubr.bf16.mxu1 %v3291_v26  ;;  %v5982_v35 = vrot.slane %v5981_v49, 2  ;;  %v5093_v1 = vmax.f32 %v4051_v32, 0.0  ;;  %v4053_v57 = vadd.f32 %v4052_v58, %v8769_v37  ;;  %v5988_v41 = vmax.f32 %v5986_v5, %v5987_v20 }
 0x2dc   :  { %v2025_v19 = vpop.f32.mrf.mxu0  ;;  %v4056_v44 = vpop.f32.mrf.mxu1  ;;  %4295 = vmatmul.mubr.bf16.gmra.mxu1 %v3290_v47  ;;  %v2911_v16 = vmax.f32 %v2023_v17, 0.0  ;;  %v2910_v29 = vmax.f32 %v2021_v61, 0.0  ;;  %v7561_v10 = vsel %vm7501_vm5, %v5957_v50, %v7560_v8  ;;  %v7568_v52 = vsel %vm7501_vm5, %v5964_v62, %v7567_v18 }
 0x2dd   :  { %v5983_v40 = vmax.f32 %v5981_v49, %v5982_v35  ;;  %v5993_v7 = vmax.f32 %v5091_v23, %v5093_v1  ;;  %v5094_v38 = vmax.f32 %v4053_v57, 0.0  ;;  %v5989_v53 = vrot.slane %v5988_v41, 2  ;;  %v8284_v57 = vld [vmem:[%s10216_s0 + $0x2d8] sm:$0xff]  }
 0x2de   :  { %v2027_v42 = vpop.f32.mrf.mxu0  ;;  %v2912_v6 = vmax.f32 %v2025_v19, 0.0  ;;  %v4058_v48 = vpop.f32.mrf.mxu1  ;;  %v4057_v32 = vadd.f32 %v4056_v44, %v8764_v31  ;;  %v5978_v61 = vmax.f32 %v5976_v12, %v5977_v13  ;;  %v7562_v19 = vsel %vm7503_vm6, %v5971_v46, %v7561_v10 }
 0x2df   :  { %v2913_v55 = vmax.f32 %v2027_v42, 0.0  ;;  %v5994_v39 = vrot.slane %v5993_v7, 4  ;;  %v6000_v3 = vmax.f32 %v5092_v51, %v5094_v38  ;;  %v5990_v9 = vmax.f32 %v5988_v41, %v5989_v53 }
 0x2e0   :  { %v2031_v43 = vpop.f32.mrf.mxu0  ;;  %8031 = vmatmul.mubr.msk.bf16.gmra.mxu0 %vm945_vm1, %v8283_v2  ;;  %v4060_v26 = vpop.f32.mrf.mxu1  ;;  %v5984_v27 = vrot.slane %v5983_v40, 1  ;;  %v3292_v20 = vpack.c.bf16 %v2912_v6, %v2910_v29  ;;  %v4059_v2 = vadd.f32 %v4058_v48, %v8769_v37  ;;  %v5095_v44 = vmax.f32 %v4057_v32, 0.0 }
 0x2e1   :  { %v3293_v5 = vpack.c.bf16 %v2913_v55, %v2911_v16  ;;  %2279 = vmatprep.mubr.bf16.mxu0 %v8343_v4  ;;  %v5995_v49 = vmax.f32 %v5993_v7, %v5994_v39  ;;  %v6001_v45 = vrot.slane %v6000_v3, 4  ;;  %v4061_v47 = vadd.f32 %v4060_v26, %v8764_v31 }
 0x2e2   :  { %v2033_v17 = vpop.f32.mrf.mxu0  ;;  %v4062_v30 = vpop.f32.mrf.mxu1  ;;  %v5991_v8 = vrot.slane %v5990_v9, 1  ;;  %v5985_v15 = vmax.f32 %v5983_v40, %v5984_v27  ;;  %v2914_v18 = vmax.f32 %v2031_v43, 0.0  ;;  %v7569_v43 = vsel %vm7503_vm6, %v5978_v61, %v7568_v52 }
 0x2e3   :  { %4304 = vmatprep.mubr.bf16.mxu1 %v3293_v5  ;;  %v5996_v58 = vrot.slane %v5995_v49, 2  ;;  %v6002_v35 = vmax.f32 %v6000_v3, %v6001_v45  ;;  %v4063_v23 = vadd.f32 %v4062_v30, %v8769_v37  ;;  %v5097_v50 = vmax.f32 %v4061_v47, 0.0 }
 0x2e4   :  { %v2035_v1 = vpop.f32.mrf.mxu0  ;;  %v4066_v62 = vpop.f32.mrf.mxu1  ;;  %4305 = vmatmul.mubr.bf16.gmra.mxu1 %v3292_v20  ;;  %v2915_v7 = vmax.f32 %v2033_v17, 0.0  ;;  %v5992_v48 = vmax.f32 %v5990_v9, %v5991_v8  ;;  %v5096_v3 = vmax.f32 %v4059_v2, 0.0  ;;  %v7563_v32 = vsel %vm7505_vm7, %v5985_v15, %v7562_v19 }
 0x2e5   :  { %v5997_v41 = vmax.f32 %v5995_v49, %v5996_v58  ;;  %v6003_v12 = vrot.slane %v6002_v35, 2  ;;  %v5098_v38 = vmax.f32 %v4063_v23, 0.0  ;;  %v2916_v42 = vmax.f32 %v2035_v1, 0.0  ;;  %v8285_v23 = vld [vmem:[%s10216_s0 + $0x2e0] sm:$0xff]  }
 0x2e6   :  { %v2037_v51 = vpop.f32.mrf.mxu0  ;;  %v4068_v16 = vpop.f32.mrf.mxu1  ;;  %v4067_v13 = vadd.f32 %v4066_v62, %v8764_v31  ;;  %v6007_v40 = vmax.f32 %v5095_v44, %v5097_v50  ;;  %v7570_v1 = vsel %vm7505_vm7, %v5992_v48, %v7569_v43 }
 0x2e7   :  { %v2917_v53 = vmax.f32 %v2037_v51, 0.0  ;;  %v5998_v6 = vrot.slane %v5997_v41, 1  ;;  %v6004_v55 = vmax.f32 %v6002_v35, %v6003_v12  ;;  %v4069_v27 = vadd.f32 %v4068_v16, %v8769_v37 }
 0x2e8   :  { %v2041_v39 = vpop.f32.mrf.mxu0  ;;  %8032 = vmatmul.mubr.msk.bf16.gmra.mxu0 %vm945_vm1, %v8284_v57  ;;  %v4070_v29 = vpop.f32.mrf.mxu1  ;;  %v6014_v17 = vmax.f32 %v5096_v3, %v5098_v38  ;;  %v3294_v10 = vpack.c.bf16 %v2916_v42, %v2914_v18  ;;  %v5099_v30 = vmax.f32 %v4067_v13, 0.0  ;;  %v6008_v19 = vrot.slane %v6007_v40, 4 }
 0x2e9   :  { %v3295_v46 = vpack.c.bf16 %v2917_v53, %v2915_v7  ;;  %2289 = vmatprep.mubr.bf16.mxu0 %v8343_v4  ;;  %v5999_v5 = vmax.f32 %v5997_v41, %v5998_v6  ;;  %v6005_v26 = vrot.slane %v6004_v55, 1  ;;  %v4071_v49 = vadd.f32 %v4070_v29, %v8764_v31 }
 0x2ea   :  { %v2043_v45 = vpop.f32.mrf.mxu0  ;;  %v4072_v9 = vpop.f32.mrf.mxu1  ;;  %v5100_v8 = vmax.f32 %v4069_v27, 0.0  ;;  %v6015_v51 = vrot.slane %v6014_v17, 4  ;;  %v2918_v42 = vmax.f32 %v2041_v39, 0.0  ;;  %v6009_v3 = vmax.f32 %v6007_v40, %v6008_v19 }
 0x2eb   :  { %4314 = vmatprep.mubr.bf16.mxu1 %v3295_v46  ;;  %v7564_v20 = vsel %vm7507_vm8, %v5999_v5, %v7563_v32  ;;  %v6006_v47 = vmax.f32 %v6004_v55, %v6005_v26  ;;  %v5101_v58 = vmax.f32 %v4071_v49, 0.0  ;;  %v4073_v52 = vadd.f32 %v4072_v9, %v8769_v37 }
 0x2ec   :  { %v2045_v35 = vpop.f32.mrf.mxu0  ;;  %7766 = vst [vmem:[#allocation2 + $0x40] sm:$0xff] %v7564_v20  ;;  %v4076_v61 = vpop.f32.mrf.mxu1  ;;  %4315 = vmatmul.mubr.bf16.gmra.mxu1 %v3294_v10  ;;  %v2919_v62 = vmax.f32 %v2043_v45, 0.0  ;;  %v6016_v5 = vmax.f32 %v6014_v17, %v6015_v51  ;;  %v8286_v45 = vld [vmem:[%s10216_s0 + $0x2e8] sm:$0xff]  }
 0x2ed   :  { %v7571_v57 = vsel %vm7507_vm8, %v6006_v47, %v7570_v1  ;;  %v6021_v2 = vmax.f32 %v5099_v30, %v5101_v58  ;;  %v5102_v15 = vmax.f32 %v4073_v52, 0.0  ;;  %v2920_v41 = vmax.f32 %v2045_v35, 0.0 }
 0x2ee   :  { %v2047_v50 = vpop.f32.mrf.mxu0  ;;  %7767 = vst [vmem:[#allocation2 + $0x48] sm:$0xff] %v7571_v57  ;;  %v4078_v44 = vpop.f32.mrf.mxu1  ;;  %v4077_v7 = vadd.f32 %v4076_v61, %v8764_v31  ;;  %v6017_v1 = vrot.slane %v6016_v5, 2 }
 0x2ef   :  { %v2921_v12 = vmax.f32 %v2047_v50, 0.0  ;;  %v6022_v53 = vrot.slane %v6021_v2, 4  ;;  %v6028_v16 = vmax.f32 %v5100_v8, %v5102_v15  ;;  %v4079_v18 = vadd.f32 %v4078_v44, %v8769_v37 }
 0x2f0   :  { %v2051_v38 = vpop.f32.mrf.mxu0  ;;  %8033 = vmatmul.mubr.msk.bf16.gmra.mxu0 %vm945_vm1, %v8285_v23  ;;  %v4080_v55 = vpop.f32.mrf.mxu1  ;;  %v3296_v46 = vpack.c.bf16 %v2920_v41, %v2918_v42  ;;  %v5103_v26 = vmax.f32 %v4077_v7, 0.0  ;;  %v6010_v23 = vrot.slane %v6009_v3, 2 }
 0x2f1   :  { %v3297_v6 = vpack.c.bf16 %v2921_v12, %v2919_v62  ;;  %2299 = vmatprep.mubr.bf16.mxu0 %v8343_v4  ;;  %v4081_v13 = vadd.f32 %v4080_v55, %v8764_v31  ;;  %v6023_v43 = vmax.f32 %v6021_v2, %v6022_v53  ;;  %v6029_v32 = vrot.slane %v6028_v16, 4 }
 0x2f2   :  { %v2053_v48 = vpop.f32.mrf.mxu0  ;;  %v4082_v29 = vpop.f32.mrf.mxu1  ;;  %v5104_v9 = vmax.f32 %v4079_v18, 0.0  ;;  %v2922_v2 = vmax.f32 %v2051_v38, 0.0  ;;  %v6011_v53 = vmax.f32 %v6009_v3, %v6010_v23  ;;  %v8287_v38 = vld [vmem:[%s10216_s0 + $0x2f0] sm:$0xff]   ;;  %v9267_v18 = vmax.f32 %v6016_v5, %v6017_v1 }
 0x2f3   :  { %4324 = vmatprep.mubr.bf16.mxu1 %v3297_v6  ;;  %v5105_v27 = vmax.f32 %v4081_v13, 0.0  ;;  %v4083_v39 = vadd.f32 %v4082_v29, %v8769_v37  ;;  %v2923_v30 = vmax.f32 %v2053_v48, 0.0  ;;  %v6024_v19 = vrot.slane %v6023_v43, 2 }
 0x2f4   :  { %v2055_v49 = vpop.f32.mrf.mxu0  ;;  %v4086_v10 = vpop.f32.mrf.mxu1  ;;  %4325 = vmatmul.mubr.bf16.gmra.mxu1 %v3296_v46  ;;  %v6030_v8 = vmax.f32 %v6028_v16, %v6029_v32 }
 0x2f5   :  { %v6035_v20 = vmax.f32 %v5103_v26, %v5105_v27  ;;  %v5106_v40 = vmax.f32 %v4083_v39, 0.0  ;;  %v2924_v58 = vmax.f32 %v2055_v49, 0.0  ;;  %v4087_v41 = vadd.f32 %v4086_v10, %v8764_v31 }
 0x2f6   :  { %v2057_v47 = vpop.f32.mrf.mxu0  ;;  %v4088_v35 = vpop.f32.mrf.mxu1  ;;  %v6025_v13 = vmax.f32 %v6023_v43, %v6024_v19  ;;  %v6031_v29 = vrot.slane %v6030_v8, 2 }
 0x2f7   :  { %v2925_v17 = vmax.f32 %v2057_v47, 0.0  ;;  %v6036_v52 = vrot.slane %v6035_v20, 4  ;;  %v6042_v61 = vmax.f32 %v5104_v9, %v5106_v40  ;;  %v4089_v12 = vadd.f32 %v4088_v35, %v8769_v37 }
 0x2f8   :  { %v2061_v57 = vpop.f32.mrf.mxu0  ;;  %8034 = vmatmul.mubr.msk.bf16.gmra.mxu0 %vm945_vm1, %v8286_v45  ;;  %v4090_v62 = vpop.f32.mrf.mxu1  ;;  %v3298_v7 = vpack.c.bf16 %v2924_v58, %v2922_v2  ;;  %v5107_v27 = vmax.f32 %v4087_v41, 0.0  ;;  %v6032_v1 = vmax.f32 %v6030_v8, %v6031_v29  ;;  %v8288_v8 = vld [vmem:[%s10216_s0 + $0x2f8] sm:$0xff]  }
 0x2f9   :  { %v3299_v50 = vpack.c.bf16 %v2925_v17, %v2923_v30  ;;  %2309 = vmatprep.mubr.bf16.mxu0 %v8343_v4  ;;  %v6043_v15 = vrot.slane %v6042_v61, 4  ;;  %v4091_v44 = vadd.f32 %v4090_v62, %v8764_v31  ;;  %v6037_v6 = vmax.f32 %v6035_v20, %v6036_v52 }
 0x2fa   :  { %v2063_v51 = vpop.f32.mrf.mxu0  ;;  %v4092_v42 = vpop.f32.mrf.mxu1  ;;  %v5108_v39 = vmax.f32 %v4089_v12, 0.0  ;;  %v6012_v20 = vrot.slane %v6011_v53, 1  ;;  %v6026_v30 = vrot.slane %v6025_v13, 1  ;;  %v2926_v58 = vmax.f32 %v2061_v57, 0.0 }
 0x2fb   :  { %4334 = vmatprep.mubr.bf16.mxu1 %v3299_v50  ;;  %v5109_v55 = vmax.f32 %v4091_v44, 0.0  ;;  %v4093_v48 = vadd.f32 %v4092_v42, %v8769_v37  ;;  %v6044_v26 = vmax.f32 %v6042_v61, %v6043_v15  ;;  %v2927_v3 = vmax.f32 %v2063_v51, 0.0 }
 0x2fc   :  { %v2065_v16 = vpop.f32.mrf.mxu0  ;;  %v4096_v46 = vpop.f32.mrf.mxu1  ;;  %4335 = vmatmul.mubr.bf16.gmra.mxu1 %v3298_v7  ;;  %v6038_v40 = vrot.slane %v6037_v6, 2  ;;  %v6019_v50 = vrot.slane %v9267_v18, 1  ;;  %v6013_v7 = vmax.f32 %v6011_v53, %v6012_v20  ;;  %v6027_v42 = vmax.f32 %v6025_v13, %v6026_v30 }
 0x2fd   :  { %v5110_v45 = vmax.f32 %v4093_v48, 0.0  ;;  %v2928_v32 = vmax.f32 %v2065_v16, 0.0  ;;  %v6049_v47 = vmax.f32 %v5107_v27, %v5109_v55  ;;  %v4097_v5 = vadd.f32 %v4096_v46, %v8764_v31 }
 0x2fe   :  { %v2067_v49 = vpop.f32.mrf.mxu0  ;;  %v4098_v9 = vpop.f32.mrf.mxu1  ;;  %v6045_v52 = vrot.slane %v6044_v26, 2  ;;  %v6039_v41 = vmax.f32 %v6037_v6, %v6038_v40  ;;  %v6033_v48 = vrot.slane %v6032_v1, 1 }
 0x2ff   :  { %v2929_v10 = vmax.f32 %v2067_v49, 0.0  ;;  %v6056_v17 = vmax.f32 %v5108_v39, %v5110_v45  ;;  %v4099_v61 = vadd.f32 %v4098_v9, %v8769_v37  ;;  %v3300_v62 = vpack.c.bf16 %v2928_v32, %v2926_v58 }
 0x300   :  { %v2071_v43 = vpop.f32.mrf.mxu0  ;;  %8035 = vmatmul.mubr.msk.bf16.gmra.mxu0 %vm945_vm1, %v8287_v38  ;;  %v4100_v23 = vpop.f32.mrf.mxu1  ;;  %v6050_v12 = vrot.slane %v6049_v47, 4  ;;  %v5111_v57 = vmax.f32 %v4097_v5, 0.0  ;;  %v6046_v46 = vmax.f32 %v6044_v26, %v6045_v52 }
 0x301   :  { %v3301_v35 = vpack.c.bf16 %v2929_v10, %v2927_v3  ;;  %2319 = vmatprep.mubr.bf16.mxu0 %v8343_v4  ;;  %v4101_v19 = vadd.f32 %v4100_v23, %v8764_v31  ;;  %v6057_v55 = vrot.slane %v6056_v17, 4  ;;  %v5112_v29 = vmax.f32 %v4099_v61, 0.0 }
 0x302   :  { %v2073_v2 = vpop.f32.mrf.mxu0  ;;  %v4102_v15 = vpop.f32.mrf.mxu1  ;;  %v6040_v10 = vrot.slane %v6039_v41, 1  ;;  %v6051_v9 = vmax.f32 %v6049_v47, %v6050_v12  ;;  %v2930_v5 = vmax.f32 %v2071_v43, 0.0  ;;  %v6047_v23 = vrot.slane %v6046_v46, 1 }
 0x303   :  { %4344 = vmatprep.mubr.bf16.mxu1 %v3301_v35  ;;  %v5113_v44 = vmax.f32 %v4101_v19, 0.0  ;;  %v4103_v16 = vadd.f32 %v4102_v15, %v8769_v37  ;;  %v2931_v39 = vmax.f32 %v2073_v2, 0.0  ;;  %v6058_v20 = vmax.f32 %v6056_v17, %v6057_v55 }
 0x304   :  { %v2075_v51 = vpop.f32.mrf.mxu0  ;;  %v4106_v38 = vpop.f32.mrf.mxu1  ;;  %4345 = vmatmul.mubr.bf16.gmra.mxu1 %v3300_v62  ;;  %v6020_v35 = vmax.f32 %v9267_v18, %v6019_v50  ;;  %v7572_v19 = vsel %vm7495_vm2, %v6027_v42, %v6013_v7  ;;  %v6052_v43 = vrot.slane %v6051_v9, 2  ;;  %v8289_v18 = vld [vmem:[%s10216_s0 + $0x300] sm:$0xff]   ;;  %v6034_v50 = vmax.f32 %v6032_v1, %v6033_v48 }
 0x305   :  { %v6063_v27 = vmax.f32 %v5111_v57, %v5113_v44  ;;  %v5114_v49 = vmax.f32 %v4103_v16, 0.0  ;;  %v2932_v3 = vmax.f32 %v2075_v51, 0.0  ;;  %v4107_v53 = vadd.f32 %v4106_v38, %v8764_v31 }
 0x306   :  { %v2077_v6 = vpop.f32.mrf.mxu0  ;;  %v4108_v32 = vpop.f32.mrf.mxu1  ;;  %v6059_v55 = vrot.slane %v6058_v20, 2  ;;  %v6048_v42 = vmax.f32 %v6046_v46, %v6047_v23 }
 0x307   :  { %v2933_v45 = vmax.f32 %v2077_v6, 0.0  ;;  %v6064_v40 = vrot.slane %v6063_v27, 4  ;;  %v6070_v30 = vmax.f32 %v5112_v29, %v5114_v49  ;;  %v4109_v52 = vadd.f32 %v4108_v32, %v8769_v37 }
 0x308   :  { %v2081_v13 = vpop.f32.mrf.mxu0  ;;  %8036 = vmatmul.mubr.msk.bf16.gmra.mxu0 %vm945_vm1, %v8288_v8  ;;  %v4110_v58 = vpop.f32.mrf.mxu1  ;;  %v3302_v15 = vpack.c.bf16 %v2932_v3, %v2930_v5  ;;  %v5115_v12 = vmax.f32 %v4107_v53, 0.0  ;;  %v6041_v8 = vmax.f32 %v6039_v41, %v6040_v10  ;;  %v6060_v48 = vmax.f32 %v6058_v20, %v6059_v55 }
 0x309   :  { %v3303_v26 = vpack.c.bf16 %v2933_v45, %v2931_v39  ;;  %2329 = vmatprep.mubr.bf16.mxu0 %v8343_v4  ;;  %v4111_v47 = vadd.f32 %v4110_v58, %v8764_v31  ;;  %v6065_v2 = vmax.f32 %v6063_v27, %v6064_v40  ;;  %v6071_v62 = vrot.slane %v6070_v30, 4 }
 0x30a   :  { %v2083_v61 = vpop.f32.mrf.mxu0  ;;  %v4112_v17 = vpop.f32.mrf.mxu1  ;;  %v5116_v38 = vmax.f32 %v4109_v52, 0.0  ;;  %v6053_v40 = vmax.f32 %v6051_v9, %v6052_v43  ;;  %v2934_v46 = vmax.f32 %v2081_v13, 0.0 }
 0x30b   :  { %4354 = vmatprep.mubr.bf16.mxu1 %v3303_v26  ;;  %v5117_v57 = vmax.f32 %v4111_v47, 0.0  ;;  %v4113_v44 = vadd.f32 %v4112_v17, %v8769_v37  ;;  %v6072_v16 = vmax.f32 %v6070_v30, %v6071_v62  ;;  %v6066_v39 = vrot.slane %v6065_v2, 2 }
 0x30c   :  { %v2085_v51 = vpop.f32.mrf.mxu0  ;;  %v4116_v7 = vpop.f32.mrf.mxu1  ;;  %4355 = vmatmul.mubr.bf16.gmra.mxu1 %v3302_v15  ;;  %v2935_v49 = vmax.f32 %v2083_v61, 0.0  ;;  %v7579_v61 = vsel %vm7495_vm2, %v6034_v50, %v6020_v35  ;;  %v9298_v62 = vsel %vm7497_vm3, %v6041_v8, %v7572_v19  ;;  %v6054_v35 = vrot.slane %v6053_v40, 1 }
 0x30d   :  { %v6077_v29 = vmax.f32 %v5115_v12, %v5117_v57  ;;  %v5118_v27 = vmax.f32 %v4113_v44, 0.0  ;;  %v2936_v3 = vmax.f32 %v2085_v51, 0.0  ;;  %v4117_v1 = vadd.f32 %v4116_v7, %v8764_v31  ;;  %v8290_v51 = vld [vmem:[%s10216_s0 + $0x308] sm:$0xff]  }
 0x30e   :  { %v2087_v6 = vpop.f32.mrf.mxu0  ;;  %v4118_v32 = vpop.f32.mrf.mxu1  ;;  %v6073_v10 = vrot.slane %v6072_v16, 2  ;;  %v6067_v15 = vmax.f32 %v6065_v2, %v6066_v39  ;;  %v6061_v8 = vrot.slane %v6060_v48, 1 }
 0x30f   :  { %v2937_v45 = vmax.f32 %v2087_v6, 0.0  ;;  %v6078_v53 = vrot.slane %v6077_v29, 4  ;;  %v6084_v5 = vmax.f32 %v5116_v38, %v5118_v27  ;;  %v4119_v52 = vadd.f32 %v4118_v32, %v8769_v37 }
 0x310   :  { %v2091_v41 = vpop.f32.mrf.mxu0  ;;  %8037 = vmatmul.mubr.msk.bf16.gmra.mxu0 %vm945_vm1, %v8289_v18  ;;  %v4120_v26 = vpop.f32.mrf.mxu1  ;;  %v3304_v20 = vpack.c.bf16 %v2936_v3, %v2934_v46  ;;  %v5119_v12 = vmax.f32 %v4117_v1, 0.0  ;;  %v9304_v18 = vsel %vm7497_vm3, %v6048_v42, %v7579_v61  ;;  %v6074_v50 = vmax.f32 %v6072_v16, %v6073_v10 }
 0x311   :  { %v3305_v30 = vpack.c.bf16 %v2937_v45, %v2935_v49  ;;  %2339 = vmatprep.mubr.bf16.mxu0 %v8343_v4  ;;  %v6079_v58 = vmax.f32 %v6077_v29, %v6078_v53  ;;  %v6085_v23 = vrot.slane %v6084_v5, 4  ;;  %v4121_v9 = vadd.f32 %v4120_v26, %v8764_v31 }
 0x312   :  { %v2093_v47 = vpop.f32.mrf.mxu0  ;;  %v4122_v17 = vpop.f32.mrf.mxu1  ;;  %v5120_v55 = vmax.f32 %v4119_v52, 0.0  ;;  %v6068_v45 = vrot.slane %v6067_v15, 1  ;;  %v2938_v1 = vmax.f32 %v2091_v41, 0.0  ;;  %v6055_v26 = vmax.f32 %v6053_v40, %v6054_v35  ;;  %v8291_v40 = vld [vmem:[%s10216_s0 + $0x310] sm:$0xff]  }
 0x313   :  { %4364 = vmatprep.mubr.bf16.mxu1 %v3305_v30  ;;  %v6080_v13 = vrot.slane %v6079_v58, 2  ;;  %v6086_v43 = vmax.f32 %v6084_v5, %v6085_v23  ;;  %v5121_v57 = vmax.f32 %v4121_v9, 0.0  ;;  %v4123_v19 = vadd.f32 %v4122_v17, %v8769_v37 }
 0x314   :  { %v2095_v44 = vpop.f32.mrf.mxu0  ;;  %v4126_v2 = vpop.f32.mrf.mxu1  ;;  %4365 = vmatmul.mubr.bf16.gmra.mxu1 %v3304_v20  ;;  %v2939_v38 = vmax.f32 %v2093_v47, 0.0  ;;  %v6075_v5 = vrot.slane %v6074_v50, 1  ;;  %v6062_v47 = vmax.f32 %v6060_v48, %v6061_v8  ;;  %v6069_v35 = vmax.f32 %v6067_v15, %v6068_v45 }
 0x315   :  { %v6091_v7 = vmax.f32 %v5119_v12, %v5121_v57  ;;  %v6081_v27 = vmax.f32 %v6079_v58, %v6080_v13  ;;  %v5122_v6 = vmax.f32 %v4123_v19, 0.0  ;;  %v2940_v39 = vmax.f32 %v2095_v44, 0.0 }
 0x316   :  { %v2097_v29 = vpop.f32.mrf.mxu0  ;;  %v4128_v3 = vpop.f32.mrf.mxu1  ;;  %v6087_v32 = vrot.slane %v6086_v43, 2  ;;  %v4127_v53 = vadd.f32 %v4126_v2, %v8764_v31  ;;  %v6076_v19 = vmax.f32 %v6074_v50, %v6075_v5 }
 0x317   :  { %v2941_v49 = vmax.f32 %v2097_v29, 0.0  ;;  %v6092_v42 = vrot.slane %v6091_v7, 4  ;;  %v6098_v10 = vmax.f32 %v5120_v55, %v5122_v6  ;;  %v4129_v23 = vadd.f32 %v4128_v3, %v8769_v37 }
 0x318   :  { %v2101_v16 = vpop.f32.mrf.mxu0  ;;  %8038 = vmatmul.mubr.msk.bf16.gmra.mxu0 %vm945_vm1, %v8290_v51  ;;  %v4130_v30 = vpop.f32.mrf.mxu1  ;;  %v6082_v61 = vrot.slane %v6081_v27, 1  ;;  %v3306_v17 = vpack.c.bf16 %v2940_v39, %v2938_v1  ;;  %v6088_v12 = vmax.f32 %v6086_v43, %v6087_v32  ;;  %v5123_v57 = vmax.f32 %v4127_v53, 0.0 }
 0x319   :  { %v3307_v46 = vpack.c.bf16 %v2941_v49, %v2939_v38  ;;  %2349 = vmatprep.mubr.bf16.mxu0 %v8343_v4  ;;  %v6093_v58 = vmax.f32 %v6091_v7, %v6092_v42  ;;  %v4131_v52 = vadd.f32 %v4130_v30, %v8764_v31  ;;  %v6099_v20 = vrot.slane %v6098_v10, 4 }
 0x31a   :  { %v2103_v9 = vpop.f32.mrf.mxu0  ;;  %v4132_v13 = vpop.f32.mrf.mxu1  ;;  %v5124_v7 = vmax.f32 %v4129_v23, 0.0  ;;  %v6083_v42 = vmax.f32 %v6081_v27, %v6082_v61  ;;  %v6089_v53 = vrot.slane %v6088_v12, 1  ;;  %v2942_v1 = vmax.f32 %v2101_v16, 0.0 }
 0x31b   :  { %4374 = vmatprep.mubr.bf16.mxu1 %v3307_v46  ;;  %v6094_v41 = vrot.slane %v6093_v58, 2  ;;  %v5125_v44 = vmax.f32 %v4131_v52, 0.0  ;;  %v6100_v2 = vmax.f32 %v6098_v10, %v6099_v20  ;;  %v4133_v55 = vadd.f32 %v4132_v13, %v8769_v37 }
 0x31c   :  { %v2105_v51 = vpop.f32.mrf.mxu0  ;;  %v4136_v48 = vpop.f32.mrf.mxu1  ;;  %4375 = vmatmul.mubr.bf16.gmra.mxu1 %v3306_v17  ;;  %v2943_v29 = vmax.f32 %v2103_v9, 0.0  ;;  %v7581_v9 = vsel %vm7499_vm4, %v6062_v47, %v9304_v18 }
 0x31d   :  { %v6095_v8 = vmax.f32 %v6093_v58, %v6094_v41  ;;  %v6105_v38 = vmax.f32 %v5123_v57, %v5125_v44  ;;  %v6101_v6 = vrot.slane %v6100_v2, 2  ;;  %v5126_v39 = vmax.f32 %v4133_v55, 0.0 }
 0x31e   :  { %v2107_v43 = vpop.f32.mrf.mxu0  ;;  %v2944_v49 = vmax.f32 %v2105_v51, 0.0  ;;  %v4138_v32 = vpop.f32.mrf.mxu1  ;;  %v4137_v10 = vadd.f32 %v4136_v48, %v8764_v31  ;;  %v7574_v58 = vsel %vm7499_vm4, %v6055_v26, %v9298_v62  ;;  %v7582_v41 = vsel %vm7501_vm5, %v6076_v19, %v7581_v9  ;;  %v8292_v26 = vld [vmem:[%s10216_s0 + $0x318] sm:$0xff]  }
 0x31f   :  { %v2945_v3 = vmax.f32 %v2107_v43, 0.0  ;;  %v6106_v15 = vrot.slane %v6105_v38, 4  ;;  %v6102_v45 = vmax.f32 %v6100_v2, %v6101_v6  ;;  %v6112_v5 = vmax.f32 %v5124_v7, %v5126_v39 }
 0x320   :  { %v2111_v50 = vpop.f32.mrf.mxu0  ;;  %8039 = vmatmul.mubr.msk.bf16.gmra.mxu0 %vm945_vm1, %v8291_v40  ;;  %v4140_v30 = vpop.f32.mrf.mxu1  ;;  %v6096_v23 = vrot.slane %v6095_v8, 1  ;;  %v7575_v61 = vsel %vm7501_vm5, %v6069_v35, %v7574_v58  ;;  %v3308_v17 = vpack.c.bf16 %v2944_v49, %v2942_v1  ;;  %v6090_v57 = vmax.f32 %v6088_v12, %v6089_v53 }
 0x321   :  { %v3309_v46 = vpack.c.bf16 %v2945_v3, %v2943_v29  ;;  %2359 = vmatprep.mubr.bf16.mxu0 %v8343_v4  ;;  %v6107_v52 = vmax.f32 %v6105_v38, %v6106_v15  ;;  %v4141_v27 = vadd.f32 %v4140_v30, %v8764_v31  ;;  %v6113_v20 = vrot.slane %v6112_v5, 4 }
 0x322   :  { %v2113_v16 = vpop.f32.mrf.mxu0  ;;  %v4142_v13 = vpop.f32.mrf.mxu1  ;;  %v7576_v40 = vsel %vm7503_vm6, %v6083_v42, %v7575_v61  ;;  %v6103_v2 = vrot.slane %v6102_v45, 1  ;;  %v5127_v47 = vmax.f32 %v4137_v10, 0.0  ;;  %v6097_v55 = vmax.f32 %v6095_v8, %v6096_v23 }
 0x323   :  { %4384 = vmatprep.mubr.bf16.mxu1 %v3309_v46  ;;  %v6108_v44 = vrot.slane %v6107_v52, 2  ;;  %v5129_v51 = vmax.f32 %v4141_v27, 0.0  ;;  %v6114_v18 = vmax.f32 %v6112_v5, %v6113_v20  ;;  %v4139_v7 = vadd.f32 %v4138_v32, %v8769_v37 }
 0x324   :  { %v2115_v62 = vpop.f32.mrf.mxu0  ;;  %v4146_v35 = vpop.f32.mrf.mxu1  ;;  %4385 = vmatmul.mubr.bf16.gmra.mxu1 %v3308_v17  ;;  %v4143_v12 = vadd.f32 %v4142_v13, %v8769_v37  ;;  %v2947_v29 = vmax.f32 %v2113_v16, 0.0  ;;  %v7583_v49 = vsel %vm7503_vm6, %v6090_v57, %v7582_v41  ;;  %v6104_v8 = vmax.f32 %v6102_v45, %v6103_v2  ;;  %v8293_v57 = vld [vmem:[%s10216_s0 + $0x320] sm:$0xff]  }
 0x325   :  { %v6109_v48 = vmax.f32 %v6107_v52, %v6108_v44  ;;  %v6115_v38 = vrot.slane %v6114_v18, 2  ;;  %v2948_v43 = vmax.f32 %v2115_v62, 0.0  ;;  %v6119_v42 = vmax.f32 %v5127_v47, %v5129_v51 }
 0x326   :  { %v2117_v19 = vpop.f32.mrf.mxu0  ;;  %v4148_v39 = vpop.f32.mrf.mxu1  ;;  %v4147_v53 = vadd.f32 %v4146_v35, %v8764_v31  ;;  %v2946_v32 = vmax.f32 %v2111_v50, 0.0  ;;  %v5130_v30 = vmax.f32 %v4143_v12, 0.0  ;;  %v7577_v27 = vsel %vm7505_vm7, %v6097_v55, %v7576_v40 }
 0x327   :  { %v2949_v6 = vmax.f32 %v2117_v19, 0.0  ;;  %v6110_v3 = vrot.slane %v6109_v48, 1  ;;  %v6116_v15 = vmax.f32 %v6114_v18, %v6115_v38  ;;  %v4149_v58 = vadd.f32 %v4148_v39, %v8769_v37 }
 0x328   :  { %v2121_v1 = vpop.f32.mrf.mxu0  ;;  %8040 = vmatmul.mubr.msk.bf16.gmra.mxu0 %vm945_vm1, %v8292_v26  ;;  %v4150_v10 = vpop.f32.mrf.mxu1  ;;  %v5128_v9 = vmax.f32 %v4139_v7, 0.0  ;;  %v3310_v61 = vpack.c.bf16 %v2948_v43, %v2946_v32  ;;  %v6120_v45 = vrot.slane %v6119_v42, 4  ;;  %v5131_v17 = vmax.f32 %v4147_v53, 0.0 }
 0x329   :  { %v3311_v5 = vpack.c.bf16 %v2949_v6, %v2947_v29  ;;  %2369 = vmatprep.mubr.bf16.mxu0 %v8343_v4  ;;  %v6111_v46 = vmax.f32 %v6109_v48, %v6110_v3  ;;  %v4151_v23 = vadd.f32 %v4150_v10, %v8764_v31  ;;  %v6117_v16 = vrot.slane %v6116_v15, 1 }
 0x32a   :  { %v2123_v52 = vpop.f32.mrf.mxu0  ;;  %v4152_v20 = vpop.f32.mrf.mxu1  ;;  %v7584_v44 = vsel %vm7505_vm7, %v6104_v8, %v7583_v49  ;;  %v6126_v40 = vmax.f32 %v5128_v9, %v5130_v30  ;;  %v5132_v2 = vmax.f32 %v4149_v58, 0.0  ;;  %v6121_v38 = vmax.f32 %v6119_v42, %v6120_v45 }
 0x32b   :  { %4394 = vmatprep.mubr.bf16.mxu1 %v3311_v5  ;;  %v7578_v50 = vsel %vm7507_vm8, %v6111_v46, %v7577_v27  ;;  %v5133_v13 = vmax.f32 %v4151_v23, 0.0  ;;  %v6118_v51 = vmax.f32 %v6116_v15, %v6117_v16  ;;  %v4153_v62 = vadd.f32 %v4152_v20, %v8769_v37 }
 0x32c   :  { %v2125_v41 = vpop.f32.mrf.mxu0  ;;  %7768 = vst [vmem:[#allocation2 + $0x50] sm:$0xff] %v7578_v50  ;;  %v4156_v26 = vpop.f32.mrf.mxu1  ;;  %4395 = vmatmul.mubr.bf16.gmra.mxu1 %v3310_v61  ;;  %v2951_v47 = vmax.f32 %v2123_v52, 0.0  ;;  %v2950_v6 = vmax.f32 %v2121_v1, 0.0  ;;  %v6127_v5 = vrot.slane %v6126_v40, 4  ;;  %v6122_v46 = vrot.slane %v6121_v38, 2  ;;  %v8294_v52 = vld [vmem:[%s10216_s0 + $0x328] sm:$0xff]  }
 0x32d   :  { %v6133_v18 = vmax.f32 %v5131_v17, %v5133_v13  ;;  %v7585_v55 = vsel %vm7507_vm8, %v6118_v51, %v7584_v44  ;;  %v5134_v48 = vmax.f32 %v4153_v62, 0.0  ;;  %v2952_v7 = vmax.f32 %v2125_v41, 0.0 }
 0x32e   :  { %v2127_v35 = vpop.f32.mrf.mxu0  ;;  %v4158_v19 = vpop.f32.mrf.mxu1  ;;  %7769 = vst [vmem:[#allocation2 + $0x58] sm:$0xff] %v7585_v55  ;;  %v4157_v29 = vadd.f32 %v4156_v26, %v8764_v31  ;;  %v6123_v44 = vmax.f32 %v6121_v38, %v6122_v46  ;;  %v6128_v51 = vmax.f32 %v6126_v40, %v6127_v5 }
 0x32f   :  { %v2953_v12 = vmax.f32 %v2127_v35, 0.0  ;;  %v6134_v39 = vrot.slane %v6133_v18, 4  ;;  %v6140_v49 = vmax.f32 %v5132_v2, %v5134_v48  ;;  %v4159_v8 = vadd.f32 %v4158_v19, %v8769_v37 }
 0x330   :  { %v2131_v43 = vpop.f32.mrf.mxu0  ;;  %8041 = vmatmul.mubr.msk.bf16.gmra.mxu0 %vm945_vm1, %v8293_v57  ;;  %v4160_v53 = vpop.f32.mrf.mxu1  ;;  %v3312_v10 = vpack.c.bf16 %v2952_v7, %v2950_v6  ;;  %v5135_v30 = vmax.f32 %v4157_v29, 0.0 }
 0x331   :  { %v3313_v3 = vpack.c.bf16 %v2953_v12, %v2951_v47  ;;  %2379 = vmatprep.mubr.bf16.mxu0 %v8343_v4  ;;  %v4161_v15 = vadd.f32 %v4160_v53, %v8764_v31  ;;  %v6135_v27 = vmax.f32 %v6133_v18, %v6134_v39  ;;  %v6141_v16 = vrot.slane %v6140_v49, 4 }
 0x332   :  { %v2133_v32 = vpop.f32.mrf.mxu0  ;;  %v4162_v42 = vpop.f32.mrf.mxu1  ;;  %v5136_v61 = vmax.f32 %v4159_v8, 0.0  ;;  %v2954_v35 = vmax.f32 %v2131_v43, 0.0  ;;  %v6129_v39 = vrot.slane %v6128_v51, 2  ;;  %v8295_v43 = vld [vmem:[%s10216_s0 + $0x330] sm:$0xff]   ;;  %v6124_v8 = vrot.slane %v6123_v44, 1 }
 0x333   :  { %4404 = vmatprep.mubr.bf16.mxu1 %v3313_v3  ;;  %v5137_v58 = vmax.f32 %v4161_v15, 0.0  ;;  %v4163_v1 = vadd.f32 %v4162_v42, %v8769_v37  ;;  %v2955_v17 = vmax.f32 %v2133_v32, 0.0  ;;  %v6136_v47 = vrot.slane %v6135_v27, 2 }
 0x334   :  { %v2135_v23 = vpop.f32.mrf.mxu0  ;;  %v4166_v9 = vpop.f32.mrf.mxu1  ;;  %4405 = vmatmul.mubr.bf16.gmra.mxu1 %v3312_v10  ;;  %v6142_v18 = vmax.f32 %v6140_v49, %v6141_v16 }
 0x335   :  { %v6147_v20 = vmax.f32 %v5135_v30, %v5137_v58  ;;  %v5138_v50 = vmax.f32 %v4163_v1, 0.0  ;;  %v2956_v13 = vmax.f32 %v2135_v23, 0.0  ;;  %v4167_v12 = vadd.f32 %v4166_v9, %v8764_v31 }
 0x336   :  { %v2137_v45 = vpop.f32.mrf.mxu0  ;;  %v4168_v57 = vpop.f32.mrf.mxu1  ;;  %v6137_v15 = vmax.f32 %v6135_v27, %v6136_v47  ;;  %v6143_v10 = vrot.slane %v6142_v18, 2 }
 0x337   :  { %v2957_v41 = vmax.f32 %v2137_v45, 0.0  ;;  %v6148_v62 = vrot.slane %v6147_v20, 4  ;;  %v6154_v26 = vmax.f32 %v5136_v61, %v5138_v50  ;;  %v4169_v19 = vadd.f32 %v4168_v57, %v8769_v37 }
 0x338   :  { %v2141_v2 = vpop.f32.mrf.mxu0  ;;  %8042 = vmatmul.mubr.msk.bf16.gmra.mxu0 %vm945_vm1, %v8294_v52  ;;  %v4170_v48 = vpop.f32.mrf.mxu1  ;;  %v3314_v29 = vpack.c.bf16 %v2956_v13, %v2954_v35  ;;  %v5139_v46 = vmax.f32 %v4167_v12, 0.0  ;;  %v6130_v61 = vmax.f32 %v6128_v51, %v6129_v39 }
 0x339   :  { %v3315_v55 = vpack.c.bf16 %v2957_v41, %v2955_v17  ;;  %2389 = vmatprep.mubr.bf16.mxu0 %v8343_v4  ;;  %v6155_v7 = vrot.slane %v6154_v26, 4  ;;  %v4171_v38 = vadd.f32 %v4170_v48, %v8764_v31  ;;  %v6149_v3 = vmax.f32 %v6147_v20, %v6148_v62 }
 0x33a   :  { %v2143_v40 = vpop.f32.mrf.mxu0  ;;  %v4172_v6 = vpop.f32.mrf.mxu1  ;;  %v5140_v30 = vmax.f32 %v4169_v19, 0.0  ;;  %v6138_v17 = vrot.slane %v6137_v15, 1  ;;  %v2958_v13 = vmax.f32 %v2141_v2, 0.0  ;;  %v6125_v48 = vmax.f32 %v6123_v44, %v6124_v8 }
 0x33b   :  { %4414 = vmatprep.mubr.bf16.mxu1 %v3315_v55  ;;  %v5141_v53 = vmax.f32 %v4171_v38, 0.0  ;;  %v4173_v32 = vadd.f32 %v4172_v6, %v8769_v37  ;;  %v6156_v42 = vmax.f32 %v6154_v26, %v6155_v7  ;;  %v2959_v1 = vmax.f32 %v2143_v40, 0.0  ;;  %v8296_v6 = vld [vmem:[%s10216_s0 + $0x338] sm:$0xff]  }
 0x33c   :  { %v2145_v49 = vpop.f32.mrf.mxu0  ;;  %v4176_v5 = vpop.f32.mrf.mxu1  ;;  %4415 = vmatmul.mubr.bf16.gmra.mxu1 %v3314_v29  ;;  %v6150_v20 = vrot.slane %v6149_v3, 2  ;;  %v6144_v26 = vmax.f32 %v6142_v18, %v6143_v10  ;;  %v6131_v18 = vrot.slane %v6130_v61, 1  ;;  %v6139_v39 = vmax.f32 %v6137_v15, %v6138_v17 }
 0x33d   :  { %v5142_v23 = vmax.f32 %v4173_v32, 0.0  ;;  %v2960_v52 = vmax.f32 %v2145_v49, 0.0  ;;  %v6161_v50 = vmax.f32 %v5139_v46, %v5141_v53  ;;  %v4177_v45 = vadd.f32 %v4176_v5, %v8764_v31 }
 0x33e   :  { %v2147_v58 = vpop.f32.mrf.mxu0  ;;  %v4178_v9 = vpop.f32.mrf.mxu1  ;;  %v6157_v47 = vrot.slane %v6156_v42, 2  ;;  %v6151_v19 = vmax.f32 %v6149_v3, %v6150_v20  ;;  %v6145_v44 = vrot.slane %v6144_v26, 1 }
 0x33f   :  { %v2961_v16 = vmax.f32 %v2147_v58, 0.0  ;;  %v6168_v41 = vmax.f32 %v5140_v30, %v5142_v23  ;;  %v4179_v35 = vadd.f32 %v4178_v9, %v8769_v37  ;;  %v3316_v7 = vpack.c.bf16 %v2960_v52, %v2958_v13 }
 0x340   :  { %v2151_v27 = vpop.f32.mrf.mxu0  ;;  %8043 = vmatmul.mubr.msk.bf16.gmra.mxu0 %vm945_vm1, %v8295_v43  ;;  %v4180_v62 = vpop.f32.mrf.mxu1  ;;  %v6162_v38 = vrot.slane %v6161_v50, 4  ;;  %v5143_v40 = vmax.f32 %v4177_v45, 0.0  ;;  %v6158_v8 = vmax.f32 %v6156_v42, %v6157_v47  ;;  %v6152_v23 = vrot.slane %v6151_v19, 1 }
 0x341   :  { %v3317_v57 = vpack.c.bf16 %v2961_v16, %v2959_v1  ;;  %2399 = vmatprep.mubr.bf16.mxu0 %v8343_v4  ;;  %v4181_v51 = vadd.f32 %v4180_v62, %v8764_v31  ;;  %v6169_v53 = vrot.slane %v6168_v41, 4  ;;  %v5144_v32 = vmax.f32 %v4179_v35, 0.0 }
 0x342   :  { %v2153_v55 = vpop.f32.mrf.mxu0  ;;  %v4182_v12 = vpop.f32.mrf.mxu1  ;;  %v6163_v52 = vmax.f32 %v6161_v50, %v6162_v38  ;;  %v2962_v45 = vmax.f32 %v2151_v27, 0.0  ;;  %v6159_v62 = vrot.slane %v6158_v8, 1 }
 0x343   :  { %4424 = vmatprep.mubr.bf16.mxu1 %v3317_v57  ;;  %v5145_v2 = vmax.f32 %v4181_v51, 0.0  ;;  %v4183_v49 = vadd.f32 %v4182_v12, %v8769_v37  ;;  %v2963_v10 = vmax.f32 %v2153_v55, 0.0  ;;  %v6170_v20 = vmax.f32 %v6168_v41, %v6169_v53 }
 0x344   :  { %v2155_v29 = vpop.f32.mrf.mxu0  ;;  %v4186_v43 = vpop.f32.mrf.mxu1  ;;  %4425 = vmatmul.mubr.bf16.gmra.mxu1 %v3316_v7  ;;  %v6132_v57 = vmax.f32 %v6130_v61, %v6131_v18  ;;  %v7586_v51 = vsel %vm7495_vm2, %v6139_v39, %v6125_v48  ;;  %v6164_v27 = vrot.slane %v6163_v52, 2  ;;  %v8297_v61 = vld [vmem:[%s10216_s0 + $0x340] sm:$0xff]   ;;  %v6153_v18 = vmax.f32 %v6151_v19, %v6152_v23 }
 0x345   :  { %v6175_v5 = vmax.f32 %v5143_v40, %v5145_v2  ;;  %v5146_v46 = vmax.f32 %v4183_v49, 0.0  ;;  %v2964_v30 = vmax.f32 %v2155_v29, 0.0  ;;  %v4187_v15 = vadd.f32 %v4186_v43, %v8764_v31 }
 0x346   :  { %v2157_v3 = vpop.f32.mrf.mxu0  ;;  %v4188_v1 = vpop.f32.mrf.mxu1  ;;  %v6171_v53 = vrot.slane %v6170_v20, 2  ;;  %v6160_v39 = vmax.f32 %v6158_v8, %v6159_v62 }
 0x347   :  { %v2965_v58 = vmax.f32 %v2157_v3, 0.0  ;;  %v6176_v16 = vrot.slane %v6175_v5, 4  ;;  %v6182_v17 = vmax.f32 %v5144_v32, %v5146_v46  ;;  %v4189_v47 = vadd.f32 %v4188_v1, %v8769_v37 }
 0x348   :  { %v2161_v9 = vpop.f32.mrf.mxu0  ;;  %8044 = vmatmul.mubr.msk.bf16.gmra.mxu0 %vm945_vm1, %v8296_v6  ;;  %v4190_v13 = vpop.f32.mrf.mxu1  ;;  %v3318_v12 = vpack.c.bf16 %v2964_v30, %v2962_v45  ;;  %v5147_v41 = vmax.f32 %v4187_v15, 0.0  ;;  %v6146_v6 = vmax.f32 %v6144_v26, %v6145_v44  ;;  %v6172_v44 = vmax.f32 %v6170_v20, %v6171_v53 }
 0x349   :  { %v3319_v42 = vpack.c.bf16 %v2965_v58, %v2963_v10  ;;  %2409 = vmatprep.mubr.bf16.mxu0 %v8343_v4  ;;  %v4191_v35 = vadd.f32 %v4190_v13, %v8764_v31  ;;  %v6177_v55 = vmax.f32 %v6175_v5, %v6176_v16  ;;  %v6183_v7 = vrot.slane %v6182_v17, 4 }
 0x34a   :  { %v2163_v50 = vpop.f32.mrf.mxu0  ;;  %v4192_v38 = vpop.f32.mrf.mxu1  ;;  %v5148_v43 = vmax.f32 %v4189_v47, 0.0  ;;  %v6165_v16 = vmax.f32 %v6163_v52, %v6164_v27  ;;  %v2966_v8 = vmax.f32 %v2161_v9, 0.0 }
 0x34b   :  { %4434 = vmatprep.mubr.bf16.mxu1 %v3319_v42  ;;  %v5149_v40 = vmax.f32 %v4191_v35, 0.0  ;;  %v4193_v2 = vadd.f32 %v4192_v38, %v8769_v37  ;;  %v6184_v49 = vmax.f32 %v6182_v17, %v6183_v7  ;;  %v6178_v10 = vrot.slane %v6177_v55, 2 }
 0x34c   :  { %v2165_v29 = vpop.f32.mrf.mxu0  ;;  %v4196_v48 = vpop.f32.mrf.mxu1  ;;  %4435 = vmatmul.mubr.bf16.gmra.mxu1 %v3318_v12  ;;  %v2967_v46 = vmax.f32 %v2163_v50, 0.0  ;;  %v7593_v50 = vsel %vm7495_vm2, %v6146_v6, %v6132_v57  ;;  %v9390_v7 = vsel %vm7497_vm3, %v6153_v18, %v7586_v51  ;;  %v6166_v57 = vrot.slane %v6165_v16, 1 }
 0x34d   :  { %v6189_v32 = vmax.f32 %v5147_v41, %v5149_v40  ;;  %v5150_v5 = vmax.f32 %v4193_v2, 0.0  ;;  %v2968_v30 = vmax.f32 %v2165_v29, 0.0  ;;  %v4197_v26 = vadd.f32 %v4196_v48, %v8764_v31  ;;  %v8298_v29 = vld [vmem:[%s10216_s0 + $0x348] sm:$0xff]  }
 0x34e   :  { %v2167_v3 = vpop.f32.mrf.mxu0  ;;  %v4198_v1 = vpop.f32.mrf.mxu1  ;;  %v6185_v23 = vrot.slane %v6184_v49, 2  ;;  %v6179_v12 = vmax.f32 %v6177_v55, %v6178_v10  ;;  %v6173_v18 = vrot.slane %v6172_v44, 1 }
 0x34f   :  { %v2969_v58 = vmax.f32 %v2167_v3, 0.0  ;;  %v6190_v15 = vrot.slane %v6189_v32, 4  ;;  %v6196_v45 = vmax.f32 %v5148_v43, %v5150_v5  ;;  %v4199_v47 = vadd.f32 %v4198_v1, %v8769_v37 }
 0x350   :  { %v2171_v19 = vpop.f32.mrf.mxu0  ;;  %8045 = vmatmul.mubr.msk.bf16.gmra.mxu0 %vm945_vm1, %v8297_v61  ;;  %v4200_v42 = vpop.f32.mrf.mxu1  ;;  %v3320_v20 = vpack.c.bf16 %v2968_v30, %v2966_v8  ;;  %v5151_v41 = vmax.f32 %v4197_v26, 0.0  ;;  %v9396_v61 = vsel %vm7497_vm3, %v6160_v39, %v7593_v50  ;;  %v6186_v6 = vmax.f32 %v6184_v49, %v6185_v23 }
 0x351   :  { %v3321_v17 = vpack.c.bf16 %v2969_v58, %v2967_v46  ;;  %2419 = vmatprep.mubr.bf16.mxu0 %v8343_v4  ;;  %v6191_v13 = vmax.f32 %v6189_v32, %v6190_v15  ;;  %v6197_v62 = vrot.slane %v6196_v45, 4  ;;  %v4201_v52 = vadd.f32 %v4200_v42, %v8764_v31 }
 0x352   :  { %v2173_v35 = vpop.f32.mrf.mxu0  ;;  %v4202_v38 = vpop.f32.mrf.mxu1  ;;  %v5152_v53 = vmax.f32 %v4199_v47, 0.0  ;;  %v6180_v58 = vrot.slane %v6179_v12, 1  ;;  %v2970_v26 = vmax.f32 %v2171_v19, 0.0  ;;  %v6167_v42 = vmax.f32 %v6165_v16, %v6166_v57  ;;  %v8299_v16 = vld [vmem:[%s10216_s0 + $0x350] sm:$0xff]  }
 0x353   :  { %4444 = vmatprep.mubr.bf16.mxu1 %v3321_v17  ;;  %v6192_v9 = vrot.slane %v6191_v13, 2  ;;  %v6198_v27 = vmax.f32 %v6196_v45, %v6197_v62  ;;  %v5153_v40 = vmax.f32 %v4201_v52, 0.0  ;;  %v4203_v51 = vadd.f32 %v4202_v38, %v8769_v37 }
 0x354   :  { %v2175_v2 = vpop.f32.mrf.mxu0  ;;  %v4206_v55 = vpop.f32.mrf.mxu1  ;;  %4445 = vmatmul.mubr.bf16.gmra.mxu1 %v3320_v20  ;;  %v2971_v43 = vmax.f32 %v2173_v35, 0.0  ;;  %v6187_v45 = vrot.slane %v6186_v6, 1  ;;  %v6174_v35 = vmax.f32 %v6172_v44, %v6173_v18  ;;  %v6181_v57 = vmax.f32 %v6179_v12, %v6180_v58 }
 0x355   :  { %v6203_v48 = vmax.f32 %v5151_v41, %v5153_v40  ;;  %v6193_v5 = vmax.f32 %v6191_v13, %v6192_v9  ;;  %v5154_v3 = vmax.f32 %v4203_v51, 0.0  ;;  %v2972_v10 = vmax.f32 %v2175_v2, 0.0 }
 0x356   :  { %v2177_v32 = vpop.f32.mrf.mxu0  ;;  %v4208_v30 = vpop.f32.mrf.mxu1  ;;  %v6199_v1 = vrot.slane %v6198_v27, 2  ;;  %v4207_v15 = vadd.f32 %v4206_v55, %v8764_v31  ;;  %v6188_v51 = vmax.f32 %v6186_v6, %v6187_v45 }
 0x357   :  { %v2973_v46 = vmax.f32 %v2177_v32, 0.0  ;;  %v6204_v39 = vrot.slane %v6203_v48, 4  ;;  %v6210_v23 = vmax.f32 %v5152_v53, %v5154_v3  ;;  %v4209_v62 = vadd.f32 %v4208_v30, %v8769_v37 }
 0x358   :  { %v2181_v49 = vpop.f32.mrf.mxu0  ;;  %8046 = vmatmul.mubr.msk.bf16.gmra.mxu0 %vm945_vm1, %v8298_v29  ;;  %v4210_v17 = vpop.f32.mrf.mxu1  ;;  %v6194_v50 = vrot.slane %v6193_v5, 1  ;;  %v3322_v38 = vpack.c.bf16 %v2972_v10, %v2970_v26  ;;  %v6200_v41 = vmax.f32 %v6198_v27, %v6199_v1  ;;  %v5155_v40 = vmax.f32 %v4207_v15, 0.0 }
 0x359   :  { %v3323_v8 = vpack.c.bf16 %v2973_v46, %v2971_v43  ;;  %2429 = vmatprep.mubr.bf16.mxu0 %v8343_v4  ;;  %v6205_v13 = vmax.f32 %v6203_v48, %v6204_v39  ;;  %v4211_v47 = vadd.f32 %v4210_v17, %v8764_v31  ;;  %v6211_v20 = vrot.slane %v6210_v23, 4 }
 0x35a   :  { %v2183_v52 = vpop.f32.mrf.mxu0  ;;  %v4212_v9 = vpop.f32.mrf.mxu1  ;;  %v5156_v48 = vmax.f32 %v4209_v62, 0.0  ;;  %v6195_v39 = vmax.f32 %v6193_v5, %v6194_v50  ;;  %v6201_v15 = vrot.slane %v6200_v41, 1  ;;  %v2974_v26 = vmax.f32 %v2181_v49, 0.0 }
 0x35b   :  { %4454 = vmatprep.mubr.bf16.mxu1 %v3323_v8  ;;  %v6206_v19 = vrot.slane %v6205_v13, 2  ;;  %v5157_v2 = vmax.f32 %v4211_v47, 0.0  ;;  %v6212_v55 = vmax.f32 %v6210_v23, %v6211_v20  ;;  %v4213_v53 = vadd.f32 %v4212_v9, %v8769_v37 }
 0x35c   :  { %v2185_v29 = vpop.f32.mrf.mxu0  ;;  %v4216_v44 = vpop.f32.mrf.mxu1  ;;  %4455 = vmatmul.mubr.bf16.gmra.mxu1 %v3322_v38  ;;  %v2975_v32 = vmax.f32 %v2183_v52, 0.0  ;;  %v7595_v52 = vsel %vm7499_vm4, %v6174_v35, %v9396_v61 }
 0x35d   :  { %v6207_v18 = vmax.f32 %v6205_v13, %v6206_v19  ;;  %v6217_v43 = vmax.f32 %v5155_v40, %v5157_v2  ;;  %v6213_v3 = vrot.slane %v6212_v55, 2  ;;  %v5158_v10 = vmax.f32 %v4213_v53, 0.0 }
 0x35e   :  { %v2187_v27 = vpop.f32.mrf.mxu0  ;;  %v2976_v46 = vmax.f32 %v2185_v29, 0.0  ;;  %v4218_v1 = vpop.f32.mrf.mxu1  ;;  %v4217_v23 = vadd.f32 %v4216_v44, %v8764_v31  ;;  %v7588_v13 = vsel %vm7499_vm4, %v6167_v42, %v9390_v7  ;;  %v7596_v19 = vsel %vm7501_vm5, %v6188_v51, %v7595_v52  ;;  %v8300_v42 = vld [vmem:[%s10216_s0 + $0x358] sm:$0xff]  }
 0x35f   :  { %v2977_v30 = vmax.f32 %v2187_v27, 0.0  ;;  %v6218_v12 = vrot.slane %v6217_v43, 4  ;;  %v6214_v58 = vmax.f32 %v6212_v55, %v6213_v3  ;;  %v6224_v45 = vmax.f32 %v5156_v48, %v5158_v10 }
 0x360   :  { %v2191_v6 = vpop.f32.mrf.mxu0  ;;  %8047 = vmatmul.mubr.msk.bf16.gmra.mxu0 %vm945_vm1, %v8299_v16  ;;  %v4220_v17 = vpop.f32.mrf.mxu1  ;;  %v6208_v62 = vrot.slane %v6207_v18, 1  ;;  %v7589_v50 = vsel %vm7501_vm5, %v6181_v57, %v7588_v13  ;;  %v3324_v38 = vpack.c.bf16 %v2976_v46, %v2974_v26  ;;  %v6202_v40 = vmax.f32 %v6200_v41, %v6201_v15 }
 0x361   :  { %v3325_v8 = vpack.c.bf16 %v2977_v30, %v2975_v32  ;;  %2439 = vmatprep.mubr.bf16.mxu0 %v8343_v4  ;;  %v6219_v47 = vmax.f32 %v6217_v43, %v6218_v12  ;;  %v4221_v5 = vadd.f32 %v4220_v17, %v8764_v31  ;;  %v6225_v20 = vrot.slane %v6224_v45, 4 }
 0x362   :  { %v2193_v49 = vpop.f32.mrf.mxu0  ;;  %v4222_v9 = vpop.f32.mrf.mxu1  ;;  %v7590_v16 = vsel %vm7503_vm6, %v6195_v39, %v7589_v50  ;;  %v6215_v55 = vrot.slane %v6214_v58, 1  ;;  %v5159_v35 = vmax.f32 %v4217_v23, 0.0  ;;  %v6209_v53 = vmax.f32 %v6207_v18, %v6208_v62 }
 0x363   :  { %4464 = vmatprep.mubr.bf16.mxu1 %v3325_v8  ;;  %v6220_v2 = vrot.slane %v6219_v47, 2  ;;  %v5161_v29 = vmax.f32 %v4221_v5, 0.0  ;;  %v6226_v61 = vmax.f32 %v6224_v45, %v6225_v20  ;;  %v4219_v48 = vadd.f32 %v4218_v1, %v8769_v37 }
 0x364   :  { %v2195_v7 = vpop.f32.mrf.mxu0  ;;  %v4226_v57 = vpop.f32.mrf.mxu1  ;;  %4465 = vmatmul.mubr.bf16.gmra.mxu1 %v3324_v38  ;;  %v4223_v41 = vadd.f32 %v4222_v9, %v8769_v37  ;;  %v2979_v32 = vmax.f32 %v2193_v49, 0.0  ;;  %v7597_v46 = vsel %vm7503_vm6, %v6202_v40, %v7596_v19  ;;  %v6216_v18 = vmax.f32 %v6214_v58, %v6215_v55  ;;  %v8301_v40 = vld [vmem:[%s10216_s0 + $0x360] sm:$0xff]  }
 0x365   :  { %v6221_v44 = vmax.f32 %v6219_v47, %v6220_v2  ;;  %v6227_v43 = vrot.slane %v6226_v61, 2  ;;  %v2980_v27 = vmax.f32 %v2195_v7, 0.0  ;;  %v6231_v39 = vmax.f32 %v5159_v35, %v5161_v29 }
 0x366   :  { %v2197_v51 = vpop.f32.mrf.mxu0  ;;  %v4228_v10 = vpop.f32.mrf.mxu1  ;;  %v4227_v15 = vadd.f32 %v4226_v57, %v8764_v31  ;;  %v2978_v1 = vmax.f32 %v2191_v6, 0.0  ;;  %v5162_v17 = vmax.f32 %v4223_v41, 0.0  ;;  %v7591_v5 = vsel %vm7505_vm7, %v6209_v53, %v7590_v16 }
 0x367   :  { %v2981_v3 = vmax.f32 %v2197_v51, 0.0  ;;  %v6222_v30 = vrot.slane %v6221_v44, 1  ;;  %v6228_v12 = vmax.f32 %v6226_v61, %v6227_v43  ;;  %v4229_v13 = vadd.f32 %v4228_v10, %v8769_v37 }
 0x368   :  { %v2201_v26 = vpop.f32.mrf.mxu0  ;;  %8048 = vmatmul.mubr.msk.bf16.gmra.mxu0 %vm945_vm1, %v8300_v42  ;;  %v4230_v23 = vpop.f32.mrf.mxu1  ;;  %v5160_v52 = vmax.f32 %v4219_v48, 0.0  ;;  %v3326_v50 = vpack.c.bf16 %v2980_v27, %v2978_v1  ;;  %v6232_v58 = vrot.slane %v6231_v39, 4  ;;  %v5163_v38 = vmax.f32 %v4227_v15, 0.0 }
 0x369   :  { %v3327_v45 = vpack.c.bf16 %v2981_v3, %v2979_v32  ;;  %2449 = vmatprep.mubr.bf16.mxu0 %v8343_v4  ;;  %v6223_v8 = vmax.f32 %v6221_v44, %v6222_v30  ;;  %v4231_v62 = vadd.f32 %v4230_v23, %v8764_v31  ;;  %v6229_v49 = vrot.slane %v6228_v12, 1 }
 0x36a   :  { %v2203_v47 = vpop.f32.mrf.mxu0  ;;  %v4232_v20 = vpop.f32.mrf.mxu1  ;;  %v7598_v2 = vsel %vm7505_vm7, %v6216_v18, %v7597_v46  ;;  %v6238_v16 = vmax.f32 %v5160_v52, %v5162_v17  ;;  %v5164_v55 = vmax.f32 %v4229_v13, 0.0  ;;  %v6233_v43 = vmax.f32 %v6231_v39, %v6232_v58 }
 0x36b   :  { %4474 = vmatprep.mubr.bf16.mxu1 %v3327_v45  ;;  %v7592_v6 = vsel %vm7507_vm8, %v6223_v8, %v7591_v5  ;;  %v5165_v9 = vmax.f32 %v4231_v62, 0.0  ;;  %v6230_v29 = vmax.f32 %v6228_v12, %v6229_v49  ;;  %v4233_v7 = vadd.f32 %v4232_v20, %v8769_v37 }
 0x36c   :  { %v2205_v19 = vpop.f32.mrf.mxu0  ;;  %7770 = vst [vmem:[#allocation2 + $0x60] sm:$0xff] %v7592_v6  ;;  %v4236_v42 = vpop.f32.mrf.mxu1  ;;  %4475 = vmatmul.mubr.bf16.gmra.mxu1 %v3326_v50  ;;  %v2983_v35 = vmax.f32 %v2203_v47, 0.0  ;;  %v2982_v3 = vmax.f32 %v2201_v26, 0.0  ;;  %v6239_v45 = vrot.slane %v6238_v16, 4  ;;  %v6234_v8 = vrot.slane %v6233_v43, 2  ;;  %v8302_v47 = vld [vmem:[%s10216_s0 + $0x368] sm:$0xff]  }
 0x36d   :  { %v6245_v61 = vmax.f32 %v5163_v38, %v5165_v9  ;;  %v7599_v53 = vsel %vm7507_vm8, %v6230_v29, %v7598_v2  ;;  %v5166_v44 = vmax.f32 %v4233_v7, 0.0  ;;  %v2984_v48 = vmax.f32 %v2205_v19, 0.0 }
 0x36e   :  { %v2207_v57 = vpop.f32.mrf.mxu0  ;;  %v4238_v51 = vpop.f32.mrf.mxu1  ;;  %7771 = vst [vmem:[#allocation2 + $0x68] sm:$0xff] %v7599_v53  ;;  %v4237_v32 = vadd.f32 %v4236_v42, %v8764_v31  ;;  %v6235_v2 = vmax.f32 %v6233_v43, %v6234_v8  ;;  %v6240_v29 = vmax.f32 %v6238_v16, %v6239_v45 }
 0x36f   :  { %v2985_v41 = vmax.f32 %v2207_v57, 0.0  ;;  %v6246_v10 = vrot.slane %v6245_v61, 4  ;;  %v6252_v46 = vmax.f32 %v5164_v55, %v5166_v44  ;;  %v4239_v18 = vadd.f32 %v4238_v51, %v8769_v37 }
 0x370   :  { %v2211_v27 = vpop.f32.mrf.mxu0  ;;  %8049 = vmatmul.mubr.msk.bf16.gmra.mxu0 %vm945_vm1, %v8301_v40  ;;  %v4240_v15 = vpop.f32.mrf.mxu1  ;;  %v3328_v23 = vpack.c.bf16 %v2984_v48, %v2982_v3  ;;  %v5167_v17 = vmax.f32 %v4237_v32, 0.0 }
 0x371   :  { %v3329_v30 = vpack.c.bf16 %v2985_v41, %v2983_v35  ;;  %2459 = vmatprep.mubr.bf16.mxu0 %v8343_v4  ;;  %v4241_v12 = vadd.f32 %v4240_v15, %v8764_v31  ;;  %v6247_v5 = vmax.f32 %v6245_v61, %v6246_v10  ;;  %v6253_v49 = vrot.slane %v6252_v46, 4 }
 0x372   :  { %v2213_v1 = vpop.f32.mrf.mxu0  ;;  %v4242_v39 = vpop.f32.mrf.mxu1  ;;  %v5168_v50 = vmax.f32 %v4239_v18, 0.0  ;;  %v2986_v57 = vmax.f32 %v2211_v27, 0.0  ;;  %v6241_v10 = vrot.slane %v6240_v29, 2  ;;  %v8303_v27 = vld [vmem:[%s10216_s0 + $0x370] sm:$0xff]   ;;  %v6236_v18 = vrot.slane %v6235_v2, 1 }
 0x373   :  { %4484 = vmatprep.mubr.bf16.mxu1 %v3329_v30  ;;  %v5169_v13 = vmax.f32 %v4241_v12, 0.0  ;;  %v4243_v26 = vadd.f32 %v4242_v39, %v8769_v37  ;;  %v2987_v38 = vmax.f32 %v2213_v1, 0.0  ;;  %v6248_v35 = vrot.slane %v6247_v5, 2 }
 0x374   :  { %v2215_v62 = vpop.f32.mrf.mxu0  ;;  %v4246_v52 = vpop.f32.mrf.mxu1  ;;  %4485 = vmatmul.mubr.bf16.gmra.mxu1 %v3328_v23  ;;  %v6254_v61 = vmax.f32 %v6252_v46, %v6253_v49 }
 0x375   :  { %v6259_v20 = vmax.f32 %v5167_v17, %v5169_v13  ;;  %v5170_v6 = vmax.f32 %v4243_v26, 0.0  ;;  %v2988_v9 = vmax.f32 %v2215_v62, 0.0  ;;  %v4247_v41 = vadd.f32 %v4246_v52, %v8764_v31 }
 0x376   :  { %v2217_v58 = vpop.f32.mrf.mxu0  ;;  %v4248_v40 = vpop.f32.mrf.mxu1  ;;  %v6249_v12 = vmax.f32 %v6247_v5, %v6248_v35  ;;  %v6255_v23 = vrot.slane %v6254_v61, 2 }
 0x377   :  { %v2989_v19 = vmax.f32 %v2217_v58, 0.0  ;;  %v6260_v7 = vrot.slane %v6259_v20, 4  ;;  %v6266_v42 = vmax.f32 %v5168_v50, %v5170_v6  ;;  %v4249_v51 = vadd.f32 %v4248_v40, %v8769_v37 }
 0x378   :  { %v2221_v55 = vpop.f32.mrf.mxu0  ;;  %8050 = vmatmul.mubr.msk.bf16.gmra.mxu0 %vm945_vm1, %v8302_v47  ;;  %v4250_v44 = vpop.f32.mrf.mxu1  ;;  %v3330_v32 = vpack.c.bf16 %v2988_v9, %v2986_v57  ;;  %v5171_v8 = vmax.f32 %v4247_v41, 0.0  ;;  %v6242_v50 = vmax.f32 %v6240_v29, %v6241_v10 }
 0x379   :  { %v3331_v53 = vpack.c.bf16 %v2989_v19, %v2987_v38  ;;  %2469 = vmatprep.mubr.bf16.mxu0 %v8343_v4  ;;  %v6267_v48 = vrot.slane %v6266_v42, 4  ;;  %v4251_v43 = vadd.f32 %v4250_v44, %v8764_v31  ;;  %v6261_v30 = vmax.f32 %v6259_v20, %v6260_v7 }
 0x37a   :  { %v2223_v16 = vpop.f32.mrf.mxu0  ;;  %v4252_v3 = vpop.f32.mrf.mxu1  ;;  %v5172_v17 = vmax.f32 %v4249_v51, 0.0  ;;  %v6250_v38 = vrot.slane %v6249_v12, 1  ;;  %v2990_v9 = vmax.f32 %v2221_v55, 0.0  ;;  %v6237_v44 = vmax.f32 %v6235_v2, %v6236_v18 }
 0x37b   :  { %4494 = vmatprep.mubr.bf16.mxu1 %v3331_v53  ;;  %v5173_v15 = vmax.f32 %v4251_v43, 0.0  ;;  %v4253_v1 = vadd.f32 %v4252_v3, %v8769_v37  ;;  %v6268_v39 = vmax.f32 %v6266_v42, %v6267_v48  ;;  %v2991_v26 = vmax.f32 %v2223_v16, 0.0  ;;  %v8304_v3 = vld [vmem:[%s10216_s0 + $0x378] sm:$0xff]  }
 0x37c   :  { %v2225_v46 = vpop.f32.mrf.mxu0  ;;  %v4256_v45 = vpop.f32.mrf.mxu1  ;;  %4495 = vmatmul.mubr.bf16.gmra.mxu1 %v3330_v32  ;;  %v6262_v20 = vrot.slane %v6261_v30, 2  ;;  %v6256_v42 = vmax.f32 %v6254_v61, %v6255_v23  ;;  %v6243_v61 = vrot.slane %v6242_v50, 1  ;;  %v6251_v10 = vmax.f32 %v6249_v12, %v6250_v38 }
 0x37d   :  { %v5174_v62 = vmax.f32 %v4253_v1, 0.0  ;;  %v2992_v47 = vmax.f32 %v2225_v46, 0.0  ;;  %v6273_v6 = vmax.f32 %v5171_v8, %v5173_v15  ;;  %v4257_v58 = vadd.f32 %v4256_v45, %v8764_v31 }
 0x37e   :  { %v2227_v13 = vpop.f32.mrf.mxu0  ;;  %v4258_v52 = vpop.f32.mrf.mxu1  ;;  %v6269_v35 = vrot.slane %v6268_v39, 2  ;;  %v6263_v51 = vmax.f32 %v6261_v30, %v6262_v20  ;;  %v6257_v2 = vrot.slane %v6256_v42, 1 }
 0x37f   :  { %v2993_v49 = vmax.f32 %v2227_v13, 0.0  ;;  %v6280_v19 = vmax.f32 %v5172_v17, %v5174_v62  ;;  %v4259_v57 = vadd.f32 %v4258_v52, %v8769_v37  ;;  %v3332_v48 = vpack.c.bf16 %v2992_v47, %v2990_v9 }
 0x380   :  { %v2231_v5 = vpop.f32.mrf.mxu0  ;;  %8051 = vmatmul.mubr.msk.bf16.gmra.mxu0 %vm945_vm1, %v8303_v27  ;;  %v4260_v7 = vpop.f32.mrf.mxu1  ;;  %v6274_v43 = vrot.slane %v6273_v6, 4  ;;  %v5175_v16 = vmax.f32 %v4257_v58, 0.0  ;;  %v6270_v18 = vmax.f32 %v6268_v39, %v6269_v35  ;;  %v6264_v62 = vrot.slane %v6263_v51, 1 }
 0x381   :  { %v3333_v40 = vpack.c.bf16 %v2993_v49, %v2991_v26  ;;  %2479 = vmatprep.mubr.bf16.mxu0 %v8343_v4  ;;  %v4261_v29 = vadd.f32 %v4260_v7, %v8764_v31  ;;  %v6281_v15 = vrot.slane %v6280_v19, 4  ;;  %v5176_v1 = vmax.f32 %v4259_v57, 0.0 }
 0x382   :  { %v2233_v53 = vpop.f32.mrf.mxu0  ;;  %v4262_v41 = vpop.f32.mrf.mxu1  ;;  %v6275_v47 = vmax.f32 %v6273_v6, %v6274_v43  ;;  %v2994_v58 = vmax.f32 %v2231_v5, 0.0  ;;  %v6271_v7 = vrot.slane %v6270_v18, 1 }
 0x383   :  { %4504 = vmatprep.mubr.bf16.mxu1 %v3333_v40  ;;  %v5177_v55 = vmax.f32 %v4261_v29, 0.0  ;;  %v4263_v46 = vadd.f32 %v4262_v41, %v8769_v37  ;;  %v2995_v23 = vmax.f32 %v2233_v53, 0.0  ;;  %v6282_v20 = vmax.f32 %v6280_v19, %v6281_v15 }
 0x384   :  { %v2235_v32 = vpop.f32.mrf.mxu0  ;;  %v4266_v27 = vpop.f32.mrf.mxu1  ;;  %4505 = vmatmul.mubr.bf16.gmra.mxu1 %v3332_v48  ;;  %v6244_v40 = vmax.f32 %v6242_v50, %v6243_v61  ;;  %v7600_v29 = vsel %vm7495_vm2, %v6251_v10, %v6237_v44  ;;  %v6276_v5 = vrot.slane %v6275_v47, 2  ;;  %v8305_v50 = vld [vmem:[%s10216_s0 + $0x380] sm:$0xff]   ;;  %v6265_v61 = vmax.f32 %v6263_v51, %v6264_v62 }
 0x385   :  { %v6287_v45 = vmax.f32 %v5175_v16, %v5177_v55  ;;  %v5178_v8 = vmax.f32 %v4263_v46, 0.0  ;;  %v2996_v17 = vmax.f32 %v2235_v32, 0.0  ;;  %v4267_v12 = vadd.f32 %v4266_v27, %v8764_v31 }
 0x386   :  { %v2237_v30 = vpop.f32.mrf.mxu0  ;;  %v4268_v26 = vpop.f32.mrf.mxu1  ;;  %v6283_v15 = vrot.slane %v6282_v20, 2  ;;  %v6272_v10 = vmax.f32 %v6270_v18, %v6271_v7 }
 0x387   :  { %v2997_v13 = vmax.f32 %v2237_v30, 0.0  ;;  %v6288_v49 = vrot.slane %v6287_v45, 4  ;;  %v6294_v38 = vmax.f32 %v5176_v1, %v5178_v8  ;;  %v4269_v35 = vadd.f32 %v4268_v26, %v8769_v37 }
 0x388   :  { %v2241_v52 = vpop.f32.mrf.mxu0  ;;  %8052 = vmatmul.mubr.msk.bf16.gmra.mxu0 %vm945_vm1, %v8304_v3  ;;  %v4270_v9 = vpop.f32.mrf.mxu1  ;;  %v3334_v41 = vpack.c.bf16 %v2996_v17, %v2994_v58  ;;  %v5179_v19 = vmax.f32 %v4267_v12, 0.0  ;;  %v6258_v3 = vmax.f32 %v6256_v42, %v6257_v2  ;;  %v6284_v2 = vmax.f32 %v6282_v20, %v6283_v15 }
 0x389   :  { %v3335_v39 = vpack.c.bf16 %v2997_v13, %v2995_v23  ;;  %2489 = vmatprep.mubr.bf16.mxu0 %v8343_v4  ;;  %v4271_v57 = vadd.f32 %v4270_v9, %v8764_v31  ;;  %v6289_v53 = vmax.f32 %v6287_v45, %v6288_v49  ;;  %v6295_v48 = vrot.slane %v6294_v38, 4 }
 0x38a   :  { %v2243_v6 = vpop.f32.mrf.mxu0  ;;  %v4272_v43 = vpop.f32.mrf.mxu1  ;;  %v5180_v27 = vmax.f32 %v4269_v35, 0.0  ;;  %v6277_v49 = vmax.f32 %v6275_v47, %v6276_v5  ;;  %v2998_v18 = vmax.f32 %v2241_v52, 0.0 }
 0x38b   :  { %4514 = vmatprep.mubr.bf16.mxu1 %v3335_v39  ;;  %v5181_v16 = vmax.f32 %v4271_v57, 0.0  ;;  %v4273_v55 = vadd.f32 %v4272_v43, %v8769_v37  ;;  %v6296_v46 = vmax.f32 %v6294_v38, %v6295_v48  ;;  %v6290_v23 = vrot.slane %v6289_v53, 2 }
 0x38c   :  { %v2245_v32 = vpop.f32.mrf.mxu0  ;;  %v4276_v44 = vpop.f32.mrf.mxu1  ;;  %4515 = vmatmul.mubr.bf16.gmra.mxu1 %v3334_v41  ;;  %v2999_v8 = vmax.f32 %v2243_v6, 0.0  ;;  %v7607_v6 = vsel %vm7495_vm2, %v6258_v3, %v6244_v40  ;;  %v9482_v48 = vsel %vm7497_vm3, %v6265_v61, %v7600_v29  ;;  %v6278_v40 = vrot.slane %v6277_v49, 1 }
 0x38d   :  { %v6301_v1 = vmax.f32 %v5179_v19, %v5181_v16  ;;  %v5182_v45 = vmax.f32 %v4273_v55, 0.0  ;;  %v3000_v17 = vmax.f32 %v2245_v32, 0.0  ;;  %v4277_v42 = vadd.f32 %v4276_v44, %v8764_v31  ;;  %v8306_v32 = vld [vmem:[%s10216_s0 + $0x388] sm:$0xff]  }
 0x38e   :  { %v2247_v30 = vpop.f32.mrf.mxu0  ;;  %v4278_v26 = vpop.f32.mrf.mxu1  ;;  %v6297_v62 = vrot.slane %v6296_v46, 2  ;;  %v6291_v41 = vmax.f32 %v6289_v53, %v6290_v23  ;;  %v6285_v61 = vrot.slane %v6284_v2, 1 }
 0x38f   :  { %v3001_v13 = vmax.f32 %v2247_v30, 0.0  ;;  %v6302_v12 = vrot.slane %v6301_v1, 4  ;;  %v6308_v58 = vmax.f32 %v5180_v27, %v5182_v45  ;;  %v4279_v35 = vadd.f32 %v4278_v26, %v8769_v37 }
 0x390   :  { %v2251_v51 = vpop.f32.mrf.mxu0  ;;  %8053 = vmatmul.mubr.msk.bf16.gmra.mxu0 %vm945_vm1, %v8305_v50  ;;  %v4280_v39 = vpop.f32.mrf.mxu1  ;;  %v3336_v20 = vpack.c.bf16 %v3000_v17, %v2998_v18  ;;  %v5183_v19 = vmax.f32 %v4277_v42, 0.0  ;;  %v9488_v50 = vsel %vm7497_vm3, %v6272_v10, %v7607_v6  ;;  %v6298_v3 = vmax.f32 %v6296_v46, %v6297_v62 }
 0x391   :  { %v3337_v38 = vpack.c.bf16 %v3001_v13, %v2999_v8  ;;  %2499 = vmatprep.mubr.bf16.mxu0 %v8343_v4  ;;  %v6303_v9 = vmax.f32 %v6301_v1, %v6302_v12  ;;  %v6309_v7 = vrot.slane %v6308_v58, 4  ;;  %v4281_v47 = vadd.f32 %v4280_v39, %v8764_v31 }
 0x392   :  { %v2253_v57 = vpop.f32.mrf.mxu0  ;;  %v4282_v43 = vpop.f32.mrf.mxu1  ;;  %v5184_v15 = vmax.f32 %v4279_v35, 0.0  ;;  %v6292_v13 = vrot.slane %v6291_v41, 1  ;;  %v3002_v42 = vmax.f32 %v2251_v51, 0.0  ;;  %v6279_v39 = vmax.f32 %v6277_v49, %v6278_v40  ;;  %v8307_v49 = vld [vmem:[%s10216_s0 + $0x390] sm:$0xff]  }
 0x393   :  { %4524 = vmatprep.mubr.bf16.mxu1 %v3337_v38  ;;  %v6304_v52 = vrot.slane %v6303_v9, 2  ;;  %v6310_v5 = vmax.f32 %v6308_v58, %v6309_v7  ;;  %v5185_v16 = vmax.f32 %v4281_v47, 0.0  ;;  %v4283_v29 = vadd.f32 %v4282_v43, %v8769_v37 }
 0x394   :  { %v2255_v55 = vpop.f32.mrf.mxu0  ;;  %v4286_v53 = vpop.f32.mrf.mxu1  ;;  %4525 = vmatmul.mubr.bf16.gmra.mxu1 %v3336_v20  ;;  %v3003_v27 = vmax.f32 %v2253_v57, 0.0  ;;  %v6299_v58 = vrot.slane %v6298_v3, 1  ;;  %v6286_v57 = vmax.f32 %v6284_v2, %v6285_v61  ;;  %v6293_v40 = vmax.f32 %v6291_v41, %v6292_v13 }
 0x395   :  { %v6315_v44 = vmax.f32 %v5183_v19, %v5185_v16  ;;  %v6305_v45 = vmax.f32 %v6303_v9, %v6304_v52  ;;  %v5186_v30 = vmax.f32 %v4283_v29, 0.0  ;;  %v3004_v23 = vmax.f32 %v2255_v55, 0.0 }
 0x396   :  { %v2257_v1 = vpop.f32.mrf.mxu0  ;;  %v4288_v17 = vpop.f32.mrf.mxu1  ;;  %v6311_v26 = vrot.slane %v6310_v5, 2  ;;  %v4287_v12 = vadd.f32 %v4286_v53, %v8764_v31  ;;  %v6300_v29 = vmax.f32 %v6298_v3, %v6299_v58 }
 0x397   :  { %v3005_v8 = vmax.f32 %v2257_v1, 0.0  ;;  %v6316_v10 = vrot.slane %v6315_v44, 4  ;;  %v6322_v62 = vmax.f32 %v5184_v15, %v5186_v30  ;;  %v4289_v7 = vadd.f32 %v4288_v17, %v8769_v37 }
 0x398   :  { %v2261_v46 = vpop.f32.mrf.mxu0  ;;  %8054 = vmatmul.mubr.msk.bf16.gmra.mxu0 %vm945_vm1, %v8306_v32  ;;  %v4290_v38 = vpop.f32.mrf.mxu1  ;;  %v6306_v6 = vrot.slane %v6305_v45, 1  ;;  %v3338_v43 = vpack.c.bf16 %v3004_v23, %v3002_v42  ;;  %v6312_v19 = vmax.f32 %v6310_v5, %v6311_v26  ;;  %v5187_v16 = vmax.f32 %v4287_v12, 0.0 }
 0x399   :  { %v3339_v18 = vpack.c.bf16 %v3005_v8, %v3003_v27  ;;  %2509 = vmatprep.mubr.bf16.mxu0 %v8343_v4  ;;  %v6317_v9 = vmax.f32 %v6315_v44, %v6316_v10  ;;  %v4291_v35 = vadd.f32 %v4290_v38, %v8764_v31  ;;  %v6323_v20 = vrot.slane %v6322_v62, 4 }
 0x39a   :  { %v2263_v47 = vpop.f32.mrf.mxu0  ;;  %v4292_v52 = vpop.f32.mrf.mxu1  ;;  %v5188_v44 = vmax.f32 %v4289_v7, 0.0  ;;  %v6307_v10 = vmax.f32 %v6305_v45, %v6306_v6  ;;  %v6313_v12 = vrot.slane %v6312_v19, 1  ;;  %v3006_v42 = vmax.f32 %v2261_v46, 0.0 }
 0x39b   :  { %4534 = vmatprep.mubr.bf16.mxu1 %v3339_v18  ;;  %v6318_v51 = vrot.slane %v6317_v9, 2  ;;  %v5189_v55 = vmax.f32 %v4291_v35, 0.0  ;;  %v6324_v53 = vmax.f32 %v6322_v62, %v6323_v20  ;;  %v4293_v15 = vadd.f32 %v4292_v52, %v8769_v37 }
 0x39c   :  { %v2265_v32 = vpop.f32.mrf.mxu0  ;;  %v4296_v2 = vpop.f32.mrf.mxu1  ;;  %4535 = vmatmul.mubr.bf16.gmra.mxu1 %v3338_v43  ;;  %v3007_v1 = vmax.f32 %v2263_v47, 0.0  ;;  %v7609_v47 = vsel %vm7499_vm4, %v6286_v57, %v9488_v50 }
 0x39d   :  { %v6319_v61 = vmax.f32 %v6317_v9, %v6318_v51  ;;  %v6329_v27 = vmax.f32 %v5187_v16, %v5189_v55  ;;  %v6325_v30 = vrot.slane %v6324_v53, 2  ;;  %v5190_v23 = vmax.f32 %v4293_v15, 0.0 }
 0x39e   :  { %v2267_v5 = vpop.f32.mrf.mxu0  ;;  %v3008_v8 = vmax.f32 %v2265_v32, 0.0  ;;  %v4298_v26 = vpop.f32.mrf.mxu1  ;;  %v4297_v62 = vadd.f32 %v4296_v2, %v8764_v31  ;;  %v7602_v9 = vsel %vm7499_vm4, %v6279_v39, %v9482_v48  ;;  %v7610_v51 = vsel %vm7501_vm5, %v6300_v29, %v7609_v47  ;;  %v8308_v39 = vld [vmem:[%s10216_s0 + $0x398] sm:$0xff]  }
 0x39f   :  { %v3009_v17 = vmax.f32 %v2267_v5, 0.0  ;;  %v6330_v41 = vrot.slane %v6329_v27, 4  ;;  %v6326_v13 = vmax.f32 %v6324_v53, %v6325_v30  ;;  %v6336_v58 = vmax.f32 %v5188_v44, %v5190_v23 }
 0x3a0   :  { %v2271_v3 = vpop.f32.mrf.mxu0  ;;  %8055 = vmatmul.mubr.msk.bf16.gmra.mxu0 %vm945_vm1, %v8307_v49  ;;  %v4300_v38 = vpop.f32.mrf.mxu1  ;;  %v6320_v7 = vrot.slane %v6319_v61, 1  ;;  %v7603_v6 = vsel %vm7501_vm5, %v6293_v40, %v7602_v9  ;;  %v3340_v43 = vpack.c.bf16 %v3008_v8, %v3006_v42  ;;  %v6314_v16 = vmax.f32 %v6312_v19, %v6313_v12 }
 0x3a1   :  { %v3341_v18 = vpack.c.bf16 %v3009_v17, %v3007_v1  ;;  %2519 = vmatprep.mubr.bf16.mxu0 %v8343_v4  ;;  %v6331_v35 = vmax.f32 %v6329_v27, %v6330_v41  ;;  %v4301_v45 = vadd.f32 %v4300_v38, %v8764_v31  ;;  %v6337_v20 = vrot.slane %v6336_v58, 4 }
 0x3a2   :  { %v2273_v46 = vpop.f32.mrf.mxu0  ;;  %v4302_v52 = vpop.f32.mrf.mxu1  ;;  %v7604_v49 = vsel %vm7503_vm6, %v6307_v10, %v7603_v6  ;;  %v6327_v53 = vrot.slane %v6326_v13, 1  ;;  %v5191_v57 = vmax.f32 %v4297_v62, 0.0  ;;  %v6321_v15 = vmax.f32 %v6319_v61, %v6320_v7 }
 0x3a3   :  { %4544 = vmatprep.mubr.bf16.mxu1 %v3341_v18  ;;  %v6332_v55 = vrot.slane %v6331_v35, 2  ;;  %v5193_v32 = vmax.f32 %v4301_v45, 0.0  ;;  %v6338_v50 = vmax.f32 %v6336_v58, %v6337_v20  ;;  %v4299_v44 = vadd.f32 %v4298_v26, %v8769_v37 }
 0x3a4   :  { %v2275_v48 = vpop.f32.mrf.mxu0  ;;  %v4306_v40 = vpop.f32.mrf.mxu1  ;;  %4545 = vmatmul.mubr.bf16.gmra.mxu1 %v3340_v43  ;;  %v4303_v19 = vadd.f32 %v4302_v52, %v8769_v37  ;;  %v3011_v1 = vmax.f32 %v2273_v46, 0.0  ;;  %v7611_v8 = vsel %vm7503_vm6, %v6314_v16, %v7610_v51  ;;  %v6328_v61 = vmax.f32 %v6326_v13, %v6327_v53  ;;  %v8309_v16 = vld [vmem:[%s10216_s0 + $0x3a0] sm:$0xff]  }
 0x3a5   :  { %v6333_v2 = vmax.f32 %v6331_v35, %v6332_v55  ;;  %v6339_v27 = vrot.slane %v6338_v50, 2  ;;  %v3012_v5 = vmax.f32 %v2275_v48, 0.0  ;;  %v6343_v10 = vmax.f32 %v5191_v57, %v5193_v32 }
 0x3a6   :  { %v2277_v29 = vpop.f32.mrf.mxu0  ;;  %v4308_v23 = vpop.f32.mrf.mxu1  ;;  %v4307_v12 = vadd.f32 %v4306_v40, %v8764_v31  ;;  %v3010_v26 = vmax.f32 %v2271_v3, 0.0  ;;  %v5194_v38 = vmax.f32 %v4303_v19, 0.0  ;;  %v7605_v45 = vsel %vm7505_vm7, %v6321_v15, %v7604_v49 }
 0x3a7   :  { %v3013_v30 = vmax.f32 %v2277_v29, 0.0  ;;  %v6334_v17 = vrot.slane %v6333_v2, 1  ;;  %v6340_v41 = vmax.f32 %v6338_v50, %v6339_v27  ;;  %v4309_v9 = vadd.f32 %v4308_v23, %v8769_v37 }
 0x3a8   :  { %v2281_v42 = vpop.f32.mrf.mxu0  ;;  %8056 = vmatmul.mubr.msk.bf16.gmra.mxu0 %vm945_vm1, %v8308_v39  ;;  %v4310_v62 = vpop.f32.mrf.mxu1  ;;  %v5192_v47 = vmax.f32 %v4299_v44, 0.0  ;;  %v3342_v6 = vpack.c.bf16 %v3012_v5, %v3010_v26  ;;  %v6344_v13 = vrot.slane %v6343_v10, 4  ;;  %v5195_v43 = vmax.f32 %v4307_v12, 0.0 }
 0x3a9   :  { %v3343_v58 = vpack.c.bf16 %v3013_v30, %v3011_v1  ;;  %2529 = vmatprep.mubr.bf16.mxu0 %v8343_v4  ;;  %v6335_v18 = vmax.f32 %v6333_v2, %v6334_v17  ;;  %v4311_v7 = vadd.f32 %v4310_v62, %v8764_v31  ;;  %v6341_v46 = vrot.slane %v6340_v41, 1 }
 0x3aa   :  { %v2283_v35 = vpop.f32.mrf.mxu0  ;;  %v4312_v20 = vpop.f32.mrf.mxu1  ;;  %v7612_v55 = vsel %vm7505_vm7, %v6328_v61, %v7611_v8  ;;  %v6350_v49 = vmax.f32 %v5192_v47, %v5194_v38  ;;  %v5196_v53 = vmax.f32 %v4309_v9, 0.0  ;;  %v6345_v27 = vmax.f32 %v6343_v10, %v6344_v13 }
 0x3ab   :  { %4554 = vmatprep.mubr.bf16.mxu1 %v3343_v58  ;;  %v7606_v3 = vsel %vm7507_vm8, %v6335_v18, %v7605_v45  ;;  %v5197_v52 = vmax.f32 %v4311_v7, 0.0  ;;  %v6342_v32 = vmax.f32 %v6340_v41, %v6341_v46  ;;  %v4313_v48 = vadd.f32 %v4312_v20, %v8769_v37 }
 0x3ac   :  { %v2285_v51 = vpop.f32.mrf.mxu0  ;;  %7772 = vst [vmem:[#allocation2 + $0x70] sm:$0xff] %v7606_v3  ;;  %v4316_v39 = vpop.f32.mrf.mxu1  ;;  %4555 = vmatmul.mubr.bf16.gmra.mxu1 %v3342_v6  ;;  %v3015_v57 = vmax.f32 %v2283_v35, 0.0  ;;  %v3014_v30 = vmax.f32 %v2281_v42, 0.0  ;;  %v6351_v58 = vrot.slane %v6350_v49, 4  ;;  %v6346_v18 = vrot.slane %v6345_v27, 2  ;;  %v8310_v35 = vld [vmem:[%s10216_s0 + $0x3a8] sm:$0xff]  }
 0x3ad   :  { %v6357_v50 = vmax.f32 %v5195_v43, %v5197_v52  ;;  %v7613_v15 = vsel %vm7507_vm8, %v6342_v32, %v7612_v55  ;;  %v5198_v2 = vmax.f32 %v4313_v48, 0.0  ;;  %v3016_v44 = vmax.f32 %v2285_v51, 0.0 }
 0x3ae   :  { %v2287_v40 = vpop.f32.mrf.mxu0  ;;  %v4318_v29 = vpop.f32.mrf.mxu1  ;;  %7773 = vst [vmem:[#allocation2 + $0x78] sm:$0xff] %v7613_v15  ;;  %v4317_v1 = vadd.f32 %v4316_v39, %v8764_v31  ;;  %v6347_v55 = vmax.f32 %v6345_v27, %v6346_v18  ;;  %v6352_v32 = vmax.f32 %v6350_v49, %v6351_v58 }
 0x3af   :  { %v3017_v19 = vmax.f32 %v2287_v40, 0.0  ;;  %v6358_v23 = vrot.slane %v6357_v50, 4  ;;  %v6364_v8 = vmax.f32 %v5196_v53, %v5198_v2  ;;  %v4319_v61 = vadd.f32 %v4318_v29, %v8769_v37 }
 0x3b0   :  { %v2291_v5 = vpop.f32.mrf.mxu0  ;;  %8057 = vmatmul.mubr.msk.bf16.gmra.mxu0 %vm945_vm1, %v8309_v16  ;;  %v4320_v12 = vpop.f32.mrf.mxu1  ;;  %v3344_v62 = vpack.c.bf16 %v3016_v44, %v3014_v30  ;;  %v5199_v38 = vmax.f32 %v4317_v1, 0.0 }
 0x3b1   :  { %v3345_v17 = vpack.c.bf16 %v3017_v19, %v3015_v57  ;;  %2539 = vmatprep.mubr.bf16.mxu0 %v8343_v4  ;;  %v4321_v41 = vadd.f32 %v4320_v12, %v8764_v31  ;;  %v6359_v45 = vmax.f32 %v6357_v50, %v6358_v23  ;;  %v6365_v46 = vrot.slane %v6364_v8, 4 }
 0x3b2   :  { %v2293_v26 = vpop.f32.mrf.mxu0  ;;  %v4322_v10 = vpop.f32.mrf.mxu1  ;;  %v5200_v6 = vmax.f32 %v4319_v61, 0.0  ;;  %v3018_v40 = vmax.f32 %v2291_v5, 0.0  ;;  %v6353_v23 = vrot.slane %v6352_v32, 2  ;;  %v8311_v5 = vld [vmem:[%s10216_s0 + $0x3b0] sm:$0xff]   ;;  %v6348_v61 = vrot.slane %v6347_v55, 1 }
 0x3b3   :  { %4564 = vmatprep.mubr.bf16.mxu1 %v3345_v17  ;;  %v5201_v9 = vmax.f32 %v4321_v41, 0.0  ;;  %v4323_v42 = vadd.f32 %v4322_v10, %v8769_v37  ;;  %v3019_v43 = vmax.f32 %v2293_v26, 0.0  ;;  %v6360_v57 = vrot.slane %v6359_v45, 2 }
 0x3b4   :  { %v2295_v7 = vpop.f32.mrf.mxu0  ;;  %v4326_v47 = vpop.f32.mrf.mxu1  ;;  %4565 = vmatmul.mubr.bf16.gmra.mxu1 %v3344_v62  ;;  %v6366_v50 = vmax.f32 %v6364_v8, %v6365_v46 }
 0x3b5   :  { %v6371_v20 = vmax.f32 %v5199_v38, %v5201_v9  ;;  %v5202_v3 = vmax.f32 %v4323_v42, 0.0  ;;  %v3020_v52 = vmax.f32 %v2295_v7, 0.0  ;;  %v4327_v19 = vadd.f32 %v4326_v47, %v8764_v31 }
 0x3b6   :  { %v2297_v13 = vpop.f32.mrf.mxu0  ;;  %v4328_v16 = vpop.f32.mrf.mxu1  ;;  %v6361_v41 = vmax.f32 %v6359_v45, %v6360_v57  ;;  %v6367_v62 = vrot.slane %v6366_v50, 2 }
 0x3b7   :  { %v3021_v51 = vmax.f32 %v2297_v13, 0.0  ;;  %v6372_v48 = vrot.slane %v6371_v20, 4  ;;  %v6378_v39 = vmax.f32 %v5200_v6, %v5202_v3  ;;  %v4329_v29 = vadd.f32 %v4328_v16, %v8769_v37 }
 0x3b8   :  { %v2301_v53 = vpop.f32.mrf.mxu0  ;;  %8058 = vmatmul.mubr.msk.bf16.gmra.mxu0 %vm945_vm1, %v8310_v35  ;;  %v4330_v2 = vpop.f32.mrf.mxu1  ;;  %v3346_v1 = vpack.c.bf16 %v3020_v52, %v3018_v40  ;;  %v5203_v18 = vmax.f32 %v4327_v19, 0.0  ;;  %v6354_v6 = vmax.f32 %v6352_v32, %v6353_v23 }
 0x3b9   :  { %v3347_v15 = vpack.c.bf16 %v3021_v51, %v3019_v43  ;;  %2549 = vmatprep.mubr.bf16.mxu0 %v8343_v4  ;;  %v6379_v44 = vrot.slane %v6378_v39, 4  ;;  %v4331_v27 = vadd.f32 %v4330_v2, %v8764_v31  ;;  %v6373_v17 = vmax.f32 %v6371_v20, %v6372_v48 }
 0x3ba   :  { %v2303_v49 = vpop.f32.mrf.mxu0  ;;  %v4332_v30 = vpop.f32.mrf.mxu1  ;;  %v5204_v38 = vmax.f32 %v4329_v29, 0.0  ;;  %v6362_v43 = vrot.slane %v6361_v41, 1  ;;  %v3022_v52 = vmax.f32 %v2301_v53, 0.0  ;;  %v6349_v2 = vmax.f32 %v6347_v55, %v6348_v61 }
 0x3bb   :  { %4574 = vmatprep.mubr.bf16.mxu1 %v3347_v15  ;;  %v5205_v12 = vmax.f32 %v4331_v27, 0.0  ;;  %v4333_v26 = vadd.f32 %v4332_v30, %v8769_v37  ;;  %v6380_v10 = vmax.f32 %v6378_v39, %v6379_v44  ;;  %v3023_v42 = vmax.f32 %v2303_v49, 0.0  ;;  %v8312_v30 = vld [vmem:[%s10216_s0 + $0x3b8] sm:$0xff]  }
 0x3bc   :  { %v2305_v8 = vpop.f32.mrf.mxu0  ;;  %v4336_v58 = vpop.f32.mrf.mxu1  ;;  %4575 = vmatmul.mubr.bf16.gmra.mxu1 %v3346_v1  ;;  %v6374_v20 = vrot.slane %v6373_v17, 2  ;;  %v6368_v39 = vmax.f32 %v6366_v50, %v6367_v62  ;;  %v6355_v50 = vrot.slane %v6354_v6, 1  ;;  %v6363_v23 = vmax.f32 %v6361_v41, %v6362_v43 }
 0x3bd   :  { %v5206_v7 = vmax.f32 %v4333_v26, 0.0  ;;  %v3024_v35 = vmax.f32 %v2305_v8, 0.0  ;;  %v6385_v3 = vmax.f32 %v5203_v18, %v5205_v12  ;;  %v4337_v13 = vadd.f32 %v4336_v58, %v8764_v31 }
 0x3be   :  { %v2307_v9 = vpop.f32.mrf.mxu0  ;;  %v4338_v47 = vpop.f32.mrf.mxu1  ;;  %v6381_v57 = vrot.slane %v6380_v10, 2  ;;  %v6375_v29 = vmax.f32 %v6373_v17, %v6374_v20  ;;  %v6369_v55 = vrot.slane %v6368_v39, 1 }
 0x3bf   :  { %v3025_v46 = vmax.f32 %v2307_v9, 0.0  ;;  %v6392_v51 = vmax.f32 %v5204_v38, %v5206_v7  ;;  %v4339_v40 = vadd.f32 %v4338_v47, %v8769_v37  ;;  %v3348_v44 = vpack.c.bf16 %v3024_v35, %v3022_v52 }
 0x3c0   :  { %v2311_v45 = vpop.f32.mrf.mxu0  ;;  %8059 = vmatmul.mubr.msk.bf16.gmra.mxu0 %vm945_vm1, %v8311_v5  ;;  %v4340_v48 = vpop.f32.mrf.mxu1  ;;  %v6386_v27 = vrot.slane %v6385_v3, 4  ;;  %v5207_v49 = vmax.f32 %v4337_v13, 0.0  ;;  %v6382_v61 = vmax.f32 %v6380_v10, %v6381_v57  ;;  %v6376_v7 = vrot.slane %v6375_v29, 1 }
 0x3c1   :  { %v3349_v16 = vpack.c.bf16 %v3025_v46, %v3023_v42  ;;  %2559 = vmatprep.mubr.bf16.mxu0 %v8343_v4  ;;  %v4341_v32 = vadd.f32 %v4340_v48, %v8764_v31  ;;  %v6393_v12 = vrot.slane %v6392_v51, 4  ;;  %v5208_v26 = vmax.f32 %v4339_v40, 0.0 }
 0x3c2   :  { %v2313_v15 = vpop.f32.mrf.mxu0  ;;  %v4342_v19 = vpop.f32.mrf.mxu1  ;;  %v6387_v35 = vmax.f32 %v6385_v3, %v6386_v27  ;;  %v3026_v13 = vmax.f32 %v2311_v45, 0.0  ;;  %v6383_v48 = vrot.slane %v6382_v61, 1 }
 0x3c3   :  { %4584 = vmatprep.mubr.bf16.mxu1 %v3349_v16  ;;  %v5209_v53 = vmax.f32 %v4341_v32, 0.0  ;;  %v4343_v8 = vadd.f32 %v4342_v19, %v8769_v37  ;;  %v3027_v62 = vmax.f32 %v2313_v15, 0.0  ;;  %v6394_v20 = vmax.f32 %v6392_v51, %v6393_v12 }
 0x3c4   :  { %v2315_v1 = vpop.f32.mrf.mxu0  ;;  %v4346_v5 = vpop.f32.mrf.mxu1  ;;  %4585 = vmatmul.mubr.bf16.gmra.mxu1 %v3348_v44  ;;  %v6356_v16 = vmax.f32 %v6354_v6, %v6355_v50  ;;  %v7614_v32 = vsel %vm7495_vm2, %v6363_v23, %v6349_v2  ;;  %v6388_v45 = vrot.slane %v6387_v35, 2  ;;  %v8313_v6 = vld [vmem:[%s10216_s0 + $0x3c0] sm:$0xff]   ;;  %v6377_v50 = vmax.f32 %v6375_v29, %v6376_v7 }
 0x3c5   :  { %v6399_v58 = vmax.f32 %v5207_v49, %v5209_v53  ;;  %v5210_v18 = vmax.f32 %v4343_v8, 0.0  ;;  %v3028_v38 = vmax.f32 %v2315_v1, 0.0  ;;  %v4347_v41 = vadd.f32 %v4346_v5, %v8764_v31 }
 0x3c6   :  { %v2317_v17 = vpop.f32.mrf.mxu0  ;;  %v4348_v42 = vpop.f32.mrf.mxu1  ;;  %v6395_v12 = vrot.slane %v6394_v20, 2  ;;  %v6384_v23 = vmax.f32 %v6382_v61, %v6383_v48 }
 0x3c7   :  { %v3029_v9 = vmax.f32 %v2317_v17, 0.0  ;;  %v6400_v46 = vrot.slane %v6399_v58, 4  ;;  %v6406_v43 = vmax.f32 %v5208_v26, %v5210_v18  ;;  %v4349_v57 = vadd.f32 %v4348_v42, %v8769_v37 }
 0x3c8   :  { %v2321_v47 = vpop.f32.mrf.mxu0  ;;  %8060 = vmatmul.mubr.msk.bf16.gmra.mxu0 %vm945_vm1, %v8312_v30  ;;  %v4350_v52 = vpop.f32.mrf.mxu1  ;;  %v3350_v19 = vpack.c.bf16 %v3028_v38, %v3026_v13  ;;  %v5211_v51 = vmax.f32 %v4347_v41, 0.0  ;;  %v6370_v30 = vmax.f32 %v6368_v39, %v6369_v55  ;;  %v6396_v55 = vmax.f32 %v6394_v20, %v6395_v12 }
 0x3c9   :  { %v3351_v10 = vpack.c.bf16 %v3029_v9, %v3027_v62  ;;  %2569 = vmatprep.mubr.bf16.mxu0 %v8343_v4  ;;  %v4351_v40 = vadd.f32 %v4350_v52, %v8764_v31  ;;  %v6401_v15 = vmax.f32 %v6399_v58, %v6400_v46  ;;  %v6407_v44 = vrot.slane %v6406_v43, 4 }
 0x3ca   :  { %v2323_v3 = vpop.f32.mrf.mxu0  ;;  %v4352_v27 = vpop.f32.mrf.mxu1  ;;  %v5212_v5 = vmax.f32 %v4349_v57, 0.0  ;;  %v6389_v46 = vmax.f32 %v6387_v35, %v6388_v45  ;;  %v3030_v61 = vmax.f32 %v2321_v47, 0.0 }
 0x3cb   :  { %4594 = vmatprep.mubr.bf16.mxu1 %v3351_v10  ;;  %v5213_v49 = vmax.f32 %v4351_v40, 0.0  ;;  %v4353_v53 = vadd.f32 %v4352_v27, %v8769_v37  ;;  %v6408_v8 = vmax.f32 %v6406_v43, %v6407_v44  ;;  %v6402_v62 = vrot.slane %v6401_v15, 2 }
 0x3cc   :  { %v2325_v1 = vpop.f32.mrf.mxu0  ;;  %v4356_v2 = vpop.f32.mrf.mxu1  ;;  %4595 = vmatmul.mubr.bf16.gmra.mxu1 %v3350_v19  ;;  %v3031_v18 = vmax.f32 %v2323_v3, 0.0  ;;  %v7621_v3 = vsel %vm7495_vm2, %v6370_v30, %v6356_v16  ;;  %v9574_v44 = vsel %vm7497_vm3, %v6377_v50, %v7614_v32  ;;  %v6390_v16 = vrot.slane %v6389_v46, 1 }
 0x3cd   :  { %v6413_v26 = vmax.f32 %v5211_v51, %v5213_v49  ;;  %v5214_v58 = vmax.f32 %v4353_v53, 0.0  ;;  %v3032_v38 = vmax.f32 %v2325_v1, 0.0  ;;  %v4357_v39 = vadd.f32 %v4356_v2, %v8764_v31  ;;  %v8314_v1 = vld [vmem:[%s10216_s0 + $0x3c8] sm:$0xff]  }
 0x3ce   :  { %v2327_v17 = vpop.f32.mrf.mxu0  ;;  %v4358_v42 = vpop.f32.mrf.mxu1  ;;  %v6409_v7 = vrot.slane %v6408_v8, 2  ;;  %v6403_v19 = vmax.f32 %v6401_v15, %v6402_v62  ;;  %v6397_v50 = vrot.slane %v6396_v55, 1 }
 0x3cf   :  { %v3033_v9 = vmax.f32 %v2327_v17, 0.0  ;;  %v6414_v41 = vrot.slane %v6413_v26, 4  ;;  %v6420_v13 = vmax.f32 %v5212_v5, %v5214_v58  ;;  %v4359_v57 = vadd.f32 %v4358_v42, %v8769_v37 }
 0x3d0   :  { %v2331_v29 = vpop.f32.mrf.mxu0  ;;  %8061 = vmatmul.mubr.msk.bf16.gmra.mxu0 %vm945_vm1, %v8313_v6  ;;  %v4360_v10 = vpop.f32.mrf.mxu1  ;;  %v3352_v20 = vpack.c.bf16 %v3032_v38, %v3030_v61  ;;  %v5215_v51 = vmax.f32 %v4357_v39, 0.0  ;;  %v9580_v6 = vsel %vm7497_vm3, %v6384_v23, %v7621_v3  ;;  %v6410_v30 = vmax.f32 %v6408_v8, %v6409_v7 }
 0x3d1   :  { %v3353_v43 = vpack.c.bf16 %v3033_v9, %v3031_v18  ;;  %2579 = vmatprep.mubr.bf16.mxu0 %v8343_v4  ;;  %v6415_v52 = vmax.f32 %v6413_v26, %v6414_v41  ;;  %v6421_v48 = vrot.slane %v6420_v13, 4  ;;  %v4361_v35 = vadd.f32 %v4360_v10, %v8764_v31 }
 0x3d2   :  { %v2333_v40 = vpop.f32.mrf.mxu0  ;;  %v4362_v27 = vpop.f32.mrf.mxu1  ;;  %v5216_v12 = vmax.f32 %v4359_v57, 0.0  ;;  %v6404_v9 = vrot.slane %v6403_v19, 1  ;;  %v3034_v39 = vmax.f32 %v2331_v29, 0.0  ;;  %v6391_v10 = vmax.f32 %v6389_v46, %v6390_v16  ;;  %v8315_v46 = vld [vmem:[%s10216_s0 + $0x3d0] sm:$0xff]  }
 0x3d3   :  { %4604 = vmatprep.mubr.bf16.mxu1 %v3353_v43  ;;  %v6416_v47 = vrot.slane %v6415_v52, 2  ;;  %v6422_v45 = vmax.f32 %v6420_v13, %v6421_v48  ;;  %v5217_v49 = vmax.f32 %v4361_v35, 0.0  ;;  %v4363_v32 = vadd.f32 %v4362_v27, %v8769_v37 }
 0x3d4   :  { %v2335_v53 = vpop.f32.mrf.mxu0  ;;  %v4366_v15 = vpop.f32.mrf.mxu1  ;;  %4605 = vmatmul.mubr.bf16.gmra.mxu1 %v3352_v20  ;;  %v3035_v5 = vmax.f32 %v2333_v40, 0.0  ;;  %v6411_v13 = vrot.slane %v6410_v30, 1  ;;  %v6398_v40 = vmax.f32 %v6396_v55, %v6397_v50  ;;  %v6405_v16 = vmax.f32 %v6403_v19, %v6404_v9 }
 0x3d5   :  { %v6427_v2 = vmax.f32 %v5215_v51, %v5217_v49  ;;  %v6417_v58 = vmax.f32 %v6415_v52, %v6416_v47  ;;  %v5218_v17 = vmax.f32 %v4363_v32, 0.0  ;;  %v3036_v62 = vmax.f32 %v2335_v53, 0.0 }
 0x3d6   :  { %v2337_v26 = vpop.f32.mrf.mxu0  ;;  %v4368_v38 = vpop.f32.mrf.mxu1  ;;  %v6423_v42 = vrot.slane %v6422_v45, 2  ;;  %v4367_v41 = vadd.f32 %v4366_v15, %v8764_v31  ;;  %v6412_v32 = vmax.f32 %v6410_v30, %v6411_v13 }
 0x3d7   :  { %v3037_v18 = vmax.f32 %v2337_v26, 0.0  ;;  %v6428_v23 = vrot.slane %v6427_v2, 4  ;;  %v6434_v7 = vmax.f32 %v5216_v12, %v5218_v17  ;;  %v4369_v48 = vadd.f32 %v4368_v38, %v8769_v37 }
 0x3d8   :  { %v2341_v8 = vpop.f32.mrf.mxu0  ;;  %8062 = vmatmul.mubr.msk.bf16.gmra.mxu0 %vm945_vm1, %v8314_v1  ;;  %v4370_v43 = vpop.f32.mrf.mxu1  ;;  %v6418_v3 = vrot.slane %v6417_v58, 1  ;;  %v3354_v27 = vpack.c.bf16 %v3036_v62, %v3034_v39  ;;  %v6424_v51 = vmax.f32 %v6422_v45, %v6423_v42  ;;  %v5219_v49 = vmax.f32 %v4367_v41, 0.0 }
 0x3d9   :  { %v3355_v61 = vpack.c.bf16 %v3037_v18, %v3035_v5  ;;  %2589 = vmatprep.mubr.bf16.mxu0 %v8343_v4  ;;  %v6429_v52 = vmax.f32 %v6427_v2, %v6428_v23  ;;  %v4371_v57 = vadd.f32 %v4370_v43, %v8764_v31  ;;  %v6435_v20 = vrot.slane %v6434_v7, 4 }
 0x3da   :  { %v2343_v35 = vpop.f32.mrf.mxu0  ;;  %v4372_v47 = vpop.f32.mrf.mxu1  ;;  %v5220_v2 = vmax.f32 %v4369_v48, 0.0  ;;  %v6419_v23 = vmax.f32 %v6417_v58, %v6418_v3  ;;  %v6425_v41 = vrot.slane %v6424_v51, 1  ;;  %v3038_v39 = vmax.f32 %v2341_v8, 0.0 }
 0x3db   :  { %4614 = vmatprep.mubr.bf16.mxu1 %v3355_v61  ;;  %v6430_v29 = vrot.slane %v6429_v52, 2  ;;  %v5221_v53 = vmax.f32 %v4371_v57, 0.0  ;;  %v6436_v15 = vmax.f32 %v6434_v7, %v6435_v20  ;;  %v4373_v12 = vadd.f32 %v4372_v47, %v8769_v37 }
 0x3dc   :  { %v2345_v1 = vpop.f32.mrf.mxu0  ;;  %v4376_v55 = vpop.f32.mrf.mxu1  ;;  %4615 = vmatmul.mubr.bf16.gmra.mxu1 %v3354_v27  ;;  %v3039_v26 = vmax.f32 %v2343_v35, 0.0  ;;  %v7623_v35 = vsel %vm7499_vm4, %v6398_v40, %v9580_v6 }
 0x3dd   :  { %v6431_v50 = vmax.f32 %v6429_v52, %v6430_v29  ;;  %v6441_v5 = vmax.f32 %v5219_v49, %v5221_v53  ;;  %v6437_v17 = vrot.slane %v6436_v15, 2  ;;  %v5222_v62 = vmax.f32 %v4373_v12, 0.0 }
 0x3de   :  { %v2347_v45 = vpop.f32.mrf.mxu0  ;;  %v3040_v18 = vmax.f32 %v2345_v1, 0.0  ;;  %v4378_v42 = vpop.f32.mrf.mxu1  ;;  %v4377_v7 = vadd.f32 %v4376_v55, %v8764_v31  ;;  %v7616_v52 = vsel %vm7499_vm4, %v6391_v10, %v9574_v44  ;;  %v7624_v29 = vsel %vm7501_vm5, %v6412_v32, %v7623_v35  ;;  %v8316_v10 = vld [vmem:[%s10216_s0 + $0x3d8] sm:$0xff]  }
 0x3df   :  { %v3041_v38 = vmax.f32 %v2347_v45, 0.0  ;;  %v6442_v19 = vrot.slane %v6441_v5, 4  ;;  %v6438_v9 = vmax.f32 %v6436_v15, %v6437_v17  ;;  %v6448_v13 = vmax.f32 %v5220_v2, %v5222_v62 }
 0x3e0   :  { %v2351_v30 = vpop.f32.mrf.mxu0  ;;  %8063 = vmatmul.mubr.msk.bf16.gmra.mxu0 %vm945_vm1, %v8315_v46  ;;  %v4380_v43 = vpop.f32.mrf.mxu1  ;;  %v6432_v48 = vrot.slane %v6431_v50, 1  ;;  %v7617_v3 = vsel %vm7501_vm5, %v6405_v16, %v7616_v52  ;;  %v3356_v27 = vpack.c.bf16 %v3040_v18, %v3038_v39  ;;  %v6426_v49 = vmax.f32 %v6424_v51, %v6425_v41 }
 0x3e1   :  { %v3357_v61 = vpack.c.bf16 %v3041_v38, %v3039_v26  ;;  %2599 = vmatprep.mubr.bf16.mxu0 %v8343_v4  ;;  %v6443_v57 = vmax.f32 %v6441_v5, %v6442_v19  ;;  %v4381_v58 = vadd.f32 %v4380_v43, %v8764_v31  ;;  %v6449_v20 = vrot.slane %v6448_v13, 4 }
 0x3e2   :  { %v2353_v8 = vpop.f32.mrf.mxu0  ;;  %v4382_v47 = vpop.f32.mrf.mxu1  ;;  %v7618_v46 = vsel %vm7503_vm6, %v6419_v23, %v7617_v3  ;;  %v6439_v15 = vrot.slane %v6438_v9, 1  ;;  %v5223_v40 = vmax.f32 %v4377_v7, 0.0  ;;  %v6433_v12 = vmax.f32 %v6431_v50, %v6432_v48 }
 0x3e3   :  { %4624 = vmatprep.mubr.bf16.mxu1 %v3357_v61  ;;  %v6444_v53 = vrot.slane %v6443_v57, 2  ;;  %v5225_v1 = vmax.f32 %v4381_v58, 0.0  ;;  %v6450_v6 = vmax.f32 %v6448_v13, %v6449_v20  ;;  %v4379_v2 = vadd.f32 %v4378_v42, %v8769_v37 }
 0x3e4   :  { %v2355_v44 = vpop.f32.mrf.mxu0  ;;  %v4386_v16 = vpop.f32.mrf.mxu1  ;;  %4625 = vmatmul.mubr.bf16.gmra.mxu1 %v3356_v27  ;;  %v4383_v51 = vadd.f32 %v4382_v47, %v8769_v37  ;;  %v3043_v26 = vmax.f32 %v2353_v8, 0.0  ;;  %v7625_v18 = vsel %vm7503_vm6, %v6426_v49, %v7624_v29  ;;  %v6440_v50 = vmax.f32 %v6438_v9, %v6439_v15  ;;  %v8317_v49 = vld [vmem:[%s10216_s0 + $0x3e0] sm:$0xff]  }
 0x3e5   :  { %v6445_v55 = vmax.f32 %v6443_v57, %v6444_v53  ;;  %v6451_v5 = vrot.slane %v6450_v6, 2  ;;  %v3044_v45 = vmax.f32 %v2355_v44, 0.0  ;;  %v6455_v23 = vmax.f32 %v5223_v40, %v5225_v1 }
 0x3e6   :  { %v2357_v32 = vpop.f32.mrf.mxu0  ;;  %v4388_v62 = vpop.f32.mrf.mxu1  ;;  %v4387_v41 = vadd.f32 %v4386_v16, %v8764_v31  ;;  %v3042_v42 = vmax.f32 %v2351_v30, 0.0  ;;  %v5226_v43 = vmax.f32 %v4383_v51, 0.0  ;;  %v7619_v58 = vsel %vm7505_vm7, %v6433_v12, %v7618_v46 }
 0x3e7   :  { %v3045_v17 = vmax.f32 %v2357_v32, 0.0  ;;  %v6446_v38 = vrot.slane %v6445_v55, 1  ;;  %v6452_v19 = vmax.f32 %v6450_v6, %v6451_v5  ;;  %v4389_v52 = vadd.f32 %v4388_v62, %v8769_v37 }
 0x3e8   :  { %v2361_v39 = vpop.f32.mrf.mxu0  ;;  %8064 = vmatmul.mubr.msk.bf16.gmra.mxu0 %vm945_vm1, %v8316_v10  ;;  %v4390_v7 = vpop.f32.mrf.mxu1  ;;  %v5224_v35 = vmax.f32 %v4379_v2, 0.0  ;;  %v3358_v3 = vpack.c.bf16 %v3044_v45, %v3042_v42  ;;  %v6456_v9 = vrot.slane %v6455_v23, 4  ;;  %v5227_v27 = vmax.f32 %v4387_v41, 0.0 }
 0x3e9   :  { %v3359_v13 = vpack.c.bf16 %v3045_v17, %v3043_v26  ;;  %2609 = vmatprep.mubr.bf16.mxu0 %v8343_v4  ;;  %v6447_v61 = vmax.f32 %v6445_v55, %v6446_v38  ;;  %v4391_v48 = vadd.f32 %v4390_v7, %v8764_v31  ;;  %v6453_v8 = vrot.slane %v6452_v19, 1 }
 0x3ea   :  { %v2363_v57 = vpop.f32.mrf.mxu0  ;;  %v4392_v20 = vpop.f32.mrf.mxu1  ;;  %v7626_v53 = vsel %vm7505_vm7, %v6440_v50, %v7625_v18  ;;  %v6462_v46 = vmax.f32 %v5224_v35, %v5226_v43  ;;  %v5228_v15 = vmax.f32 %v4389_v52, 0.0  ;;  %v6457_v5 = vmax.f32 %v6455_v23, %v6456_v9 }
 0x3eb   :  { %4634 = vmatprep.mubr.bf16.mxu1 %v3359_v13  ;;  %v7620_v30 = vsel %vm7507_vm8, %v6447_v61, %v7619_v58  ;;  %v5229_v47 = vmax.f32 %v4391_v48, 0.0  ;;  %v6454_v1 = vmax.f32 %v6452_v19, %v6453_v8  ;;  %v4393_v44 = vadd.f32 %v4392_v20, %v8769_v37 }
 0x3ec   :  { %v2365_v29 = vpop.f32.mrf.mxu0  ;;  %7774 = vst [vmem:[#allocation2 + $0x80] sm:$0xff] %v7620_v30  ;;  %v4396_v10 = vpop.f32.mrf.mxu1  ;;  %4635 = vmatmul.mubr.bf16.gmra.mxu1 %v3358_v3  ;;  %v3047_v40 = vmax.f32 %v2363_v57, 0.0  ;;  %v3046_v17 = vmax.f32 %v2361_v39, 0.0  ;;  %v6463_v13 = vrot.slane %v6462_v46, 4  ;;  %v6458_v61 = vrot.slane %v6457_v5, 2  ;;  %v8318_v57 = vld [vmem:[%s10216_s0 + $0x3e8] sm:$0xff]  }
 0x3ed   :  { %v6469_v6 = vmax.f32 %v5227_v27, %v5229_v47  ;;  %v7627_v12 = vsel %vm7507_vm8, %v6454_v1, %v7626_v53  ;;  %v5230_v55 = vmax.f32 %v4393_v44, 0.0  ;;  %v3048_v2 = vmax.f32 %v2365_v29, 0.0 }
 0x3ee   :  { %v2367_v16 = vpop.f32.mrf.mxu0  ;;  %v4398_v32 = vpop.f32.mrf.mxu1  ;;  %7775 = vst [vmem:[#allocation2 + $0x88] sm:$0xff] %v7627_v12  ;;  %v4397_v26 = vadd.f32 %v4396_v10, %v8764_v31  ;;  %v6459_v53 = vmax.f32 %v6457_v5, %v6458_v61  ;;  %v6464_v1 = vmax.f32 %v6462_v46, %v6463_v13 }
 0x3ef   :  { %v3049_v51 = vmax.f32 %v2367_v16, 0.0  ;;  %v6470_v62 = vrot.slane %v6469_v6, 4  ;;  %v6476_v18 = vmax.f32 %v5228_v15, %v5230_v55  ;;  %v4399_v50 = vadd.f32 %v4398_v32, %v8769_v37 }
 0x3f0   :  { %v2371_v45 = vpop.f32.mrf.mxu0  ;;  %8065 = vmatmul.mubr.msk.bf16.gmra.mxu0 %vm945_vm1, %v8317_v49  ;;  %v4400_v41 = vpop.f32.mrf.mxu1  ;;  %v3360_v7 = vpack.c.bf16 %v3048_v2, %v3046_v17  ;;  %v5231_v43 = vmax.f32 %v4397_v26, 0.0 }
 0x3f1   :  { %v3361_v38 = vpack.c.bf16 %v3049_v51, %v3047_v40  ;;  %2619 = vmatprep.mubr.bf16.mxu0 %v8343_v4  ;;  %v4401_v19 = vadd.f32 %v4400_v41, %v8764_v31  ;;  %v6471_v58 = vmax.f32 %v6469_v6, %v6470_v62  ;;  %v6477_v8 = vrot.slane %v6476_v18, 4 }
 0x3f2   :  { %v2373_v42 = vpop.f32.mrf.mxu0  ;;  %v4402_v23 = vpop.f32.mrf.mxu1  ;;  %v5232_v3 = vmax.f32 %v4399_v50, 0.0  ;;  %v3050_v16 = vmax.f32 %v2371_v45, 0.0  ;;  %v6465_v62 = vrot.slane %v6464_v1, 2  ;;  %v8319_v45 = vld [vmem:[%s10216_s0 + $0x3f0] sm:$0xff]  }
 0x3f3   :  { %4644 = vmatprep.mubr.bf16.mxu1 %v3361_v38  ;;  %v5233_v52 = vmax.f32 %v4401_v19, 0.0  ;;  %v4403_v39 = vadd.f32 %v4402_v23, %v8769_v37  ;;  %v3051_v27 = vmax.f32 %v2373_v42, 0.0  ;;  %v6472_v40 = vrot.slane %v6471_v58, 2 }
 0x3f4   :  { %v2375_v48 = vpop.f32.mrf.mxu0  ;;  %v4406_v35 = vpop.f32.mrf.mxu1  ;;  %4645 = vmatmul.mubr.bf16.gmra.mxu1 %v3360_v7  ;;  %v6478_v6 = vmax.f32 %v6476_v18, %v6477_v8  ;;  %v6460_v18 = vrot.slane %v6459_v53, 1 }
 0x3f5   :  { %v6483_v20 = vmax.f32 %v5231_v43, %v5233_v52  ;;  %v5234_v30 = vmax.f32 %v4403_v39, 0.0  ;;  %v3052_v47 = vmax.f32 %v2375_v48, 0.0  ;;  %v4407_v51 = vadd.f32 %v4406_v35, %v8764_v31 }
 0x3f6   :  { %v2377_v9 = vpop.f32.mrf.mxu0  ;;  %v4408_v49 = vpop.f32.mrf.mxu1  ;;  %v6473_v50 = vmax.f32 %v6471_v58, %v6472_v40  ;;  %v6479_v7 = vrot.slane %v6478_v6, 2 }
 0x3f7   :  { %v3053_v29 = vmax.f32 %v2377_v9, 0.0  ;;  %v6484_v44 = vrot.slane %v6483_v20, 4  ;;  %v6490_v10 = vmax.f32 %v5232_v3, %v5234_v30  ;;  %v4409_v32 = vadd.f32 %v4408_v49, %v8769_v37 }
 0x3f8   :  { %v2381_v15 = vpop.f32.mrf.mxu0  ;;  %8066 = vmatmul.mubr.msk.bf16.gmra.mxu0 %vm945_vm1, %v8318_v57  ;;  %v4410_v55 = vpop.f32.mrf.mxu1  ;;  %v3362_v26 = vpack.c.bf16 %v3052_v47, %v3050_v16  ;;  %v5235_v61 = vmax.f32 %v4407_v51, 0.0  ;;  %v6466_v3 = vmax.f32 %v6464_v1, %v6465_v62  ;;  %v6461_v1 = vmax.f32 %v6459_v53, %v6460_v18 }
 0x3f9   :  { %v3363_v12 = vpack.c.bf16 %v3053_v29, %v3051_v27  ;;  %2629 = vmatprep.mubr.bf16.mxu0 %v8343_v4  ;;  %v6491_v2 = vrot.slane %v6490_v10, 4  ;;  %v4411_v5 = vadd.f32 %v4410_v55, %v8764_v31  ;;  %v6485_v38 = vmax.f32 %v6483_v20, %v6484_v44 }
 0x3fa   :  { %v2383_v46 = vpop.f32.mrf.mxu0  ;;  %v4412_v17 = vpop.f32.mrf.mxu1  ;;  %v5236_v43 = vmax.f32 %v4409_v32, 0.0  ;;  %v3054_v9 = vmax.f32 %v2381_v15, 0.0  ;;  %v6474_v44 = vrot.slane %v6473_v50, 1 }
 0x3fb   :  { %4654 = vmatprep.mubr.bf16.mxu1 %v3363_v12  ;;  %v5237_v19 = vmax.f32 %v4411_v5, 0.0  ;;  %v4413_v42 = vadd.f32 %v4412_v17, %v8769_v37  ;;  %v6492_v23 = vmax.f32 %v6490_v10, %v6491_v2  ;;  %v3055_v39 = vmax.f32 %v2383_v46, 0.0 }
 0x3fc   :  { %v2385_v41 = vpop.f32.mrf.mxu0  ;;  %v4416_v13 = vpop.f32.mrf.mxu1  ;;  %4655 = vmatmul.mubr.bf16.gmra.mxu1 %v3362_v26  ;;  %v6486_v20 = vrot.slane %v6485_v38, 2  ;;  %v6480_v10 = vmax.f32 %v6478_v6, %v6479_v7  ;;  %v6467_v26 = vrot.slane %v6466_v3, 1  ;;  %v6475_v53 = vmax.f32 %v6473_v50, %v6474_v44 }
 0x3fd   :  { %v5238_v48 = vmax.f32 %v4413_v42, 0.0  ;;  %v3056_v57 = vmax.f32 %v2385_v41, 0.0  ;;  %v4417_v30 = vadd.f32 %v4416_v13, %v8764_v31  ;;  %v6497_v27 = vmax.f32 %v5235_v61, %v5237_v19 }
 0x3fe   :  { %v2387_v52 = vpop.f32.mrf.mxu0  ;;  %v4418_v35 = vpop.f32.mrf.mxu1  ;;  %v6493_v40 = vrot.slane %v6492_v23, 2  ;;  %v6487_v51 = vmax.f32 %v6485_v38, %v6486_v20 }
 0x3ff   :  { %v3057_v8 = vmax.f32 %v2387_v52, 0.0  ;;  %v6504_v47 = vmax.f32 %v5236_v43, %v5238_v48  ;;  %v3364_v55 = vpack.c.bf16 %v3056_v57, %v3054_v9  ;;  %v5239_v32 = vmax.f32 %v4417_v30, 0.0 }
 0x400   :  { %v2391_v58 = vpop.f32.mrf.mxu0  ;;  %8067 = vmatmul.mubr.msk.bf16.gmra.mxu0 %vm945_vm1, %v8319_v45  ;;  %v4420_v49 = vpop.f32.mrf.mxu1  ;;  %v4419_v15 = vadd.f32 %v4418_v35, %v8769_v37  ;;  %v6498_v6 = vrot.slane %v6497_v27, 4  ;;  %v6481_v45 = vrot.slane %v6480_v10, 1  ;;  %v6494_v18 = vmax.f32 %v6492_v23, %v6493_v40 }
 0x401   :  { %v3365_v29 = vpack.c.bf16 %v3057_v8, %v3055_v39  ;;  %2639 = vmatprep.mubr.bf16.mxu0 %v8343_v4  ;;  %v4421_v16 = vadd.f32 %v4420_v49, %v8764_v31  ;;  %v8320_v4 = vld [vmem:[%s10216_s0 + $0x3f8] sm:$0xff]   ;;  %v6505_v17 = vrot.slane %v6504_v47, 4  ;;  %v6488_v52 = vrot.slane %v6487_v51, 1  ;;  %s8344_s0 = smov [#allocation2]  }
 0x402   :  { %v2393_v12 = vpop.f32.mrf.mxu0  ;;  %v4422_v2 = vpop.f32.mrf.mxu1  ;;  %v5240_v39 = vmax.f32 %v4419_v15, 0.0  ;;  %v6499_v35 = vmax.f32 %v6497_v27, %v6498_v6  ;;  %v3058_v50 = vmax.f32 %v2391_v58, 0.0  ;;  %v6468_v40 = vmax.f32 %v6466_v3, %v6467_v26  ;;  %s7795_s9 = sshll.u32 %s8344_s0, 4  ;;  %s7796_s9 = int_to_ptr.vmem [resolvable:$true] %s7795_s9 }
 0x403   :  { %4664 = vmatprep.mubr.bf16.mxu1 %v3365_v29  ;;  %v5241_v5 = vmax.f32 %v4421_v16, 0.0  ;;  %v4423_v62 = vadd.f32 %v4422_v2, %v8769_v37  ;;  %v3059_v42 = vmax.f32 %v2393_v12, 0.0  ;;  %v6506_v20 = vmax.f32 %v6504_v47, %v6505_v17  ;;  %s8321_s2 = scalar_lea.vmem %s7796_s9, 4096  ;;  %p8326_p1 = scmp.lt.s32.totalorder %s7796_s9, %s7796_s9 }
 0x404   :  { %v2395_v46 = vpop.f32.mrf.mxu0  ;;  %v4426_v41 = vpop.f32.mrf.mxu1  ;;  %4665 = vmatmul.mubr.bf16.gmra.mxu1 %v3364_v55  ;;  %v7628_v16 = vsel %vm7495_vm2, %v6475_v53, %v6461_v1  ;;  %v6495_v12 = vrot.slane %v6494_v18, 1  ;;  %p8322_p0 = scmp.ne.s32.totalorder %s7796_s9, %s8321_s2  ;;  %p8327_p2 = scmp.lt.s32.totalorder %s8321_s2, %s8321_s2 }
 0x405   :  { %v6511_v38 = vmax.f32 %v5239_v32, %v5241_v5  ;;  %v5242_v13 = vmax.f32 %v4423_v62, 0.0  ;;  %v3060_v7 = vmax.f32 %v2395_v46, 0.0  ;;  %v4427_v57 = vadd.f32 %v4426_v41, %v8764_v31 }
 0x406   :  { %v2397_v19 = vpop.f32.mrf.mxu0  ;;  %v4428_v43 = vpop.f32.mrf.mxu1  ;;  %v6489_v5 = vmax.f32 %v6487_v51, %v6488_v52  ;;  %v6500_v46 = vrot.slane %v6499_v35, 2  ;;  %v6496_v41 = vmax.f32 %v6494_v18, %v6495_v12  ;;  %p8328_p3 = por %p8327_p2, %p8326_p1 }
 0x407   :  { %v3061_v61 = vmax.f32 %v2397_v19, 0.0  ;;  %v6512_v48 = vrot.slane %v6511_v38, 4  ;;  %v6518_v9 = vmax.f32 %v5240_v39, %v5242_v13  ;;  %v4429_v29 = vadd.f32 %v4428_v43, %v8769_v37 }
 0x408   :  { %v2401_v8 = vpop.f32.mrf.mxu0  ;;  %8068 = vmatmul.mubr.msk.bf16.gmra.mxu0 %vm945_vm1, %v8320_v4  ;;  %v4430_v23 = vpop.f32.mrf.mxu1  ;;  %v3366_v55 = vpack.c.bf16 %v3060_v7, %v3058_v50  ;;  %v5243_v47 = vmax.f32 %v4427_v57, 0.0  ;;  %v6507_v4 = vrot.slane %v6506_v20, 2  ;;  %p8329_p4 = pnand %p8328_p3, %p8322_p0 }
 0x409   :  { %v3367_v30 = vpack.c.bf16 %v3061_v61, %v3059_v42  ;;  %3654 = vmatprep.mubr.bf16.mxu0 %v8615_v14  ;;  %v4431_v49 = vadd.f32 %v4430_v23, %v8764_v31  ;;  %v6513_v27 = vmax.f32 %v6511_v38, %v6512_v48  ;;  %v6482_v14 = vmax.f32 %v6480_v10, %v6481_v45 }
 0x40a   :  { %v2403_v44 = vpop.f32.mrf.mxu0  ;;  %v4432_v2 = vpop.f32.mrf.mxu1  ;;  %v6519_v17 = vrot.slane %v6518_v9, 4  ;;  %v5244_v3 = vmax.f32 %v4429_v29, 0.0  ;;  %v6501_v45 = vmax.f32 %v6499_v35, %v6500_v46  ;;  %v6508_v43 = vmax.f32 %v6506_v20, %v6507_v4 }
 0x40b   :  { %4674 = vmatprep.mubr.bf16.mxu1 %v3367_v30  ;;  %v5245_v58 = vmax.f32 %v4431_v49, 0.0  ;;  %v4433_v32 = vadd.f32 %v4432_v2, %v8769_v37  ;;  %v3063_v53 = vmax.f32 %v2403_v44, 0.0  ;;  %v6514_v13 = vrot.slane %v6513_v27, 2 }
 0x40c   :  { %v2405_v15 = vpop.f32.mrf.mxu0  ;;  %v4436_v6 = vpop.f32.mrf.mxu1  ;;  %4675 = vmatmul.mubr.bf16.gmra.mxu1 %v3366_v55  ;;  %v3062_v52 = vmax.f32 %v2401_v8, 0.0  ;;  %v6520_v18 = vmax.f32 %v6518_v9, %v6519_v17  ;;  %v5490_v29 = vrot.slane %v8780_v60, 4  ;;  %v7635_v49 = vsel %vm7495_vm2, %v6482_v14, %v6468_v40 }
 0x40d   :  { %v6525_v26 = vmax.f32 %v5243_v47, %v5245_v58  ;;  %v5246_v1 = vmax.f32 %v4433_v32, 0.0  ;;  %v3064_v19 = vmax.f32 %v2405_v15, 0.0  ;;  %v4437_v10 = vadd.f32 %v4436_v6, %v8764_v31 }
 0x40e   :  { %v2407_v62 = vpop.f32.mrf.mxu0  ;;  %v4438_v42 = vpop.f32.mrf.mxu1  ;;  %v6515_v20 = vmax.f32 %v6513_v27, %v6514_v13  ;;  %v9667_v55 = vsel %vm7497_vm3, %v6496_v41, %v7635_v49  ;;  %v6502_v2 = vrot.slane %v6501_v45, 1  ;;  %v6509_v40 = vrot.slane %v6508_v43, 1 }
 0x40f   :  { %v3065_v38 = vmax.f32 %v2407_v62, 0.0  ;;  %v6526_v7 = vrot.slane %v6525_v26, 4  ;;  %v6532_v61 = vmax.f32 %v5244_v3, %v5246_v1  ;;  %v4439_v50 = vadd.f32 %v4438_v42, %v8769_v37 }
 0x410   :  { %v2411_v51 = vpop.f32.mrf.mxu0  ;;  %3655 = vmatmul.mubr.bf16.vlgmr.msra.gmra.mxu0 %v8612_v11  ;;  %v4440_v48 = vpop.f32.mrf.mxu1  ;;  %v9664_v11 = vsel %vm7497_vm3, %v6489_v5, %v7628_v16  ;;  %v3368_v35 = vpack.c.bf16 %v3064_v19, %v3062_v52  ;;  %v6521_v16 = vrot.slane %v6520_v18, 2  ;;  %v6516_v3 = vrot.slane %v6515_v20, 1 }
 0x411   :  { %v3369_v39 = vpack.c.bf16 %v3065_v38, %v3063_v53  ;;  %3664 = vmatprep.mubr.bf16.mxu0 %v8624_v25  ;;  %v6527_v57 = vmax.f32 %v6525_v26, %v6526_v7  ;;  %v4441_v30 = vadd.f32 %v4440_v48, %v8764_v31  ;;  %v6533_v44 = vrot.slane %v6532_v61, 4 }
 0x412   :  { %v2413_v23 = vpop.f32.mrf.mxu0  ;;  %v4442_v8 = vpop.f32.mrf.mxu1  ;;  %v5247_v25 = vmax.f32 %v4437_v10, 0.0  ;;  %v5248_v15 = vmax.f32 %v4439_v50, 0.0  ;;  %v3066_v19 = vmax.f32 %v2411_v51, 0.0  ;;  %v6503_v7 = vmax.f32 %v6501_v45, %v6502_v2 }
 0x413   :  { %4684 = vmatprep.mubr.bf16.mxu1 %v3369_v39  ;;  %v5249_v9 = vmax.f32 %v4441_v30, 0.0  ;;  %v6528_v47 = vrot.slane %v6527_v57, 2  ;;  %v4443_v58 = vadd.f32 %v4442_v8, %v8769_v37  ;;  %v3067_v46 = vmax.f32 %v2413_v23, 0.0 }
 0x414   :  { %v2415_v12 = vpop.f32.mrf.mxu0  ;;  %v4446_v32 = vpop.f32.mrf.mxu1  ;;  %4685 = vmatmul.mubr.bf16.gmra.mxu1 %v3368_v35  ;;  %v6534_v26 = vmax.f32 %v6532_v61, %v6533_v44  ;;  %v6510_v48 = vmax.f32 %v6508_v43, %v6509_v40  ;;  %v6522_v50 = vmax.f32 %v6520_v18, %v6521_v16  ;;  %v6517_v44 = vmax.f32 %v6515_v20, %v6516_v3 }
 0x415   :  { %v6539_v14 = vmax.f32 %v5247_v25, %v5249_v9  ;;  %v5250_v27 = vmax.f32 %v4443_v58, 0.0  ;;  %v3068_v4 = vmax.f32 %v2415_v12, 0.0  ;;  %v4447_v62 = vadd.f32 %v4446_v32, %v8764_v31 }
 0x416   :  { %v2417_v5 = vpop.f32.mrf.mxu0  ;;  %v4448_v17 = vpop.f32.mrf.mxu1  ;;  %v6529_v53 = vmax.f32 %v6527_v57, %v6528_v47 }
 0x417   :  { %v3069_v6 = vmax.f32 %v2417_v5, 0.0  ;;  %v6540_v1 = vrot.slane %v6539_v14, 4  ;;  %v6546_v38 = vmax.f32 %v5248_v15, %v5250_v27  ;;  %v4449_v52 = vadd.f32 %v4448_v17, %v8769_v37 }
 0x418   :  { %v2421_v41 = vpop.f32.mrf.mxu0  ;;  %3665 = vmatmul.mubr.bf16.gmra.mxu0 %v8621_v22  ;;  %v4450_v13 = vpop.f32.mrf.mxu1  ;;  %v3370_v23 = vpack.c.bf16 %v3068_v4, %v3066_v19  ;;  %v6535_v22 = vrot.slane %v6534_v26, 2  ;;  %v5251_v57 = vmax.f32 %v4447_v62, 0.0 }
 0x419   :  { %v3371_v42 = vpack.c.bf16 %v3069_v6, %v3067_v46  ;;  %3674 = vmatprep.mubr.bf16.mxu0 %v8633_v36  ;;  %v6541_v10 = vmax.f32 %v6539_v14, %v6540_v1  ;;  %v4451_v39 = vadd.f32 %v4450_v13, %v8764_v31  ;;  %v6547_v30 = vrot.slane %v6546_v38, 4 }
 0x41a   :  { %v2423_v61 = vpop.f32.mrf.mxu0  ;;  %v4452_v49 = vpop.f32.mrf.mxu1  ;;  %v6530_v36 = vrot.slane %v6529_v53, 1  ;;  %v5252_v2 = vmax.f32 %v4449_v52, 0.0  ;;  %v6523_v14 = vrot.slane %v6522_v50, 1  ;;  %v6536_v5 = vmax.f32 %v6534_v26, %v6535_v22 }
 0x41b   :  { %4694 = vmatprep.mubr.bf16.mxu1 %v3371_v42  ;;  %v6542_v51 = vrot.slane %v6541_v10, 2  ;;  %v5253_v35 = vmax.f32 %v4451_v39, 0.0  ;;  %v6548_v45 = vmax.f32 %v6546_v38, %v6547_v30  ;;  %v4453_v25 = vadd.f32 %v4452_v49, %v8769_v37 }
 0x41c   :  { %v2425_v8 = vpop.f32.mrf.mxu0  ;;  %v4456_v9 = vpop.f32.mrf.mxu1  ;;  %4695 = vmatmul.mubr.bf16.gmra.mxu1 %v3370_v23  ;;  %v3071_v18 = vmax.f32 %v2423_v61, 0.0  ;;  %v3070_v46 = vmax.f32 %v2421_v41, 0.0  ;;  %v6531_v4 = vmax.f32 %v6529_v53, %v6530_v36  ;;  %v7630_v26 = vsel %vm7499_vm4, %v6503_v7, %v9664_v11 }
 0x41d   :  { %v6543_v12 = vmax.f32 %v6541_v10, %v6542_v51  ;;  %v6553_v43 = vmax.f32 %v5251_v57, %v5253_v35  ;;  %v6549_v58 = vrot.slane %v6548_v45, 2  ;;  %v5254_v32 = vmax.f32 %v4453_v25, 0.0 }
 0x41e   :  { %v2427_v47 = vpop.f32.mrf.mxu0  ;;  %v3072_v40 = vmax.f32 %v2425_v8, 0.0  ;;  %v4458_v15 = vpop.f32.mrf.mxu1  ;;  %v4457_v17 = vadd.f32 %v4456_v9, %v8764_v31  ;;  %v7637_v41 = vsel %vm7499_vm4, %v6510_v48, %v9667_v55  ;;  %v7631_v52 = vsel %vm7501_vm5, %v6517_v44, %v7630_v26 }
 0x41f   :  { %v3073_v16 = vmax.f32 %v2427_v47, 0.0  ;;  %v6554_v20 = vrot.slane %v6553_v43, 4  ;;  %v6560_v6 = vmax.f32 %v5252_v2, %v5254_v32  ;;  %v6544_v62 = vrot.slane %v6543_v12, 1 }
 0x420   :  { %v2431_v27 = vpop.f32.mrf.mxu0  ;;  %3675 = vmatmul.mubr.bf16.gmra.mxu0 %v8630_v33  ;;  %v4460_v1 = vpop.f32.mrf.mxu1  ;;  %v6550_v19 = vmax.f32 %v6548_v45, %v6549_v58  ;;  %v3372_v33 = vpack.c.bf16 %v3072_v40, %v3070_v46  ;;  %v6524_v39 = vmax.f32 %v6522_v50, %v6523_v14  ;;  %v6537_v61 = vrot.slane %v6536_v5, 1 }
 0x421   :  { %v3373_v3 = vpack.c.bf16 %v3073_v16, %v3071_v18  ;;  %v6555_v38 = vmax.f32 %v6553_v43, %v6554_v20  ;;  %v4461_v42 = vadd.f32 %v4460_v1, %v8764_v31  ;;  %v6561_v10 = vrot.slane %v6560_v6, 4 }
 0x422   :  { %v2433_v13 = vpop.f32.mrf.mxu0  ;;  %v4462_v53 = vpop.f32.mrf.mxu1  ;;  %v7632_v49 = vsel %vm7503_vm6, %v6531_v4, %v7631_v52  ;;  %v5255_v51 = vmax.f32 %v4457_v17, 0.0  ;;  %v6545_v11 = vmax.f32 %v6543_v12, %v6544_v62  ;;  %v6551_v7 = vrot.slane %v6550_v19, 1 }
 0x423   :  { %4704 = vmatprep.mubr.bf16.mxu1 %v3373_v3  ;;  %v6556_v30 = vrot.slane %v6555_v38, 2  ;;  %v6562_v22 = vmax.f32 %v6560_v6, %v6561_v10  ;;  %v5257_v57 = vmax.f32 %v4461_v42, 0.0  ;;  %v4463_v48 = vadd.f32 %v4462_v53, %v8769_v37 }
 0x424   :  { %v2435_v23 = vpop.f32.mrf.mxu0  ;;  %v4466_v35 = vpop.f32.mrf.mxu1  ;;  %4705 = vmatmul.mubr.bf16.gmra.mxu1 %v3372_v33  ;;  %v3075_v45 = vmax.f32 %v2433_v13, 0.0  ;;  %v6538_v9 = vmax.f32 %v6536_v5, %v6537_v61  ;;  %v4459_v43 = vadd.f32 %v4458_v15, %v8769_v37  ;;  %v3074_v32 = vmax.f32 %v2431_v27, 0.0 }
 0x425   :  { %v6557_v55 = vmax.f32 %v6555_v38, %v6556_v30  ;;  %v6563_v36 = vrot.slane %v6562_v22, 2  ;;  %v3076_v44 = vmax.f32 %v2435_v23, 0.0  ;;  %v4467_v18 = vadd.f32 %v4466_v35, %v8764_v31 }
 0x426   :  { %v2437_v8 = vpop.f32.mrf.mxu0  ;;  %v4468_v25 = vpop.f32.mrf.mxu1  ;;  %v6567_v12 = vmax.f32 %v5255_v51, %v5257_v57  ;;  %v6552_v14 = vmax.f32 %v6550_v19, %v6551_v7  ;;  %v5258_v20 = vmax.f32 %v4463_v48, 0.0  ;;  %v7638_v17 = vsel %vm7501_vm5, %v6524_v39, %v7637_v41 }
 0x427   :  { %v3077_v50 = vmax.f32 %v2437_v8, 0.0  ;;  %v6558_v2 = vrot.slane %v6557_v55, 1  ;;  %v6564_v58 = vmax.f32 %v6562_v22, %v6563_v36  ;;  %v7633_v5 = vsel %vm7505_vm7, %v6545_v11, %v7632_v49 }
 0x428   :  { %v2441_v47 = vpop.f32.mrf.mxu0  ;;  %v4470_v16 = vpop.f32.mrf.mxu1  ;;  %v3374_v15 = vpack.c.bf16 %v3076_v44, %v3074_v32  ;;  %v5256_v27 = vmax.f32 %v4459_v43, 0.0  ;;  %v5259_v38 = vmax.f32 %v4467_v18, 0.0  ;;  %v7639_v19 = vsel %vm7503_vm6, %v6538_v9, %v7638_v17 }
 0x429   :  { %v3375_v40 = vpack.c.bf16 %v3077_v50, %v3075_v45  ;;  %v6559_v46 = vmax.f32 %v6557_v55, %v6558_v2  ;;  %v4471_v4 = vadd.f32 %v4470_v16, %v8764_v31  ;;  %v6565_v3 = vrot.slane %v6564_v58, 1 }
 0x42a   :  { %v2443_v6 = vpop.f32.mrf.mxu0  ;;  %v4472_v1 = vpop.f32.mrf.mxu1  ;;  %v6568_v10 = vrot.slane %v6567_v12, 4  ;;  %v7640_v53 = vsel %vm7505_vm7, %v6552_v14, %v7639_v19  ;;  %v6574_v52 = vmax.f32 %v5256_v27, %v5258_v20  ;;  %v4469_v39 = vadd.f32 %v4468_v25, %v8769_v37 }
 0x42b   :  { %4714 = vmatprep.mubr.bf16.mxu1 %v3375_v40  ;;  %v7634_v62 = vsel %vm7507_vm8, %v6559_v46, %v7633_v5  ;;  %v5261_v42 = vmax.f32 %v4471_v4, 0.0  ;;  %v6566_v26 = vmax.f32 %v6564_v58, %v6565_v3  ;;  %v4473_v33 = vadd.f32 %v4472_v1, %v8769_v37 }
 0x42c   :  { %v2445_v13 = vpop.f32.mrf.mxu0  ;;  %7776 = vst [vmem:[#allocation2 + $0x90] sm:$0xff] %v7634_v62  ;;  %v4476_v41 = vpop.f32.mrf.mxu1  ;;  %4715 = vmatmul.mubr.bf16.gmra.mxu1 %v3374_v15  ;;  %v3079_v49 = vmax.f32 %v2443_v6, 0.0  ;;  %v6569_v55 = vmax.f32 %v6567_v12, %v6568_v10  ;;  %v3078_v48 = vmax.f32 %v2441_v47, 0.0  ;;  %v6575_v44 = vrot.slane %v6574_v52, 4 }
 0x42d   :  { %v6581_v61 = vmax.f32 %v5259_v38, %v5261_v42  ;;  %v7641_v23 = vsel %vm7507_vm8, %v6566_v26, %v7640_v53  ;;  %v3080_v22 = vmax.f32 %v2445_v13, 0.0  ;;  %v5262_v35 = vmax.f32 %v4473_v33, 0.0 }
 0x42e   :  { %v2447_v30 = vpop.f32.mrf.mxu0  ;;  %v4478_v57 = vpop.f32.mrf.mxu1  ;;  %7777 = vst [vmem:[#allocation2 + $0x98] sm:$0xff] %v7641_v23  ;;  %v4477_v11 = vadd.f32 %v4476_v41, %v8764_v31  ;;  %v5260_v50 = vmax.f32 %v4469_v39, 0.0  ;;  %v5491_v43 = vmax.f32 %v8780_v60, %v5490_v29  ;;  %v5497_v14 = vrot.slane %v8782_v0, 4 }
 0x42f   :  { %v3081_v51 = vmax.f32 %v2447_v30, 0.0  ;;  %v6582_v8 = vrot.slane %v6581_v61, 4  ;;  %v4479_v25 = vadd.f32 %v4478_v57, %v8769_v37  ;;  %v3376_v18 = vpack.c.bf16 %v3080_v22, %v3078_v48 }
 0x430   :  { %v2451_v7 = vpop.f32.mrf.mxu0  ;;  %v4480_v45 = vpop.f32.mrf.mxu1  ;;  %v6588_v32 = vmax.f32 %v5260_v50, %v5262_v35  ;;  %v5263_v12 = vmax.f32 %v4477_v11, 0.0  ;;  %v6570_v46 = vrot.slane %v6569_v55, 2  ;;  %v6576_v6 = vmax.f32 %v6574_v52, %v6575_v44 }
 0x431   :  { %v3377_v36 = vpack.c.bf16 %v3081_v51, %v3079_v49  ;;  %v4481_v9 = vadd.f32 %v4480_v45, %v8764_v31  ;;  %v6583_v20 = vmax.f32 %v6581_v61, %v6582_v8  ;;  %v5264_v17 = vmax.f32 %v4479_v25, 0.0 }
 0x432   :  { %v2453_v2 = vpop.f32.mrf.mxu0  ;;  %v4482_v58 = vpop.f32.mrf.mxu1  ;;  %v5492_v29 = vrot.slane %v5491_v43, 2  ;;  %v6589_v38 = vrot.slane %v6588_v32, 4  ;;  %v6571_v10 = vmax.f32 %v6569_v55, %v6570_v46  ;;  %v3082_v41 = vmax.f32 %v2451_v7, 0.0 }
 0x433   :  { %4724 = vmatprep.mubr.bf16.mxu1 %v3377_v36  ;;  %v5265_v47 = vmax.f32 %v4481_v9, 0.0  ;;  %v4483_v40 = vadd.f32 %v4482_v58, %v8769_v37  ;;  %v3083_v15 = vmax.f32 %v2453_v2, 0.0  ;;  %v6584_v33 = vrot.slane %v6583_v20, 2 }
 0x434   :  { %v2455_v16 = vpop.f32.mrf.mxu0  ;;  %v4486_v4 = vpop.f32.mrf.mxu1  ;;  %4725 = vmatmul.mubr.bf16.gmra.mxu1 %v3376_v18  ;;  %v6577_v39 = vrot.slane %v6576_v6, 2  ;;  %v9708_v22 = vmax.f32 %v5491_v43, %v5492_v29  ;;  %v9711_v51 = vmax.f32 %v8782_v0, %v5497_v14  ;;  %v6590_v11 = vmax.f32 %v6588_v32, %v6589_v38 }
 0x435   :  { %v6595_v5 = vmax.f32 %v5263_v12, %v5265_v47  ;;  %v5266_v3 = vmax.f32 %v4483_v40, 0.0  ;;  %v3084_v1 = vmax.f32 %v2455_v16, 0.0  ;;  %v4487_v19 = vadd.f32 %v4486_v4, %v8764_v31 }
 0x436   :  { %v2457_v60 = vpop.f32.mrf.mxu0  ;;  %v4488_v27 = vpop.f32.mrf.mxu1  ;;  %v5504_v36 = vrot.slane %v8793_v24, 4  ;;  %v6572_v45 = vrot.slane %v6571_v10, 1  ;;  %v6585_v44 = vmax.f32 %v6583_v20, %v6584_v33  ;;  %v6578_v9 = vmax.f32 %v6576_v6, %v6577_v39 }
 0x437   :  { %v3085_v62 = vmax.f32 %v2457_v60, 0.0  ;;  %v6596_v42 = vrot.slane %v6595_v5, 4  ;;  %v6602_v13 = vmax.f32 %v5264_v17, %v5266_v3  ;;  %v4489_v30 = vadd.f32 %v4488_v27, %v8769_v37 }
 0x438   :  { %v2461_v26 = vpop.f32.mrf.mxu0  ;;  %v4490_v52 = vpop.f32.mrf.mxu1  ;;  %v3378_v57 = vpack.c.bf16 %v3084_v1, %v3082_v41  ;;  %v5267_v7 = vmax.f32 %v4487_v19, 0.0  ;;  %v6591_v16 = vrot.slane %v6590_v11, 2  ;;  %v6586_v17 = vrot.slane %v6585_v44, 1 }
 0x439   :  { %v3379_v53 = vpack.c.bf16 %v3085_v62, %v3083_v15  ;;  %v6603_v61 = vrot.slane %v6602_v13, 4  ;;  %v4491_v23 = vadd.f32 %v4490_v52, %v8764_v31  ;;  %v6597_v55 = vmax.f32 %v6595_v5, %v6596_v42 }
 0x43a   :  { %v2463_v49 = vpop.f32.mrf.mxu0  ;;  %v4492_v35 = vpop.f32.mrf.mxu1  ;;  %v5268_v0 = vmax.f32 %v4489_v30, 0.0  ;;  %v3086_v5 = vmax.f32 %v2461_v26, 0.0  ;;  %v5499_v29 = vrot.slane %v9711_v51, 2  ;;  %v9720_v38 = vmax.f32 %v8793_v24, %v5504_v36 }
 0x43b   :  { %4734 = vmatprep.mubr.bf16.mxu1 %v3379_v53  ;;  %v5269_v48 = vmax.f32 %v4491_v23, 0.0  ;;  %v4493_v50 = vadd.f32 %v4492_v35, %v8769_v37  ;;  %v6604_v2 = vmax.f32 %v6602_v13, %v6603_v61  ;;  %v3087_v58 = vmax.f32 %v2463_v49, 0.0 }
 0x43c   :  { %v2465_v8 = vpop.f32.mrf.mxu0  ;;  %v4496_v25 = vpop.f32.mrf.mxu1  ;;  %4735 = vmatmul.mubr.bf16.gmra.mxu1 %v3378_v57  ;;  %v6598_v14 = vrot.slane %v6597_v55, 2  ;;  %v6573_v42 = vmax.f32 %v6571_v10, %v6572_v45  ;;  %v6592_v26 = vmax.f32 %v6590_v11, %v6591_v16  ;;  %v6579_v61 = vrot.slane %v6578_v9, 1 }
 0x43d   :  { %v6609_v43 = vmax.f32 %v5267_v7, %v5269_v48  ;;  %v5270_v12 = vmax.f32 %v4493_v50, 0.0  ;;  %v3088_v32 = vmax.f32 %v2465_v8, 0.0  ;;  %v4497_v4 = vadd.f32 %v4496_v25, %v8764_v31 }
 0x43e   :  { %v2467_v18 = vpop.f32.mrf.mxu0  ;;  %v4498_v40 = vpop.f32.mrf.mxu1  ;;  %v6605_v15 = vrot.slane %v6604_v2, 2  ;;  %v6599_v41 = vmax.f32 %v6597_v55, %v6598_v14  ;;  %v6587_v30 = vmax.f32 %v6585_v44, %v6586_v17  ;;  %v6593_v50 = vrot.slane %v6592_v26, 1 }
 0x43f   :  { %v3089_v47 = vmax.f32 %v2467_v18, 0.0  ;;  %v6610_v46 = vrot.slane %v6609_v43, 4  ;;  %v6616_v3 = vmax.f32 %v5268_v0, %v5270_v12  ;;  %v4499_v1 = vadd.f32 %v4498_v40, %v8769_v37 }
 0x440   :  { %v2471_v20 = vpop.f32.mrf.mxu0  ;;  %v4500_v6 = vpop.f32.mrf.mxu1  ;;  %v3380_v19 = vpack.c.bf16 %v3088_v32, %v3086_v5  ;;  %v5271_v53 = vmax.f32 %v4497_v4, 0.0  ;;  %v6606_v35 = vmax.f32 %v6604_v2, %v6605_v15  ;;  %v6600_v25 = vrot.slane %v6599_v41, 1 }
 0x441   :  { %v3381_v60 = vpack.c.bf16 %v3089_v47, %v3087_v58  ;;  %v4501_v62 = vadd.f32 %v4500_v6, %v8764_v31  ;;  %v6611_v13 = vmax.f32 %v6609_v43, %v6610_v46  ;;  %v6617_v23 = vrot.slane %v6616_v3, 4 }
 0x442   :  { %v2473_v27 = vpop.f32.mrf.mxu0  ;;  %v4502_v33 = vpop.f32.mrf.mxu1  ;;  %v5272_v24 = vmax.f32 %v4499_v1, 0.0  ;;  %v3090_v58 = vmax.f32 %v2471_v20, 0.0  ;;  %v6580_v47 = vmax.f32 %v6578_v9, %v6579_v61  ;;  %v6607_v40 = vrot.slane %v6606_v35, 1 }
 0x443   :  { %4744 = vmatprep.mubr.bf16.mxu1 %v3381_v60  ;;  %v5273_v52 = vmax.f32 %v4501_v62, 0.0  ;;  %v4503_v49 = vadd.f32 %v4502_v33, %v8769_v37  ;;  %v3091_v10 = vmax.f32 %v2473_v27, 0.0  ;;  %v6612_v8 = vrot.slane %v6611_v13, 2 }
 0x444   :  { %v2475_v39 = vpop.f32.mrf.mxu0  ;;  %v4506_v57 = vpop.f32.mrf.mxu1  ;;  %4745 = vmatmul.mubr.bf16.gmra.mxu1 %v3380_v19  ;;  %v6618_v18 = vmax.f32 %v6616_v3, %v6617_v23  ;;  %v7642_v4 = vsel %vm7495_vm2, %v6587_v30, %v6573_v42  ;;  %v6594_v9 = vmax.f32 %v6592_v26, %v6593_v50  ;;  %v6601_v27 = vmax.f32 %v6599_v41, %v6600_v25 }
 0x445   :  { %v6623_v7 = vmax.f32 %v5271_v53, %v5273_v52  ;;  %v5274_v36 = vmax.f32 %v4503_v49, 0.0  ;;  %v3092_v45 = vmax.f32 %v2475_v39, 0.0  ;;  %v4507_v44 = vadd.f32 %v4506_v57, %v8764_v31 }
 0x446   :  { %v2477_v48 = vpop.f32.mrf.mxu0  ;;  %v4508_v55 = vpop.f32.mrf.mxu1  ;;  %v6613_v17 = vmax.f32 %v6611_v13, %v6612_v8  ;;  %v6619_v19 = vrot.slane %v6618_v18, 2  ;;  %v6608_v52 = vmax.f32 %v6606_v35, %v6607_v40 }
 0x447   :  { %v3093_v11 = vmax.f32 %v2477_v48, 0.0  ;;  %v6624_v0 = vrot.slane %v6623_v7, 4  ;;  %v6630_v12 = vmax.f32 %v5272_v24, %v5274_v36  ;;  %v4509_v16 = vadd.f32 %v4508_v55, %v8769_v37 }
 0x448   :  { %v2481_v43 = vpop.f32.mrf.mxu0  ;;  %v4510_v2 = vpop.f32.mrf.mxu1  ;;  %v3382_v60 = vpack.c.bf16 %v3092_v45, %v3090_v58  ;;  %v5275_v3 = vmax.f32 %v4507_v44, 0.0  ;;  %v6614_v30 = vrot.slane %v6613_v17, 1  ;;  %v6620_v8 = vmax.f32 %v6618_v18, %v6619_v19 }
 0x449   :  { %v3383_v32 = vpack.c.bf16 %v3093_v11, %v3091_v10  ;;  %v4511_v14 = vadd.f32 %v4510_v2, %v8764_v31  ;;  %v6631_v5 = vrot.slane %v6630_v12, 4  ;;  %v6625_v15 = vmax.f32 %v6623_v7, %v6624_v0 }
 0x44a   :  { %v2483_v46 = vpop.f32.mrf.mxu0  ;;  %v4512_v6 = vpop.f32.mrf.mxu1  ;;  %v5276_v39 = vmax.f32 %v4509_v16, 0.0  ;;  %v3094_v45 = vmax.f32 %v2481_v43, 0.0  ;;  %v5511_v58 = vrot.slane %v8795_v34, 4 }
 0x44b   :  { %4754 = vmatprep.mubr.bf16.mxu1 %v3383_v32  ;;  %v5277_v20 = vmax.f32 %v4511_v14, 0.0  ;;  %v4513_v1 = vadd.f32 %v4512_v6, %v8769_v37  ;;  %v6632_v33 = vmax.f32 %v6630_v12, %v6631_v5  ;;  %v3095_v23 = vmax.f32 %v2483_v46, 0.0 }
 0x44c   :  { %v2485_v62 = vpop.f32.mrf.mxu0  ;;  %v4516_v53 = vpop.f32.mrf.mxu1  ;;  %4755 = vmatmul.mubr.bf16.gmra.mxu1 %v3382_v60  ;;  %v6626_v7 = vrot.slane %v6625_v15, 2  ;;  %v7649_v12 = vsel %vm7495_vm2, %v6594_v9, %v6580_v47  ;;  %v7643_v32 = vsel %vm7497_vm3, %v6601_v27, %v7642_v4  ;;  %v6615_v60 = vmax.f32 %v6613_v17, %v6614_v30 }
 0x44d   :  { %v6637_v42 = vmax.f32 %v5275_v3, %v5277_v20  ;;  %v5278_v13 = vmax.f32 %v4513_v1, 0.0  ;;  %v3096_v49 = vmax.f32 %v2485_v62, 0.0  ;;  %v4517_v26 = vadd.f32 %v4516_v53, %v8764_v31 }
 0x44e   :  { %v2487_v61 = vpop.f32.mrf.mxu0  ;;  %v4518_v24 = vpop.f32.mrf.mxu1  ;;  %v6633_v36 = vrot.slane %v6632_v33, 2  ;;  %v6627_v18 = vmax.f32 %v6625_v15, %v6626_v7  ;;  %v9735_v5 = vsel %vm7497_vm3, %v6608_v52, %v7649_v12  ;;  %v6621_v47 = vrot.slane %v6620_v8, 1 }
 0x44f   :  { %v3097_v57 = vmax.f32 %v2487_v61, 0.0  ;;  %v6638_v10 = vrot.slane %v6637_v42, 4  ;;  %v6644_v48 = vmax.f32 %v5276_v39, %v5278_v13  ;;  %v4519_v25 = vadd.f32 %v4518_v24, %v8769_v37 }
 0x450   :  { %v2491_v41 = vpop.f32.mrf.mxu0  ;;  %v4520_v35 = vpop.f32.mrf.mxu1  ;;  %v3384_v2 = vpack.c.bf16 %v3096_v49, %v3094_v45  ;;  %v5279_v16 = vmax.f32 %v4517_v26, 0.0  ;;  %v6634_v1 = vmax.f32 %v6632_v33, %v6633_v36  ;;  %v7644_v33 = vsel %vm7499_vm4, %v6615_v60, %v7643_v32 }
 0x451   :  { %v3385_v11 = vpack.c.bf16 %v3097_v57, %v3095_v23  ;;  %v6639_v55 = vmax.f32 %v6637_v42, %v6638_v10  ;;  %v6645_v50 = vrot.slane %v6644_v48, 4  ;;  %v4521_v0 = vadd.f32 %v4520_v35, %v8764_v31 }
 0x452   :  { %v2493_v44 = vpop.f32.mrf.mxu0  ;;  %v4522_v40 = vpop.f32.mrf.mxu1  ;;  %v5280_v4 = vmax.f32 %v4519_v25, 0.0  ;;  %v6628_v42 = vrot.slane %v6627_v18, 1  ;;  %v3098_v23 = vmax.f32 %v2491_v41, 0.0  ;;  %v6622_v36 = vmax.f32 %v6620_v8, %v6621_v47 }
 0x453   :  { %4764 = vmatprep.mubr.bf16.mxu1 %v3385_v11  ;;  %v6640_v43 = vrot.slane %v6639_v55, 2  ;;  %v5281_v14 = vmax.f32 %v4521_v0, 0.0  ;;  %v6646_v6 = vmax.f32 %v6644_v48, %v6645_v50  ;;  %v4523_v3 = vadd.f32 %v4522_v40, %v8769_v37 }
 0x454   :  { %v2495_v46 = vpop.f32.mrf.mxu0  ;;  %v4526_v20 = vpop.f32.mrf.mxu1  ;;  %4765 = vmatmul.mubr.bf16.gmra.mxu1 %v3384_v2  ;;  %v3099_v27 = vmax.f32 %v2493_v44, 0.0  ;;  %v6635_v45 = vrot.slane %v6634_v1, 1  ;;  %v6629_v12 = vmax.f32 %v6627_v18, %v6628_v42 }
 0x455   :  { %v6651_v62 = vmax.f32 %v5279_v16, %v5281_v14  ;;  %v5282_v15 = vmax.f32 %v4523_v3, 0.0  ;;  %v3100_v19 = vmax.f32 %v2495_v46, 0.0  ;;  %v6641_v13 = vmax.f32 %v6639_v55, %v6640_v43 }
 0x456   :  { %v2497_v9 = vpop.f32.mrf.mxu0  ;;  %v4528_v39 = vpop.f32.mrf.mxu1  ;;  %v4527_v17 = vadd.f32 %v4526_v20, %v8764_v31  ;;  %v6647_v30 = vrot.slane %v6646_v6, 2 }
 0x457   :  { %v3101_v53 = vmax.f32 %v2497_v9, 0.0  ;;  %v6652_v52 = vrot.slane %v6651_v62, 4  ;;  %v6658_v49 = vmax.f32 %v5280_v4, %v5282_v15  ;;  %v4529_v10 = vadd.f32 %v4528_v39, %v8769_v37 }
 0x458   :  { %v2501_v61 = vpop.f32.mrf.mxu0  ;;  %v4530_v24 = vpop.f32.mrf.mxu1  ;;  %v3386_v35 = vpack.c.bf16 %v3100_v19, %v3098_v23  ;;  %v6642_v50 = vrot.slane %v6641_v13, 1  ;;  %v5283_v41 = vmax.f32 %v4527_v17, 0.0  ;;  %v6648_v2 = vmax.f32 %v6646_v6, %v6647_v30 }
 0x459   :  { %v3387_v57 = vpack.c.bf16 %v3101_v53, %v3099_v27  ;;  %v6653_v7 = vmax.f32 %v6651_v62, %v6652_v52  ;;  %v4531_v48 = vadd.f32 %v4530_v24, %v8764_v31  ;;  %v6659_v11 = vrot.slane %v6658_v49, 4 }
 0x45a   :  { %v2503_v26 = vpop.f32.mrf.mxu0  ;;  %v4532_v55 = vpop.f32.mrf.mxu1  ;;  %v5284_v14 = vmax.f32 %v4529_v10, 0.0  ;;  %v6636_v9 = vmax.f32 %v6634_v1, %v6635_v45  ;;  %v6643_v27 = vmax.f32 %v6641_v13, %v6642_v50  ;;  %v3102_v15 = vmax.f32 %v2501_v61, 0.0 }
 0x45b   :  { %4774 = vmatprep.mubr.bf16.mxu1 %v3387_v57  ;;  %v6654_v25 = vrot.slane %v6653_v7, 2  ;;  %v5285_v0 = vmax.f32 %v4531_v48, 0.0  ;;  %v6660_v32 = vmax.f32 %v6658_v49, %v6659_v11  ;;  %v4533_v40 = vadd.f32 %v4532_v55, %v8769_v37 }
 0x45c   :  { %v2505_v44 = vpop.f32.mrf.mxu0  ;;  %v4536_v43 = vpop.f32.mrf.mxu1  ;;  %4775 = vmatmul.mubr.bf16.gmra.mxu1 %v3386_v35  ;;  %v3103_v46 = vmax.f32 %v2503_v26, 0.0  ;;  %v6649_v19 = vrot.slane %v6648_v2, 1  ;;  %v7651_v24 = vsel %vm7499_vm4, %v6622_v36, %v9735_v5  ;;  %v7645_v1 = vsel %vm7501_vm5, %v6629_v12, %v7644_v33 }
 0x45d   :  { %v6655_v16 = vmax.f32 %v6653_v7, %v6654_v25  ;;  %v6665_v8 = vmax.f32 %v5283_v41, %v5285_v0  ;;  %v6661_v3 = vrot.slane %v6660_v32, 2  ;;  %v5286_v20 = vmax.f32 %v4533_v40, 0.0 }
 0x45e   :  { %v2507_v60 = vpop.f32.mrf.mxu0  ;;  %v3104_v47 = vmax.f32 %v2505_v44, 0.0  ;;  %v4538_v62 = vpop.f32.mrf.mxu1  ;;  %v4537_v23 = vadd.f32 %v4536_v43, %v8764_v31  ;;  %v9751_v10 = vmax.f32 %v8795_v34, %v5511_v58  ;;  %v7652_v48 = vsel %vm7501_vm5, %v6636_v9, %v7651_v24 }
 0x45f   :  { %v3105_v4 = vmax.f32 %v2507_v60, 0.0  ;;  %v6666_v18 = vrot.slane %v6665_v8, 4  ;;  %v6662_v53 = vmax.f32 %v6660_v32, %v6661_v3  ;;  %v6672_v39 = vmax.f32 %v5284_v14, %v5286_v20 }
 0x460   :  { %v2511_v6 = vpop.f32.mrf.mxu0  ;;  %v4540_v52 = vpop.f32.mrf.mxu1  ;;  %v6656_v17 = vrot.slane %v6655_v16, 1  ;;  %v3388_v61 = vpack.c.bf16 %v3104_v47, %v3102_v15  ;;  %v7646_v26 = vsel %vm7503_vm6, %v6643_v27, %v7645_v1  ;;  %v6650_v35 = vmax.f32 %v6648_v2, %v6649_v19 }
 0x461   :  { %v3389_v42 = vpack.c.bf16 %v3105_v4, %v3103_v46  ;;  %v6667_v30 = vmax.f32 %v6665_v8, %v6666_v18  ;;  %v4541_v49 = vadd.f32 %v4540_v52, %v8764_v31  ;;  %v6673_v13 = vrot.slane %v6672_v39, 4 }
 0x462   :  { %v2513_v57 = vpop.f32.mrf.mxu0  ;;  %v4542_v7 = vpop.f32.mrf.mxu1  ;;  %v6663_v55 = vrot.slane %v6662_v53, 1  ;;  %v6657_v50 = vmax.f32 %v6655_v16, %v6656_v17  ;;  %v5287_v41 = vmax.f32 %v4537_v23, 0.0  ;;  %v4539_v14 = vadd.f32 %v4538_v62, %v8769_v37 }
 0x463   :  { %4784 = vmatprep.mubr.bf16.mxu1 %v3389_v42  ;;  %v6668_v45 = vrot.slane %v6667_v30, 2  ;;  %v6674_v5 = vmax.f32 %v6672_v39, %v6673_v13  ;;  %v5289_v36 = vmax.f32 %v4541_v49, 0.0  ;;  %v4543_v0 = vadd.f32 %v4542_v7, %v8769_v37 }
 0x464   :  { %v2515_v11 = vpop.f32.mrf.mxu0  ;;  %v4546_v33 = vpop.f32.mrf.mxu1  ;;  %4785 = vmatmul.mubr.bf16.gmra.mxu1 %v3388_v61  ;;  %v3107_v58 = vmax.f32 %v2513_v57, 0.0  ;;  %v3106_v2 = vmax.f32 %v2511_v6, 0.0  ;;  %v6664_v60 = vmax.f32 %v6662_v53, %v6663_v55  ;;  %v7653_v19 = vsel %vm7503_vm6, %v6650_v35, %v7652_v48 }
 0x465   :  { %v6669_v25 = vmax.f32 %v6667_v30, %v6668_v45  ;;  %v6675_v34 = vrot.slane %v6674_v5, 2  ;;  %v3108_v12 = vmax.f32 %v2515_v11, 0.0  ;;  %v4547_v8 = vadd.f32 %v4546_v33, %v8764_v31 }
 0x466   :  { %v2517_v44 = vpop.f32.mrf.mxu0  ;;  %v4548_v40 = vpop.f32.mrf.mxu1  ;;  %v6679_v16 = vmax.f32 %v5287_v41, %v5289_v36  ;;  %v5290_v9 = vmax.f32 %v4543_v0, 0.0  ;;  %v7647_v62 = vsel %vm7505_vm7, %v6657_v50, %v7646_v26  ;;  %v5288_v52 = vmax.f32 %v4539_v14, 0.0 }
 0x467   :  { %v3109_v32 = vmax.f32 %v2517_v44, 0.0  ;;  %v6670_v43 = vrot.slane %v6669_v25, 1  ;;  %v6676_v3 = vmax.f32 %v6674_v5, %v6675_v34  ;;  %v4549_v27 = vadd.f32 %v4548_v40, %v8769_v37 }
 0x468   :  { %v2521_v46 = vpop.f32.mrf.mxu0  ;;  %v4550_v47 = vpop.f32.mrf.mxu1  ;;  %v3390_v39 = vpack.c.bf16 %v3108_v12, %v3106_v2  ;;  %v5291_v17 = vmax.f32 %v4547_v8, 0.0  ;;  %v7654_v49 = vsel %vm7505_vm7, %v6664_v60, %v7653_v19  ;;  %v6680_v24 = vrot.slane %v6679_v16, 4 }
 0x469   :  { %v3391_v20 = vpack.c.bf16 %v3109_v32, %v3107_v58  ;;  %v6671_v4 = vmax.f32 %v6669_v25, %v6670_v43  ;;  %v4551_v15 = vadd.f32 %v4550_v47, %v8764_v31  ;;  %v6677_v6 = vrot.slane %v6676_v3, 1 }
 0x46a   :  { %v2523_v18 = vpop.f32.mrf.mxu0  ;;  %v4552_v42 = vpop.f32.mrf.mxu1  ;;  %v6686_v61 = vmax.f32 %v5288_v52, %v5290_v9  ;;  %v5292_v7 = vmax.f32 %v4549_v27, 0.0  ;;  %v5494_v33 = vrot.slane %v9708_v22, 1  ;;  %v5506_v50 = vrot.slane %v9720_v38, 2 }
 0x46b   :  { %4794 = vmatprep.mubr.bf16.mxu1 %v3391_v20  ;;  %v7648_v53 = vsel %vm7507_vm8, %v6671_v4, %v7647_v62  ;;  %v5293_v30 = vmax.f32 %v4551_v15, 0.0  ;;  %v6678_v57 = vmax.f32 %v6676_v3, %v6677_v6  ;;  %v4553_v1 = vadd.f32 %v4552_v42, %v8769_v37 }
 0x46c   :  { %v2525_v23 = vpop.f32.mrf.mxu0  ;;  %7778 = vst [vmem:[#allocation2 + $0xa0] sm:$0xff] %v7648_v53  ;;  %v4556_v13 = vpop.f32.mrf.mxu1  ;;  %4795 = vmatmul.mubr.bf16.gmra.mxu1 %v3390_v39  ;;  %v3111_v26 = vmax.f32 %v2523_v18, 0.0  ;;  %v5513_v44 = vrot.slane %v9751_v10, 2  ;;  %v3110_v34 = vmax.f32 %v2521_v46, 0.0  ;;  %v6681_v40 = vmax.f32 %v6679_v16, %v6680_v24 }
 0x46d   :  { %v6693_v48 = vmax.f32 %v5291_v17, %v5293_v30  ;;  %v7655_v11 = vsel %vm7507_vm8, %v6678_v57, %v7654_v49  ;;  %v5294_v35 = vmax.f32 %v4553_v1, 0.0  ;;  %v3112_v55 = vmax.f32 %v2525_v23, 0.0 }
 0x46e   :  { %v2527_v45 = vpop.f32.mrf.mxu0  ;;  %v4558_v36 = vpop.f32.mrf.mxu1  ;;  %7779 = vst [vmem:[#allocation2 + $0xa8] sm:$0xff] %v7655_v11  ;;  %v4557_v41 = vadd.f32 %v4556_v13, %v8764_v31  ;;  %v9775_v8 = vmax.f32 %v9711_v51, %v5499_v29  ;;  %v6687_v60 = vrot.slane %v6686_v61, 4  ;;  %v9779_v27 = vmax.f32 %v9708_v22, %v5494_v33 }
 0x46f   :  { %v3113_v5 = vmax.f32 %v2527_v45, 0.0  ;;  %v6694_v25 = vrot.slane %v6693_v48, 4  ;;  %v6700_v58 = vmax.f32 %v5292_v7, %v5294_v35  ;;  %v4559_v43 = vadd.f32 %v4558_v36, %v8769_v37 }
 0x470   :  { %v2531_v0 = vpop.f32.mrf.mxu0  ;;  %v4560_v32 = vpop.f32.mrf.mxu1  ;;  %v3392_v3 = vpack.c.bf16 %v3112_v55, %v3110_v34  ;;  %v5295_v46 = vmax.f32 %v4557_v41, 0.0  ;;  %v9782_v15 = vmax.f32 %v9720_v38, %v5506_v50  ;;  %v9785_v18 = vmax.f32 %v9751_v10, %v5513_v44 }
 0x471   :  { %v3393_v12 = vpack.c.bf16 %v3113_v5, %v3111_v26  ;;  %v4561_v14 = vadd.f32 %v4560_v32, %v8764_v31  ;;  %v6695_v47 = vmax.f32 %v6693_v48, %v6694_v25  ;;  %v6701_v51 = vrot.slane %v6700_v58, 4 }
 0x472   :  { %v2533_v2 = vpop.f32.mrf.mxu0  ;;  %v4562_v20 = vpop.f32.mrf.mxu1  ;;  %v6682_v19 = vrot.slane %v6681_v40, 2  ;;  %v5296_v62 = vmax.f32 %v4559_v43, 0.0  ;;  %v6688_v53 = vmax.f32 %v6686_v61, %v6687_v60  ;;  %v5518_v24 = vrot.slane %v8806_v56, 4 }
 0x473   :  { %4804 = vmatprep.mubr.bf16.mxu1 %v3393_v12  ;;  %v5297_v4 = vmax.f32 %v4561_v14, 0.0  ;;  %v4563_v9 = vadd.f32 %v4562_v20, %v8769_v37  ;;  %v3115_v52 = vmax.f32 %v2533_v2, 0.0  ;;  %v6696_v23 = vrot.slane %v6695_v47, 2 }
 0x474   :  { %v2535_v16 = vpop.f32.mrf.mxu0  ;;  %v4566_v29 = vpop.f32.mrf.mxu1  ;;  %4805 = vmatmul.mubr.bf16.gmra.mxu1 %v3392_v3  ;;  %v6702_v1 = vmax.f32 %v6700_v58, %v6701_v51  ;;  %v3114_v13 = vmax.f32 %v2531_v0, 0.0  ;;  %v5501_v26 = vrot.slane %v9775_v8, 1  ;;  %v6683_v45 = vmax.f32 %v6681_v40, %v6682_v19 }
 0x475   :  { %v6707_v6 = vmax.f32 %v5295_v46, %v5297_v4  ;;  %v5298_v39 = vmax.f32 %v4563_v9, 0.0  ;;  %v3116_v17 = vmax.f32 %v2535_v16, 0.0  ;;  %v4567_v57 = vadd.f32 %v4566_v29, %v8764_v31 }
 0x476   :  { %v2537_v42 = vpop.f32.mrf.mxu0  ;;  %v4568_v22 = vpop.f32.mrf.mxu1  ;;  %v5508_v55 = vrot.slane %v9782_v15, 1  ;;  %v5525_v5 = vrot.slane %v8808_v59, 4  ;;  %v6689_v36 = vrot.slane %v6688_v53, 2  ;;  %v6697_v25 = vmax.f32 %v6695_v47, %v6696_v23 }
 0x477   :  { %v3117_v30 = vmax.f32 %v2537_v42, 0.0  ;;  %v6708_v49 = vrot.slane %v6707_v6, 4  ;;  %v6714_v38 = vmax.f32 %v5296_v62, %v5298_v39  ;;  %v3394_v33 = vpack.c.bf16 %v3116_v17, %v3114_v13 }
 0x478   :  { %v2541_v10 = vpop.f32.mrf.mxu0  ;;  %v4570_v48 = vpop.f32.mrf.mxu1  ;;  %v5299_v0 = vmax.f32 %v4567_v57, 0.0  ;;  %v5515_v58 = vrot.slane %v9785_v18, 1  ;;  %v9795_v12 = vmax.f32 %v8806_v56, %v5518_v24  ;;  %v6703_v32 = vrot.slane %v6702_v1, 2 }
 0x479   :  { %v3395_v7 = vpack.c.bf16 %v3117_v30, %v3115_v52  ;;  %v6715_v61 = vrot.slane %v6714_v38, 4  ;;  %v4571_v11 = vadd.f32 %v4570_v48, %v8764_v31  ;;  %v6709_v41 = vmax.f32 %v6707_v6, %v6708_v49 }
 0x47a   :  { %v2543_v35 = vpop.f32.mrf.mxu0  ;;  %v4572_v50 = vpop.f32.mrf.mxu1  ;;  %v6684_v14 = vrot.slane %v6683_v45, 1  ;;  %v4569_v60 = vadd.f32 %v4568_v22, %v8769_v37  ;;  %v6690_v47 = vmax.f32 %v6688_v53, %v6689_v36  ;;  %v6698_v51 = vrot.slane %v6697_v25, 1 }
 0x47b   :  { %4814 = vmatprep.mubr.bf16.mxu1 %v3395_v7  ;;  %v5301_v44 = vmax.f32 %v4571_v11, 0.0  ;;  %v4573_v40 = vadd.f32 %v4572_v50, %v8769_v37  ;;  %v6716_v2 = vmax.f32 %v6714_v38, %v6715_v61  ;;  %v3119_v46 = vmax.f32 %v2543_v35, 0.0 }
 0x47c   :  { %v2545_v34 = vpop.f32.mrf.mxu0  ;;  %v4576_v43 = vpop.f32.mrf.mxu1  ;;  %4815 = vmatmul.mubr.bf16.gmra.mxu1 %v3394_v33  ;;  %v6710_v29 = vrot.slane %v6709_v41, 2  ;;  %v9800_v6 = vmax.f32 %v6702_v1, %v6703_v32  ;;  %v3118_v39 = vmax.f32 %v2541_v10, 0.0  ;;  %v5300_v22 = vmax.f32 %v4569_v60, 0.0 }
 0x47d   :  { %v6721_v3 = vmax.f32 %v5299_v0, %v5301_v44  ;;  %v3120_v4 = vmax.f32 %v2545_v34, 0.0  ;;  %v5302_v56 = vmax.f32 %v4573_v40, 0.0  ;;  %v4577_v19 = vadd.f32 %v4576_v43, %v8764_v31 }
 0x47e   :  { %v2547_v20 = vpop.f32.mrf.mxu0  ;;  %v4578_v16 = vpop.f32.mrf.mxu1  ;;  %v6717_v30 = vrot.slane %v6716_v2, 2  ;;  %v5520_v38 = vrot.slane %v9795_v12, 2  ;;  %v9806_v57 = vmax.f32 %v8808_v59, %v5525_v5  ;;  %v6685_v24 = vmax.f32 %v6683_v45, %v6684_v14 }
 0x47f   :  { %v3121_v9 = vmax.f32 %v2547_v20, 0.0  ;;  %v6722_v42 = vrot.slane %v6721_v3, 4  ;;  %v4579_v53 = vadd.f32 %v4578_v16, %v8769_v37  ;;  %v3396_v13 = vpack.c.bf16 %v3120_v4, %v3118_v39 }
 0x480   :  { %v2551_v62 = vpop.f32.mrf.mxu0  ;;  %v4580_v17 = vpop.f32.mrf.mxu1  ;;  %v6711_v10 = vmax.f32 %v6709_v41, %v6710_v29  ;;  %v6728_v7 = vmax.f32 %v5300_v22, %v5302_v56  ;;  %v5303_v48 = vmax.f32 %v4577_v19, 0.0  ;;  %v6691_v35 = vrot.slane %v6690_v47, 1 }
 0x481   :  { %v3397_v52 = vpack.c.bf16 %v3121_v9, %v3119_v46  ;;  %v4581_v23 = vadd.f32 %v4580_v17, %v8764_v31  ;;  %v6699_v36 = vmax.f32 %v6697_v25, %v6698_v51  ;;  %v6723_v33 = vmax.f32 %v6721_v3, %v6722_v42 }
 0x482   :  { %v2553_v49 = vpop.f32.mrf.mxu0  ;;  %v4582_v1 = vpop.f32.mrf.mxu1  ;;  %v6705_v44 = vrot.slane %v9800_v6, 1  ;;  %v6718_v59 = vmax.f32 %v6716_v2, %v6717_v30  ;;  %v5304_v5 = vmax.f32 %v4579_v53, 0.0  ;;  %v6712_v60 = vrot.slane %v6711_v10, 1 }
 0x483   :  { %4824 = vmatprep.mubr.bf16.mxu1 %v3397_v52  ;;  %v5305_v61 = vmax.f32 %v4581_v23, 0.0  ;;  %v4583_v50 = vadd.f32 %v4582_v1, %v8769_v37  ;;  %v3123_v32 = vmax.f32 %v2553_v49, 0.0  ;;  %v6729_v20 = vrot.slane %v6728_v7, 4 }
 0x484   :  { %v2555_v11 = vpop.f32.mrf.mxu0  ;;  %v4586_v0 = vpop.f32.mrf.mxu1  ;;  %4825 = vmatmul.mubr.bf16.gmra.mxu1 %v3396_v13  ;;  %v3122_v46 = vmax.f32 %v2551_v62, 0.0  ;;  %v6724_v4 = vrot.slane %v6723_v33, 2  ;;  %v5532_v2 = vrot.slane %v8819_v21, 4  ;;  %v6692_v56 = vmax.f32 %v6690_v47, %v6691_v35 }
 0x485   :  { %v6735_v45 = vmax.f32 %v5303_v48, %v5305_v61  ;;  %v5306_v40 = vmax.f32 %v4583_v50, 0.0  ;;  %v3124_v41 = vmax.f32 %v2555_v11, 0.0  ;;  %v4587_v25 = vadd.f32 %v4586_v0, %v8764_v31 }
 0x486   :  { %v2557_v34 = vpop.f32.mrf.mxu0  ;;  %v4588_v14 = vpop.f32.mrf.mxu1  ;;  %v7656_v52 = vsel %vm7495_vm2, %v6699_v36, %v6685_v24  ;;  %v6719_v17 = vrot.slane %v6718_v59, 1  ;;  %v6730_v53 = vmax.f32 %v6728_v7, %v6729_v20  ;;  %v6706_v47 = vmax.f32 %v9800_v6, %v6705_v44 }
 0x487   :  { %v3125_v43 = vmax.f32 %v2557_v34, 0.0  ;;  %v6736_v9 = vrot.slane %v6735_v45, 4  ;;  %v6742_v16 = vmax.f32 %v5304_v5, %v5306_v40  ;;  %v4589_v19 = vadd.f32 %v4588_v14, %v8769_v37 }
 0x488   :  { %v2561_v3 = vpop.f32.mrf.mxu0  ;;  %v4590_v29 = vpop.f32.mrf.mxu1  ;;  %v3398_v30 = vpack.c.bf16 %v3124_v41, %v3122_v46  ;;  %v5307_v23 = vmax.f32 %v4587_v25, 0.0  ;;  %v6713_v48 = vmax.f32 %v6711_v10, %v6712_v60  ;;  %v6725_v61 = vmax.f32 %v6723_v33, %v6724_v4 }
 0x489   :  { %v3399_v51 = vpack.c.bf16 %v3125_v43, %v3123_v32  ;;  %v4591_v39 = vadd.f32 %v4590_v29, %v8764_v31  ;;  %v6743_v62 = vrot.slane %v6742_v16, 4  ;;  %v6737_v11 = vmax.f32 %v6735_v45, %v6736_v9 }
 0x48a   :  { %v2563_v42 = vpop.f32.mrf.mxu0  ;;  %v4592_v22 = vpop.f32.mrf.mxu1  ;;  %v5308_v24 = vmax.f32 %v4589_v19, 0.0  ;;  %v6720_v34 = vmax.f32 %v6718_v59, %v6719_v17  ;;  %v6731_v43 = vrot.slane %v6730_v53, 2  ;;  %v6726_v33 = vrot.slane %v6725_v61, 1 }
 0x48b   :  { %4834 = vmatprep.mubr.bf16.mxu1 %v3399_v51  ;;  %v5309_v49 = vmax.f32 %v4591_v39, 0.0  ;;  %v4593_v13 = vadd.f32 %v4592_v22, %v8769_v37  ;;  %v6744_v50 = vmax.f32 %v6742_v16, %v6743_v62  ;;  %v3127_v32 = vmax.f32 %v2563_v42, 0.0 }
 0x48c   :  { %v2565_v1 = vpop.f32.mrf.mxu0  ;;  %v4596_v35 = vpop.f32.mrf.mxu1  ;;  %4835 = vmatmul.mubr.bf16.gmra.mxu1 %v3398_v30  ;;  %v6738_v44 = vrot.slane %v6737_v11, 2  ;;  %v3126_v45 = vmax.f32 %v2561_v3, 0.0  ;;  %v7663_v51 = vsel %vm7495_vm2, %v6706_v47, %v6692_v56  ;;  %v7657_v29 = vsel %vm7497_vm3, %v6713_v48, %v7656_v52 }
 0x48d   :  { %v6749_v36 = vmax.f32 %v5307_v23, %v5309_v49  ;;  %v5310_v0 = vmax.f32 %v4593_v13, 0.0  ;;  %v3128_v7 = vmax.f32 %v2565_v1, 0.0  ;;  %v4597_v6 = vadd.f32 %v4596_v35, %v8764_v31 }
 0x48e   :  { %v2567_v5 = vpop.f32.mrf.mxu0  ;;  %v4598_v41 = vpop.f32.mrf.mxu1  ;;  %v6745_v25 = vrot.slane %v6744_v50, 2  ;;  %v6732_v17 = vmax.f32 %v6730_v53, %v6731_v43  ;;  %v9823_v23 = vsel %vm7497_vm3, %v6720_v34, %v7663_v51  ;;  %v6727_v49 = vmax.f32 %v6725_v61, %v6726_v33 }
 0x48f   :  { %v3129_v40 = vmax.f32 %v2567_v5, 0.0  ;;  %v6750_v14 = vrot.slane %v6749_v36, 4  ;;  %v6756_v20 = vmax.f32 %v5308_v24, %v5310_v0  ;;  %v4599_v9 = vadd.f32 %v4598_v41, %v8769_v37 }
 0x490   :  { %v2571_v10 = vpop.f32.mrf.mxu0  ;;  %v4600_v46 = vpop.f32.mrf.mxu1  ;;  %v3400_v39 = vpack.c.bf16 %v3128_v7, %v3126_v45  ;;  %v5311_v3 = vmax.f32 %v4597_v6, 0.0  ;;  %v6739_v13 = vmax.f32 %v6737_v11, %v6738_v44  ;;  %v6746_v56 = vmax.f32 %v6744_v50, %v6745_v25 }
 0x491   :  { %v3401_v60 = vpack.c.bf16 %v3129_v40, %v3127_v32  ;;  %v6751_v4 = vmax.f32 %v6749_v36, %v6750_v14  ;;  %v4601_v59 = vadd.f32 %v4600_v46, %v8764_v31  ;;  %v6757_v19 = vrot.slane %v6756_v20, 4 }
 0x492   :  { %v2573_v16 = vpop.f32.mrf.mxu0  ;;  %v4602_v42 = vpop.f32.mrf.mxu1  ;;  %v5312_v52 = vmax.f32 %v4599_v9, 0.0  ;;  %v6733_v7 = vrot.slane %v6732_v17, 1  ;;  %v6740_v41 = vrot.slane %v6739_v13, 1  ;;  %v3130_v43 = vmax.f32 %v2571_v10, 0.0 }
 0x493   :  { %4844 = vmatprep.mubr.bf16.mxu1 %v3401_v60  ;;  %v6752_v62 = vrot.slane %v6751_v4, 2  ;;  %v5313_v30 = vmax.f32 %v4601_v59, 0.0  ;;  %v4603_v1 = vadd.f32 %v4602_v42, %v8769_v37  ;;  %v3131_v48 = vmax.f32 %v2573_v16, 0.0 }
 0x494   :  { %v2575_v22 = vpop.f32.mrf.mxu0  ;;  %v4606_v35 = vpop.f32.mrf.mxu1  ;;  %4845 = vmatmul.mubr.bf16.gmra.mxu1 %v3400_v39  ;;  %v6758_v36 = vmax.f32 %v6756_v20, %v6757_v19  ;;  %v7658_v33 = vsel %vm7499_vm4, %v6727_v49, %v7657_v29  ;;  %v6747_v46 = vrot.slane %v6746_v56, 1  ;;  %v6734_v42 = vmax.f32 %v6732_v17, %v6733_v7 }
 0x495   :  { %v6763_v47 = vmax.f32 %v5311_v3, %v5313_v30  ;;  %v5314_v53 = vmax.f32 %v4603_v1, 0.0  ;;  %v3132_v0 = vmax.f32 %v2575_v22, 0.0  ;;  %v6753_v40 = vmax.f32 %v6751_v4, %v6752_v62 }
 0x496   :  { %v2577_v24 = vpop.f32.mrf.mxu0  ;;  %v4608_v32 = vpop.f32.mrf.mxu1  ;;  %v4607_v61 = vadd.f32 %v4606_v35, %v8764_v31  ;;  %v6759_v25 = vrot.slane %v6758_v36, 2  ;;  %v6741_v62 = vmax.f32 %v6739_v13, %v6740_v41 }
 0x497   :  { %v3133_v5 = vmax.f32 %v2577_v24, 0.0  ;;  %v6764_v34 = vrot.slane %v6763_v47, 4  ;;  %v6770_v14 = vmax.f32 %v5312_v52, %v5314_v53  ;;  %v4609_v20 = vadd.f32 %v4608_v32, %v8769_v37 }
 0x498   :  { %v2581_v11 = vpop.f32.mrf.mxu0  ;;  %v4610_v50 = vpop.f32.mrf.mxu1  ;;  %v3402_v9 = vpack.c.bf16 %v3132_v0, %v3130_v43  ;;  %v6754_v16 = vrot.slane %v6753_v40, 1  ;;  %v5315_v10 = vmax.f32 %v4607_v61, 0.0 }
 0x499   :  { %v3403_v6 = vpack.c.bf16 %v3133_v5, %v3131_v48  ;;  %v6765_v44 = vmax.f32 %v6763_v47, %v6764_v34  ;;  %v4611_v45 = vadd.f32 %v4610_v50, %v8764_v31  ;;  %v6771_v4 = vrot.slane %v6770_v14, 4 }
 0x49a   :  { %v2583_v60 = vpop.f32.mrf.mxu0  ;;  %v4612_v59 = vpop.f32.mrf.mxu1  ;;  %v5316_v49 = vmax.f32 %v4609_v20, 0.0  ;;  %v6748_v5 = vmax.f32 %v6746_v56, %v6747_v46  ;;  %v6755_v32 = vmax.f32 %v6753_v40, %v6754_v16  ;;  %v6760_v34 = vmax.f32 %v6758_v36, %v6759_v25 }
 0x49b   :  { %4854 = vmatprep.mubr.bf16.mxu1 %v3403_v6  ;;  %v6766_v51 = vrot.slane %v6765_v44, 2  ;;  %v5317_v19 = vmax.f32 %v4611_v45, 0.0  ;;  %v6772_v29 = vmax.f32 %v6770_v14, %v6771_v4  ;;  %v4613_v3 = vadd.f32 %v4612_v59, %v8769_v37 }
 0x49c   :  { %v2585_v39 = vpop.f32.mrf.mxu0  ;;  %v4616_v30 = vpop.f32.mrf.mxu1  ;;  %4855 = vmatmul.mubr.bf16.gmra.mxu1 %v3402_v9  ;;  %v3135_v35 = vmax.f32 %v2583_v60, 0.0  ;;  %v3134_v7 = vmax.f32 %v2581_v11, 0.0  ;;  %v7665_v60 = vsel %vm7499_vm4, %v6734_v42, %v9823_v23  ;;  %v7659_v56 = vsel %vm7501_vm5, %v6741_v62, %v7658_v33 }
 0x49d   :  { %v6767_v22 = vmax.f32 %v6765_v44, %v6766_v51  ;;  %v6777_v1 = vmax.f32 %v5315_v10, %v5317_v19  ;;  %v6773_v47 = vrot.slane %v6772_v29, 2  ;;  %v5318_v48 = vmax.f32 %v4613_v3, 0.0 }
 0x49e   :  { %v2587_v52 = vpop.f32.mrf.mxu0  ;;  %v3136_v24 = vmax.f32 %v2585_v39, 0.0  ;;  %v4618_v0 = vpop.f32.mrf.mxu1  ;;  %v4617_v41 = vadd.f32 %v4616_v30, %v8764_v31  ;;  %v7666_v11 = vsel %vm7501_vm5, %v6748_v5, %v7665_v60  ;;  %v7660_v25 = vsel %vm7503_vm6, %v6755_v32, %v7659_v56 }
 0x49f   :  { %v3137_v53 = vmax.f32 %v2587_v52, 0.0  ;;  %v6778_v17 = vrot.slane %v6777_v1, 4  ;;  %v6784_v61 = vmax.f32 %v5316_v49, %v5318_v48  ;;  %v6768_v6 = vrot.slane %v6767_v22, 1 }
 0x4a0   :  { %v2591_v13 = vpop.f32.mrf.mxu0  ;;  %v4620_v14 = vpop.f32.mrf.mxu1  ;;  %v6774_v50 = vmax.f32 %v6772_v29, %v6773_v47  ;;  %v3404_v40 = vpack.c.bf16 %v3136_v24, %v3134_v7  ;;  %v6761_v4 = vrot.slane %v6760_v34, 1  ;;  %v5319_v51 = vmax.f32 %v4617_v41, 0.0 }
 0x4a1   :  { %v3405_v43 = vpack.c.bf16 %v3137_v53, %v3135_v35  ;;  %v6779_v44 = vmax.f32 %v6777_v1, %v6778_v17  ;;  %v4621_v20 = vadd.f32 %v4620_v14, %v8764_v31  ;;  %v6785_v36 = vrot.slane %v6784_v61, 4 }
 0x4a2   :  { %v2593_v45 = vpop.f32.mrf.mxu0  ;;  %v4622_v46 = vpop.f32.mrf.mxu1  ;;  %v6769_v23 = vmax.f32 %v6767_v22, %v6768_v6  ;;  %v6775_v33 = vrot.slane %v6774_v50, 1  ;;  %v4619_v62 = vadd.f32 %v4618_v0, %v8769_v37  ;;  %v6762_v52 = vmax.f32 %v6760_v34, %v6761_v4 }
 0x4a3   :  { %4864 = vmatprep.mubr.bf16.mxu1 %v3405_v43  ;;  %v6780_v9 = vrot.slane %v6779_v44, 2  ;;  %v6786_v16 = vmax.f32 %v6784_v61, %v6785_v36  ;;  %v5321_v10 = vmax.f32 %v4621_v20, 0.0  ;;  %v4623_v19 = vadd.f32 %v4622_v46, %v8769_v37 }
 0x4a4   :  { %v2595_v59 = vpop.f32.mrf.mxu0  ;;  %v4626_v39 = vpop.f32.mrf.mxu1  ;;  %4865 = vmatmul.mubr.bf16.gmra.mxu1 %v3404_v40  ;;  %v3139_v30 = vmax.f32 %v2593_v45, 0.0  ;;  %v3138_v48 = vmax.f32 %v2591_v13, 0.0  ;;  %v6776_v61 = vmax.f32 %v6774_v50, %v6775_v33  ;;  %v7661_v6 = vsel %vm7505_vm7, %v6769_v23, %v7660_v25 }
 0x4a5   :  { %v6781_v42 = vmax.f32 %v6779_v44, %v6780_v9  ;;  %v6787_v3 = vrot.slane %v6786_v16, 2  ;;  %v3140_v49 = vmax.f32 %v2595_v59, 0.0  ;;  %v4627_v24 = vadd.f32 %v4626_v39, %v8764_v31 }
 0x4a6   :  { %v2597_v29 = vpop.f32.mrf.mxu0  ;;  %v4628_v35 = vpop.f32.mrf.mxu1  ;;  %v6791_v32 = vmax.f32 %v5319_v51, %v5321_v10  ;;  %v5322_v17 = vmax.f32 %v4623_v19, 0.0  ;;  %v5320_v44 = vmax.f32 %v4619_v62, 0.0  ;;  %v7667_v45 = vsel %vm7503_vm6, %v6762_v52, %v7666_v11 }
 0x4a7   :  { %v3141_v1 = vmax.f32 %v2597_v29, 0.0  ;;  %v6782_v47 = vrot.slane %v6781_v42, 1  ;;  %v6788_v5 = vmax.f32 %v6786_v16, %v6787_v3  ;;  %v4629_v0 = vadd.f32 %v4628_v35, %v8769_v37 }
 0x4a8   :  { %v2601_v53 = vpop.f32.mrf.mxu0  ;;  %v4630_v7 = vpop.f32.mrf.mxu1  ;;  %v3406_v13 = vpack.c.bf16 %v3140_v49, %v3138_v48  ;;  %v5323_v56 = vmax.f32 %v4627_v24, 0.0  ;;  %v6792_v46 = vrot.slane %v6791_v32, 4  ;;  %v6798_v4 = vmax.f32 %v5320_v44, %v5322_v17 }
 0x4a9   :  { %v3407_v22 = vpack.c.bf16 %v3141_v1, %v3139_v30  ;;  %v6783_v41 = vmax.f32 %v6781_v42, %v6782_v47  ;;  %v4631_v43 = vadd.f32 %v4630_v7, %v8764_v31  ;;  %v6789_v34 = vrot.slane %v6788_v5, 1 }
 0x4aa   :  { %v2603_v14 = vpop.f32.mrf.mxu0  ;;  %v4632_v20 = vpop.f32.mrf.mxu1  ;;  %v7668_v25 = vsel %vm7505_vm7, %v6776_v61, %v7667_v45  ;;  %v5324_v16 = vmax.f32 %v4629_v0, 0.0  ;;  %v9852_v62 = vmax.f32 %v9795_v12, %v5520_v38  ;;  %v5527_v29 = vrot.slane %v9806_v57, 2 }
 0x4ab   :  { %4874 = vmatprep.mubr.bf16.mxu1 %v3407_v22  ;;  %v7662_v60 = vsel %vm7507_vm8, %v6783_v41, %v7661_v6  ;;  %v5325_v36 = vmax.f32 %v4631_v43, 0.0  ;;  %v6790_v40 = vmax.f32 %v6788_v5, %v6789_v34  ;;  %v4633_v9 = vadd.f32 %v4632_v20, %v8769_v37 }
 0x4ac   :  { %v2605_v50 = vpop.f32.mrf.mxu0  ;;  %7780 = vst [vmem:[#allocation2 + $0xb0] sm:$0xff] %v7662_v60  ;;  %v4636_v59 = vpop.f32.mrf.mxu1  ;;  %4875 = vmatmul.mubr.bf16.gmra.mxu1 %v3406_v13  ;;  %v3143_v10 = vmax.f32 %v2603_v14, 0.0  ;;  %v3142_v3 = vmax.f32 %v2601_v53, 0.0  ;;  %v6793_v1 = vmax.f32 %v6791_v32, %v6792_v46  ;;  %v6799_v35 = vrot.slane %v6798_v4, 4 }
 0x4ad   :  { %v6805_v51 = vmax.f32 %v5323_v56, %v5325_v36  ;;  %v7669_v11 = vsel %vm7507_vm8, %v6790_v40, %v7668_v25  ;;  %v5326_v39 = vmax.f32 %v4633_v9, 0.0  ;;  %v3144_v23 = vmax.f32 %v2605_v50, 0.0 }
 0x4ae   :  { %v2607_v19 = vpop.f32.mrf.mxu0  ;;  %v4638_v42 = vpop.f32.mrf.mxu1  ;;  %7781 = vst [vmem:[#allocation2 + $0xb8] sm:$0xff] %v7669_v11  ;;  %v9858_v24 = vmax.f32 %v9775_v8, %v5501_v26  ;;  %v5533_v12 = vmax.f32 %v8819_v21, %v5532_v2  ;;  %v4637_v38 = vadd.f32 %v4636_v59, %v8764_v31  ;;  %v9868_v32 = vmax.f32 %v9782_v15, %v5508_v55 }
 0x4af   :  { %v3145_v33 = vmax.f32 %v2607_v19, 0.0  ;;  %v6806_v30 = vrot.slane %v6805_v51, 4  ;;  %v6812_v52 = vmax.f32 %v5324_v16, %v5326_v39  ;;  %v3408_v7 = vpack.c.bf16 %v3144_v23, %v3142_v3 }
 0x4b0   :  { %v2611_v49 = vpop.f32.mrf.mxu0  ;;  %v4640_v48 = vpop.f32.mrf.mxu1  ;;  %v9873_v8 = vmax.f32 %v9785_v18, %v5515_v58  ;;  %v5539_v21 = vrot.slane %v8821_v28, 4  ;;  %v5522_v0 = vrot.slane %v9852_v62, 1  ;;  %v9879_v15 = vmax.f32 %v9806_v57, %v5527_v29 }
 0x4b1   :  { %v3409_v47 = vpack.c.bf16 %v3145_v33, %v3143_v10  ;;  %v4641_v53 = vadd.f32 %v4640_v48, %v8764_v31  ;;  %v6807_v17 = vmax.f32 %v6805_v51, %v6806_v30  ;;  %v6813_v22 = vrot.slane %v6812_v52, 4 }
 0x4b2   :  { %v2613_v5 = vpop.f32.mrf.mxu0  ;;  %v4642_v61 = vpop.f32.mrf.mxu1  ;;  %v6794_v55 = vrot.slane %v6793_v1, 2  ;;  %v6800_v43 = vmax.f32 %v6798_v4, %v6799_v35  ;;  %v5534_v6 = vrot.slane %v5533_v12, 2  ;;  %v5327_v44 = vmax.f32 %v4637_v38, 0.0 }
 0x4b3   :  { %4884 = vmatprep.mubr.bf16.mxu1 %v3409_v47  ;;  %v5329_v26 = vmax.f32 %v4641_v53, 0.0  ;;  %v4643_v2 = vadd.f32 %v4642_v61, %v8769_v37  ;;  %v6814_v34 = vmax.f32 %v6812_v52, %v6813_v22  ;;  %v4639_v18 = vadd.f32 %v4638_v42, %v8769_v37 }
 0x4b4   :  { %v2615_v41 = vpop.f32.mrf.mxu0  ;;  %v4646_v14 = vpop.f32.mrf.mxu1  ;;  %4885 = vmatmul.mubr.bf16.gmra.mxu1 %v3408_v7  ;;  %v6808_v13 = vrot.slane %v6807_v17, 2  ;;  %v3147_v20 = vmax.f32 %v2613_v5, 0.0  ;;  %v5540_v36 = vmax.f32 %v8821_v28, %v5539_v21  ;;  %v6795_v4 = vmax.f32 %v6793_v1, %v6794_v55 }
 0x4b5   :  { %v3148_v45 = vmax.f32 %v2615_v41, 0.0  ;;  %v6819_v50 = vmax.f32 %v5327_v44, %v5329_v26  ;;  %v5330_v57 = vmax.f32 %v4643_v2, 0.0  ;;  %v4647_v40 = vadd.f32 %v4646_v14, %v8764_v31 }
 0x4b6   :  { %v2617_v58 = vpop.f32.mrf.mxu0  ;;  %v4648_v56 = vpop.f32.mrf.mxu1  ;;  %v6801_v9 = vrot.slane %v6800_v43, 2  ;;  %v3146_v59 = vmax.f32 %v2611_v49, 0.0  ;;  %v6815_v51 = vrot.slane %v6814_v34, 2  ;;  %v5328_v10 = vmax.f32 %v4639_v18, 0.0 }
 0x4b7   :  { %v3149_v60 = vmax.f32 %v2617_v58, 0.0  ;;  %v4649_v19 = vadd.f32 %v4648_v56, %v8769_v37  ;;  %v5529_v23 = vrot.slane %v9879_v15, 1  ;;  %v9887_v28 = vmax.f32 %v5533_v12, %v5534_v6 }
 0x4b8   :  { %v2621_v46 = vpop.f32.mrf.mxu0  ;;  %v4650_v16 = vpop.f32.mrf.mxu1  ;;  %v6809_v33 = vmax.f32 %v6807_v17, %v6808_v13  ;;  %v3410_v42 = vpack.c.bf16 %v3148_v45, %v3146_v59  ;;  %v6820_v3 = vrot.slane %v6819_v50, 4  ;;  %v6826_v30 = vmax.f32 %v5328_v10, %v5330_v57 }
 0x4b9   :  { %v3411_v25 = vpack.c.bf16 %v3149_v60, %v3147_v20  ;;  %v4651_v11 = vadd.f32 %v4650_v16, %v8764_v31  ;;  %v5331_v49 = vmax.f32 %v4647_v40, 0.0  ;;  %v5541_v52 = vrot.slane %v5540_v36, 2 }
 0x4ba   :  { %v2623_v39 = vpop.f32.mrf.mxu0  ;;  %v4652_v29 = vpop.f32.mrf.mxu1  ;;  %v5546_v47 = vrot.slane %v8832_v54, 4  ;;  %v6796_v48 = vrot.slane %v6795_v4, 1  ;;  %v9891_v5 = vmax.f32 %v6800_v43, %v6801_v9  ;;  %v6816_v12 = vmax.f32 %v6814_v34, %v6815_v51 }
 0x4bb   :  { %4894 = vmatprep.mubr.bf16.mxu1 %v3411_v25  ;;  %v5333_v1 = vmax.f32 %v4651_v11, 0.0  ;;  %v4653_v38 = vadd.f32 %v4652_v29, %v8769_v37  ;;  %v5332_v17 = vmax.f32 %v4649_v19, 0.0  ;;  %v3151_v61 = vmax.f32 %v2623_v39, 0.0 }
 0x4bc   :  { %v2625_v35 = vpop.f32.mrf.mxu0  ;;  %v4656_v53 = vpop.f32.mrf.mxu1  ;;  %4895 = vmatmul.mubr.bf16.gmra.mxu1 %v3410_v42  ;;  %v6810_v55 = vrot.slane %v6809_v33, 1  ;;  %v6821_v14 = vmax.f32 %v6819_v50, %v6820_v3  ;;  %v6827_v6 = vrot.slane %v6826_v30, 4  ;;  %v3150_v58 = vmax.f32 %v2621_v46, 0.0 }
 0x4bd   :  { %v6833_v22 = vmax.f32 %v5331_v49, %v5333_v1  ;;  %v5334_v21 = vmax.f32 %v4653_v38, 0.0  ;;  %v3152_v26 = vmax.f32 %v2625_v35, 0.0  ;;  %v4657_v44 = vadd.f32 %v4656_v53, %v8764_v31 }
 0x4be   :  { %v2627_v7 = vpop.f32.mrf.mxu0  ;;  %v4658_v41 = vpop.f32.mrf.mxu1  ;;  %v9894_v34 = vmax.f32 %v5540_v36, %v5541_v52  ;;  %v6817_v60 = vrot.slane %v6816_v12, 1  ;;  %v9899_v9 = vmax.f32 %v8832_v54, %v5546_v47  ;;  %v6797_v50 = vmax.f32 %v6795_v4, %v6796_v48 }
 0x4bf   :  { %v3153_v2 = vmax.f32 %v2627_v7, 0.0  ;;  %v6834_v13 = vrot.slane %v6833_v22, 4  ;;  %v6840_v20 = vmax.f32 %v5332_v17, %v5334_v21  ;;  %v4659_v56 = vadd.f32 %v4658_v41, %v8769_v37 }
 0x4c0   :  { %v2631_v18 = vpop.f32.mrf.mxu0  ;;  %v4660_v45 = vpop.f32.mrf.mxu1  ;;  %v3412_v25 = vpack.c.bf16 %v3152_v26, %v3150_v58  ;;  %v6822_v46 = vrot.slane %v6821_v14, 2  ;;  %v6828_v51 = vmax.f32 %v6826_v30, %v6827_v6  ;;  %v5335_v10 = vmax.f32 %v4657_v44, 0.0 }
 0x4c1   :  { %v3413_v43 = vpack.c.bf16 %v3153_v2, %v3151_v61  ;;  %v4661_v57 = vadd.f32 %v4660_v45, %v8764_v31  ;;  %v6841_v59 = vrot.slane %v6840_v20, 4  ;;  %v6803_v11 = vrot.slane %v9891_v5, 1 }
 0x4c2   :  { %v2633_v40 = vpop.f32.mrf.mxu0  ;;  %v4662_v16 = vpop.f32.mrf.mxu1  ;;  %v6811_v39 = vmax.f32 %v6809_v33, %v6810_v55  ;;  %v6835_v42 = vmax.f32 %v6833_v22, %v6834_v13  ;;  %v6818_v54 = vmax.f32 %v6816_v12, %v6817_v60  ;;  %v5336_v4 = vmax.f32 %v4659_v56, 0.0 }
 0x4c3   :  { %4904 = vmatprep.mubr.bf16.mxu1 %v3413_v43  ;;  %v5337_v19 = vmax.f32 %v4661_v57, 0.0  ;;  %v4663_v29 = vadd.f32 %v4662_v16, %v8769_v37  ;;  %v6842_v49 = vmax.f32 %v6840_v20, %v6841_v59  ;;  %v3155_v52 = vmax.f32 %v2633_v40, 0.0 }
 0x4c4   :  { %v2635_v36 = vpop.f32.mrf.mxu0  ;;  %v4666_v3 = vpop.f32.mrf.mxu1  ;;  %4905 = vmatmul.mubr.bf16.gmra.mxu1 %v3412_v25  ;;  %v6823_v53 = vmax.f32 %v6821_v14, %v6822_v46  ;;  %v6829_v17 = vrot.slane %v6828_v51, 2  ;;  %v6836_v61 = vrot.slane %v6835_v42, 2  ;;  %v3154_v21 = vmax.f32 %v2631_v18, 0.0 }
 0x4c5   :  { %v6847_v1 = vmax.f32 %v5335_v10, %v5337_v19  ;;  %v5338_v47 = vmax.f32 %v4663_v29, 0.0  ;;  %v3156_v48 = vmax.f32 %v2635_v36, 0.0  ;;  %v4667_v33 = vadd.f32 %v4666_v3, %v8764_v31 }
 0x4c6   :  { %v2637_v35 = vpop.f32.mrf.mxu0  ;;  %v4668_v38 = vpop.f32.mrf.mxu1  ;;  %v5553_v41 = vrot.slane %v8834_v63, 4  ;;  %v6843_v55 = vrot.slane %v6842_v49, 2  ;;  %v6804_v14 = vmax.f32 %v9891_v5, %v6803_v11  ;;  %v7670_v13 = vsel %vm7495_vm2, %v6811_v39, %v6797_v50 }
 0x4c7   :  { %v3157_v30 = vmax.f32 %v2637_v35, 0.0  ;;  %v6848_v7 = vrot.slane %v6847_v1, 4  ;;  %v6854_v26 = vmax.f32 %v5336_v4, %v5338_v47  ;;  %v4669_v6 = vadd.f32 %v4668_v38, %v8769_v37 }
 0x4c8   :  { %v2641_v22 = vpop.f32.mrf.mxu0  ;;  %v4670_v12 = vpop.f32.mrf.mxu1  ;;  %v3414_v43 = vpack.c.bf16 %v3156_v48, %v3154_v21  ;;  %v5339_v60 = vmax.f32 %v4667_v33, 0.0  ;;  %v9911_v59 = vsel %vm7495_vm2, %v6818_v54, %v6804_v14  ;;  %v6824_v25 = vrot.slane %v6823_v53, 1 }
 0x4c9   :  { %v3415_v2 = vpack.c.bf16 %v3157_v30, %v3155_v52  ;;  %v4671_v44 = vadd.f32 %v4670_v12, %v8764_v31  ;;  %v6849_v20 = vmax.f32 %v6847_v1, %v6848_v7  ;;  %v6855_v18 = vrot.slane %v6854_v26, 4 }
 0x4ca   :  { %v2643_v58 = vpop.f32.mrf.mxu0  ;;  %v4672_v45 = vpop.f32.mrf.mxu1  ;;  %v6830_v16 = vmax.f32 %v6828_v51, %v6829_v17  ;;  %v6837_v46 = vmax.f32 %v6835_v42, %v6836_v61  ;;  %v6844_v5 = vmax.f32 %v6842_v49, %v6843_v55  ;;  %v5340_v50 = vmax.f32 %v4669_v6, 0.0 }
 0x4cb   :  { %4914 = vmatprep.mubr.bf16.mxu1 %v3415_v2  ;;  %v5341_v56 = vmax.f32 %v4671_v44, 0.0  ;;  %v4673_v57 = vadd.f32 %v4672_v45, %v8769_v37  ;;  %v6850_v39 = vrot.slane %v6849_v20, 2  ;;  %v3159_v29 = vmax.f32 %v2643_v58, 0.0 }
 0x4cc   :  { %v2645_v40 = vpop.f32.mrf.mxu0  ;;  %v4676_v10 = vpop.f32.mrf.mxu1  ;;  %4915 = vmatmul.mubr.bf16.gmra.mxu1 %v3414_v43  ;;  %v6856_v35 = vmax.f32 %v6854_v26, %v6855_v18  ;;  %v6831_v51 = vrot.slane %v6830_v16, 1  ;;  %v6838_v42 = vrot.slane %v6837_v46, 1  ;;  %v3158_v30 = vmax.f32 %v2641_v22, 0.0 }
 0x4cd   :  { %v6861_v19 = vmax.f32 %v5339_v60, %v5341_v56  ;;  %v5342_v36 = vmax.f32 %v4673_v57, 0.0  ;;  %v3160_v3 = vmax.f32 %v2645_v40, 0.0  ;;  %v4677_v54 = vadd.f32 %v4676_v10, %v8764_v31 }
 0x4ce   :  { %v2647_v11 = vpop.f32.mrf.mxu0  ;;  %v4678_v1 = vpop.f32.mrf.mxu1  ;;  %v6825_v17 = vmax.f32 %v6823_v53, %v6824_v25  ;;  %v6845_v2 = vrot.slane %v6844_v5, 1  ;;  %v6851_v12 = vmax.f32 %v6849_v20, %v6850_v39  ;;  %v6857_v44 = vrot.slane %v6856_v35, 2 }
 0x4cf   :  { %v3161_v4 = vmax.f32 %v2647_v11, 0.0  ;;  %v6862_v52 = vrot.slane %v6861_v19, 4  ;;  %v6868_v47 = vmax.f32 %v5340_v50, %v5342_v36  ;;  %v3416_v55 = vpack.c.bf16 %v3160_v3, %v3158_v30 }
 0x4d0   :  { %v3656_v48 = vpop.f32.mrf.mxu0  ;;  %v4680_v49 = vpop.f32.mrf.mxu1  ;;  %v4679_v26 = vadd.f32 %v4678_v1, %v8769_v37  ;;  %v5343_v14 = vmax.f32 %v4677_v54, 0.0  ;;  %v6832_v45 = vmax.f32 %v6830_v16, %v6831_v51  ;;  %v6839_v18 = vmax.f32 %v6837_v46, %v6838_v42 }
 0x4d1   :  { %v3417_v38 = vpack.c.bf16 %v3161_v4, %v3159_v29  ;;  %v6863_v7 = vmax.f32 %v6861_v19, %v6862_v52  ;;  %v6869_v33 = vrot.slane %v6868_v47, 4  ;;  %v4681_v61 = vadd.f32 %v4680_v49, %v8764_v31 }
 0x4d2   :  { %v3658_v21 = vpop.f32.mrf.mxu0  ;;  %v4682_v6 = vpop.f32.mrf.mxu1  ;;  %v7671_v20 = vsel %vm7497_vm3, %v6825_v17, %v7670_v13  ;;  %v3657_v40 = vadd.f32 %v3656_v48, %v8764_v31  ;;  %v6846_v50 = vmax.f32 %v6844_v5, %v6845_v2  ;;  %v5344_v36 = vmax.f32 %v4679_v26, 0.0 }
 0x4d3   :  { %4924 = vmatprep.mubr.bf16.mxu1 %v3417_v38  ;;  %v6870_v58 = vmax.f32 %v6868_v47, %v6869_v33  ;;  %v5345_v43 = vmax.f32 %v4681_v61, 0.0  ;;  %v4683_v53 = vadd.f32 %v4682_v6, %v8769_v37  ;;  %v6864_v57 = vrot.slane %v6863_v7, 2 }
 0x4d4   :  { %v3660_v22 = vpop.f32.mrf.mxu0  ;;  %v4686_v56 = vpop.f32.mrf.mxu1  ;;  %4925 = vmatmul.mubr.bf16.gmra.mxu1 %v3416_v55  ;;  %v6852_v16 = vrot.slane %v6851_v12, 1  ;;  %v6858_v46 = vmax.f32 %v6856_v35, %v6857_v44  ;;  %v7678_v1 = vsel %vm7497_vm3, %v6832_v45, %v9911_v59  ;;  %v7672_v13 = vsel %vm7499_vm4, %v6839_v18, %v7671_v20 }
 0x4d5   :  { %v3661_v60 = vadd.f32 %v3660_v22, %v8764_v31  ;;  %v6875_v25 = vmax.f32 %v5343_v14, %v5345_v43  ;;  %v6871_v19 = vrot.slane %v6870_v58, 2  ;;  %v5346_v11 = vmax.f32 %v4683_v53, 0.0 }
 0x4d6   :  { %v3662_v10 = vpop.f32.mrf.mxu0  ;;  %v4688_v39 = vpop.f32.mrf.mxu1  ;;  %v6865_v48 = vmax.f32 %v6863_v7, %v6864_v57  ;;  %v4935_v5 = vmax.f32 %v3657_v40, 0.0  ;;  %v3659_v42 = vadd.f32 %v3658_v21, %v8769_v37  ;;  %v7679_v35 = vsel %vm7499_vm4, %v6846_v50, %v7678_v1 }
 0x4d7   :  { %v6876_v29 = vrot.slane %v6875_v25, 4  ;;  %v4937_v3 = vmax.f32 %v3661_v60, 0.0  ;;  %v6882_v52 = vmax.f32 %v5344_v36, %v5346_v11  ;;  %v3663_v47 = vadd.f32 %v3662_v10, %v8769_v37 }
 0x4d8   :  { %v3666_v4 = vpop.f32.mrf.mxu0  ;;  %v4690_v54 = vpop.f32.mrf.mxu1  ;;  %v6872_v38 = vmax.f32 %v6870_v58, %v6871_v19  ;;  %v4687_v17 = vadd.f32 %v4686_v56, %v8764_v31  ;;  %v6853_v59 = vmax.f32 %v6851_v12, %v6852_v16  ;;  %v6859_v61 = vrot.slane %v6858_v46, 1 }
 0x4d9   :  { %v6877_v51 = vmax.f32 %v6875_v25, %v6876_v29  ;;  %v6883_v49 = vrot.slane %v6882_v52, 4  ;;  %v5447_v2 = vmax.f32 %v4935_v5, %v4937_v3  ;;  %v4689_v55 = vadd.f32 %v4688_v39, %v8769_v37 }
 0x4da   :  { %v3668_v30 = vpop.f32.mrf.mxu0  ;;  %v4692_v33 = vpop.f32.mrf.mxu1  ;;  %v4938_v44 = vmax.f32 %v3663_v47, 0.0  ;;  %v4691_v14 = vadd.f32 %v4690_v54, %v8764_v31  ;;  %v6866_v43 = vrot.slane %v6865_v48, 1  ;;  %v4936_v22 = vmax.f32 %v3659_v42, 0.0 }
 0x4db   :  { %v6878_v6 = vrot.slane %v6877_v51, 2  ;;  %v6884_v7 = vmax.f32 %v6882_v52, %v6883_v49  ;;  %v3667_v58 = vadd.f32 %v3666_v4, %v8764_v31  ;;  %v4693_v45 = vadd.f32 %v4692_v33, %v8769_v37 }
 0x4dc   :  { %v3670_v26 = vpop.f32.mrf.mxu0  ;;  %v9929_v21 = vpop.f32.mrf.mxu1  ;;  %v6873_v12 = vrot.slane %v6872_v38, 1  ;;  %v5347_v60 = vmax.f32 %v4687_v17, 0.0  ;;  %v5349_v56 = vmax.f32 %v4691_v14, 0.0  ;;  %v6860_v57 = vmax.f32 %v6858_v46, %v6859_v61 }
 0x4dd   :  { %v6885_v53 = vrot.slane %v6884_v7, 2  ;;  %v5348_v40 = vmax.f32 %v4689_v55, 0.0  ;;  %v5350_v25 = vmax.f32 %v4693_v45, 0.0  ;;  %v3671_v10 = vadd.f32 %v3670_v26, %v8764_v31 }
 0x4de   :  { %v3672_v18 = vpop.f32.mrf.mxu0  ;;  %v9933_v20 = vpop.f32.mrf.mxu1  ;;  %v6879_v19 = vmax.f32 %v6877_v51, %v6878_v6  ;;  %v5448_v36 = vrot.slane %v5447_v2, 4  ;;  %v5454_v11 = vmax.f32 %v4936_v22, %v4938_v44  ;;  %v6889_v39 = vmax.f32 %v5347_v60, %v5349_v56 }
 0x4df   :  { %v6886_v29 = vmax.f32 %v6884_v7, %v6885_v53  ;;  %v4939_v3 = vmax.f32 %v3667_v58, 0.0  ;;  %v6896_v4 = vmax.f32 %v5348_v40, %v5350_v25  ;;  %v4941_v1 = vmax.f32 %v3671_v10, 0.0 }
 0x4e0   :  { %v3676_v50 = vpop.f32.mrf.mxu0  ;;  %v4700_v16 = vpop.f32.mrf.mxu1  ;;  %v7673_v52 = vsel %vm7501_vm5, %v6853_v59, %v7672_v13  ;;  %v6867_v47 = vmax.f32 %v6865_v48, %v6866_v43  ;;  %v6874_v54 = vmax.f32 %v6872_v38, %v6873_v12  ;;  %v6890_v5 = vrot.slane %v6889_v39, 4 }
 0x4e1   :  { %v7680_v42 = vsel %vm7501_vm5, %v6860_v57, %v7679_v35  ;;  %v3669_v49 = vadd.f32 %v3668_v30, %v8769_v37  ;;  %v6897_v17 = vrot.slane %v6896_v4, 4  ;;  %v5461_v51 = vmax.f32 %v4939_v3, %v4941_v1 }
 0x4e2   :  { %v4702_v46 = vpop.f32.mrf.mxu1  ;;  %v3678_v33 = vpop.f32.mrf.mxu0  ;;  %v6880_v61 = vrot.slane %v6879_v19, 1  ;;  %v9939_v55 = vmax.f32 %v5447_v2, %v5448_v36  ;;  %v5455_v26 = vrot.slane %v5454_v11, 4  ;;  %v6891_v6 = vmax.f32 %v6889_v39, %v6890_v5 }
 0x4e3   :  { %v6887_v44 = vrot.slane %v6886_v29, 1  ;;  %v6898_v13 = vmax.f32 %v6896_v4, %v6897_v17  ;;  %v5462_v48 = vrot.slane %v5461_v51, 4  ;;  %v3673_v38 = vadd.f32 %v3672_v18, %v8769_v37 }
 0x4e4   :  { %v9941_v7 = vpop.f32.mrf.mxu1  ;;  %v5548_v59 = vrot.slane %v9899_v9, 2  ;;  %v7674_v35 = vsel %vm7503_vm6, %v6867_v47, %v7673_v52  ;;  %v7681_v30 = vsel %vm7503_vm6, %v6874_v54, %v7680_v42  ;;  %v6892_v14 = vrot.slane %v6891_v6, 2  ;;  %v3680_v12 = vpop.f32.mrf.mxu0 }
 0x4e5   :  { %v4940_v2 = vmax.f32 %v3669_v49, 0.0  ;;  %v6899_v22 = vrot.slane %v6898_v13, 2  ;;  %v5463_v58 = vmax.f32 %v5461_v51, %v5462_v48  ;;  %v4942_v45 = vmax.f32 %v3673_v38, 0.0 }
 0x4e6   :  { %v9947_v43 = vpop.f32.mrf.mxu1  ;;  %v6881_v53 = vmax.f32 %v6879_v19, %v6880_v61  ;;  %v5450_v60 = vrot.slane %v9939_v55, 2  ;;  %v6893_v56 = vmax.f32 %v6891_v6, %v6892_v14  ;;  %v3677_v18 = vadd.f32 %v3676_v50, %v8764_v31  ;;  %v3682_v61 = vpop.f32.mrf.mxu0 }
 0x4e7   :  { %v6888_v40 = vmax.f32 %v6886_v29, %v6887_v44  ;;  %v5456_v25 = vmax.f32 %v5454_v11, %v5455_v26  ;;  %v6900_v10 = vmax.f32 %v6898_v13, %v6899_v22  ;;  %v5468_v36 = vmax.f32 %v4940_v2, %v4942_v45 }
 0x4e8   :  { %v9951_v57 = vpop.f32.mrf.mxu1  ;;  %v6894_v39 = vrot.slane %v6893_v56, 1  ;;  %v4697_v3 = vadd.f32 %v9929_v21, %v8764_v31  ;;  %v4701_v4 = vadd.f32 %v4700_v16, %v8764_v31  ;;  %v3681_v1 = vadd.f32 %v3680_v12, %v8764_v31 }
 0x4e9   :  { %v6901_v52 = vrot.slane %v6900_v10, 1  ;;  %v5464_v47 = vrot.slane %v5463_v58, 2  ;;  %v5469_v54 = vrot.slane %v5468_v36, 4  ;;  %v4703_v50 = vadd.f32 %v4702_v46, %v8769_v37 }
 0x4ea   :  { %v9957_v19 = vpop.f32.mrf.mxu1  ;;  %v7675_v29 = vsel %vm7505_vm7, %v6881_v53, %v7674_v35  ;;  %v6895_v11 = vmax.f32 %v6893_v56, %v6894_v39  ;;  %v4943_v5 = vmax.f32 %v3677_v18, 0.0  ;;  %v4945_v42 = vmax.f32 %v3681_v1, 0.0 }
 0x4eb   :  { %v7682_v21 = vsel %vm7505_vm7, %v6888_v40, %v7681_v30  ;;  %v6902_v17 = vmax.f32 %v6900_v10, %v6901_v52  ;;  %v5470_v16 = vmax.f32 %v5468_v36, %v5469_v54  ;;  %v4699_v51 = vadd.f32 %v9933_v20, %v8769_v37 }
 0x4ec   :  { %v9961_v49 = vpop.f32.mrf.mxu1  ;;  %v7676_v26 = vsel %vm7507_vm8, %v6895_v11, %v7675_v29  ;;  %v5353_v6 = vmax.f32 %v4701_v4, 0.0  ;;  %v3679_v46 = vadd.f32 %v3678_v33, %v8769_v37  ;;  %v5475_v44 = vmax.f32 %v4943_v5, %v4945_v42 }
 0x4ed   :  { %v5554_v48 = vmax.f32 %v8834_v63, %v5553_v41  ;;  %7782 = vst [vmem:[#allocation2 + $0xc0] sm:$0xff] %v7676_v26  ;;  %v7683_v38 = vsel %vm7507_vm8, %v6902_v17, %v7682_v21  ;;  %v5465_v35 = vmax.f32 %v5463_v58, %v5464_v47  ;;  %v5354_v30 = vmax.f32 %v4703_v50, 0.0 }
 0x4ee   :  { %v9968_v13 = vpop.f32.mrf.mxu1  ;;  %v5457_v14 = vrot.slane %v5456_v25, 2  ;;  %7783 = vst [vmem:[#allocation2 + $0xc8] sm:$0xff] %v7683_v38  ;;  %v5351_v20 = vmax.f32 %v4697_v3, 0.0  ;;  %v5476_v2 = vrot.slane %v5475_v44, 4  ;;  %v3683_v22 = vadd.f32 %v3682_v61, %v8769_v37 }
 0x4ef   :  { %v5536_v33 = vrot.slane %v9887_v28, 1  ;;  %v5451_v12 = vmax.f32 %v9939_v55, %v5450_v60  ;;  %v5471_v53 = vrot.slane %v5470_v16, 2  ;;  %v5352_v56 = vmax.f32 %v4699_v51, 0.0 }
 0x4f0   :  { %v9975_v45 = vpop.f32.mrf.mxu1  ;;  %v6903_v63 = vmax.f32 %v5351_v20, %v5353_v6  ;;  %v4944_v41 = vmax.f32 %v3679_v46, 0.0  ;;  %v5477_v18 = vmax.f32 %v5475_v44, %v5476_v2  ;;  %v4946_v40 = vmax.f32 %v3683_v22, 0.0 }
 0x4f1   :  { %v5543_v10 = vrot.slane %v9894_v34, 1  ;;  %v5549_v36 = vmax.f32 %v9899_v9, %v5548_v59  ;;  %v5466_v39 = vrot.slane %v5465_v35, 1  ;;  %v6910_v3 = vmax.f32 %v5352_v56, %v5354_v30 }
 0x4f2   :  { %v4722_v58 = vpop.f32.mrf.mxu1  ;;  %v5555_v4 = vrot.slane %v5554_v48, 2  ;;  %v5458_v1 = vmax.f32 %v5456_v25, %v5457_v14  ;;  %v5478_v52 = vrot.slane %v5477_v18, 2  ;;  %v5482_v47 = vmax.f32 %v4944_v41, %v4946_v40 }
 0x4f3   :  { %v5523_v60 = vmax.f32 %v9852_v62, %v5522_v0  ;;  %v9991_v54 = vmax.f32 %v9879_v15, %v5529_v23  ;;  %v5452_v50 = vrot.slane %v5451_v12, 1  ;;  %v5472_v29 = vmax.f32 %v5470_v16, %v5471_v53 }
 0x4f4   :  { %v9983_v55 = vpop.f32.mrf.mxu1  ;;  %v5537_v9 = vmax.f32 %v9887_v28, %v5536_v33  ;;  %v6904_v59 = vrot.slane %v6903_v63, 4  ;;  %v5479_v11 = vmax.f32 %v5477_v18, %v5478_v52  ;;  %v5483_v25 = vrot.slane %v5482_v47, 4 }
 0x4f5   :  { %v9997_v42 = vmax.f32 %v9894_v34, %v5543_v10  ;;  %v5550_v21 = vrot.slane %v5549_v36, 1  ;;  %v5467_v17 = vmax.f32 %v5465_v35, %v5466_v39  ;;  %v6911_v62 = vrot.slane %v6910_v3, 4 }
 0x4f6   :  { %v9994_v5 = vpop.f32.mrf.mxu1  ;;  %v5556_v0 = vmax.f32 %v5554_v48, %v5555_v4  ;;  %v5459_v51 = vrot.slane %v5458_v1, 1  ;;  %v5480_v61 = vrot.slane %v5479_v11, 1  ;;  %v5484_v15 = vmax.f32 %v5482_v47, %v5483_v25 }
 0x4f7   :  { %v5453_v26 = vmax.f32 %v5451_v12, %v5452_v50  ;;  %v5473_v16 = vrot.slane %v5472_v29, 1  ;;  %v4711_v28 = vadd.f32 %v9951_v57, %v8764_v31  ;;  %v4713_v6 = vadd.f32 %v9957_v19, %v8769_v37 }
 0x4f8   :  { %v4730_v23 = vpop.f32.mrf.mxu1  ;;  %v6905_v46 = vmax.f32 %v6903_v63, %v6904_v59  ;;  %v5481_v44 = vmax.f32 %v5479_v11, %v5480_v61  ;;  %v4707_v34 = vadd.f32 %v9941_v7, %v8764_v31  ;;  %v5485_v38 = vrot.slane %v5484_v15, 2 }
 0x4f9   :  { %v5551_v48 = vmax.f32 %v5549_v36, %v5550_v21  ;;  %v7496_v30 = vsel %vm7495_vm2, %v5467_v17, %v5453_v26  ;;  %v6912_v14 = vmax.f32 %v6910_v3, %v6911_v62  ;;  %v4709_v20 = vadd.f32 %v9947_v43, %v8769_v37 }
 0x4fa   :  { %v4732_v35 = vpop.f32.mrf.mxu1  ;;  %v5557_v2 = vrot.slane %v5556_v0, 1  ;;  %v5460_v22 = vmax.f32 %v5458_v1, %v5459_v51  ;;  %v7498_v57 = vsel %vm7497_vm3, %v5481_v44, %v7496_v30  ;;  %v5486_v33 = vmax.f32 %v5484_v15, %v5485_v38 }
 0x4fb   :  { %v5474_v12 = vmax.f32 %v5472_v29, %v5473_v16  ;;  %v7500_v53 = vsel %vm7499_vm4, %v9779_v27, %v7498_v57  ;;  %v5357_v7 = vmax.f32 %v4711_v28, 0.0  ;;  %v5358_v56 = vmax.f32 %v4713_v6, 0.0 }
 0x4fc   :  { %v4736_v19 = vpop.f32.mrf.mxu1  ;;  %v6906_v63 = vrot.slane %v6905_v46, 2  ;;  %v7502_v41 = vsel %vm7501_vm5, %v9868_v32, %v7500_v53  ;;  %v5355_v18 = vmax.f32 %v4707_v34, 0.0  ;;  %v5487_v40 = vrot.slane %v5486_v33, 1 }
 0x4fd   :  { %v6913_v43 = vrot.slane %v6912_v14, 2  ;;  %v7504_v36 = vsel %vm7503_vm6, %v5523_v60, %v7502_v41  ;;  %v5356_v39 = vmax.f32 %v4709_v20, 0.0  ;;  %v4721_v3 = vadd.f32 %v9975_v45, %v8764_v31 }
 0x4fe   :  { %v4738_v10 = vpop.f32.mrf.mxu1  ;;  %v7506_v4 = vsel %vm7505_vm7, %v5537_v9, %v7504_v36  ;;  %v5488_v1 = vmax.f32 %v5486_v33, %v5487_v40  ;;  %v4717_v27 = vadd.f32 %v9961_v49, %v8764_v31  ;;  %v4723_v52 = vadd.f32 %v4722_v58, %v8769_v37 }
 0x4ff   :  { %v7509_v32 = vsel %vm7495_vm2, %v5474_v12, %v5460_v22  ;;  %v7508_v50 = vsel %vm7507_vm8, %v5551_v48, %v7506_v4  ;;  %v6917_v29 = vmax.f32 %v5355_v18, %v5357_v7  ;;  %v6924_v59 = vmax.f32 %v5356_v39, %v5358_v56 }
 0x500   :  { %v4740_v47 = vpop.f32.mrf.mxu1  ;;  %v5558_v60 = vmax.f32 %v5556_v0, %v5557_v2  ;;  %7758 = vst [vmem:[#allocation2] sm:$0xff] %v7508_v50  ;;  %v7510_v11 = vsel %vm7497_vm3, %v5488_v1, %v7509_v32  ;;  %v4719_v45 = vadd.f32 %v9968_v13, %v8769_v37  ;;  %v4731_v9 = vadd.f32 %v4730_v23, %v8764_v31 }
 0x501   :  { %v6907_v49 = vmax.f32 %v6905_v46, %v6906_v63  ;;  %v10026_v21 = vmax.f32 %v6912_v14, %v6913_v43  ;;  %v7511_v58 = vsel %vm7499_vm4, %v9858_v24, %v7510_v11  ;;  %v5361_v17 = vmax.f32 %v4721_v3, 0.0 }
 0x502   :  { %v4742_v25 = vpop.f32.mrf.mxu1  ;;  %v7512_v62 = vsel %vm7501_vm5, %v9873_v8, %v7511_v58  ;;  %v5362_v0 = vmax.f32 %v4723_v52, 0.0  ;;  %v4727_v51 = vadd.f32 %v9983_v55, %v8764_v31  ;;  %v4733_v61 = vadd.f32 %v4732_v35, %v8769_v37 }
 0x503   :  { %v7513_v15 = vsel %vm7503_vm6, %v9991_v54, %v7512_v62  ;;  %v6918_v23 = vrot.slane %v6917_v29, 4  ;;  %v6925_v26 = vrot.slane %v6924_v59, 4  ;;  %v5359_v16 = vmax.f32 %v4717_v27, 0.0 }
 0x504   :  { %v4746_v13 = vpop.f32.mrf.mxu1  ;;  %v7514_v24 = vsel %vm7505_vm7, %v9997_v42, %v7513_v15  ;;  %v5360_v28 = vmax.f32 %v4719_v45, 0.0  ;;  %v4729_v8 = vadd.f32 %v9994_v5, %v8769_v37  ;;  %v5365_v6 = vmax.f32 %v4731_v9, 0.0 }
 0x505   :  { %v6908_v44 = vrot.slane %v6907_v49, 1  ;;  %v7515_v55 = vsel %vm7507_vm8, %v5558_v60, %v7514_v24  ;;  %v6931_v34 = vmax.f32 %v5359_v16, %v5361_v17  ;;  %v4737_v38 = vadd.f32 %v4736_v19, %v8764_v31 }
 0x506   :  { %v4748_v46 = vpop.f32.mrf.mxu1  ;;  %7759 = vst [vmem:[#allocation2 + $0x8] sm:$0xff] %v7515_v55  ;;  %v6938_v54 = vmax.f32 %v5360_v28, %v5362_v0  ;;  %v5363_v35 = vmax.f32 %v4727_v51, 0.0  ;;  %v5366_v48 = vmax.f32 %v4733_v61, 0.0  ;;  %v4741_v30 = vadd.f32 %v4740_v47, %v8764_v31 }
 0x507   :  { %v6919_v42 = vmax.f32 %v6917_v29, %v6918_v23  ;;  %v6926_v20 = vmax.f32 %v6924_v59, %v6925_v26  ;;  %v4739_v2 = vadd.f32 %v4738_v10, %v8769_v37  ;;  %v4743_v5 = vadd.f32 %v4742_v25, %v8769_v37 }
 0x508   :  { %v4750_v14 = vpop.f32.mrf.mxu1  ;;  %v5364_v22 = vmax.f32 %v4729_v8, 0.0  ;;  %v6945_v57 = vmax.f32 %v5363_v35, %v5365_v6  ;;  %v5369_v33 = vmax.f32 %v4741_v30, 0.0  ;;  %v4747_v12 = vadd.f32 %v4746_v13, %v8764_v31 }
 0x509   :  { %v6915_v19 = vrot.slane %v10026_v21, 1  ;;  %v5367_v7 = vmax.f32 %v4737_v38, 0.0  ;;  %v5370_v56 = vmax.f32 %v4743_v5, 0.0  ;;  %v4749_v63 = vadd.f32 %v4748_v46, %v8769_v37 }
 0x50a   :  { %v4752_v53 = vpop.f32.mrf.mxu1  ;;  %v10049_v41 = vmax.f32 %v6907_v49, %v6908_v44  ;;  %v6932_v18 = vrot.slane %v6931_v34, 4  ;;  %v6939_v40 = vrot.slane %v6938_v54, 4  ;;  %v6952_v43 = vmax.f32 %v5364_v22, %v5366_v48 }
 0x50b   :  { %v5368_v36 = vmax.f32 %v4739_v2, 0.0  ;;  %v6959_v39 = vmax.f32 %v5367_v7, %v5369_v33  ;;  %v4751_v3 = vadd.f32 %v4750_v14, %v8764_v31  ;;  %v4753_v4 = vadd.f32 %v4752_v53, %v8769_v37 }
 0x50c   :  { %v4756_v10 = vpop.f32.mrf.mxu1  ;;  %v6920_v1 = vrot.slane %v6919_v42, 2  ;;  %v6927_v27 = vrot.slane %v6926_v20, 2  ;;  %v6946_v52 = vrot.slane %v6945_v57, 4  ;;  %v5371_v47 = vmax.f32 %v4747_v12, 0.0 }
 0x50d   :  { %v6966_v50 = vmax.f32 %v5368_v36, %v5370_v56  ;;  %v5372_v29 = vmax.f32 %v4749_v63, 0.0  ;;  %v5373_v59 = vmax.f32 %v4751_v3, 0.0  ;;  %v5374_v60 = vmax.f32 %v4753_v4, 0.0 }
 0x50e   :  { %v4758_v32 = vpop.f32.mrf.mxu1  ;;  %v6933_v11 = vmax.f32 %v6931_v34, %v6932_v18  ;;  %v6940_v45 = vmax.f32 %v6938_v54, %v6939_v40  ;;  %v6953_v9 = vrot.slane %v6952_v43, 4  ;;  %v4757_v25 = vadd.f32 %v4756_v10, %v8764_v31 }
 0x50f   :  { %v6960_v58 = vrot.slane %v6959_v39, 4  ;;  %v6973_v17 = vmax.f32 %v5371_v47, %v5373_v59  ;;  %v6980_v62 = vmax.f32 %v5372_v29, %v5374_v60  ;;  %v4759_v0 = vadd.f32 %v4758_v32, %v8769_v37 }
 0x510   :  { %v4760_v49 = vpop.f32.mrf.mxu1  ;;  %v10055_v51 = vmax.f32 %v6919_v42, %v6920_v1  ;;  %v10057_v61 = vmax.f32 %v6926_v20, %v6927_v27  ;;  %v6947_v13 = vmax.f32 %v6945_v57, %v6946_v52  ;;  %v6967_v26 = vrot.slane %v6966_v50, 4 }
 0x511   :  { %v4761_v15 = vadd.f32 %v4760_v49, %v8764_v31  ;;  %v6974_v16 = vrot.slane %v6973_v17, 4  ;;  %v6981_v24 = vrot.slane %v6980_v62, 4  ;;  %v6934_v8 = vrot.slane %v6933_v11, 2 }
 0x512   :  { %v4762_v23 = vpop.f32.mrf.mxu1  ;;  %v6941_v6 = vrot.slane %v6940_v45, 2  ;;  %v5375_v46 = vmax.f32 %v4757_v25, 0.0  ;;  %v6954_v34 = vmax.f32 %v6952_v43, %v6953_v9  ;;  %v6961_v38 = vmax.f32 %v6959_v39, %v6960_v58 }
 0x513   :  { %v4763_v28 = vadd.f32 %v4762_v23, %v8769_v37  ;;  %v5377_v44 = vmax.f32 %v4761_v15, 0.0  ;;  %v5376_v54 = vmax.f32 %v4759_v0, 0.0  ;;  %v10062_v48 = vmax.f32 %v10026_v21, %v6915_v19 }
 0x514   :  { %v4766_v55 = vpop.f32.mrf.mxu1  ;;  %v6922_v30 = vrot.slane %v10055_v51, 1  ;;  %v6975_v14 = vmax.f32 %v6973_v17, %v6974_v16  ;;  %v6948_v2 = vrot.slane %v6947_v13, 2  ;;  %v6968_v5 = vmax.f32 %v6966_v50, %v6967_v26 }
 0x515   :  { %v5378_v35 = vmax.f32 %v4763_v28, 0.0  ;;  %v6987_v42 = vmax.f32 %v5375_v46, %v5377_v44  ;;  %v6982_v22 = vmax.f32 %v6980_v62, %v6981_v24  ;;  %v6929_v33 = vrot.slane %v10057_v61, 1 }
 0x516   :  { %v4768_v20 = vpop.f32.mrf.mxu1  ;;  %v6935_v12 = vmax.f32 %v6933_v11, %v6934_v8  ;;  %v4767_v7 = vadd.f32 %v4766_v55, %v8764_v31  ;;  %v6942_v63 = vmax.f32 %v6940_v45, %v6941_v6  ;;  %v6955_v18 = vrot.slane %v6954_v34, 2 }
 0x517   :  { %v6994_v57 = vmax.f32 %v5376_v54, %v5378_v35  ;;  %v6988_v53 = vrot.slane %v6987_v42, 4  ;;  %v6962_v21 = vrot.slane %v6961_v38, 2  ;;  %v6976_v40 = vrot.slane %v6975_v14, 2 }
 0x518   :  { %v4770_v56 = vpop.f32.mrf.mxu1  ;;  %v4769_v10 = vadd.f32 %v4768_v20, %v8769_v37  ;;  %v6949_v3 = vmax.f32 %v6947_v13, %v6948_v2  ;;  %v6969_v4 = vrot.slane %v6968_v5, 2  ;;  %v6983_v1 = vrot.slane %v6982_v22, 2 }
 0x519   :  { %v6995_v19 = vrot.slane %v6994_v57, 4  ;;  %v6989_v43 = vmax.f32 %v6987_v42, %v6988_v53  ;;  %v4771_v36 = vadd.f32 %v4770_v56, %v8764_v31  ;;  %v5379_v47 = vmax.f32 %v4767_v7, 0.0 }
 0x51a   :  { %v4772_v39 = vpop.f32.mrf.mxu1  ;;  %v6936_v59 = vrot.slane %v6935_v12, 1  ;;  %v6956_v60 = vmax.f32 %v6954_v34, %v6955_v18  ;;  %v6963_v11 = vmax.f32 %v6961_v38, %v6962_v21  ;;  %v6977_v9 = vmax.f32 %v6975_v14, %v6976_v40 }
 0x51b   :  { %v6996_v27 = vmax.f32 %v6994_v57, %v6995_v19  ;;  %v6990_v52 = vrot.slane %v6989_v43, 2  ;;  %v5381_v32 = vmax.f32 %v4771_v36, 0.0  ;;  %v4773_v50 = vadd.f32 %v4772_v39, %v8769_v37 }
 0x51c   :  { %v4776_v29 = vpop.f32.mrf.mxu1  ;;  %v5380_v25 = vmax.f32 %v4769_v10, 0.0  ;;  %v6943_v62 = vrot.slane %v6942_v63, 1  ;;  %v6950_v0 = vrot.slane %v6949_v3, 1  ;;  %v6970_v13 = vmax.f32 %v6968_v5, %v6969_v4 }
 0x51d   :  { %v6997_v45 = vrot.slane %v6996_v27, 2  ;;  %v7001_v49 = vmax.f32 %v5379_v47, %v5381_v32  ;;  %v5382_v58 = vmax.f32 %v4773_v50, 0.0  ;;  %v6991_v15 = vmax.f32 %v6989_v43, %v6990_v52 }
 0x51e   :  { %v10070_v17 = vpop.f32.mrf.mxu1  ;;  %v6923_v23 = vmax.f32 %v10055_v51, %v6922_v30  ;;  %v6984_v26 = vmax.f32 %v6982_v22, %v6983_v1  ;;  %v6930_v8 = vmax.f32 %v10057_v61, %v6929_v33  ;;  %v6957_v6 = vrot.slane %v6956_v60, 1 }
 0x51f   :  { %v7002_v16 = vrot.slane %v7001_v49, 4  ;;  %v7008_v24 = vmax.f32 %v5380_v25, %v5382_v58  ;;  %v6964_v46 = vrot.slane %v6963_v11, 1  ;;  %v6998_v44 = vmax.f32 %v6996_v27, %v6997_v45 }
 0x520   :  { %v4780_v28 = vpop.f32.mrf.mxu1  ;;  %v6937_v55 = vmax.f32 %v6935_v12, %v6936_v59  ;;  %v6978_v34 = vrot.slane %v6977_v9, 1  ;;  %v6944_v14 = vmax.f32 %v6942_v63, %v6943_v62  ;;  %v6951_v42 = vmax.f32 %v6949_v3, %v6950_v0 }
 0x521   :  { %v7003_v38 = vmax.f32 %v7001_v49, %v7002_v16  ;;  %v7009_v54 = vrot.slane %v7008_v24, 4  ;;  %v6971_v20 = vrot.slane %v6970_v13, 1  ;;  %v6992_v2 = vrot.slane %v6991_v15, 1 }
 0x522   :  { %v4782_v35 = vpop.f32.mrf.mxu1  ;;  %v7684_v51 = vsel %vm7495_vm2, %v6923_v23, %v10049_v41  ;;  %v6985_v30 = vrot.slane %v6984_v26, 1  ;;  %v7691_v61 = vsel %vm7495_vm2, %v6930_v8, %v10062_v48  ;;  %v6958_v33 = vmax.f32 %v6956_v60, %v6957_v6 }
 0x523   :  { %v7004_v5 = vrot.slane %v7003_v38, 2  ;;  %v7010_v22 = vmax.f32 %v7008_v24, %v7009_v54  ;;  %v6965_v12 = vmax.f32 %v6963_v11, %v6964_v46  ;;  %v6999_v53 = vrot.slane %v6998_v44, 1 }
 0x524   :  { %v4786_v57 = vpop.f32.mrf.mxu1  ;;  %v7685_v7 = vsel %vm7497_vm3, %v6937_v55, %v7684_v51  ;;  %v6979_v56 = vmax.f32 %v6977_v9, %v6978_v34  ;;  %v7692_v19 = vsel %vm7497_vm3, %v6944_v14, %v7691_v61  ;;  %v6972_v40 = vmax.f32 %v6970_v13, %v6971_v20 }
 0x525   :  { %v7005_v63 = vmax.f32 %v7003_v38, %v7004_v5  ;;  %v7011_v18 = vrot.slane %v7010_v22, 2  ;;  %v7686_v41 = vsel %vm7499_vm4, %v6951_v42, %v7685_v7  ;;  %v6993_v43 = vmax.f32 %v6991_v15, %v6992_v2 }
 0x526   :  { %v4788_v21 = vpop.f32.mrf.mxu1  ;;  %v6986_v10 = vmax.f32 %v6984_v26, %v6985_v30  ;;  %v4781_v48 = vadd.f32 %v4780_v28, %v8764_v31  ;;  %v7693_v4 = vsel %vm7499_vm4, %v6958_v33, %v7692_v19  ;;  %v7687_v1 = vsel %vm7501_vm5, %v6965_v12, %v7686_v41 }
 0x527   :  { %v7006_v36 = vrot.slane %v7005_v63, 1  ;;  %v7012_v39 = vmax.f32 %v7010_v22, %v7011_v18  ;;  %v7000_v27 = vmax.f32 %v6998_v44, %v6999_v53  ;;  %v7688_v52 = vsel %vm7503_vm6, %v6979_v56, %v7687_v1 }
 0x528   :  { %v4790_v3 = vpop.f32.mrf.mxu1  ;;  %v4777_v50 = vadd.f32 %v4776_v29, %v8764_v31  ;;  %v7694_v60 = vsel %vm7501_vm5, %v6972_v40, %v7693_v4  ;;  %v7689_v11 = vsel %vm7505_vm7, %v6993_v43, %v7688_v52  ;;  %v5385_v49 = vmax.f32 %v4781_v48, 0.0 }
 0x529   :  { %v7007_v47 = vmax.f32 %v7005_v63, %v7006_v36  ;;  %v7013_v32 = vrot.slane %v7012_v39, 1  ;;  %v7695_v45 = vsel %vm7503_vm6, %v6986_v10, %v7694_v60  ;;  %v4783_v29 = vadd.f32 %v4782_v35, %v8769_v37 }
 0x52a   :  { %v4792_v59 = vpop.f32.mrf.mxu1  ;;  %v7696_v62 = vsel %vm7505_vm7, %v7000_v27, %v7695_v45  ;;  %v5383_v13 = vmax.f32 %v4777_v50, 0.0  ;;  %v4779_v23 = vadd.f32 %v10070_v17, %v8769_v37  ;;  %v4791_v38 = vadd.f32 %v4790_v3, %v8764_v31 }
 0x52b   :  { %v7690_v9 = vsel %vm7507_vm8, %v7007_v47, %v7689_v11  ;;  %v7014_v25 = vmax.f32 %v7012_v39, %v7013_v32  ;;  %v5386_v24 = vmax.f32 %v4783_v29, 0.0  ;;  %v4787_v35 = vadd.f32 %v4786_v57, %v8764_v31 }
 0x52c   :  { %v4796_v58 = vpop.f32.mrf.mxu1  ;;  %7784 = vst [vmem:[#allocation2 + $0xd0] sm:$0xff] %v7690_v9  ;;  %v7015_v26 = vmax.f32 %v5383_v13, %v5385_v49  ;;  %v5384_v8 = vmax.f32 %v4779_v23, 0.0  ;;  %v4793_v42 = vadd.f32 %v4792_v59, %v8769_v37  ;;  %v4789_v2 = vadd.f32 %v4788_v21, %v8769_v37 }
 0x52d   :  { %v7697_v0 = vsel %vm7507_vm8, %v7014_v25, %v7696_v62  ;;  %v5389_v51 = vmax.f32 %v4791_v38, 0.0  ;;  %v5387_v22 = vmax.f32 %v4787_v35, 0.0  ;;  %v4797_v57 = vadd.f32 %v4796_v58, %v8764_v31 }
 0x52e   :  { %v4798_v15 = vpop.f32.mrf.mxu1  ;;  %7785 = vst [vmem:[#allocation2 + $0xd8] sm:$0xff] %v7697_v0  ;;  %v7016_v6 = vrot.slane %v7015_v26, 4  ;;  %v7022_v44 = vmax.f32 %v5384_v8, %v5386_v24  ;;  %v5390_v61 = vmax.f32 %v4793_v42, 0.0  ;;  %v5388_v7 = vmax.f32 %v4789_v2, 0.0 }
 0x52f   :  { %v7029_v56 = vmax.f32 %v5387_v22, %v5389_v51  ;;  %v5391_v1 = vmax.f32 %v4797_v57, 0.0  ;;  %v4799_v27 = vadd.f32 %v4798_v15, %v8769_v37 }
 0x530   :  { %v4800_v16 = vpop.f32.mrf.mxu1  ;;  %v7017_v34 = vmax.f32 %v7015_v26, %v7016_v6  ;;  %v7023_v14 = vrot.slane %v7022_v44, 4  ;;  %v7036_v41 = vmax.f32 %v5388_v7, %v5390_v61 }
 0x531   :  { %v4801_v12 = vadd.f32 %v4800_v16, %v8764_v31  ;;  %v7030_v48 = vrot.slane %v7029_v56, 4  ;;  %v5392_v15 = vmax.f32 %v4799_v27, 0.0 }
 0x532   :  { %v4802_v28 = vpop.f32.mrf.mxu1  ;;  %v7018_v17 = vrot.slane %v7017_v34, 2  ;;  %v7024_v5 = vmax.f32 %v7022_v44, %v7023_v14  ;;  %v7037_v50 = vrot.slane %v7036_v41, 4 }
 0x533   :  { %v5393_v40 = vmax.f32 %v4801_v12, 0.0  ;;  %v4803_v43 = vadd.f32 %v4802_v28, %v8769_v37  ;;  %v7031_v58 = vmax.f32 %v7029_v56, %v7030_v48 }
 0x534   :  { %v4806_v46 = vpop.f32.mrf.mxu1  ;;  %v10100_v53 = vmax.f32 %v7017_v34, %v7018_v17  ;;  %v7025_v19 = vrot.slane %v7024_v5, 2  ;;  %v7038_v24 = vmax.f32 %v7036_v41, %v7037_v50 }
 0x535   :  { %v4807_v10 = vadd.f32 %v4806_v46, %v8764_v31  ;;  %v7043_v45 = vmax.f32 %v5391_v1, %v5393_v40  ;;  %v5394_v9 = vmax.f32 %v4803_v43, 0.0  ;;  %v7032_v17 = vrot.slane %v7031_v58, 2 }
 0x536   :  { %v4808_v55 = vpop.f32.mrf.mxu1  ;;  %v7020_v39 = vrot.slane %v10100_v53, 1  ;;  %v7026_v32 = vmax.f32 %v7024_v5, %v7025_v19  ;;  %v7039_v12 = vrot.slane %v7038_v24, 2 }
 0x537   :  { %v4809_v52 = vadd.f32 %v4808_v55, %v8769_v37  ;;  %v5395_v25 = vmax.f32 %v4807_v10, 0.0  ;;  %v7044_v44 = vrot.slane %v7043_v45, 4  ;;  %v7050_v55 = vmax.f32 %v5392_v15, %v5394_v9 }
 0x538   :  { %v4810_v54 = vpop.f32.mrf.mxu1  ;;  %v7027_v5 = vrot.slane %v7026_v32, 1  ;;  %v10120_v57 = vmax.f32 %v10100_v53, %v7020_v39  ;;  %v10122_v40 = vmax.f32 %v7031_v58, %v7032_v17 }
 0x539   :  { %v4811_v18 = vadd.f32 %v4810_v54, %v8764_v31  ;;  %v5396_v23 = vmax.f32 %v4809_v52, 0.0  ;;  %v7051_v7 = vrot.slane %v7050_v55, 4  ;;  %v10128_v52 = vmax.f32 %v7038_v24, %v7039_v12 }
 0x53a   :  { %v4812_v20 = vpop.f32.mrf.mxu1  ;;  %v10125_v48 = vmax.f32 %v7026_v32, %v7027_v5  ;;  %v7034_v9 = vrot.slane %v10122_v40, 1 }
 0x53b   :  { %v4813_v36 = vadd.f32 %v4812_v20, %v8769_v37  ;;  %v5397_v47 = vmax.f32 %v4811_v18, 0.0  ;;  %v7045_v18 = vmax.f32 %v7043_v45, %v7044_v44  ;;  %v7052_v53 = vmax.f32 %v7050_v55, %v7051_v7 }
 0x53c   :  { %v4816_v30 = vpop.f32.mrf.mxu1  ;;  %v7041_v15 = vrot.slane %v10128_v52, 1 }
 0x53d   :  { %v4817_v59 = vadd.f32 %v4816_v30, %v8764_v31  ;;  %v5398_v49 = vmax.f32 %v4813_v36, 0.0  ;;  %v7057_v26 = vmax.f32 %v5395_v25, %v5397_v47  ;;  %v7046_v50 = vrot.slane %v7045_v18, 2 }
 0x53e   :  { %v4818_v33 = vpop.f32.mrf.mxu1 }
 0x53f   :  { %v4819_v62 = vadd.f32 %v4818_v33, %v8769_v37  ;;  %v5399_v28 = vmax.f32 %v4817_v59, 0.0  ;;  %v7064_v34 = vmax.f32 %v5396_v23, %v5398_v49  ;;  %v7058_v2 = vrot.slane %v7057_v26, 4 }
 0x540   :  { %v4820_v63 = vpop.f32.mrf.mxu1  ;;  %v7053_v23 = vrot.slane %v7052_v53, 2  ;;  %v7047_v24 = vmax.f32 %v7045_v18, %v7046_v50 }
 0x541   :  { %v4821_v3 = vadd.f32 %v4820_v63, %v8764_v31  ;;  %v5400_v54 = vmax.f32 %v4819_v62, 0.0  ;;  %v7065_v19 = vrot.slane %v7064_v34, 4  ;;  %v7059_v43 = vmax.f32 %v7057_v26, %v7058_v2 }
 0x542   :  { %v4822_v21 = vpop.f32.mrf.mxu1  ;;  %v7054_v5 = vmax.f32 %v7052_v53, %v7053_v23 }
 0x543   :  { %v4823_v60 = vadd.f32 %v4822_v21, %v8769_v37  ;;  %v5401_v0 = vmax.f32 %v4821_v3, 0.0  ;;  %v7066_v59 = vmax.f32 %v7064_v34, %v7065_v19  ;;  %v7060_v32 = vrot.slane %v7059_v43, 2 }
 0x544   :  { %v4826_v4 = vpop.f32.mrf.mxu1  ;;  %v7048_v19 = vrot.slane %v7047_v24, 1  ;;  %v7055_v53 = vrot.slane %v7054_v5, 1 }
 0x545   :  { %v4827_v13 = vadd.f32 %v4826_v4, %v8764_v31  ;;  %v5402_v8 = vmax.f32 %v4823_v60, 0.0  ;;  %v7071_v14 = vmax.f32 %v5399_v28, %v5401_v0  ;;  %v7067_v28 = vrot.slane %v7066_v59, 2 }
 0x546   :  { %v4828_v11 = vpop.f32.mrf.mxu1 }
 0x547   :  { %v4829_v16 = vadd.f32 %v4828_v11, %v8769_v37  ;;  %v5403_v35 = vmax.f32 %v4827_v13, 0.0  ;;  %v7078_v22 = vmax.f32 %v5400_v54, %v5402_v8  ;;  %v7072_v41 = vrot.slane %v7071_v14, 4 }
 0x548   :  { %v4830_v29 = vpop.f32.mrf.mxu1  ;;  %v7061_v54 = vmax.f32 %v7059_v43, %v7060_v32  ;;  %v7042_v32 = vmax.f32 %v10128_v52, %v7041_v15 }
 0x549   :  { %v4831_v6 = vadd.f32 %v4830_v29, %v8764_v31  ;;  %v5404_v51 = vmax.f32 %v4829_v16, 0.0  ;;  %v7079_v3 = vrot.slane %v7078_v22, 4  ;;  %v7073_v60 = vmax.f32 %v7071_v14, %v7072_v41 }
 0x54a   :  { %v4832_v46 = vpop.f32.mrf.mxu1  ;;  %v7705_v52 = vsel %vm7495_vm2, %v7042_v32, %v10125_v48 }
 0x54b   :  { %v4833_v38 = vadd.f32 %v4832_v46, %v8769_v37  ;;  %v5405_v42 = vmax.f32 %v4831_v6, 0.0  ;;  %v7080_v58 = vmax.f32 %v7078_v22, %v7079_v3  ;;  %v7074_v8 = vrot.slane %v7073_v60, 2 }
 0x54c   :  { %v4836_v20 = vpop.f32.mrf.mxu1  ;;  %v7068_v22 = vmax.f32 %v7066_v59, %v7067_v28 }
 0x54d   :  { %v5406_v30 = vmax.f32 %v4833_v38, 0.0  ;;  %v7085_v61 = vmax.f32 %v5403_v35, %v5405_v42  ;;  %v4837_v63 = vadd.f32 %v4836_v20, %v8764_v31  ;;  %v7081_v14 = vrot.slane %v7080_v58, 2 }
 0x54e   :  { %v4838_v33 = vpop.f32.mrf.mxu1  ;;  %v7069_v59 = vrot.slane %v7068_v22, 1 }
 0x54f   :  { %v7092_v56 = vmax.f32 %v5404_v51, %v5406_v30  ;;  %v7086_v10 = vrot.slane %v7085_v61, 4  ;;  %v4839_v1 = vadd.f32 %v4838_v33, %v8769_v37  ;;  %v5407_v39 = vmax.f32 %v4837_v63, 0.0 }
 0x550   :  { %v4840_v21 = vpop.f32.mrf.mxu1  ;;  %v7082_v41 = vmax.f32 %v7080_v58, %v7081_v14 }
 0x551   :  { %v4841_v36 = vadd.f32 %v4840_v21, %v8764_v31  ;;  %v7093_v4 = vrot.slane %v7092_v56, 4  ;;  %v7087_v25 = vmax.f32 %v7085_v61, %v7086_v10  ;;  %v5408_v0 = vmax.f32 %v4839_v1, 0.0 }
 0x552   :  { %v4842_v27 = vpop.f32.mrf.mxu1  ;;  %v7075_v61 = vmax.f32 %v7073_v60, %v7074_v8  ;;  %v7070_v8 = vmax.f32 %v7068_v22, %v7069_v59 }
 0x553   :  { %v5409_v47 = vmax.f32 %v4841_v36, 0.0  ;;  %v4843_v11 = vadd.f32 %v4842_v27, %v8769_v37  ;;  %v7094_v62 = vmax.f32 %v7092_v56, %v7093_v4  ;;  %v7088_v44 = vrot.slane %v7087_v25, 2 }
 0x554   :  { %v4846_v45 = vpop.f32.mrf.mxu1  ;;  %v7062_v36 = vrot.slane %v7061_v54, 1  ;;  %v7035_v27 = vmax.f32 %v10122_v40, %v7034_v9  ;;  %v7056_v9 = vmax.f32 %v7054_v5, %v7055_v53 }
 0x555   :  { %v7099_v49 = vmax.f32 %v5407_v39, %v5409_v47  ;;  %v5410_v13 = vmax.f32 %v4843_v11, 0.0  ;;  %v4847_v16 = vadd.f32 %v4846_v45, %v8764_v31  ;;  %v7095_v35 = vrot.slane %v7094_v62, 2 }
 0x556   :  { %v4848_v29 = vpop.f32.mrf.mxu1  ;;  %v7089_v7 = vmax.f32 %v7087_v25, %v7088_v44  ;;  %v7076_v39 = vrot.slane %v7075_v61, 1  ;;  %v7049_v25 = vmax.f32 %v7047_v24, %v7048_v19  ;;  %v7698_v40 = vsel %vm7495_vm2, %v7035_v27, %v10120_v57 }
 0x557   :  { %v7100_v26 = vrot.slane %v7099_v49, 4  ;;  %v7106_v6 = vmax.f32 %v5408_v0, %v5410_v13  ;;  %v4849_v34 = vadd.f32 %v4848_v29, %v8769_v37  ;;  %v5411_v2 = vmax.f32 %v4847_v16, 0.0 }
 0x558   :  { %v4850_v46 = vpop.f32.mrf.mxu1  ;;  %v7096_v3 = vmax.f32 %v7094_v62, %v7095_v35  ;;  %v7090_v60 = vrot.slane %v7089_v7, 1  ;;  %v7063_v13 = vmax.f32 %v7061_v54, %v7062_v36  ;;  %v7699_v15 = vsel %vm7497_vm3, %v7049_v25, %v7698_v40 }
 0x559   :  { %v7101_v55 = vmax.f32 %v7099_v49, %v7100_v26  ;;  %v4851_v38 = vadd.f32 %v4850_v46, %v8764_v31  ;;  %v7107_v42 = vrot.slane %v7106_v6, 4  ;;  %v5412_v56 = vmax.f32 %v4849_v34, 0.0 }
 0x55a   :  { %v4852_v20 = vpop.f32.mrf.mxu1  ;;  %v7083_v49 = vrot.slane %v7082_v41, 1  ;;  %v7097_v62 = vrot.slane %v7096_v3, 1  ;;  %v7077_v26 = vmax.f32 %v7075_v61, %v7076_v39  ;;  %v7706_v35 = vsel %vm7497_vm3, %v7056_v9, %v7705_v52 }
 0x55b   :  { %v7102_v17 = vrot.slane %v7101_v55, 2  ;;  %v5413_v51 = vmax.f32 %v4851_v38, 0.0  ;;  %v4853_v30 = vadd.f32 %v4852_v20, %v8769_v37  ;;  %v7108_v33 = vmax.f32 %v7106_v6, %v7107_v42 }
 0x55c   :  { %v10137_v12 = vpop.f32.mrf.mxu1  ;;  %v7091_v6 = vmax.f32 %v7089_v7, %v7090_v60  ;;  %v7084_v24 = vmax.f32 %v7082_v41, %v7083_v49  ;;  %v7700_v38 = vsel %vm7499_vm4, %v7063_v13, %v7699_v15  ;;  %v7098_v54 = vmax.f32 %v7096_v3, %v7097_v62 }
 0x55d   :  { %v7113_v63 = vmax.f32 %v5411_v2, %v5413_v51  ;;  %v5414_v18 = vmax.f32 %v4853_v30, 0.0  ;;  %v7103_v21 = vmax.f32 %v7101_v55, %v7102_v17  ;;  %v7109_v43 = vrot.slane %v7108_v33, 2 }
 0x55e   :  { %v10139_v10 = vpop.f32.mrf.mxu1  ;;  %v7701_v42 = vsel %vm7501_vm5, %v7077_v26, %v7700_v38  ;;  %v7707_v2 = vsel %vm7499_vm4, %v7070_v8, %v7706_v35  ;;  %v4857_v36 = vadd.f32 %v10137_v12, %v8764_v31 }
 0x55f   :  { %v7114_v4 = vrot.slane %v7113_v63, 4  ;;  %v7120_v1 = vmax.f32 %v5412_v56, %v5414_v18  ;;  %v7110_v47 = vmax.f32 %v7108_v33, %v7109_v43  ;;  %v7104_v58 = vrot.slane %v7103_v21, 1 }
 0x560   :  { %v4860_v50 = vpop.f32.mrf.mxu1  ;;  %v7702_v48 = vsel %vm7503_vm6, %v7091_v6, %v7701_v42  ;;  %v7708_v5 = vsel %vm7501_vm5, %v7084_v24, %v7707_v2  ;;  %v4859_v3 = vadd.f32 %v10139_v10, %v8769_v37  ;;  %v5415_v39 = vmax.f32 %v4857_v36, 0.0 }
 0x561   :  { %v7115_v11 = vmax.f32 %v7113_v63, %v7114_v4  ;;  %v7121_v45 = vrot.slane %v7120_v1, 4  ;;  %v7111_v16 = vrot.slane %v7110_v47, 1  ;;  %v7105_v55 = vmax.f32 %v7103_v21, %v7104_v58 }
 0x562   :  { %v4862_v0 = vpop.f32.mrf.mxu1  ;;  %v7709_v33 = vsel %vm7503_vm6, %v7098_v54, %v7708_v5  ;;  %v4861_v41 = vadd.f32 %v4860_v50, %v8764_v31 }
 0x563   :  { %v7116_v29 = vrot.slane %v7115_v11, 2  ;;  %v7122_v23 = vmax.f32 %v7120_v1, %v7121_v45  ;;  %v7112_v20 = vmax.f32 %v7110_v47, %v7111_v16  ;;  %v7703_v22 = vsel %vm7505_vm7, %v7105_v55, %v7702_v48 }
 0x564   :  { %v4866_v28 = vpop.f32.mrf.mxu1  ;;  %v4863_v21 = vadd.f32 %v4862_v0, %v8769_v37  ;;  %v5417_v1 = vmax.f32 %v4861_v41, 0.0  ;;  %v5416_v47 = vmax.f32 %v4859_v3, 0.0 }
 0x565   :  { %v7117_v46 = vmax.f32 %v7115_v11, %v7116_v29  ;;  %v7123_v44 = vrot.slane %v7122_v23, 2  ;;  %v7710_v63 = vsel %vm7505_vm7, %v7112_v20, %v7709_v33  ;;  %v4867_v49 = vadd.f32 %v4866_v28, %v8764_v31 }
 0x566   :  { %v4868_v34 = vpop.f32.mrf.mxu1  ;;  %v5418_v27 = vmax.f32 %v4863_v21, 0.0  ;;  %v7127_v60 = vmax.f32 %v5415_v39, %v5417_v1 }
 0x567   :  { %v7118_v57 = vrot.slane %v7117_v46, 1  ;;  %v7124_v14 = vmax.f32 %v7122_v23, %v7123_v44  ;;  %v5419_v29 = vmax.f32 %v4867_v49, 0.0  ;;  %v4869_v9 = vadd.f32 %v4868_v34, %v8769_v37 }
 0x568   :  { %v4870_v17 = vpop.f32.mrf.mxu1  ;;  %v7134_v11 = vmax.f32 %v5416_v47, %v5418_v27  ;;  %v7128_v25 = vrot.slane %v7127_v60, 4 }
 0x569   :  { %v7119_v51 = vmax.f32 %v7117_v46, %v7118_v57  ;;  %v7125_v30 = vrot.slane %v7124_v14, 1  ;;  %v4871_v45 = vadd.f32 %v4870_v17, %v8764_v31  ;;  %v5420_v15 = vmax.f32 %v4869_v9, 0.0 }
 0x56a   :  { %v4872_v61 = vpop.f32.mrf.mxu1  ;;  %v7135_v12 = vrot.slane %v7134_v11, 4  ;;  %v7129_v62 = vmax.f32 %v7127_v60, %v7128_v25 }
 0x56b   :  { %v7704_v7 = vsel %vm7507_vm8, %v7119_v51, %v7703_v22  ;;  %v7126_v56 = vmax.f32 %v7124_v14, %v7125_v30  ;;  %v5421_v0 = vmax.f32 %v4871_v45, 0.0  ;;  %v4873_v10 = vadd.f32 %v4872_v61, %v8769_v37 }
 0x56c   :  { %7786 = vst [vmem:[#allocation2 + $0xe0] sm:$0xff] %v7704_v7  ;;  %v4876_v18 = vpop.f32.mrf.mxu1  ;;  %v7136_v40 = vmax.f32 %v7134_v11, %v7135_v12  ;;  %v7130_v28 = vrot.slane %v7129_v62, 2 }
 0x56d   :  { %v7711_v19 = vsel %vm7507_vm8, %v7126_v56, %v7710_v63  ;;  %v7141_v16 = vmax.f32 %v5419_v29, %v5421_v0  ;;  %v4877_v8 = vadd.f32 %v4876_v18, %v8764_v31  ;;  %v5422_v6 = vmax.f32 %v4873_v10, 0.0 }
 0x56e   :  { %7787 = vst [vmem:[#allocation2 + $0xe8] sm:$0xff] %v7711_v19  ;;  %v4878_v43 = vpop.f32.mrf.mxu1  ;;  %v7137_v52 = vrot.slane %v7136_v40, 2  ;;  %v7131_v17 = vmax.f32 %v7129_v62, %v7130_v28 }
 0x56f   :  { %v7142_v38 = vrot.slane %v7141_v16, 4  ;;  %v5423_v54 = vmax.f32 %v4877_v8, 0.0  ;;  %v4879_v57 = vadd.f32 %v4878_v43, %v8769_v37  ;;  %v7148_v14 = vmax.f32 %v5420_v15, %v5422_v6 }
 0x570   :  { %v4880_v4 = vpop.f32.mrf.mxu1  ;;  %v7138_v51 = vmax.f32 %v7136_v40, %v7137_v52 }
 0x571   :  { %v4881_v23 = vadd.f32 %v4880_v4, %v8764_v31  ;;  %v7143_v33 = vmax.f32 %v7141_v16, %v7142_v38  ;;  %v5424_v7 = vmax.f32 %v4879_v57, 0.0  ;;  %v7149_v18 = vrot.slane %v7148_v14, 4 }
 0x572   :  { %v4882_v53 = vpop.f32.mrf.mxu1  ;;  %v7139_v29 = vrot.slane %v7138_v51, 1 }
 0x573   :  { %v5425_v44 = vmax.f32 %v4881_v23, 0.0  ;;  %v4883_v34 = vadd.f32 %v4882_v53, %v8769_v37  ;;  %v7144_v25 = vrot.slane %v7143_v33, 2  ;;  %v7150_v16 = vmax.f32 %v7148_v14, %v7149_v18 }
 0x574   :  { %v4886_v59 = vpop.f32.mrf.mxu1  ;;  %v10189_v57 = vmax.f32 %v7138_v51, %v7139_v29 }
 0x575   :  { %v4887_v35 = vadd.f32 %v4886_v59, %v8764_v31  ;;  %v7155_v2 = vmax.f32 %v5423_v54, %v5425_v44  ;;  %v5426_v19 = vmax.f32 %v4883_v34, 0.0 }
 0x576   :  { %v4888_v50 = vpop.f32.mrf.mxu1 }
 0x577   :  { %v4889_v30 = vadd.f32 %v4888_v50, %v8769_v37  ;;  %v5427_v41 = vmax.f32 %v4887_v35, 0.0  ;;  %v7156_v36 = vrot.slane %v7155_v2, 4  ;;  %v7162_v49 = vmax.f32 %v5424_v7, %v5426_v19 }
 0x578   :  { %v4890_v32 = vpop.f32.mrf.mxu1 }
 0x579   :  { %v4891_v24 = vadd.f32 %v4890_v32, %v8764_v31  ;;  %v5428_v27 = vmax.f32 %v4889_v30, 0.0  ;;  %v7132_v32 = vrot.slane %v7131_v17, 1  ;;  %v7157_v23 = vmax.f32 %v7155_v2, %v7156_v36 }
 0x57a   :  { %v4892_v58 = vpop.f32.mrf.mxu1  ;;  %v7163_v28 = vrot.slane %v7162_v49, 4 }
 0x57b   :  { %v4893_v48 = vadd.f32 %v4892_v58, %v8769_v37  ;;  %v5429_v5 = vmax.f32 %v4891_v24, 0.0  ;;  %v7145_v24 = vmax.f32 %v7143_v33, %v7144_v25  ;;  %v7158_v34 = vrot.slane %v7157_v23, 2 }
 0x57c   :  { %v4896_v13 = vpop.f32.mrf.mxu1  ;;  %v7164_v30 = vmax.f32 %v7162_v49, %v7163_v28 }
 0x57d   :  { %v4897_v22 = vadd.f32 %v4896_v13, %v8764_v31  ;;  %v5430_v3 = vmax.f32 %v4893_v48, 0.0  ;;  %v7169_v53 = vmax.f32 %v5427_v41, %v5429_v5  ;;  %v7146_v7 = vrot.slane %v7145_v24, 1 }
 0x57e   :  { %v4898_v26 = vpop.f32.mrf.mxu1  ;;  %v7159_v18 = vmax.f32 %v7157_v23, %v7158_v34 }
 0x57f   :  { %v4899_v4 = vadd.f32 %v4898_v26, %v8769_v37  ;;  %v5431_v39 = vmax.f32 %v4897_v22, 0.0  ;;  %v7176_v0 = vmax.f32 %v5428_v27, %v5430_v3  ;;  %v7170_v40 = vrot.slane %v7169_v53, 4 }
 0x580   :  { %v4900_v46 = vpop.f32.mrf.mxu1  ;;  %v7165_v27 = vrot.slane %v7164_v30, 2 }
 0x581   :  { %v4901_v42 = vadd.f32 %v4900_v46, %v8764_v31  ;;  %v5432_v10 = vmax.f32 %v4899_v4, 0.0  ;;  %v10186_v46 = vmax.f32 %v7131_v17, %v7132_v32  ;;  %v7171_v35 = vmax.f32 %v7169_v53, %v7170_v40 }
 0x582   :  { %v4902_v55 = vpop.f32.mrf.mxu1  ;;  %v7160_v32 = vrot.slane %v7159_v18, 1 }
 0x583   :  { %v4903_v56 = vadd.f32 %v4902_v55, %v8769_v37  ;;  %v5433_v21 = vmax.f32 %v4901_v42, 0.0  ;;  %v7177_v55 = vrot.slane %v7176_v0, 4  ;;  %v7172_v19 = vrot.slane %v7171_v35, 2 }
 0x584   :  { %v4906_v20 = vpop.f32.mrf.mxu1 }
 0x585   :  { %v4907_v63 = vadd.f32 %v4906_v20, %v8764_v31  ;;  %v5434_v60 = vmax.f32 %v4903_v56, 0.0  ;;  %v7183_v12 = vmax.f32 %v5431_v39, %v5433_v21  ;;  %v7151_v20 = vrot.slane %v7150_v16, 2 }
 0x586   :  { %v4908_v61 = vpop.f32.mrf.mxu1  ;;  %v7178_v56 = vmax.f32 %v7176_v0, %v7177_v55  ;;  %v7173_v25 = vmax.f32 %v7171_v35, %v7172_v19 }
 0x587   :  { %v4909_v47 = vadd.f32 %v4908_v61, %v8769_v37  ;;  %v5435_v11 = vmax.f32 %v4907_v63, 0.0  ;;  %v7190_v8 = vmax.f32 %v5432_v10, %v5434_v60  ;;  %v7184_v44 = vrot.slane %v7183_v12, 4 }
 0x588   :  { %v4910_v43 = vpop.f32.mrf.mxu1  ;;  %v7152_v36 = vmax.f32 %v7150_v16, %v7151_v20  ;;  %v7179_v60 = vrot.slane %v7178_v56, 2  ;;  %v7174_v55 = vrot.slane %v7173_v25, 1 }
 0x589   :  { %v4911_v1 = vadd.f32 %v4910_v43, %v8764_v31  ;;  %v5436_v9 = vmax.f32 %v4909_v47, 0.0  ;;  %v7191_v2 = vrot.slane %v7190_v8, 4  ;;  %v7185_v5 = vmax.f32 %v7183_v12, %v7184_v44 }
 0x58a   :  { %v4912_v59 = vpop.f32.mrf.mxu1  ;;  %v7180_v16 = vmax.f32 %v7178_v56, %v7179_v60  ;;  %v7153_v34 = vrot.slane %v7152_v36, 1 }
 0x58b   :  { %v5437_v50 = vmax.f32 %v4911_v1, 0.0  ;;  %v4913_v45 = vadd.f32 %v4912_v59, %v8769_v37  ;;  %v7192_v3 = vmax.f32 %v7190_v8, %v7191_v2  ;;  %v7186_v53 = vrot.slane %v7185_v5, 2 }
 0x58c   :  { %v4916_v58 = vpop.f32.mrf.mxu1  ;;  %v7154_v56 = vmax.f32 %v7152_v36, %v7153_v34 }
 0x58d   :  { %v7197_v13 = vmax.f32 %v5435_v11, %v5437_v50  ;;  %v5438_v62 = vmax.f32 %v4913_v45, 0.0  ;;  %v4917_v6 = vadd.f32 %v4916_v58, %v8764_v31  ;;  %v7193_v0 = vrot.slane %v7192_v3, 2 }
 0x58e   :  { %v4918_v26 = vpop.f32.mrf.mxu1  ;;  %v7187_v29 = vmax.f32 %v7185_v5, %v7186_v53 }
 0x58f   :  { %v7204_v52 = vmax.f32 %v5436_v9, %v5438_v62  ;;  %v7198_v38 = vrot.slane %v7197_v13, 4  ;;  %v4919_v14 = vadd.f32 %v4918_v26, %v8769_v37  ;;  %v5439_v17 = vmax.f32 %v4917_v6, 0.0 }
 0x590   :  { %v4920_v15 = vpop.f32.mrf.mxu1  ;;  %v7166_v26 = vmax.f32 %v7164_v30, %v7165_v27  ;;  %v7188_v35 = vrot.slane %v7187_v29, 1  ;;  %v7181_v30 = vrot.slane %v7180_v16, 1 }
 0x591   :  { %v4921_v54 = vadd.f32 %v4920_v15, %v8764_v31  ;;  %v7205_v22 = vrot.slane %v7204_v52, 4  ;;  %v7199_v63 = vmax.f32 %v7197_v13, %v7198_v38  ;;  %v5440_v41 = vmax.f32 %v4919_v14, 0.0 }
 0x592   :  { %v4922_v42 = vpop.f32.mrf.mxu1  ;;  %v7147_v15 = vmax.f32 %v7145_v24, %v7146_v7  ;;  %v7194_v38 = vmax.f32 %v7192_v3, %v7193_v0  ;;  %v7167_v20 = vrot.slane %v7166_v26, 1 }
 0x593   :  { %v5441_v48 = vmax.f32 %v4921_v54, 0.0  ;;  %v4923_v61 = vadd.f32 %v4922_v42, %v8769_v37  ;;  %v7206_v39 = vmax.f32 %v7204_v52, %v7205_v22  ;;  %v7200_v11 = vrot.slane %v7199_v63, 2 }
 0x594   :  { %v4926_v33 = vpop.f32.mrf.mxu1  ;;  %v7195_v24 = vrot.slane %v7194_v38, 1 }
 0x595   :  { %v7211_v51 = vmax.f32 %v5439_v17, %v5441_v48  ;;  %v5442_v21 = vmax.f32 %v4923_v61, 0.0  ;;  %v4927_v1 = vadd.f32 %v4926_v33, %v8764_v31  ;;  %v7207_v23 = vrot.slane %v7206_v39, 2 }
 0x596   :  { %v4928_v43 = vpop.f32.mrf.mxu1  ;;  %v7201_v8 = vmax.f32 %v7199_v63, %v7200_v11  ;;  %v7161_v48 = vmax.f32 %v7159_v18, %v7160_v32  ;;  %v7712_v61 = vsel %vm7495_vm2, %v7147_v15, %v10186_v46  ;;  %v7175_v33 = vmax.f32 %v7173_v25, %v7174_v55 }
 0x597   :  { %v7212_v4 = vrot.slane %v7211_v51, 4  ;;  %v7218_v47 = vmax.f32 %v5440_v41, %v5442_v21  ;;  %v4929_v12 = vadd.f32 %v4928_v43, %v8769_v37  ;;  %v5443_v13 = vmax.f32 %v4927_v1, 0.0 }
 0x598   :  { %v4930_v59 = vpop.f32.mrf.mxu1  ;;  %v7208_v14 = vmax.f32 %v7206_v39, %v7207_v23  ;;  %v7202_v2 = vrot.slane %v7201_v8, 1  ;;  %v7189_v63 = vmax.f32 %v7187_v29, %v7188_v35  ;;  %v7168_v41 = vmax.f32 %v7166_v26, %v7167_v20 }
 0x599   :  { %v7213_v50 = vmax.f32 %v7211_v51, %v7212_v4  ;;  %v4931_v45 = vadd.f32 %v4930_v59, %v8764_v31  ;;  %v7219_v49 = vrot.slane %v7218_v47, 4  ;;  %v5444_v44 = vmax.f32 %v4929_v12, 0.0 }
 0x59a   :  { %v4932_v58 = vpop.f32.mrf.mxu1  ;;  %v7209_v51 = vrot.slane %v7208_v14, 1  ;;  %v7203_v21 = vmax.f32 %v7201_v8, %v7202_v2  ;;  %v7713_v4 = vsel %vm7497_vm3, %v7161_v48, %v7712_v61  ;;  %v7182_v18 = vmax.f32 %v7180_v16, %v7181_v30 }
 0x59b   :  { %v7214_v10 = vrot.slane %v7213_v50, 2  ;;  %v5445_v62 = vmax.f32 %v4931_v45, 0.0  ;;  %v7220_v40 = vmax.f32 %v7218_v47, %v7219_v49  ;;  %v4933_v9 = vadd.f32 %v4932_v58, %v8769_v37 }
 0x59c   :  { %v7714_v53 = vsel %vm7499_vm4, %v7175_v33, %v7713_v4  ;;  %v7196_v39 = vmax.f32 %v7194_v38, %v7195_v24  ;;  %v7719_v47 = vsel %vm7495_vm2, %v7154_v56, %v10189_v57  ;;  %v7210_v59 = vmax.f32 %v7208_v14, %v7209_v51 }
 0x59d   :  { %v7225_v6 = vmax.f32 %v5443_v13, %v5445_v62  ;;  %v7215_v31 = vmax.f32 %v7213_v50, %v7214_v10  ;;  %v7221_v28 = vrot.slane %v7220_v40, 2  ;;  %v5446_v52 = vmax.f32 %v4933_v9, 0.0 }
 0x59e   :  { %v7715_v36 = vsel %vm7501_vm5, %v7189_v63, %v7714_v53  ;;  %v7720_v11 = vsel %vm7497_vm3, %v7168_v41, %v7719_v47 }
 0x59f   :  { %v7226_v54 = vrot.slane %v7225_v6, 4  ;;  %v7232_v42 = vmax.f32 %v5444_v44, %v5446_v52  ;;  %v7222_v17 = vmax.f32 %v7220_v40, %v7221_v28  ;;  %v7216_v5 = vrot.slane %v7215_v31, 1 }
 0x5a0   :  { %v7716_v50 = vsel %vm7503_vm6, %v7203_v21, %v7715_v36  ;;  %v7721_v25 = vsel %vm7499_vm4, %v7182_v18, %v7720_v11 }
 0x5a1   :  { %v7227_v37 = vmax.f32 %v7225_v6, %v7226_v54  ;;  %v7233_v22 = vrot.slane %v7232_v42, 4  ;;  %v7223_v43 = vrot.slane %v7222_v17, 1  ;;  %v7217_v1 = vmax.f32 %v7215_v31, %v7216_v5 }
 0x5a2   :  { %v7722_v58 = vsel %vm7501_vm5, %v7196_v39, %v7721_v25 }
 0x5a3   :  { %v7228_v7 = vrot.slane %v7227_v37, 2  ;;  %v7234_v19 = vmax.f32 %v7232_v42, %v7233_v22  ;;  %v7224_v45 = vmax.f32 %v7222_v17, %v7223_v43  ;;  %v7717_v49 = vsel %vm7505_vm7, %v7217_v1, %v7716_v50 }
 0x5a4   :  { %v7723_v0 = vsel %vm7503_vm6, %v7210_v59, %v7722_v58 }
 0x5a5   :  { %v7229_v3 = vmax.f32 %v7227_v37, %v7228_v7  ;;  %v7235_v27 = vrot.slane %v7234_v19, 2  ;;  %v7724_v13 = vsel %vm7505_vm7, %v7224_v45, %v7723_v0 }
 0x5a7   :  { %v7230_v46 = vrot.slane %v7229_v3, 1  ;;  %v7236_v60 = vmax.f32 %v7234_v19, %v7235_v27 }
 0x5a9   :  { %v7231_v32 = vmax.f32 %v7229_v3, %v7230_v46  ;;  %v7237_v12 = vrot.slane %v7236_v60, 1 }
 0x5ab   :  { %v7718_v57 = vsel %vm7507_vm8, %v7231_v32, %v7717_v49  ;;  %v7238_v10 = vmax.f32 %v7236_v60, %v7237_v12 }
 0x5ac   :  { %7788 = vst [vmem:[#allocation2 + $0xf0] sm:$0xff] %v7718_v57 }
 0x5ad   :  { %v7725_v62 = vsel %vm7507_vm8, %v7238_v10, %v7724_v13 }
 0x5ae   :  { %7789 = vst [vmem:[#allocation2 + $0xf8] sm:$0xff] %v7725_v62 }
 0x5af   :  { %8332 = shalt.err (!%p8329_p4)
}
 0x5b0   :  { %s8345_s10 = smov 256   ;;  %s8346_s11 = smov 16  }
 0x5b1   :  { %7801 = dma.vmem_to_hbm [thread:$0]  %s7796_s9, 4096, %s10220_s4, [#allocation3], %s8345_s10, %s8345_s10, %s8346_s11  }
 0x5b2   :  { %8341 = dma.done.wait [#allocation3], 4096  }
 0x5b3   :  { %8342 = vsyncadd [#allocation3], 4294963200 }
 0x5b4   :  { %7805 = vsyncpa [#allocation3], 1 }

</bundles_post_ra>
